<compile_context>
chip_gen: v6e
topology: v6e:2x2x1
jax: 0.10.0
libtpu: 0.0.40
codegen_flags: <defaults>
</compile_context>

<pallas_src>
import functools

import jax
import jax.numpy as jnp
from jax import lax
from jax.experimental import pallas as pl
from jax.experimental.pallas import tpu as pltpu


# ----------------------------------------------------------------------------
# Tiling helper: largest multiple of `align` that divides `dim` and is <= target,
# else the full dim (block_shape must be divisible by (8,128) or equal full dims).
# ----------------------------------------------------------------------------
def _tile(dim, target, align):
    if dim <= target:
        return dim
    t = (target // align) * align
    while t >= align:
        if dim % t == 0:
            return t
        t -= align
    return dim


# ----------------------------------------------------------------------------
# Batched matmul:  (G, M, K) @ (G, K, N) [+ (G, 1, N)]
# bf16 operands, f32 accumulation, tiled over M and N.  K stays whole (K is at
# most C*16 / 8C in this model, comfortably VMEM resident).
# ----------------------------------------------------------------------------
def _mm_kernel(a_ref, b_ref, o_ref):
    o_ref[0] = jnp.dot(a_ref[0], b_ref[0], preferred_element_type=jnp.float32)


def _mm_bias_kernel(a_ref, b_ref, bias_ref, o_ref):
    o_ref[0] = (jnp.dot(a_ref[0], b_ref[0], preferred_element_type=jnp.float32)
                + bias_ref[0])


def bmm(a, b, bias=None, *, bm_target=256, bn_target=512):
    G, M, K = a.shape
    N = b.shape[-1]
    bm = _tile(M, bm_target, 8)
    bn = _tile(N, bn_target, 128)
    grid = (G, M // bm, N // bn)
    a16 = a.astype(jnp.bfloat16)
    b16 = b.astype(jnp.bfloat16)
    params = pltpu.CompilerParams(
        dimension_semantics=("parallel", "parallel", "parallel"),
        vmem_limit_bytes=32 * 1024 * 1024)
    if bias is None:
        return pl.pallas_call(
            _mm_kernel,
            out_shape=jax.ShapeDtypeStruct((G, M, N), jnp.float32),
            grid=grid,
            in_specs=[pl.BlockSpec((1, bm, K), lambda g, i, j: (g, i, 0)),
                      pl.BlockSpec((1, K, bn), lambda g, i, j: (g, 0, j))],
            out_specs=pl.BlockSpec((1, bm, bn), lambda g, i, j: (g, i, j)),
            compiler_params=params,
        )(a16, b16)
    bias3 = bias.reshape(G, 1, N).astype(jnp.float32)
    return pl.pallas_call(
        _mm_bias_kernel,
        out_shape=jax.ShapeDtypeStruct((G, M, N), jnp.float32),
        grid=grid,
        in_specs=[pl.BlockSpec((1, bm, K), lambda g, i, j: (g, i, 0)),
                  pl.BlockSpec((1, K, bn), lambda g, i, j: (g, 0, j)),
                  pl.BlockSpec((1, 1, bn), lambda g, i, j: (g, 0, j))],
        out_specs=pl.BlockSpec((1, bm, bn), lambda g, i, j: (g, i, j)),
        compiler_params=params,
    )(a16, b16, bias3)


def matmul(a, w, bias=None):
    """(M, K) @ (K, N) + (N,)"""
    out = bmm(a[None], w[None], None if bias is None else bias[None])
    return out[0]


# ----------------------------------------------------------------------------
# Row-tiled LayerNorm over the last dim
# ----------------------------------------------------------------------------
def _ln_kernel(x_ref, g_ref, b_ref, o_ref):
    x = x_ref[...]
    mu = jnp.mean(x, axis=-1, keepdims=True)
    xc = x - mu
    var = jnp.mean(xc * xc, axis=-1, keepdims=True)
    o_ref[...] = xc * lax.rsqrt(var + 1e-5) * g_ref[...] + b_ref[...]


def layernorm(x, g, b):
    M, D = x.shape
    bm = _tile(M, 512, 8)
    return pl.pallas_call(
        _ln_kernel,
        out_shape=jax.ShapeDtypeStruct((M, D), jnp.float32),
        grid=(M // bm,),
        in_specs=[pl.BlockSpec((bm, D), lambda i: (i, 0)),
                  pl.BlockSpec((1, D), lambda i: (0, 0)),
                  pl.BlockSpec((1, D), lambda i: (0, 0))],
        out_specs=pl.BlockSpec((bm, D), lambda i: (i, 0)),
        compiler_params=pltpu.CompilerParams(dimension_semantics=("parallel",)),
    )(x.astype(jnp.float32), g.reshape(1, D).astype(jnp.float32),
      b.reshape(1, D).astype(jnp.float32))


# ----------------------------------------------------------------------------
# Fused LayerNorm + SiLU(z) gate:  out = LN(y) * (z * sigmoid(z)),  row-tiled.
# ----------------------------------------------------------------------------
def _ln_silu_gate_kernel(x_ref, z_ref, g_ref, b_ref, o_ref):
    x = x_ref[...]
    mu = jnp.mean(x, axis=-1, keepdims=True)
    xc = x - mu
    var = jnp.mean(xc * xc, axis=-1, keepdims=True)
    y = xc * lax.rsqrt(var + 1e-5) * g_ref[...] + b_ref[...]
    z = z_ref[...]
    o_ref[...] = y * (z * (1.0 / (1.0 + jnp.exp(-z))))


def ln_silu_gate(x, z, g, b):
    M, D = x.shape
    bm = _tile(M, 512, 8)
    return pl.pallas_call(
        _ln_silu_gate_kernel,
        out_shape=jax.ShapeDtypeStruct((M, D), jnp.float32),
        grid=(M // bm,),
        in_specs=[pl.BlockSpec((bm, D), lambda i: (i, 0)),
                  pl.BlockSpec((bm, D), lambda i: (i, 0)),
                  pl.BlockSpec((1, D), lambda i: (0, 0)),
                  pl.BlockSpec((1, D), lambda i: (0, 0))],
        out_specs=pl.BlockSpec((bm, D), lambda i: (i, 0)),
        compiler_params=pltpu.CompilerParams(dimension_semantics=("parallel",)),
    )(x.astype(jnp.float32), z.astype(jnp.float32),
      g.reshape(1, D).astype(jnp.float32), b.reshape(1, D).astype(jnp.float32))


# ----------------------------------------------------------------------------
# Row-tiled residual gate:  out = x * (1 + gelu(a))   (== x + gelu(a) * x)
# ----------------------------------------------------------------------------
def _residual_gate_kernel(a_ref, x_ref, o_ref):
    # TODO(synk): nn.GELU() uses exact erf; tanh approximation used here (Pallas TPU).
    a = a_ref[...]
    g = 0.5 * a * (1.0 + jnp.tanh(0.7978845608028654 * (a + 0.044715 * a * a * a)))
    o_ref[...] = x_ref[...] * (1.0 + g)


def residual_gate(agg, x):
    M, D = x.shape
    bm = _tile(M, 512, 8)
    return pl.pallas_call(
        _residual_gate_kernel,
        out_shape=jax.ShapeDtypeStruct((M, D), jnp.float32),
        grid=(M // bm,),
        in_specs=[pl.BlockSpec((bm, D), lambda i: (i, 0)),
                  pl.BlockSpec((bm, D), lambda i: (i, 0))],
        out_specs=pl.BlockSpec((bm, D), lambda i: (i, 0)),
        compiler_params=pltpu.CompilerParams(dimension_semantics=("parallel",)),
    )(agg.astype(jnp.float32), x.astype(jnp.float32))


# ----------------------------------------------------------------------------
# Depthwise 3x3 conv (NHWC, pre-padded input), optional fused SiLU.  Grid over batch.
# ----------------------------------------------------------------------------
def _dwconv_kernel(xp_ref, w_ref, b_ref, o_ref, *, act):
    H, W = o_ref.shape[1], o_ref.shape[2]
    w = w_ref[...]                       # (3, 3, Cd)
    acc = jnp.zeros(o_ref.shape, jnp.float32)
    # TODO(synk): the 9 shifted slices could be replaced with in-register rolls to
    # avoid VMEM copies at large resolutions.
    for dh in range(3):
        for dw in range(3):
            acc = acc + xp_ref[:, dh:dh + H, dw:dw + W, :] * w[dh, dw]
    acc = acc + b_ref[...]
    if act == "silu":
        acc = acc * (1.0 / (1.0 + jnp.exp(-acc)))
    o_ref[...] = acc


def dwconv(xpad, w, b, act="none"):
    Bn, Hp, Wp, Cd = xpad.shape
    H, W = Hp - 2, Wp - 2
    kern = functools.partial(_dwconv_kernel, act=act)
    return pl.pallas_call(
        kern,
        out_shape=jax.ShapeDtypeStruct((Bn, H, W, Cd), jnp.float32),
        grid=(Bn,),
        in_specs=[pl.BlockSpec((1, Hp, Wp, Cd), lambda i: (i, 0, 0, 0)),
                  pl.BlockSpec((3, 3, Cd), lambda i: (0, 0, 0)),
                  pl.BlockSpec((1, 1, 1, Cd), lambda i: (0, 0, 0, 0))],
        out_specs=pl.BlockSpec((1, H, W, Cd), lambda i: (i, 0, 0, 0)),
        compiler_params=pltpu.CompilerParams(dimension_semantics=("parallel",)),
    )(xpad.astype(jnp.float32), w.astype(jnp.float32),
      b.reshape(1, 1, 1, Cd).astype(jnp.float32))


# ----------------------------------------------------------------------------
# Selective scan (SS2D core), chunked over L.
#   h[l] = exp(delta[l]*A) * h[l-1] + delta[l]*B[l]*u[l];  y[l] = C[l].h[l] + D*u[l]
# State h is (N, d_inner): d_inner on lanes (full-width VPU in the recurrence).
# exp(delta*A) and delta*B*u are computed vectorized for the whole chunk before
# the recurrence; the fori_loop body is pure mul/add plus one dynamic-index store.
# ----------------------------------------------------------------------------
def _scan_kernel(u_ref, dt_ref, B_ref, C_ref, A_ref, D_ref, dtb_ref, y_ref,
                 h_sc, dA_sc, hx_sc):
    @pl.when(pl.program_id(2) == 0)
    def _():
        h_sc[...] = jnp.zeros_like(h_sc)

    Lc = u_ref.shape[2]
    u = u_ref[0, 0]                      # (Lc, Dd)
    A = A_ref[0]                         # (N, Dd), already -exp(A_log)
    Dvec = D_ref[0]                      # (1, Dd)
    dtb = dtb_ref[0]                     # (1, Dd)
    Bm = B_ref[0, 0]                     # (Lc, N)
    Cm = C_ref[0, 0]                     # (Lc, N)

    dtr = dt_ref[0, 0] + dtb
    # numerically-stable softplus
    delta = jnp.maximum(dtr, 0.0) + jnp.log(1.0 + jnp.exp(-jnp.abs(dtr)))

    # Batched (per-chunk) transcendental / broadcast work, off the recurrence path.
    dA_sc[...] = jnp.exp(delta[:, None, :] * A[None, :, :])        # (Lc, N, Dd)
    hx_sc[...] = (delta * u)[:, None, :] * Bm[:, :, None]          # delta*B*u

    def body(l, h):
        h = dA_sc[l] * h + hx_sc[l]
        hx_sc[l] = h                     # reuse hx_sc as the h history
        return h

    h_sc[...] = lax.fori_loop(0, Lc, body, h_sc[...])

    # y[l, d] = sum_n C[l, n] * h[l, n, d] + D[d] * u[l, d]   (vectorized over the chunk)
    y = jnp.sum(Cm[:, :, None] * hx_sc[...], axis=1) + Dvec * u
    y_ref[0, 0] = y


def selective_scan(u, dt, A_neg_T, Bs, Cs, Ds, dt_bias, *, lc_target=64):
    B, K, L, Dd = u.shape
    N = Bs.shape[-1]
    Lc = _tile(L, lc_target, 8)
    nc = L // Lc
    Ds3 = Ds.reshape(K, 1, Dd).astype(jnp.float32)
    dtb3 = dt_bias.reshape(K, 1, Dd).astype(jnp.float32)
    return pl.pallas_call(
        _scan_kernel,
        out_shape=jax.ShapeDtypeStruct((B, K, L, Dd), jnp.float32),
        grid=(B, K, nc),
        in_specs=[
            pl.BlockSpec((1, 1, Lc, Dd), lambda b, k, c: (b, k, c, 0)),
            pl.BlockSpec((1, 1, Lc, Dd), lambda b, k, c: (b, k, c, 0)),
            pl.BlockSpec((1, 1, Lc, N), lambda b, k, c: (b, k, c, 0)),
            pl.BlockSpec((1, 1, Lc, N), lambda b, k, c: (b, k, c, 0)),
            pl.BlockSpec((1, N, Dd), lambda b, k, c: (k, 0, 0)),
            pl.BlockSpec((1, 1, Dd), lambda b, k, c: (k, 0, 0)),
            pl.BlockSpec((1, 1, Dd), lambda b, k, c: (k, 0, 0)),
        ],
        out_specs=pl.BlockSpec((1, 1, Lc, Dd), lambda b, k, c: (b, k, c, 0)),
        scratch_shapes=[pltpu.VMEM((N, Dd), jnp.float32),       # carried state h
                        pltpu.VMEM((Lc, N, Dd), jnp.float32),   # exp(delta*A)
                        pltpu.VMEM((Lc, N, Dd), jnp.float32)],  # delta*B*u -> h history
        compiler_params=pltpu.CompilerParams(
            dimension_semantics=("parallel", "parallel", "arbitrary"),
            vmem_limit_bytes=32 * 1024 * 1024),
    )(u.astype(jnp.float32), dt.astype(jnp.float32), Bs.astype(jnp.float32),
      Cs.astype(jnp.float32), A_neg_T.astype(jnp.float32), Ds3, dtb3)


# ----------------------------------------------------------------------------
# SS2D (VMamba selective-scan 2D attention block)
# ----------------------------------------------------------------------------
def ss2d(x_nhwc, p):
    B, h, w, D = x_nhwc.shape
    L = h * w
    d_inner = p["conv_w"].shape[-1]
    N = p["A_log"].shape[-1]
    dt_rank = p["dt_projs_w"].shape[-1]
    K = p["A_log"].shape[0]

    # in_proj (no bias), split x / z
    xz = matmul(x_nhwc.reshape(B * L, D), p["in_proj_w"].T, None)
    xz = xz.reshape(B, h, w, 2 * d_inner)
    x_in, z = xz[..., :d_inner], xz[..., d_inner:]

    # depthwise 3x3 conv + SiLU
    xpad = jnp.pad(x_in, ((0, 0), (1, 1), (1, 1), (0, 0)))
    xc = dwconv(xpad, p["conv_w"], p["conv_b"], act="silu")          # (B,h,w,d_inner)

    # four scan directions (row-major, col-major, and their reverses)
    # TODO(synk): directions still materialized in JAX glue; direction-dependent
    # index_maps (and reversed in-kernel iteration) would save HBM passes.
    x_row = xc.reshape(B, L, d_inner)
    x_col = xc.transpose(0, 2, 1, 3).reshape(B, L, d_inner)
    xs = jnp.stack([x_row, x_col, x_row[:, ::-1], x_col[:, ::-1]], axis=1)  # (B,K,L,d)

    # x_proj: per-direction Linear(d_inner -> dt_rank + 2N)
    xs_k = xs.transpose(1, 0, 2, 3).reshape(K, B * L, d_inner)
    x_dbl = bmm(xs_k, jnp.swapaxes(p["x_proj_w"], 1, 2), None)       # (K,BL,dt_rank+2N)
    dts_r = x_dbl[..., :dt_rank]
    Bs = x_dbl[..., dt_rank:dt_rank + N]
    Cs = x_dbl[..., dt_rank + N:]

    # dt_proj: per-direction Linear(dt_rank -> d_inner); bias added inside the scan
    dts = bmm(dts_r, jnp.swapaxes(p["dt_projs_w"], 1, 2), None)      # (K,BL,d_inner)

    dt = dts.reshape(K, B, L, d_inner).transpose(1, 0, 2, 3)
    Bs = Bs.reshape(K, B, L, N).transpose(1, 0, 2, 3)
    Cs = Cs.reshape(K, B, L, N).transpose(1, 0, 2, 3)

    # A = -exp(A_log) hoisted out of the kernel, transposed so d_inner is the lane axis
    A_neg_T = -jnp.exp(p["A_log"]).transpose(0, 2, 1)                # (K, N, d_inner)

    y = selective_scan(xs, dt, A_neg_T, Bs, Cs, p["Ds"], p["dt_projs_b"])

    # merge directions back into row-major token order
    y0 = y[:, 0]
    y1 = y[:, 1].reshape(B, w, h, d_inner).transpose(0, 2, 1, 3).reshape(B, L, d_inner)
    y2 = y[:, 2, ::-1]
    y3 = y[:, 3, ::-1].reshape(B, w, h, d_inner).transpose(0, 2, 1, 3).reshape(B, L, d_inner)
    y_sum = (y0 + y1 + y2 + y3).reshape(B * L, d_inner)

    # fused LayerNorm + SiLU(z) gate, then out_proj
    y_g = ln_silu_gate(y_sum, z.reshape(B * L, d_inner), p["outn_g"], p["outn_b"])
    out = matmul(y_g, p["out_proj_w"].T, None)                       # (BL, D)
    return out.reshape(B, h, w, D)


# ----------------------------------------------------------------------------
# SAFM (+ fused outer residual):  x + gelu(aggr(multi-scale dwconv)) * x
# ----------------------------------------------------------------------------
def safm_residual(x_nchw, p):
    B, C, Hs, Ws = x_nchw.shape
    n_levels = 4
    cd = C // n_levels
    xh = x_nchw.transpose(0, 2, 3, 1)                                # NHWC
    outs = []
    # TODO(synk): the 4 per-level dwconvs run lane-masked (cd << 128); batching levels
    # into one call would need per-level spatial handling (different pooled sizes).
    for i in range(n_levels):
        xi = xh[..., i * cd:(i + 1) * cd]
        f = 2 ** i
        if i > 0:
            # TODO(synk): adaptive max-pool / nearest-resize done in JAX glue (exact
            # power-of-two factors -> window max-pool + pixel repeat).
            s = xi.reshape(B, Hs // f, f, Ws // f, f, cd).max(axis=(2, 4))
        else:
            s = xi
        sp = jnp.pad(s, ((0, 0), (1, 1), (1, 1), (0, 0)))
        s = dwconv(sp, p["mfr_w"][i], p["mfr_b"][i], act="none")
        if i > 0:
            s = jnp.repeat(jnp.repeat(s, f, axis=1), f, axis=2)
        outs.append(s)
    agg_in = jnp.concatenate(outs, axis=-1).reshape(B * Hs * Ws, C)
    agg = matmul(agg_in, p["aggr_w"].T, p["aggr_b"])                 # 1x1 conv
    xflat = xh.reshape(B * Hs * Ws, C)
    out = residual_gate(agg, xflat)                                  # x * (1 + gelu(agg))
    return out.reshape(B, Hs, Ws, C).transpose(0, 3, 1, 2)


# ----------------------------------------------------------------------------
# AFD forward
# ----------------------------------------------------------------------------
def afd_forward(x, p):
    B, C, H, W = x.shape
    P = 4
    h, w = H // P, W // P
    D = 4 * C

    # ---- PatchEmbed2D: Conv2d(C, 4C, k=4, s=4) as im2col matmul, NHWC out ----
    patches = (x.reshape(B, C, h, P, w, P)
                .transpose(0, 2, 4, 1, 3, 5)
                .reshape(B * h * w, C * P * P))
    pe_w = p["pe_w"].reshape(D, C * P * P).T
    emb = matmul(patches, pe_w, p["pe_b"])                           # (B*h*w, D)
    x_embed = emb.reshape(B, h, w, D)

    # ---- VSSBlock: x + SS2D(LayerNorm(x)) ----
    # TODO(synk): AFD passes hidden_dim=in_channels but the embedded feature dim is
    # 4*in_channels; the actual feature dim is used so the block composes.
    tok_ln = layernorm(emb, p["ln1_g"], p["ln1_b"])
    ss_out = ss2d(tok_ln.reshape(B, h, w, D), p)
    x_vss = x_embed + ss_out                                         # (B,h,w,D)

    # ---- PatchExpand(dim=C, dim_scale=2) ----
    # TODO(synk): original PatchExpand source unavailable; implemented as
    # Linear(4C->4C, no bias) + pixel-shuffle(2) + LayerNorm(C) (dimensionally
    # consistent with the rest of AFD.forward).
    t = matmul(x_vss.reshape(B * h * w, D), p["pexp_w"].T, None)     # (Bhw, 4C)
    t = (t.reshape(B, h, w, 2, 2, C)
          .transpose(0, 1, 3, 2, 4, 5)
          .reshape(B, 2 * h, 2 * w, C))
    t = layernorm(t.reshape(-1, C), p["pexp_g"], p["pexp_b"]).reshape(B, 2 * h, 2 * w, C)

    # ---- permute(0,3,1,2) then x + SAFM(x) ----
    x_nchw = t.transpose(0, 3, 1, 2)                                 # (B, C, H/2, W/2)
    return safm_residual(x_nchw, p)


# ----------------------------------------------------------------------------
# Deterministic synthetic parameter init (shapes implied by __init__)
# ----------------------------------------------------------------------------
def init_params(key, C):
    D = 4 * C
    d_inner = 2 * D
    N = 16
    K = 4
    dt_rank = max(1, (D + 15) // 16)
    ks = jax.random.split(key, 16)

    def nrm(k, shape, s=0.1):
        return jax.random.normal(k, shape, jnp.float32) * s

    p = {}
    p["pe_w"] = nrm(ks[0], (D, C, 4, 4))                 # Conv2d(C, 4C, 4, 4)
    p["pe_b"] = nrm(ks[1], (D,), 0.01)
    p["ln1_g"] = jnp.ones((D,), jnp.float32)
    p["ln1_b"] = jnp.zeros((D,), jnp.float32)
    p["in_proj_w"] = nrm(ks[2], (2 * d_inner, D))        # Linear(D, 2*d_inner)
    p["conv_w"] = nrm(ks[3], (3, 3, d_inner))            # depthwise conv (HWC layout)
    p["conv_b"] = nrm(ks[4], (d_inner,), 0.01)
    p["x_proj_w"] = nrm(ks[5], (K, dt_rank + 2 * N, d_inner))
    p["dt_projs_w"] = nrm(ks[6], (K, d_inner, dt_rank))
    p["dt_projs_b"] = nrm(ks[7], (K, d_inner), 0.01)
    A = jnp.tile(jnp.arange(1, N + 1, dtype=jnp.float32)[None, None, :], (K, d_inner, 1))
    p["A_log"] = jnp.log(A)                              # (K, d_inner, N)
    p["Ds"] = jnp.ones((K, d_inner), jnp.float32)
    p["outn_g"] = jnp.ones((d_inner,), jnp.float32)
    p["outn_b"] = jnp.zeros((d_inner,), jnp.float32)
    p["out_proj_w"] = nrm(ks[8], (D, d_inner))           # Linear(d_inner, D)
    p["pexp_w"] = nrm(ks[9], (4 * C, D))                 # PatchExpand Linear
    p["pexp_g"] = jnp.ones((C,), jnp.float32)
    p["pexp_b"] = jnp.zeros((C,), jnp.float32)
    # TODO(synk): mfr_w has a single filter channel; only a true per-channel depthwise
    # conv when C//4 == 1 (C=4 here) — kept for parity with the previous revision.
    p["mfr_w"] = nrm(ks[10], (4, 3, 3, 1))               # 4 x single-channel 3x3 conv
    p["mfr_b"] = nrm(ks[11], (4, 1), 0.01)
    p["aggr_w"] = nrm(ks[12], (C, C))                    # 1x1 conv
    p["aggr_b"] = nrm(ks[13], (C,), 0.01)
    return p


if __name__ == "__main__":
    key = jax.random.PRNGKey(0)
    kx, kp = jax.random.split(key)
    C = 4
    x = jax.random.normal(kx, (2, C, 16, 16), jnp.float32)
    params = init_params(kp, C)

    out = jax.jit(afd_forward)(x, params)
    out = jax.block_until_ready(out)
    assert out.shape == (2, C, 8, 8), out.shape
    assert jnp.all(jnp.isfinite(out))
    print("KERNEL_OK")
</pallas_src>

<mosaic_0001>
module attributes {stable_mosaic.version = 11 : i64} {
  func.func @_ln_kernel(%arg0: i32, %arg1: memref<32x16xf32, #tpu.memory_space<vmem>>, %arg2: memref<1x16xf32, #tpu.memory_space<vmem>>, %arg3: memref<1x16xf32, #tpu.memory_space<vmem>>, %arg4: memref<32x16xf32, #tpu.memory_space<vmem>>) attributes {dimension_semantics = [#tpu.dimension_semantics<parallel>], iteration_bounds = array<i64: 1>, scalar_prefetch = 0 : i64, scratch_operands = 0 : i64, tpu.core_type = #tpu.core_type<tc>, window_params = [{transform_indices = @transform_0, window_bounds = array<i64: 32, 16>}, {pipeline_mode = #tpu.pipeline_mode<synchronous>, transform_indices = @transform_1, window_bounds = array<i64: 1, 16>}, {pipeline_mode = #tpu.pipeline_mode<synchronous>, transform_indices = @transform_2, window_bounds = array<i64: 1, 16>}, {transform_indices = @transform_3, window_bounds = array<i64: 32, 16>}]} {
    %c0 = arith.constant 0 : index
    %c0_0 = arith.constant 0 : index
    %0 = vector.load %arg1[%c0, %c0_0] : memref<32x16xf32, #tpu.memory_space<vmem>>, vector<32x16xf32>
    %cst = arith.constant dense<0.000000e+00> : vector<32xf32>
    %1 = vector.multi_reduction <add>, %0, %cst [1] : vector<32x16xf32> to vector<32xf32>
    %2 = vector.shape_cast %1 : vector<32xf32> to vector<32x1xf32>
    %cst_1 = arith.constant 1.600000e+01 : f32
    %3 = vector.broadcast %cst_1 : f32 to vector<32x1xf32>
    %4 = arith.divf %2, %3 : vector<32x1xf32>
    %5 = vector.broadcast %4 : vector<32x1xf32> to vector<32x16xf32>
    %6 = arith.subf %0, %5 : vector<32x16xf32>
    %7 = arith.mulf %6, %6 : vector<32x16xf32>
    %cst_2 = arith.constant dense<0.000000e+00> : vector<32xf32>
    %8 = vector.multi_reduction <add>, %7, %cst_2 [1] : vector<32x16xf32> to vector<32xf32>
    %9 = vector.shape_cast %8 : vector<32xf32> to vector<32x1xf32>
    %cst_3 = arith.constant 1.600000e+01 : f32
    %10 = vector.broadcast %cst_3 : f32 to vector<32x1xf32>
    %11 = arith.divf %9, %10 : vector<32x1xf32>
    %cst_4 = arith.constant 9.99999974E-6 : f32
    %12 = vector.broadcast %cst_4 : f32 to vector<32x1xf32>
    %13 = arith.addf %11, %12 : vector<32x1xf32>
    %14 = math.rsqrt %13 : vector<32x1xf32>
    %15 = vector.broadcast %14 : vector<32x1xf32> to vector<32x16xf32>
    %16 = arith.mulf %6, %15 : vector<32x16xf32>
    %c0_5 = arith.constant 0 : index
    %c0_6 = arith.constant 0 : index
    %17 = vector.load %arg2[%c0_5, %c0_6] : memref<1x16xf32, #tpu.memory_space<vmem>>, vector<1x16xf32>
    %18 = vector.broadcast %17 : vector<1x16xf32> to vector<32x16xf32>
    %19 = arith.mulf %16, %18 : vector<32x16xf32>
    %c0_7 = arith.constant 0 : index
    %c0_8 = arith.constant 0 : index
    %20 = vector.load %arg3[%c0_7, %c0_8] : memref<1x16xf32, #tpu.memory_space<vmem>>, vector<1x16xf32>
    %21 = vector.broadcast %20 : vector<1x16xf32> to vector<32x16xf32>
    %22 = arith.addf %19, %21 : vector<32x16xf32>
    %c0_9 = arith.constant 0 : index
    %c0_10 = arith.constant 0 : index
    %23 = vector.load %arg4[%c0_9, %c0_10] : memref<32x16xf32, #tpu.memory_space<vmem>>, vector<32x16xf32>
    tpu.vector_store %arg4[%c0_9, %c0_10], %22 {strides = array<i32>} : memref<32x16xf32, #tpu.memory_space<vmem>>, vector<32x16xf32>,
    return
  }
  func.func @transform_0(%arg0: i32) -> (i32, i32) {
    %c0_i32 = arith.constant 0 : i32
    %c0_i32_0 = arith.constant 0 : i32
    return %arg0, %c0_i32 : i32, i32
  }
  func.func @transform_1(%arg0: i32) -> (i32, i32) {
    %c0_i32 = arith.constant 0 : i32
    %c0_i32_0 = arith.constant 0 : i32
    %c0_i32_1 = arith.constant 0 : i32
    return %c0_i32, %c0_i32_0 : i32, i32
  }
  func.func @transform_2(%arg0: i32) -> (i32, i32) {
    %c0_i32 = arith.constant 0 : i32
    %c0_i32_0 = arith.constant 0 : i32
    %c0_i32_1 = arith.constant 0 : i32
    return %c0_i32, %c0_i32_0 : i32, i32
  }
  func.func @transform_3(%arg0: i32) -> (i32, i32) {
    %c0_i32 = arith.constant 0 : i32
    %c0_i32_0 = arith.constant 0 : i32
    return %arg0, %c0_i32 : i32, i32
  }
}

module attributes {stable_mosaic.version = 11 : i64} {
  func.func @_mm_bias_kernel(%arg0: i32, %arg1: i32, %arg2: i32, %arg3: memref<1x32x64xbf16, #tpu.memory_space<vmem>>, %arg4: memref<1x64x16xbf16, #tpu.memory_space<vmem>>, %arg5: memref<1x1x16xf32, #tpu.memory_space<vmem>>, %arg6: memref<1x32x16xf32, #tpu.memory_space<vmem>>) attributes {dimension_semantics = [#tpu.dimension_semantics<parallel>, #tpu.dimension_semantics<parallel>, #tpu.dimension_semantics<parallel>], iteration_bounds = array<i64: 1, 1, 1>, scalar_prefetch = 0 : i64, scratch_operands = 0 : i64, tpu.core_type = #tpu.core_type<tc>, window_params = [{transform_indices = @transform_0, window_bounds = array<i64: 1, 32, 64>}, {transform_indices = @transform_1, window_bounds = array<i64: 1, 64, 16>}, {transform_indices = @transform_2, window_bounds = array<i64: 1, 1, 16>}, {transform_indices = @transform_3, window_bounds = array<i64: 1, 32, 16>}]} {
    %c0 = arith.constant 0 : index
    %c0_0 = arith.constant 0 : index
    %c0_1 = arith.constant 0 : index
    %0 = vector.load %arg3[%c0, %c0_0, %c0_1] : memref<1x32x64xbf16, #tpu.memory_space<vmem>>, vector<1x32x64xbf16>
    %1 = vector.shape_cast %0 : vector<1x32x64xbf16> to vector<32x64xbf16>
    %c0_2 = arith.constant 0 : index
    %c0_3 = arith.constant 0 : index
    %c0_4 = arith.constant 0 : index
    %2 = vector.load %arg4[%c0_2, %c0_3, %c0_4] : memref<1x64x16xbf16, #tpu.memory_space<vmem>>, vector<1x64x16xbf16>
    %3 = vector.shape_cast %2 : vector<1x64x16xbf16> to vector<64x16xbf16>
    %cst = arith.constant dense<0.000000e+00> : vector<32x16xf32>
    %4 = tpu.matmul %1, %3, %cst {dimension_numbers = #tpu.dot_dimension_numbers<[1], [0], [0], [1], [0, 0, 1, 1], [], []>} : vector<32x64xbf16>, vector<64x16xbf16>, vector<32x16xf32> -> vector<32x16xf32>
    %c0_5 = arith.constant 0 : index
    %c0_6 = arith.constant 0 : index
    %c0_7 = arith.constant 0 : index
    %5 = vector.load %arg5[%c0_5, %c0_6, %c0_7] : memref<1x1x16xf32, #tpu.memory_space<vmem>>, vector<1x1x16xf32>
    %6 = vector.shape_cast %5 : vector<1x1x16xf32> to vector<1x16xf32>
    %7 = vector.broadcast %6 : vector<1x16xf32> to vector<32x16xf32>
    %8 = arith.addf %4, %7 : vector<32x16xf32>
    %c0_8 = arith.constant 0 : index
    %c0_9 = arith.constant 0 : index
    %c0_10 = arith.constant 0 : index
    %9 = vector.load %arg6[%c0_8, %c0_9, %c0_10] : memref<1x32x16xf32, #tpu.memory_space<vmem>>, vector<1x32x16xf32>
    %10 = vector.shape_cast %9 : vector<1x32x16xf32> to vector<32x16xf32>
    %11 = vector.shape_cast %8 : vector<32x16xf32> to vector<1x32x16xf32>
    tpu.vector_store %arg6[%c0_8, %c0_9, %c0_10], %11 {strides = array<i32>} : memref<1x32x16xf32, #tpu.memory_space<vmem>>, vector<1x32x16xf32>,
    return
  }
  func.func @transform_0(%arg0: i32, %arg1: i32, %arg2: i32) -> (i32, i32, i32) {
    %c0_i32 = arith.constant 0 : i32
    %c0_i32_0 = arith.constant 0 : i32
    return %arg0, %arg1, %c0_i32 : i32, i32, i32
  }
  func.func @transform_1(%arg0: i32, %arg1: i32, %arg2: i32) -> (i32, i32, i32) {
    %c0_i32 = arith.constant 0 : i32
    %c0_i32_0 = arith.constant 0 : i32
    return %arg0, %c0_i32, %arg2 : i32, i32, i32
  }
  func.func @transform_2(%arg0: i32, %arg1: i32, %arg2: i32) -> (i32, i32, i32) {
    %c0_i32 = arith.constant 0 : i32
    %c0_i32_0 = arith.constant 0 : i32
    return %arg0, %c0_i32, %arg2 : i32, i32, i32
  }
  func.func @transform_3(%arg0: i32, %arg1: i32, %arg2: i32) -> (i32, i32, i32) {
    %c0_i32 = arith.constant 0 : i32
    return %arg0, %arg1, %arg2 : i32, i32, i32
  }
}

module attributes {stable_mosaic.version = 11 : i64} {
  func.func @_mm_kernel(%arg0: i32, %arg1: i32, %arg2: i32, %arg3: memref<1x32x16xbf16, #tpu.memory_space<vmem>>, %arg4: memref<1x16x64xbf16, #tpu.memory_space<vmem>>, %arg5: memref<1x32x64xf32, #tpu.memory_space<vmem>>) attributes {dimension_semantics = [#tpu.dimension_semantics<parallel>, #tpu.dimension_semantics<parallel>, #tpu.dimension_semantics<parallel>], iteration_bounds = array<i64: 1, 1, 1>, scalar_prefetch = 0 : i64, scratch_operands = 0 : i64, tpu.core_type = #tpu.core_type<tc>, window_params = [{transform_indices = @transform_0, window_bounds = array<i64: 1, 32, 16>}, {transform_indices = @transform_1, window_bounds = array<i64: 1, 16, 64>}, {transform_indices = @transform_2, window_bounds = array<i64: 1, 32, 64>}]} {
    %c0 = arith.constant 0 : index
    %c0_0 = arith.constant 0 : index
    %c0_1 = arith.constant 0 : index
    %0 = vector.load %arg3[%c0, %c0_0, %c0_1] : memref<1x32x16xbf16, #tpu.memory_space<vmem>>, vector<1x32x16xbf16>
    %1 = vector.shape_cast %0 : vector<1x32x16xbf16> to vector<32x16xbf16>
    %c0_2 = arith.constant 0 : index
    %c0_3 = arith.constant 0 : index
    %c0_4 = arith.constant 0 : index
    %2 = vector.load %arg4[%c0_2, %c0_3, %c0_4] : memref<1x16x64xbf16, #tpu.memory_space<vmem>>, vector<1x16x64xbf16>
    %3 = vector.shape_cast %2 : vector<1x16x64xbf16> to vector<16x64xbf16>
    %cst = arith.constant dense<0.000000e+00> : vector<32x64xf32>
    %4 = tpu.matmul %1, %3, %cst {dimension_numbers = #tpu.dot_dimension_numbers<[1], [0], [0], [1], [0, 0, 1, 1], [], []>} : vector<32x16xbf16>, vector<16x64xbf16>, vector<32x64xf32> -> vector<32x64xf32>
    %c0_5 = arith.constant 0 : index
    %c0_6 = arith.constant 0 : index
    %c0_7 = arith.constant 0 : index
    %5 = vector.load %arg5[%c0_5, %c0_6, %c0_7] : memref<1x32x64xf32, #tpu.memory_space<vmem>>, vector<1x32x64xf32>
    %6 = vector.shape_cast %5 : vector<1x32x64xf32> to vector<32x64xf32>
    %7 = vector.shape_cast %4 : vector<32x64xf32> to vector<1x32x64xf32>
    tpu.vector_store %arg5[%c0_5, %c0_6, %c0_7], %7 {strides = array<i32>} : memref<1x32x64xf32, #tpu.memory_space<vmem>>, vector<1x32x64xf32>,
    return
  }
  func.func @transform_0(%arg0: i32, %arg1: i32, %arg2: i32) -> (i32, i32, i32) {
    %c0_i32 = arith.constant 0 : i32
    %c0_i32_0 = arith.constant 0 : i32
    return %arg0, %arg1, %c0_i32 : i32, i32, i32
  }
  func.func @transform_1(%arg0: i32, %arg1: i32, %arg2: i32) -> (i32, i32, i32) {
    %c0_i32 = arith.constant 0 : i32
    %c0_i32_0 = arith.constant 0 : i32
    return %arg0, %c0_i32, %arg2 : i32, i32, i32
  }
  func.func @transform_2(%arg0: i32, %arg1: i32, %arg2: i32) -> (i32, i32, i32) {
    %c0_i32 = arith.constant 0 : i32
    return %arg0, %arg1, %arg2 : i32, i32, i32
  }
}

module attributes {stable_mosaic.version = 11 : i64} {
  func.func @_dwconv_kernel(%arg0: i32, %arg1: memref<1x6x6x32xf32, #tpu.memory_space<vmem>>, %arg2: memref<3x3x32xf32, #tpu.memory_space<vmem>>, %arg3: memref<1x1x1x32xf32, #tpu.memory_space<vmem>>, %arg4: memref<1x4x4x32xf32, #tpu.memory_space<vmem>>) attributes {dimension_semantics = [#tpu.dimension_semantics<parallel>], iteration_bounds = array<i64: 2>, scalar_prefetch = 0 : i64, scratch_operands = 0 : i64, tpu.core_type = #tpu.core_type<tc>, window_params = [{transform_indices = @transform_0, window_bounds = array<i64: 1, 6, 6, 32>}, {pipeline_mode = #tpu.pipeline_mode<synchronous>, transform_indices = @transform_1, window_bounds = array<i64: 3, 3, 32>}, {pipeline_mode = #tpu.pipeline_mode<synchronous>, transform_indices = @transform_2, window_bounds = array<i64: 1, 1, 1, 32>}, {transform_indices = @transform_3, window_bounds = array<i64: 1, 4, 4, 32>}]} {
    %c0 = arith.constant 0 : index
    %c0_0 = arith.constant 0 : index
    %c0_1 = arith.constant 0 : index
    %0 = vector.load %arg2[%c0, %c0_0, %c0_1] : memref<3x3x32xf32, #tpu.memory_space<vmem>>, vector<3x3x32xf32>
    %cst = arith.constant 0.000000e+00 : f32
    %1 = vector.broadcast %cst : f32 to vector<1x4x4x32xf32>
    %c0_2 = arith.constant 0 : index
    %c0_3 = arith.constant 0 : index
    %c0_4 = arith.constant 0 : index
    %c0_5 = arith.constant 0 : index
    %2 = vector.load %arg1[%c0_2, %c0_3, %c0_4, %c0_5] : memref<1x6x6x32xf32, #tpu.memory_space<vmem>>, vector<1x4x4x32xf32>
    %3 = vector.extract_strided_slice %0 {offsets = [0, 0, 0], sizes = [1, 1, 32], strides = [1, 1, 1]} : vector<3x3x32xf32> to vector<1x1x32xf32>
    %4 = vector.shape_cast %3 : vector<1x1x32xf32> to vector<32xf32>
    %5 = vector.shape_cast %4 : vector<32xf32> to vector<1x1x1x32xf32>
    %6 = vector.broadcast %5 : vector<1x1x1x32xf32> to vector<1x4x4x32xf32>
    %7 = arith.mulf %2, %6 : vector<1x4x4x32xf32>
    %8 = arith.addf %1, %7 : vector<1x4x4x32xf32>
    %c0_6 = arith.constant 0 : index
    %c0_7 = arith.constant 0 : index
    %c1 = arith.constant 1 : index
    %c0_8 = arith.constant 0 : index
    %9 = vector.load %arg1[%c0_6, %c0_7, %c1, %c0_8] : memref<1x6x6x32xf32, #tpu.memory_space<vmem>>, vector<1x4x4x32xf32>
    %10 = vector.extract_strided_slice %0 {offsets = [0, 1, 0], sizes = [1, 1, 32], strides = [1, 1, 1]} : vector<3x3x32xf32> to vector<1x1x32xf32>
    %11 = vector.shape_cast %10 : vector<1x1x32xf32> to vector<32xf32>
    %12 = vector.shape_cast %11 : vector<32xf32> to vector<1x1x1x32xf32>
    %13 = vector.broadcast %12 : vector<1x1x1x32xf32> to vector<1x4x4x32xf32>
    %14 = arith.mulf %9, %13 : vector<1x4x4x32xf32>
    %15 = arith.addf %8, %14 : vector<1x4x4x32xf32>
    %c0_9 = arith.constant 0 : index
    %c0_10 = arith.constant 0 : index
    %c2 = arith.constant 2 : index
    %c0_11 = arith.constant 0 : index
    %16 = vector.load %arg1[%c0_9, %c0_10, %c2, %c0_11] : memref<1x6x6x32xf32, #tpu.memory_space<vmem>>, vector<1x4x4x32xf32>
    %17 = vector.extract_strided_slice %0 {offsets = [0, 2, 0], sizes = [1, 1, 32], strides = [1, 1, 1]} : vector<3x3x32xf32> to vector<1x1x32xf32>
    %18 = vector.shape_cast %17 : vector<1x1x32xf32> to vector<32xf32>
    %19 = vector.shape_cast %18 : vector<32xf32> to vector<1x1x1x32xf32>
    %20 = vector.broadcast %19 : vector<1x1x1x32xf32> to vector<1x4x4x32xf32>
    %21 = arith.mulf %16, %20 : vector<1x4x4x32xf32>
    %22 = arith.addf %15, %21 : vector<1x4x4x32xf32>
    %c0_12 = arith.constant 0 : index
    %c1_13 = arith.constant 1 : index
    %c0_14 = arith.constant 0 : index
    %c0_15 = arith.constant 0 : index
    %23 = vector.load %arg1[%c0_12, %c1_13, %c0_14, %c0_15] : memref<1x6x6x32xf32, #tpu.memory_space<vmem>>, vector<1x4x4x32xf32>
    %24 = vector.extract_strided_slice %0 {offsets = [1, 0, 0], sizes = [1, 1, 32], strides = [1, 1, 1]} : vector<3x3x32xf32> to vector<1x1x32xf32>
    %25 = vector.shape_cast %24 : vector<1x1x32xf32> to vector<32xf32>
    %26 = vector.shape_cast %25 : vector<32xf32> to vector<1x1x1x32xf32>
    %27 = vector.broadcast %26 : vector<1x1x1x32xf32> to vector<1x4x4x32xf32>
    %28 = arith.mulf %23, %27 : vector<1x4x4x32xf32>
    %29 = arith.addf %22, %28 : vector<1x4x4x32xf32>
    %c0_16 = arith.constant 0 : index
    %c1_17 = arith.constant 1 : index
    %c1_18 = arith.constant 1 : index
    %c0_19 = arith.constant 0 : index
    %30 = vector.load %arg1[%c0_16, %c1_17, %c1_18, %c0_19] : memref<1x6x6x32xf32, #tpu.memory_space<vmem>>, vector<1x4x4x32xf32>
    %31 = vector.extract_strided_slice %0 {offsets = [1, 1, 0], sizes = [1, 1, 32], strides = [1, 1, 1]} : vector<3x3x32xf32> to vector<1x1x32xf32>
    %32 = vector.shape_cast %31 : vector<1x1x32xf32> to vector<32xf32>
    %33 = vector.shape_cast %32 : vector<32xf32> to vector<1x1x1x32xf32>
    %34 = vector.broadcast %33 : vector<1x1x1x32xf32> to vector<1x4x4x32xf32>
    %35 = arith.mulf %30, %34 : vector<1x4x4x32xf32>
    %36 = arith.addf %29, %35 : vector<1x4x4x32xf32>
    %c0_20 = arith.constant 0 : index
    %c1_21 = arith.constant 1 : index
    %c2_22 = arith.constant 2 : index
    %c0_23 = arith.constant 0 : index
    %37 = vector.load %arg1[%c0_20, %c1_21, %c2_22, %c0_23] : memref<1x6x6x32xf32, #tpu.memory_space<vmem>>, vector<1x4x4x32xf32>
    %38 = vector.extract_strided_slice %0 {offsets = [1, 2, 0], sizes = [1, 1, 32], strides = [1, 1, 1]} : vector<3x3x32xf32> to vector<1x1x32xf32>
    %39 = vector.shape_cast %38 : vector<1x1x32xf32> to vector<32xf32>
    %40 = vector.shape_cast %39 : vector<32xf32> to vector<1x1x1x32xf32>
    %41 = vector.broadcast %40 : vector<1x1x1x32xf32> to vector<1x4x4x32xf32>
    %42 = arith.mulf %37, %41 : vector<1x4x4x32xf32>
    %43 = arith.addf %36, %42 : vector<1x4x4x32xf32>
    %c0_24 = arith.constant 0 : index
    %c2_25 = arith.constant 2 : index
    %c0_26 = arith.constant 0 : index
    %c0_27 = arith.constant 0 : index
    %44 = vector.load %arg1[%c0_24, %c2_25, %c0_26, %c0_27] : memref<1x6x6x32xf32, #tpu.memory_space<vmem>>, vector<1x4x4x32xf32>
    %45 = vector.extract_strided_slice %0 {offsets = [2, 0, 0], sizes = [1, 1, 32], strides = [1, 1, 1]} : vector<3x3x32xf32> to vector<1x1x32xf32>
    %46 = vector.shape_cast %45 : vector<1x1x32xf32> to vector<32xf32>
    %47 = vector.shape_cast %46 : vector<32xf32> to vector<1x1x1x32xf32>
    %48 = vector.broadcast %47 : vector<1x1x1x32xf32> to vector<1x4x4x32xf32>
    %49 = arith.mulf %44, %48 : vector<1x4x4x32xf32>
    %50 = arith.addf %43, %49 : vector<1x4x4x32xf32>
    %c0_28 = arith.constant 0 : index
    %c2_29 = arith.constant 2 : index
    %c1_30 = arith.constant 1 : index
    %c0_31 = arith.constant 0 : index
    %51 = vector.load %arg1[%c0_28, %c2_29, %c1_30, %c0_31] : memref<1x6x6x32xf32, #tpu.memory_space<vmem>>, vector<1x4x4x32xf32>
    %52 = vector.extract_strided_slice %0 {offsets = [2, 1, 0], sizes = [1, 1, 32], strides = [1, 1, 1]} : vector<3x3x32xf32> to vector<1x1x32xf32>
    %53 = vector.shape_cast %52 : vector<1x1x32xf32> to vector<32xf32>
    %54 = vector.shape_cast %53 : vector<32xf32> to vector<1x1x1x32xf32>
    %55 = vector.broadcast %54 : vector<1x1x1x32xf32> to vector<1x4x4x32xf32>
    %56 = arith.mulf %51, %55 : vector<1x4x4x32xf32>
    %57 = arith.addf %50, %56 : vector<1x4x4x32xf32>
    %c0_32 = arith.constant 0 : index
    %c2_33 = arith.constant 2 : index
    %c2_34 = arith.constant 2 : index
    %c0_35 = arith.constant 0 : index
    %58 = vector.load %arg1[%c0_32, %c2_33, %c2_34, %c0_35] : memref<1x6x6x32xf32, #tpu.memory_space<vmem>>, vector<1x4x4x32xf32>
    %59 = vector.extract_strided_slice %0 {offsets = [2, 2, 0], sizes = [1, 1, 32], strides = [1, 1, 1]} : vector<3x3x32xf32> to vector<1x1x32xf32>
    %60 = vector.shape_cast %59 : vector<1x1x32xf32> to vector<32xf32>
    %61 = vector.shape_cast %60 : vector<32xf32> to vector<1x1x1x32xf32>
    %62 = vector.broadcast %61 : vector<1x1x1x32xf32> to vector<1x4x4x32xf32>
    %63 = arith.mulf %58, %62 : vector<1x4x4x32xf32>
    %64 = arith.addf %57, %63 : vector<1x4x4x32xf32>
    %c0_36 = arith.constant 0 : index
    %c0_37 = arith.constant 0 : index
    %c0_38 = arith.constant 0 : index
    %c0_39 = arith.constant 0 : index
    %65 = vector.load %arg3[%c0_36, %c0_37, %c0_38, %c0_39] : memref<1x1x1x32xf32, #tpu.memory_space<vmem>>, vector<1x1x1x32xf32>
    %66 = vector.broadcast %65 : vector<1x1x1x32xf32> to vector<1x4x4x32xf32>
    %67 = arith.addf %64, %66 : vector<1x4x4x32xf32>
    %cst_40 = arith.constant 0.000000e+00 : f32
    %68 = vector.broadcast %cst_40 : f32 to vector<1x4x4x32xf32>
    %69 = arith.subf %68, %67 : vector<1x4x4x32xf32>
    %70 = math.exp %69 : vector<1x4x4x32xf32>
    %cst_41 = arith.constant 1.000000e+00 : f32
    %71 = vector.broadcast %cst_41 : f32 to vector<1x4x4x32xf32>
    %72 = arith.addf %71, %70 : vector<1x4x4x32xf32>
    %cst_42 = arith.constant 1.000000e+00 : f32
    %73 = vector.broadcast %cst_42 : f32 to vector<1x4x4x32xf32>
    %74 = arith.divf %73, %72 : vector<1x4x4x32xf32>
    %75 = arith.mulf %67, %74 : vector<1x4x4x32xf32>
    %c0_43 = arith.constant 0 : index
    %c0_44 = arith.constant 0 : index
    %c0_45 = arith.constant 0 : index
    %c0_46 = arith.constant 0 : index
    %76 = vector.load %arg4[%c0_43, %c0_44, %c0_45, %c0_46] : memref<1x4x4x32xf32, #tpu.memory_space<vmem>>, vector<1x4x4x32xf32>
    tpu.vector_store %arg4[%c0_43, %c0_44, %c0_45, %c0_46], %75 {strides = array<i32>} : memref<1x4x4x32xf32, #tpu.memory_space<vmem>>, vector<1x4x4x32xf32>,
    return
  }
  func.func @transform_0(%arg0: i32) -> (i32, i32, i32, i32) {
    %c0_i32 = arith.constant 0 : i32
    %c0_i32_0 = arith.constant 0 : i32
    %c0_i32_1 = arith.constant 0 : i32
    %c0_i32_2 = arith.constant 0 : i32
    return %arg0, %c0_i32, %c0_i32_0, %c0_i32_1 : i32, i32, i32, i32
  }
  func.func @transform_1(%arg0: i32) -> (i32, i32, i32) {
    %c0_i32 = arith.constant 0 : i32
    %c0_i32_0 = arith.constant 0 : i32
    %c0_i32_1 = arith.constant 0 : i32
    %c0_i32_2 = arith.constant 0 : i32
    return %c0_i32, %c0_i32_0, %c0_i32_1 : i32, i32, i32
  }
  func.func @transform_2(%arg0: i32) -> (i32, i32, i32, i32) {
    %c0_i32 = arith.constant 0 : i32
    %c0_i32_0 = arith.constant 0 : i32
    %c0_i32_1 = arith.constant 0 : i32
    %c0_i32_2 = arith.constant 0 : i32
    %c0_i32_3 = arith.constant 0 : i32
    return %c0_i32, %c0_i32_0, %c0_i32_1, %c0_i32_2 : i32, i32, i32, i32
  }
  func.func @transform_3(%arg0: i32) -> (i32, i32, i32, i32) {
    %c0_i32 = arith.constant 0 : i32
    %c0_i32_0 = arith.constant 0 : i32
    %c0_i32_1 = arith.constant 0 : i32
    %c0_i32_2 = arith.constant 0 : i32
    return %arg0, %c0_i32, %c0_i32_0, %c0_i32_1 : i32, i32, i32, i32
  }
}

module attributes {stable_mosaic.version = 11 : i64} {
  func.func @_mm_kernel(%arg0: i32, %arg1: i32, %arg2: i32, %arg3: memref<1x32x32xbf16, #tpu.memory_space<vmem>>, %arg4: memref<1x32x33xbf16, #tpu.memory_space<vmem>>, %arg5: memref<1x32x33xf32, #tpu.memory_space<vmem>>) attributes {dimension_semantics = [#tpu.dimension_semantics<parallel>, #tpu.dimension_semantics<parallel>, #tpu.dimension_semantics<parallel>], iteration_bounds = array<i64: 4, 1, 1>, scalar_prefetch = 0 : i64, scratch_operands = 0 : i64, tpu.core_type = #tpu.core_type<tc>, window_params = [{transform_indices = @transform_0, window_bounds = array<i64: 1, 32, 32>}, {transform_indices = @transform_1, window_bounds = array<i64: 1, 32, 33>}, {transform_indices = @transform_2, window_bounds = array<i64: 1, 32, 33>}]} {
    %c0 = arith.constant 0 : index
    %c0_0 = arith.constant 0 : index
    %c0_1 = arith.constant 0 : index
    %0 = vector.load %arg3[%c0, %c0_0, %c0_1] : memref<1x32x32xbf16, #tpu.memory_space<vmem>>, vector<1x32x32xbf16>
    %1 = vector.shape_cast %0 : vector<1x32x32xbf16> to vector<32x32xbf16>
    %c0_2 = arith.constant 0 : index
    %c0_3 = arith.constant 0 : index
    %c0_4 = arith.constant 0 : index
    %2 = vector.load %arg4[%c0_2, %c0_3, %c0_4] : memref<1x32x33xbf16, #tpu.memory_space<vmem>>, vector<1x32x33xbf16>
    %3 = vector.shape_cast %2 : vector<1x32x33xbf16> to vector<32x33xbf16>
    %cst = arith.constant dense<0.000000e+00> : vector<32x33xf32>
    %4 = tpu.matmul %1, %3, %cst {dimension_numbers = #tpu.dot_dimension_numbers<[1], [0], [0], [1], [0, 0, 1, 1], [], []>} : vector<32x32xbf16>, vector<32x33xbf16>, vector<32x33xf32> -> vector<32x33xf32>
    %c0_5 = arith.constant 0 : index
    %c0_6 = arith.constant 0 : index
    %c0_7 = arith.constant 0 : index
    %5 = vector.load %arg5[%c0_5, %c0_6, %c0_7] : memref<1x32x33xf32, #tpu.memory_space<vmem>>, vector<1x32x33xf32>
    %6 = vector.shape_cast %5 : vector<1x32x33xf32> to vector<32x33xf32>
    %7 = vector.shape_cast %4 : vector<32x33xf32> to vector<1x32x33xf32>
    tpu.vector_store %arg5[%c0_5, %c0_6, %c0_7], %7 {strides = array<i32>} : memref<1x32x33xf32, #tpu.memory_space<vmem>>, vector<1x32x33xf32>,
    return
  }
  func.func @transform_0(%arg0: i32, %arg1: i32, %arg2: i32) -> (i32, i32, i32) {
    %c0_i32 = arith.constant 0 : i32
    %c0_i32_0 = arith.constant 0 : i32
    return %arg0, %arg1, %c0_i32 : i32, i32, i32
  }
  func.func @transform_1(%arg0: i32, %arg1: i32, %arg2: i32) -> (i32, i32, i32) {
    %c0_i32 = arith.constant 0 : i32
    %c0_i32_0 = arith.constant 0 : i32
    return %arg0, %c0_i32, %arg2 : i32, i32, i32
  }
  func.func @transform_2(%arg0: i32, %arg1: i32, %arg2: i32) -> (i32, i32, i32) {
    %c0_i32 = arith.constant 0 : i32
    return %arg0, %arg1, %arg2 : i32, i32, i32
  }
}

module attributes {stable_mosaic.version = 11 : i64} {
  func.func @_mm_kernel(%arg0: i32, %arg1: i32, %arg2: i32, %arg3: memref<1x32x1xbf16, #tpu.memory_space<vmem>>, %arg4: memref<1x1x32xbf16, #tpu.memory_space<vmem>>, %arg5: memref<1x32x32xf32, #tpu.memory_space<vmem>>) attributes {dimension_semantics = [#tpu.dimension_semantics<parallel>, #tpu.dimension_semantics<parallel>, #tpu.dimension_semantics<parallel>], iteration_bounds = array<i64: 4, 1, 1>, scalar_prefetch = 0 : i64, scratch_operands = 0 : i64, tpu.core_type = #tpu.core_type<tc>, window_params = [{transform_indices = @transform_0, window_bounds = array<i64: 1, 32, 1>}, {transform_indices = @transform_1, window_bounds = array<i64: 1, 1, 32>}, {transform_indices = @transform_2, window_bounds = array<i64: 1, 32, 32>}]} {
    %c0 = arith.constant 0 : index
    %c0_0 = arith.constant 0 : index
    %c0_1 = arith.constant 0 : index
    %0 = vector.load %arg3[%c0, %c0_0, %c0_1] : memref<1x32x1xbf16, #tpu.memory_space<vmem>>, vector<1x32x1xbf16>
    %1 = vector.shape_cast %0 : vector<1x32x1xbf16> to vector<32x1xbf16>
    %c0_2 = arith.constant 0 : index
    %c0_3 = arith.constant 0 : index
    %c0_4 = arith.constant 0 : index
    %2 = vector.load %arg4[%c0_2, %c0_3, %c0_4] : memref<1x1x32xbf16, #tpu.memory_space<vmem>>, vector<1x1x32xbf16>
    %3 = vector.shape_cast %2 : vector<1x1x32xbf16> to vector<1x32xbf16>
    %cst = arith.constant dense<0.000000e+00> : vector<32x32xf32>
    %4 = tpu.matmul %1, %3, %cst {dimension_numbers = #tpu.dot_dimension_numbers<[1], [0], [0], [1], [0, 0, 1, 1], [], []>} : vector<32x1xbf16>, vector<1x32xbf16>, vector<32x32xf32> -> vector<32x32xf32>
    %c0_5 = arith.constant 0 : index
    %c0_6 = arith.constant 0 : index
    %c0_7 = arith.constant 0 : index
    %5 = vector.load %arg5[%c0_5, %c0_6, %c0_7] : memref<1x32x32xf32, #tpu.memory_space<vmem>>, vector<1x32x32xf32>
    %6 = vector.shape_cast %5 : vector<1x32x32xf32> to vector<32x32xf32>
    %7 = vector.shape_cast %4 : vector<32x32xf32> to vector<1x32x32xf32>
    tpu.vector_store %arg5[%c0_5, %c0_6, %c0_7], %7 {strides = array<i32>} : memref<1x32x32xf32, #tpu.memory_space<vmem>>, vector<1x32x32xf32>,
    return
  }
  func.func @transform_0(%arg0: i32, %arg1: i32, %arg2: i32) -> (i32, i32, i32) {
    %c0_i32 = arith.constant 0 : i32
    %c0_i32_0 = arith.constant 0 : i32
    return %arg0, %arg1, %c0_i32 : i32, i32, i32
  }
  func.func @transform_1(%arg0: i32, %arg1: i32, %arg2: i32) -> (i32, i32, i32) {
    %c0_i32 = arith.constant 0 : i32
    %c0_i32_0 = arith.constant 0 : i32
    return %arg0, %c0_i32, %arg2 : i32, i32, i32
  }
  func.func @transform_2(%arg0: i32, %arg1: i32, %arg2: i32) -> (i32, i32, i32) {
    %c0_i32 = arith.constant 0 : i32
    return %arg0, %arg1, %arg2 : i32, i32, i32
  }
}

module attributes {stable_mosaic.version = 11 : i64} {
  func.func @_scan_kernel(%arg0: i32, %arg1: i32, %arg2: i32, %arg3: memref<1x1x16x32xf32, #tpu.memory_space<vmem>>, %arg4: memref<1x1x16x32xf32, #tpu.memory_space<vmem>>, %arg5: memref<1x1x16x16xf32, #tpu.memory_space<vmem>>, %arg6: memref<1x1x16x16xf32, #tpu.memory_space<vmem>>, %arg7: memref<1x16x32xf32, #tpu.memory_space<vmem>>, %arg8: memref<1x1x32xf32, #tpu.memory_space<vmem>>, %arg9: memref<1x1x32xf32, #tpu.memory_space<vmem>>, %arg10: memref<1x1x16x32xf32, #tpu.memory_space<vmem>>, %arg11: memref<16x32xf32, #tpu.memory_space<vmem>>, %arg12: memref<16x16x32xf32, #tpu.memory_space<vmem>>, %arg13: memref<16x16x32xf32, #tpu.memory_space<vmem>>) attributes {dimension_semantics = [#tpu.dimension_semantics<parallel>, #tpu.dimension_semantics<parallel>, #tpu.dimension_semantics<arbitrary>], iteration_bounds = array<i64: 2, 4, 1>, scalar_prefetch = 0 : i64, scratch_operands = 3 : i64, tpu.core_type = #tpu.core_type<tc>, window_params = [{transform_indices = @transform_0, window_bounds = array<i64: 1, 1, 16, 32>}, {transform_indices = @transform_1, window_bounds = array<i64: 1, 1, 16, 32>}, {transform_indices = @transform_2, window_bounds = array<i64: 1, 1, 16, 16>}, {transform_indices = @transform_3, window_bounds = array<i64: 1, 1, 16, 16>}, {transform_indices = @transform_4, window_bounds = array<i64: 1, 16, 32>}, {transform_indices = @transform_5, window_bounds = array<i64: 1, 1, 32>}, {transform_indices = @transform_6, window_bounds = array<i64: 1, 1, 32>}, {transform_indices = @transform_7, window_bounds = array<i64: 1, 1, 16, 32>}]} {
    %c0_i32 = arith.constant 0 : i32
    %0 = arith.cmpi eq, %arg2, %c0_i32 : i32
    %1 = arith.extui %0 : i1 to i32
    %c0_i32_0 = arith.constant 0 : i32
    %2 = arith.cmpi ne, %1, %c0_i32_0 : i32
    scf.if %2 {
      %cst_47 = arith.constant 0.000000e+00 : f32
      %58 = vector.broadcast %cst_47 : f32 to vector<16x32xf32>
      %c0_48 = arith.constant 0 : index
      %c0_49 = arith.constant 0 : index
      %59 = vector.load %arg11[%c0_48, %c0_49] : memref<16x32xf32, #tpu.memory_space<vmem>>, vector<16x32xf32>
      tpu.vector_store %arg11[%c0_48, %c0_49], %58 {strides = array<i32>} : memref<16x32xf32, #tpu.memory_space<vmem>>, vector<16x32xf32>,
    } else {
    }
    %c0 = arith.constant 0 : index
    %c0_1 = arith.constant 0 : index
    %c0_2 = arith.constant 0 : index
    %c0_3 = arith.constant 0 : index
    %3 = vector.load %arg3[%c0, %c0_1, %c0_2, %c0_3] : memref<1x1x16x32xf32, #tpu.memory_space<vmem>>, vector<1x1x16x32xf32>
    %4 = vector.shape_cast %3 : vector<1x1x16x32xf32> to vector<16x32xf32>
    %c0_4 = arith.constant 0 : index
    %c0_5 = arith.constant 0 : index
    %c0_6 = arith.constant 0 : index
    %5 = vector.load %arg7[%c0_4, %c0_5, %c0_6] : memref<1x16x32xf32, #tpu.memory_space<vmem>>, vector<1x16x32xf32>
    %6 = vector.shape_cast %5 : vector<1x16x32xf32> to vector<16x32xf32>
    %c0_7 = arith.constant 0 : index
    %c0_8 = arith.constant 0 : index
    %c0_9 = arith.constant 0 : index
    %7 = vector.load %arg8[%c0_7, %c0_8, %c0_9] : memref<1x1x32xf32, #tpu.memory_space<vmem>>, vector<1x1x32xf32>
    %8 = vector.shape_cast %7 : vector<1x1x32xf32> to vector<1x32xf32>
    %c0_10 = arith.constant 0 : index
    %c0_11 = arith.constant 0 : index
    %c0_12 = arith.constant 0 : index
    %9 = vector.load %arg9[%c0_10, %c0_11, %c0_12] : memref<1x1x32xf32, #tpu.memory_space<vmem>>, vector<1x1x32xf32>
    %10 = vector.shape_cast %9 : vector<1x1x32xf32> to vector<1x32xf32>
    %c0_13 = arith.constant 0 : index
    %c0_14 = arith.constant 0 : index
    %c0_15 = arith.constant 0 : index
    %c0_16 = arith.constant 0 : index
    %11 = vector.load %arg5[%c0_13, %c0_14, %c0_15, %c0_16] : memref<1x1x16x16xf32, #tpu.memory_space<vmem>>, vector<1x1x16x16xf32>
    %12 = vector.shape_cast %11 : vector<1x1x16x16xf32> to vector<16x16xf32>
    %c0_17 = arith.constant 0 : index
    %c0_18 = arith.constant 0 : index
    %c0_19 = arith.constant 0 : index
    %c0_20 = arith.constant 0 : index
    %13 = vector.load %arg6[%c0_17, %c0_18, %c0_19, %c0_20] : memref<1x1x16x16xf32, #tpu.memory_space<vmem>>, vector<1x1x16x16xf32>
    %14 = vector.shape_cast %13 : vector<1x1x16x16xf32> to vector<16x16xf32>
    %c0_21 = arith.constant 0 : index
    %c0_22 = arith.constant 0 : index
    %c0_23 = arith.constant 0 : index
    %c0_24 = arith.constant 0 : index
    %15 = vector.load %arg4[%c0_21, %c0_22, %c0_23, %c0_24] : memref<1x1x16x32xf32, #tpu.memory_space<vmem>>, vector<1x1x16x32xf32>
    %16 = vector.shape_cast %15 : vector<1x1x16x32xf32> to vector<16x32xf32>
    %17 = vector.broadcast %10 : vector<1x32xf32> to vector<16x32xf32>
    %18 = arith.addf %16, %17 : vector<16x32xf32>
    %cst = arith.constant 0.000000e+00 : f32
    %19 = vector.broadcast %cst : f32 to vector<16x32xf32>
    %20 = arith.maximumf %18, %19 : vector<16x32xf32>
    %21 = math.absf %18 : vector<16x32xf32>
    %cst_25 = arith.constant 0.000000e+00 : f32
    %22 = vector.broadcast %cst_25 : f32 to vector<16x32xf32>
    %23 = arith.subf %22, %21 : vector<16x32xf32>
    %24 = math.exp %23 : vector<16x32xf32>
    %cst_26 = arith.constant 1.000000e+00 : f32
    %25 = vector.broadcast %cst_26 : f32 to vector<16x32xf32>
    %26 = arith.addf %25, %24 : vector<16x32xf32>
    %27 = math.log %26 : vector<16x32xf32>
    %28 = arith.addf %20, %27 : vector<16x32xf32>
    %29 = vector.shape_cast %28 : vector<16x32xf32> to vector<16x1x32xf32>
    %30 = vector.shape_cast %6 : vector<16x32xf32> to vector<1x16x32xf32>
    %31 = vector.broadcast %29 : vector<16x1x32xf32> to vector<16x16x32xf32>
    %32 = vector.broadcast %30 : vector<1x16x32xf32> to vector<16x16x32xf32>
    %33 = arith.mulf %31, %32 : vector<16x16x32xf32>
    %34 = math.exp %33 : vector<16x16x32xf32>
    %c0_27 = arith.constant 0 : index
    %c0_28 = arith.constant 0 : index
    %c0_29 = arith.constant 0 : index
    %35 = vector.load %arg12[%c0_27, %c0_28, %c0_29] : memref<16x16x32xf32, #tpu.memory_space<vmem>>, vector<16x16x32xf32>
    tpu.vector_store %arg12[%c0_27, %c0_28, %c0_29], %34 {strides = array<i32>} : memref<16x16x32xf32, #tpu.memory_space<vmem>>, vector<16x16x32xf32>,
    %36 = arith.mulf %28, %4 : vector<16x32xf32>
    %37 = vector.shape_cast %36 : vector<16x32xf32> to vector<16x1x32xf32>
    %38 = vector.shape_cast %12 : vector<16x16xf32> to vector<16x16x1xf32>
    %39 = vector.broadcast %37 : vector<16x1x32xf32> to vector<16x16x32xf32>
    %40 = vector.broadcast %38 : vector<16x16x1xf32> to vector<16x16x32xf32>
    %41 = arith.mulf %39, %40 : vector<16x16x32xf32>
    %c0_30 = arith.constant 0 : index
    %c0_31 = arith.constant 0 : index
    %c0_32 = arith.constant 0 : index
    %42 = vector.load %arg13[%c0_30, %c0_31, %c0_32] : memref<16x16x32xf32, #tpu.memory_space<vmem>>, vector<16x16x32xf32>
    tpu.vector_store %arg13[%c0_30, %c0_31, %c0_32], %41 {strides = array<i32>} : memref<16x16x32xf32, #tpu.memory_space<vmem>>, vector<16x16x32xf32>,
    %c0_33 = arith.constant 0 : index
    %c0_34 = arith.constant 0 : index
    %43 = vector.load %arg11[%c0_33, %c0_34] : memref<16x32xf32, #tpu.memory_space<vmem>>, vector<16x32xf32>
    %c0_i32_35 = arith.constant 0 : i32
    %c16_i32 = arith.constant 16 : i32
    %44 = arith.addi %c0_i32_35, %c16_i32 : i32
    %c1_i32 = arith.constant 1 : i32
    %45 = scf.for %arg14 = %c0_i32_35 to %44 step %c1_i32 iter_args(%arg15 = %43) -> (vector<16x32xf32>)  : i32 {
      %58 = arith.index_cast %arg14 : i32 to index
      %c0_47 = arith.constant 0 : index
      %c0_48 = arith.constant 0 : index
      %59 = vector.load %arg12[%58, %c0_47, %c0_48] : memref<16x16x32xf32, #tpu.memory_space<vmem>>, vector<1x16x32xf32>
      %60 = vector.shape_cast %59 : vector<1x16x32xf32> to vector<16x32xf32>
      %61 = arith.mulf %60, %arg15 : vector<16x32xf32>
      %62 = arith.index_cast %arg14 : i32 to index
      %c0_49 = arith.constant 0 : index
      %c0_50 = arith.constant 0 : index
      %63 = vector.load %arg13[%62, %c0_49, %c0_50] : memref<16x16x32xf32, #tpu.memory_space<vmem>>, vector<1x16x32xf32>
      %64 = vector.shape_cast %63 : vector<1x16x32xf32> to vector<16x32xf32>
      %65 = arith.addf %61, %64 : vector<16x32xf32>
      %66 = arith.index_cast %arg14 : i32 to index
      %c0_51 = arith.constant 0 : index
      %c0_52 = arith.constant 0 : index
      %67 = vector.load %arg13[%66, %c0_51, %c0_52] : memref<16x16x32xf32, #tpu.memory_space<vmem>>, vector<1x16x32xf32>
      %68 = vector.shape_cast %67 : vector<1x16x32xf32> to vector<16x32xf32>
      %69 = vector.shape_cast %65 : vector<16x32xf32> to vector<1x16x32xf32>
      tpu.vector_store %arg13[%66, %c0_51, %c0_52], %69 {strides = array<i32>} : memref<16x16x32xf32, #tpu.memory_space<vmem>>, vector<1x16x32xf32>,
      scf.yield %65 : vector<16x32xf32>
    }
    %c16_i32_36 = arith.constant 16 : i32
    %c0_37 = arith.constant 0 : index
    %c0_38 = arith.constant 0 : index
    %46 = vector.load %arg11[%c0_37, %c0_38] : memref<16x32xf32, #tpu.memory_space<vmem>>, vector<16x32xf32>
    tpu.vector_store %arg11[%c0_37, %c0_38], %45 {strides = array<i32>} : memref<16x32xf32, #tpu.memory_space<vmem>>, vector<16x32xf32>,
    %47 = vector.shape_cast %14 : vector<16x16xf32> to vector<16x16x1xf32>
    %c0_39 = arith.constant 0 : index
    %c0_40 = arith.constant 0 : index
    %c0_41 = arith.constant 0 : index
    %48 = vector.load %arg13[%c0_39, %c0_40, %c0_41] : memref<16x16x32xf32, #tpu.memory_space<vmem>>, vector<16x16x32xf32>
    %49 = vector.broadcast %47 : vector<16x16x1xf32> to vector<16x16x32xf32>
    %50 = arith.mulf %49, %48 : vector<16x16x32xf32>
    %cst_42 = arith.constant dense<0.000000e+00> : vector<16x32xf32>
    %51 = vector.multi_reduction <add>, %50, %cst_42 [1] : vector<16x16x32xf32> to vector<16x32xf32>
    %52 = vector.broadcast %8 : vector<1x32xf32> to vector<16x32xf32>
    %53 = arith.mulf %52, %4 : vector<16x32xf32>
    %54 = arith.addf %51, %53 : vector<16x32xf32>
    %c0_43 = arith.constant 0 : index
    %c0_44 = arith.constant 0 : index
    %c0_45 = arith.constant 0 : index
    %c0_46 = arith.constant 0 : index
    %55 = vector.load %arg10[%c0_43, %c0_44, %c0_45, %c0_46] : memref<1x1x16x32xf32, #tpu.memory_space<vmem>>, vector<1x1x16x32xf32>
    %56 = vector.shape_cast %55 : vector<1x1x16x32xf32> to vector<16x32xf32>
    %57 = vector.shape_cast %54 : vector<16x32xf32> to vector<1x1x16x32xf32>
    tpu.vector_store %arg10[%c0_43, %c0_44, %c0_45, %c0_46], %57 {strides = array<i32>} : memref<1x1x16x32xf32, #tpu.memory_space<vmem>>, vector<1x1x16x32xf32>,
    return
  }
  func.func @transform_0(%arg0: i32, %arg1: i32, %arg2: i32) -> (i32, i32, i32, i32) {
    %c0_i32 = arith.constant 0 : i32
    %c0_i32_0 = arith.constant 0 : i32
    return %arg0, %arg1, %arg2, %c0_i32 : i32, i32, i32, i32
  }
  func.func @transform_1(%arg0: i32, %arg1: i32, %arg2: i32) -> (i32, i32, i32, i32) {
    %c0_i32 = arith.constant 0 : i32
    %c0_i32_0 = arith.constant 0 : i32
    return %arg0, %arg1, %arg2, %c0_i32 : i32, i32, i32, i32
  }
  func.func @transform_2(%arg0: i32, %arg1: i32, %arg2: i32) -> (i32, i32, i32, i32) {
    %c0_i32 = arith.constant 0 : i32
    %c0_i32_0 = arith.constant 0 : i32
    return %arg0, %arg1, %arg2, %c0_i32 : i32, i32, i32, i32
  }
  func.func @transform_3(%arg0: i32, %arg1: i32, %arg2: i32) -> (i32, i32, i32, i32) {
    %c0_i32 = arith.constant 0 : i32
    %c0_i32_0 = arith.constant 0 : i32
    return %arg0, %arg1, %arg2, %c0_i32 : i32, i32, i32, i32
  }
  func.func @transform_4(%arg0: i32, %arg1: i32, %arg2: i32) -> (i32, i32, i32) {
    %c0_i32 = arith.constant 0 : i32
    %c0_i32_0 = arith.constant 0 : i32
    %c0_i32_1 = arith.constant 0 : i32
    return %arg1, %c0_i32, %c0_i32_0 : i32, i32, i32
  }
  func.func @transform_5(%arg0: i32, %arg1: i32, %arg2: i32) -> (i32, i32, i32) {
    %c0_i32 = arith.constant 0 : i32
    %c0_i32_0 = arith.constant 0 : i32
    %c0_i32_1 = arith.constant 0 : i32
    return %arg1, %c0_i32, %c0_i32_0 : i32, i32, i32
  }
  func.func @transform_6(%arg0: i32, %arg1: i32, %arg2: i32) -> (i32, i32, i32) {
    %c0_i32 = arith.constant 0 : i32
    %c0_i32_0 = arith.constant 0 : i32
    %c0_i32_1 = arith.constant 0 : i32
    return %arg1, %c0_i32, %c0_i32_0 : i32, i32, i32
  }
  func.func @transform_7(%arg0: i32, %arg1: i32, %arg2: i32) -> (i32, i32, i32, i32) {
    %c0_i32 = arith.constant 0 : i32
    %c0_i32_0 = arith.constant 0 : i32
    return %arg0, %arg1, %arg2, %c0_i32 : i32, i32, i32, i32
  }
}

module attributes {stable_mosaic.version = 11 : i64} {
  func.func @_ln_silu_gate_kernel(%arg0: i32, %arg1: memref<32x32xf32, #tpu.memory_space<vmem>>, %arg2: memref<32x32xf32, #tpu.memory_space<vmem>>, %arg3: memref<1x32xf32, #tpu.memory_space<vmem>>, %arg4: memref<1x32xf32, #tpu.memory_space<vmem>>, %arg5: memref<32x32xf32, #tpu.memory_space<vmem>>) attributes {dimension_semantics = [#tpu.dimension_semantics<parallel>], iteration_bounds = array<i64: 1>, scalar_prefetch = 0 : i64, scratch_operands = 0 : i64, tpu.core_type = #tpu.core_type<tc>, window_params = [{transform_indices = @transform_0, window_bounds = array<i64: 32, 32>}, {transform_indices = @transform_1, window_bounds = array<i64: 32, 32>}, {pipeline_mode = #tpu.pipeline_mode<synchronous>, transform_indices = @transform_2, window_bounds = array<i64: 1, 32>}, {pipeline_mode = #tpu.pipeline_mode<synchronous>, transform_indices = @transform_3, window_bounds = array<i64: 1, 32>}, {transform_indices = @transform_4, window_bounds = array<i64: 32, 32>}]} {
    %c0 = arith.constant 0 : index
    %c0_0 = arith.constant 0 : index
    %0 = vector.load %arg1[%c0, %c0_0] : memref<32x32xf32, #tpu.memory_space<vmem>>, vector<32x32xf32>
    %cst = arith.constant dense<0.000000e+00> : vector<32xf32>
    %1 = vector.multi_reduction <add>, %0, %cst [1] : vector<32x32xf32> to vector<32xf32>
    %2 = vector.shape_cast %1 : vector<32xf32> to vector<32x1xf32>
    %cst_1 = arith.constant 3.200000e+01 : f32
    %3 = vector.broadcast %cst_1 : f32 to vector<32x1xf32>
    %4 = arith.divf %2, %3 : vector<32x1xf32>
    %5 = vector.broadcast %4 : vector<32x1xf32> to vector<32x32xf32>
    %6 = arith.subf %0, %5 : vector<32x32xf32>
    %7 = arith.mulf %6, %6 : vector<32x32xf32>
    %cst_2 = arith.constant dense<0.000000e+00> : vector<32xf32>
    %8 = vector.multi_reduction <add>, %7, %cst_2 [1] : vector<32x32xf32> to vector<32xf32>
    %9 = vector.shape_cast %8 : vector<32xf32> to vector<32x1xf32>
    %cst_3 = arith.constant 3.200000e+01 : f32
    %10 = vector.broadcast %cst_3 : f32 to vector<32x1xf32>
    %11 = arith.divf %9, %10 : vector<32x1xf32>
    %cst_4 = arith.constant 9.99999974E-6 : f32
    %12 = vector.broadcast %cst_4 : f32 to vector<32x1xf32>
    %13 = arith.addf %11, %12 : vector<32x1xf32>
    %14 = math.rsqrt %13 : vector<32x1xf32>
    %15 = vector.broadcast %14 : vector<32x1xf32> to vector<32x32xf32>
    %16 = arith.mulf %6, %15 : vector<32x32xf32>
    %c0_5 = arith.constant 0 : index
    %c0_6 = arith.constant 0 : index
    %17 = vector.load %arg3[%c0_5, %c0_6] : memref<1x32xf32, #tpu.memory_space<vmem>>, vector<1x32xf32>
    %18 = vector.broadcast %17 : vector<1x32xf32> to vector<32x32xf32>
    %19 = arith.mulf %16, %18 : vector<32x32xf32>
    %c0_7 = arith.constant 0 : index
    %c0_8 = arith.constant 0 : index
    %20 = vector.load %arg4[%c0_7, %c0_8] : memref<1x32xf32, #tpu.memory_space<vmem>>, vector<1x32xf32>
    %21 = vector.broadcast %20 : vector<1x32xf32> to vector<32x32xf32>
    %22 = arith.addf %19, %21 : vector<32x32xf32>
    %c0_9 = arith.constant 0 : index
    %c0_10 = arith.constant 0 : index
    %23 = vector.load %arg2[%c0_9, %c0_10] : memref<32x32xf32, #tpu.memory_space<vmem>>, vector<32x32xf32>
    %cst_11 = arith.constant 0.000000e+00 : f32
    %24 = vector.broadcast %cst_11 : f32 to vector<32x32xf32>
    %25 = arith.subf %24, %23 : vector<32x32xf32>
    %26 = math.exp %25 : vector<32x32xf32>
    %cst_12 = arith.constant 1.000000e+00 : f32
    %27 = vector.broadcast %cst_12 : f32 to vector<32x32xf32>
    %28 = arith.addf %27, %26 : vector<32x32xf32>
    %cst_13 = arith.constant 1.000000e+00 : f32
    %29 = vector.broadcast %cst_13 : f32 to vector<32x32xf32>
    %30 = arith.divf %29, %28 : vector<32x32xf32>
    %31 = arith.mulf %23, %30 : vector<32x32xf32>
    %32 = arith.mulf %22, %31 : vector<32x32xf32>
    %c0_14 = arith.constant 0 : index
    %c0_15 = arith.constant 0 : index
    %33 = vector.load %arg5[%c0_14, %c0_15] : memref<32x32xf32, #tpu.memory_space<vmem>>, vector<32x32xf32>
    tpu.vector_store %arg5[%c0_14, %c0_15], %32 {strides = array<i32>} : memref<32x32xf32, #tpu.memory_space<vmem>>, vector<32x32xf32>,
    return
  }
  func.func @transform_0(%arg0: i32) -> (i32, i32) {
    %c0_i32 = arith.constant 0 : i32
    %c0_i32_0 = arith.constant 0 : i32
    return %arg0, %c0_i32 : i32, i32
  }
  func.func @transform_1(%arg0: i32) -> (i32, i32) {
    %c0_i32 = arith.constant 0 : i32
    %c0_i32_0 = arith.constant 0 : i32
    return %arg0, %c0_i32 : i32, i32
  }
  func.func @transform_2(%arg0: i32) -> (i32, i32) {
    %c0_i32 = arith.constant 0 : i32
    %c0_i32_0 = arith.constant 0 : i32
    %c0_i32_1 = arith.constant 0 : i32
    return %c0_i32, %c0_i32_0 : i32, i32
  }
  func.func @transform_3(%arg0: i32) -> (i32, i32) {
    %c0_i32 = arith.constant 0 : i32
    %c0_i32_0 = arith.constant 0 : i32
    %c0_i32_1 = arith.constant 0 : i32
    return %c0_i32, %c0_i32_0 : i32, i32
  }
  func.func @transform_4(%arg0: i32) -> (i32, i32) {
    %c0_i32 = arith.constant 0 : i32
    %c0_i32_0 = arith.constant 0 : i32
    return %arg0, %c0_i32 : i32, i32
  }
}

module attributes {stable_mosaic.version = 11 : i64} {
  func.func @_mm_kernel(%arg0: i32, %arg1: i32, %arg2: i32, %arg3: memref<1x32x32xbf16, #tpu.memory_space<vmem>>, %arg4: memref<1x32x16xbf16, #tpu.memory_space<vmem>>, %arg5: memref<1x32x16xf32, #tpu.memory_space<vmem>>) attributes {dimension_semantics = [#tpu.dimension_semantics<parallel>, #tpu.dimension_semantics<parallel>, #tpu.dimension_semantics<parallel>], iteration_bounds = array<i64: 1, 1, 1>, scalar_prefetch = 0 : i64, scratch_operands = 0 : i64, tpu.core_type = #tpu.core_type<tc>, window_params = [{transform_indices = @transform_0, window_bounds = array<i64: 1, 32, 32>}, {transform_indices = @transform_1, window_bounds = array<i64: 1, 32, 16>}, {transform_indices = @transform_2, window_bounds = array<i64: 1, 32, 16>}]} {
    %c0 = arith.constant 0 : index
    %c0_0 = arith.constant 0 : index
    %c0_1 = arith.constant 0 : index
    %0 = vector.load %arg3[%c0, %c0_0, %c0_1] : memref<1x32x32xbf16, #tpu.memory_space<vmem>>, vector<1x32x32xbf16>
    %1 = vector.shape_cast %0 : vector<1x32x32xbf16> to vector<32x32xbf16>
    %c0_2 = arith.constant 0 : index
    %c0_3 = arith.constant 0 : index
    %c0_4 = arith.constant 0 : index
    %2 = vector.load %arg4[%c0_2, %c0_3, %c0_4] : memref<1x32x16xbf16, #tpu.memory_space<vmem>>, vector<1x32x16xbf16>
    %3 = vector.shape_cast %2 : vector<1x32x16xbf16> to vector<32x16xbf16>
    %cst = arith.constant dense<0.000000e+00> : vector<32x16xf32>
    %4 = tpu.matmul %1, %3, %cst {dimension_numbers = #tpu.dot_dimension_numbers<[1], [0], [0], [1], [0, 0, 1, 1], [], []>} : vector<32x32xbf16>, vector<32x16xbf16>, vector<32x16xf32> -> vector<32x16xf32>
    %c0_5 = arith.constant 0 : index
    %c0_6 = arith.constant 0 : index
    %c0_7 = arith.constant 0 : index
    %5 = vector.load %arg5[%c0_5, %c0_6, %c0_7] : memref<1x32x16xf32, #tpu.memory_space<vmem>>, vector<1x32x16xf32>
    %6 = vector.shape_cast %5 : vector<1x32x16xf32> to vector<32x16xf32>
    %7 = vector.shape_cast %4 : vector<32x16xf32> to vector<1x32x16xf32>
    tpu.vector_store %arg5[%c0_5, %c0_6, %c0_7], %7 {strides = array<i32>} : memref<1x32x16xf32, #tpu.memory_space<vmem>>, vector<1x32x16xf32>,
    return
  }
  func.func @transform_0(%arg0: i32, %arg1: i32, %arg2: i32) -> (i32, i32, i32) {
    %c0_i32 = arith.constant 0 : i32
    %c0_i32_0 = arith.constant 0 : i32
    return %arg0, %arg1, %c0_i32 : i32, i32, i32
  }
  func.func @transform_1(%arg0: i32, %arg1: i32, %arg2: i32) -> (i32, i32, i32) {
    %c0_i32 = arith.constant 0 : i32
    %c0_i32_0 = arith.constant 0 : i32
    return %arg0, %c0_i32, %arg2 : i32, i32, i32
  }
  func.func @transform_2(%arg0: i32, %arg1: i32, %arg2: i32) -> (i32, i32, i32) {
    %c0_i32 = arith.constant 0 : i32
    return %arg0, %arg1, %arg2 : i32, i32, i32
  }
}

module attributes {stable_mosaic.version = 11 : i64} {
  func.func @_mm_kernel(%arg0: i32, %arg1: i32, %arg2: i32, %arg3: memref<1x32x16xbf16, #tpu.memory_space<vmem>>, %arg4: memref<1x16x16xbf16, #tpu.memory_space<vmem>>, %arg5: memref<1x32x16xf32, #tpu.memory_space<vmem>>) attributes {dimension_semantics = [#tpu.dimension_semantics<parallel>, #tpu.dimension_semantics<parallel>, #tpu.dimension_semantics<parallel>], iteration_bounds = array<i64: 1, 1, 1>, scalar_prefetch = 0 : i64, scratch_operands = 0 : i64, tpu.core_type = #tpu.core_type<tc>, window_params = [{transform_indices = @transform_0, window_bounds = array<i64: 1, 32, 16>}, {transform_indices = @transform_1, window_bounds = array<i64: 1, 16, 16>}, {transform_indices = @transform_2, window_bounds = array<i64: 1, 32, 16>}]} {
    %c0 = arith.constant 0 : index
    %c0_0 = arith.constant 0 : index
    %c0_1 = arith.constant 0 : index
    %0 = vector.load %arg3[%c0, %c0_0, %c0_1] : memref<1x32x16xbf16, #tpu.memory_space<vmem>>, vector<1x32x16xbf16>
    %1 = vector.shape_cast %0 : vector<1x32x16xbf16> to vector<32x16xbf16>
    %c0_2 = arith.constant 0 : index
    %c0_3 = arith.constant 0 : index
    %c0_4 = arith.constant 0 : index
    %2 = vector.load %arg4[%c0_2, %c0_3, %c0_4] : memref<1x16x16xbf16, #tpu.memory_space<vmem>>, vector<1x16x16xbf16>
    %3 = vector.shape_cast %2 : vector<1x16x16xbf16> to vector<16x16xbf16>
    %cst = arith.constant dense<0.000000e+00> : vector<32x16xf32>
    %4 = tpu.matmul %1, %3, %cst {dimension_numbers = #tpu.dot_dimension_numbers<[1], [0], [0], [1], [0, 0, 1, 1], [], []>} : vector<32x16xbf16>, vector<16x16xbf16>, vector<32x16xf32> -> vector<32x16xf32>
    %c0_5 = arith.constant 0 : index
    %c0_6 = arith.constant 0 : index
    %c0_7 = arith.constant 0 : index
    %5 = vector.load %arg5[%c0_5, %c0_6, %c0_7] : memref<1x32x16xf32, #tpu.memory_space<vmem>>, vector<1x32x16xf32>
    %6 = vector.shape_cast %5 : vector<1x32x16xf32> to vector<32x16xf32>
    %7 = vector.shape_cast %4 : vector<32x16xf32> to vector<1x32x16xf32>
    tpu.vector_store %arg5[%c0_5, %c0_6, %c0_7], %7 {strides = array<i32>} : memref<1x32x16xf32, #tpu.memory_space<vmem>>, vector<1x32x16xf32>,
    return
  }
  func.func @transform_0(%arg0: i32, %arg1: i32, %arg2: i32) -> (i32, i32, i32) {
    %c0_i32 = arith.constant 0 : i32
    %c0_i32_0 = arith.constant 0 : i32
    return %arg0, %arg1, %c0_i32 : i32, i32, i32
  }
  func.func @transform_1(%arg0: i32, %arg1: i32, %arg2: i32) -> (i32, i32, i32) {
    %c0_i32 = arith.constant 0 : i32
    %c0_i32_0 = arith.constant 0 : i32
    return %arg0, %c0_i32, %arg2 : i32, i32, i32
  }
  func.func @transform_2(%arg0: i32, %arg1: i32, %arg2: i32) -> (i32, i32, i32) {
    %c0_i32 = arith.constant 0 : i32
    return %arg0, %arg1, %arg2 : i32, i32, i32
  }
}

module attributes {stable_mosaic.version = 11 : i64} {
  func.func @_ln_kernel(%arg0: i32, %arg1: memref<128x4xf32, #tpu.memory_space<vmem>>, %arg2: memref<1x4xf32, #tpu.memory_space<vmem>>, %arg3: memref<1x4xf32, #tpu.memory_space<vmem>>, %arg4: memref<128x4xf32, #tpu.memory_space<vmem>>) attributes {dimension_semantics = [#tpu.dimension_semantics<parallel>], iteration_bounds = array<i64: 1>, scalar_prefetch = 0 : i64, scratch_operands = 0 : i64, tpu.core_type = #tpu.core_type<tc>, window_params = [{transform_indices = @transform_0, window_bounds = array<i64: 128, 4>}, {pipeline_mode = #tpu.pipeline_mode<synchronous>, transform_indices = @transform_1, window_bounds = array<i64: 1, 4>}, {pipeline_mode = #tpu.pipeline_mode<synchronous>, transform_indices = @transform_2, window_bounds = array<i64: 1, 4>}, {transform_indices = @transform_3, window_bounds = array<i64: 128, 4>}]} {
    %c0 = arith.constant 0 : index
    %c0_0 = arith.constant 0 : index
    %0 = vector.load %arg1[%c0, %c0_0] : memref<128x4xf32, #tpu.memory_space<vmem>>, vector<128x4xf32>
    %cst = arith.constant dense<0.000000e+00> : vector<128xf32>
    %1 = vector.multi_reduction <add>, %0, %cst [1] : vector<128x4xf32> to vector<128xf32>
    %2 = vector.shape_cast %1 : vector<128xf32> to vector<128x1xf32>
    %cst_1 = arith.constant 4.000000e+00 : f32
    %3 = vector.broadcast %cst_1 : f32 to vector<128x1xf32>
    %4 = arith.divf %2, %3 : vector<128x1xf32>
    %5 = vector.broadcast %4 : vector<128x1xf32> to vector<128x4xf32>
    %6 = arith.subf %0, %5 : vector<128x4xf32>
    %7 = arith.mulf %6, %6 : vector<128x4xf32>
    %cst_2 = arith.constant dense<0.000000e+00> : vector<128xf32>
    %8 = vector.multi_reduction <add>, %7, %cst_2 [1] : vector<128x4xf32> to vector<128xf32>
    %9 = vector.shape_cast %8 : vector<128xf32> to vector<128x1xf32>
    %cst_3 = arith.constant 4.000000e+00 : f32
    %10 = vector.broadcast %cst_3 : f32 to vector<128x1xf32>
    %11 = arith.divf %9, %10 : vector<128x1xf32>
    %cst_4 = arith.constant 9.99999974E-6 : f32
    %12 = vector.broadcast %cst_4 : f32 to vector<128x1xf32>
    %13 = arith.addf %11, %12 : vector<128x1xf32>
    %14 = math.rsqrt %13 : vector<128x1xf32>
    %15 = vector.broadcast %14 : vector<128x1xf32> to vector<128x4xf32>
    %16 = arith.mulf %6, %15 : vector<128x4xf32>
    %c0_5 = arith.constant 0 : index
    %c0_6 = arith.constant 0 : index
    %17 = vector.load %arg2[%c0_5, %c0_6] : memref<1x4xf32, #tpu.memory_space<vmem>>, vector<1x4xf32>
    %18 = vector.broadcast %17 : vector<1x4xf32> to vector<128x4xf32>
    %19 = arith.mulf %16, %18 : vector<128x4xf32>
    %c0_7 = arith.constant 0 : index
    %c0_8 = arith.constant 0 : index
    %20 = vector.load %arg3[%c0_7, %c0_8] : memref<1x4xf32, #tpu.memory_space<vmem>>, vector<1x4xf32>
    %21 = vector.broadcast %20 : vector<1x4xf32> to vector<128x4xf32>
    %22 = arith.addf %19, %21 : vector<128x4xf32>
    %c0_9 = arith.constant 0 : index
    %c0_10 = arith.constant 0 : index
    %23 = vector.load %arg4[%c0_9, %c0_10] : memref<128x4xf32, #tpu.memory_space<vmem>>, vector<128x4xf32>
    tpu.vector_store %arg4[%c0_9, %c0_10], %22 {strides = array<i32>} : memref<128x4xf32, #tpu.memory_space<vmem>>, vector<128x4xf32>,
    return
  }
  func.func @transform_0(%arg0: i32) -> (i32, i32) {
    %c0_i32 = arith.constant 0 : i32
    %c0_i32_0 = arith.constant 0 : i32
    return %arg0, %c0_i32 : i32, i32
  }
  func.func @transform_1(%arg0: i32) -> (i32, i32) {
    %c0_i32 = arith.constant 0 : i32
    %c0_i32_0 = arith.constant 0 : i32
    %c0_i32_1 = arith.constant 0 : i32
    return %c0_i32, %c0_i32_0 : i32, i32
  }
  func.func @transform_2(%arg0: i32) -> (i32, i32) {
    %c0_i32 = arith.constant 0 : i32
    %c0_i32_0 = arith.constant 0 : i32
    %c0_i32_1 = arith.constant 0 : i32
    return %c0_i32, %c0_i32_0 : i32, i32
  }
  func.func @transform_3(%arg0: i32) -> (i32, i32) {
    %c0_i32 = arith.constant 0 : i32
    %c0_i32_0 = arith.constant 0 : i32
    return %arg0, %c0_i32 : i32, i32
  }
}

module attributes {stable_mosaic.version = 11 : i64} {
  func.func @_dwconv_kernel(%arg0: i32, %arg1: memref<1x10x10x1xf32, #tpu.memory_space<vmem>>, %arg2: memref<3x3x1xf32, #tpu.memory_space<vmem>>, %arg3: memref<1x1x1x1xf32, #tpu.memory_space<vmem>>, %arg4: memref<1x8x8x1xf32, #tpu.memory_space<vmem>>) attributes {dimension_semantics = [#tpu.dimension_semantics<parallel>], iteration_bounds = array<i64: 2>, scalar_prefetch = 0 : i64, scratch_operands = 0 : i64, tpu.core_type = #tpu.core_type<tc>, window_params = [{transform_indices = @transform_0, window_bounds = array<i64: 1, 10, 10, 1>}, {pipeline_mode = #tpu.pipeline_mode<synchronous>, transform_indices = @transform_1, window_bounds = array<i64: 3, 3, 1>}, {pipeline_mode = #tpu.pipeline_mode<synchronous>, transform_indices = @transform_2, window_bounds = array<i64: 1, 1, 1, 1>}, {transform_indices = @transform_3, window_bounds = array<i64: 1, 8, 8, 1>}]} {
    %c0 = arith.constant 0 : index
    %c0_0 = arith.constant 0 : index
    %c0_1 = arith.constant 0 : index
    %0 = vector.load %arg2[%c0, %c0_0, %c0_1] : memref<3x3x1xf32, #tpu.memory_space<vmem>>, vector<3x3x1xf32>
    %cst = arith.constant 0.000000e+00 : f32
    %1 = vector.broadcast %cst : f32 to vector<1x8x8x1xf32>
    %c0_2 = arith.constant 0 : index
    %c0_3 = arith.constant 0 : index
    %c0_4 = arith.constant 0 : index
    %c0_5 = arith.constant 0 : index
    %2 = vector.load %arg1[%c0_2, %c0_3, %c0_4, %c0_5] : memref<1x10x10x1xf32, #tpu.memory_space<vmem>>, vector<1x8x8x1xf32>
    %3 = vector.extract_strided_slice %0 {offsets = [0, 0, 0], sizes = [1, 1, 1], strides = [1, 1, 1]} : vector<3x3x1xf32> to vector<1x1x1xf32>
    %4 = vector.shape_cast %3 : vector<1x1x1xf32> to vector<1xf32>
    %5 = vector.shape_cast %4 : vector<1xf32> to vector<1x1x1x1xf32>
    %6 = vector.broadcast %5 : vector<1x1x1x1xf32> to vector<1x8x8x1xf32>
    %7 = arith.mulf %2, %6 : vector<1x8x8x1xf32>
    %8 = arith.addf %1, %7 : vector<1x8x8x1xf32>
    %c0_6 = arith.constant 0 : index
    %c0_7 = arith.constant 0 : index
    %c1 = arith.constant 1 : index
    %c0_8 = arith.constant 0 : index
    %9 = vector.load %arg1[%c0_6, %c0_7, %c1, %c0_8] : memref<1x10x10x1xf32, #tpu.memory_space<vmem>>, vector<1x8x8x1xf32>
    %10 = vector.extract_strided_slice %0 {offsets = [0, 1, 0], sizes = [1, 1, 1], strides = [1, 1, 1]} : vector<3x3x1xf32> to vector<1x1x1xf32>
    %11 = vector.shape_cast %10 : vector<1x1x1xf32> to vector<1xf32>
    %12 = vector.shape_cast %11 : vector<1xf32> to vector<1x1x1x1xf32>
    %13 = vector.broadcast %12 : vector<1x1x1x1xf32> to vector<1x8x8x1xf32>
    %14 = arith.mulf %9, %13 : vector<1x8x8x1xf32>
    %15 = arith.addf %8, %14 : vector<1x8x8x1xf32>
    %c0_9 = arith.constant 0 : index
    %c0_10 = arith.constant 0 : index
    %c2 = arith.constant 2 : index
    %c0_11 = arith.constant 0 : index
    %16 = vector.load %arg1[%c0_9, %c0_10, %c2, %c0_11] : memref<1x10x10x1xf32, #tpu.memory_space<vmem>>, vector<1x8x8x1xf32>
    %17 = vector.extract_strided_slice %0 {offsets = [0, 2, 0], sizes = [1, 1, 1], strides = [1, 1, 1]} : vector<3x3x1xf32> to vector<1x1x1xf32>
    %18 = vector.shape_cast %17 : vector<1x1x1xf32> to vector<1xf32>
    %19 = vector.shape_cast %18 : vector<1xf32> to vector<1x1x1x1xf32>
    %20 = vector.broadcast %19 : vector<1x1x1x1xf32> to vector<1x8x8x1xf32>
    %21 = arith.mulf %16, %20 : vector<1x8x8x1xf32>
    %22 = arith.addf %15, %21 : vector<1x8x8x1xf32>
    %c0_12 = arith.constant 0 : index
    %c1_13 = arith.constant 1 : index
    %c0_14 = arith.constant 0 : index
    %c0_15 = arith.constant 0 : index
    %23 = vector.load %arg1[%c0_12, %c1_13, %c0_14, %c0_15] : memref<1x10x10x1xf32, #tpu.memory_space<vmem>>, vector<1x8x8x1xf32>
    %24 = vector.extract_strided_slice %0 {offsets = [1, 0, 0], sizes = [1, 1, 1], strides = [1, 1, 1]} : vector<3x3x1xf32> to vector<1x1x1xf32>
    %25 = vector.shape_cast %24 : vector<1x1x1xf32> to vector<1xf32>
    %26 = vector.shape_cast %25 : vector<1xf32> to vector<1x1x1x1xf32>
    %27 = vector.broadcast %26 : vector<1x1x1x1xf32> to vector<1x8x8x1xf32>
    %28 = arith.mulf %23, %27 : vector<1x8x8x1xf32>
    %29 = arith.addf %22, %28 : vector<1x8x8x1xf32>
    %c0_16 = arith.constant 0 : index
    %c1_17 = arith.constant 1 : index
    %c1_18 = arith.constant 1 : index
    %c0_19 = arith.constant 0 : index
    %30 = vector.load %arg1[%c0_16, %c1_17, %c1_18, %c0_19] : memref<1x10x10x1xf32, #tpu.memory_space<vmem>>, vector<1x8x8x1xf32>
    %31 = vector.extract_strided_slice %0 {offsets = [1, 1, 0], sizes = [1, 1, 1], strides = [1, 1, 1]} : vector<3x3x1xf32> to vector<1x1x1xf32>
    %32 = vector.shape_cast %31 : vector<1x1x1xf32> to vector<1xf32>
    %33 = vector.shape_cast %32 : vector<1xf32> to vector<1x1x1x1xf32>
    %34 = vector.broadcast %33 : vector<1x1x1x1xf32> to vector<1x8x8x1xf32>
    %35 = arith.mulf %30, %34 : vector<1x8x8x1xf32>
    %36 = arith.addf %29, %35 : vector<1x8x8x1xf32>
    %c0_20 = arith.constant 0 : index
    %c1_21 = arith.constant 1 : index
    %c2_22 = arith.constant 2 : index
    %c0_23 = arith.constant 0 : index
    %37 = vector.load %arg1[%c0_20, %c1_21, %c2_22, %c0_23] : memref<1x10x10x1xf32, #tpu.memory_space<vmem>>, vector<1x8x8x1xf32>
    %38 = vector.extract_strided_slice %0 {offsets = [1, 2, 0], sizes = [1, 1, 1], strides = [1, 1, 1]} : vector<3x3x1xf32> to vector<1x1x1xf32>
    %39 = vector.shape_cast %38 : vector<1x1x1xf32> to vector<1xf32>
    %40 = vector.shape_cast %39 : vector<1xf32> to vector<1x1x1x1xf32>
    %41 = vector.broadcast %40 : vector<1x1x1x1xf32> to vector<1x8x8x1xf32>
    %42 = arith.mulf %37, %41 : vector<1x8x8x1xf32>
    %43 = arith.addf %36, %42 : vector<1x8x8x1xf32>
    %c0_24 = arith.constant 0 : index
    %c2_25 = arith.constant 2 : index
    %c0_26 = arith.constant 0 : index
    %c0_27 = arith.constant 0 : index
    %44 = vector.load %arg1[%c0_24, %c2_25, %c0_26, %c0_27] : memref<1x10x10x1xf32, #tpu.memory_space<vmem>>, vector<1x8x8x1xf32>
    %45 = vector.extract_strided_slice %0 {offsets = [2, 0, 0], sizes = [1, 1, 1], strides = [1, 1, 1]} : vector<3x3x1xf32> to vector<1x1x1xf32>
    %46 = vector.shape_cast %45 : vector<1x1x1xf32> to vector<1xf32>
    %47 = vector.shape_cast %46 : vector<1xf32> to vector<1x1x1x1xf32>
    %48 = vector.broadcast %47 : vector<1x1x1x1xf32> to vector<1x8x8x1xf32>
    %49 = arith.mulf %44, %48 : vector<1x8x8x1xf32>
    %50 = arith.addf %43, %49 : vector<1x8x8x1xf32>
    %c0_28 = arith.constant 0 : index
    %c2_29 = arith.constant 2 : index
    %c1_30 = arith.constant 1 : index
    %c0_31 = arith.constant 0 : index
    %51 = vector.load %arg1[%c0_28, %c2_29, %c1_30, %c0_31] : memref<1x10x10x1xf32, #tpu.memory_space<vmem>>, vector<1x8x8x1xf32>
    %52 = vector.extract_strided_slice %0 {offsets = [2, 1, 0], sizes = [1, 1, 1], strides = [1, 1, 1]} : vector<3x3x1xf32> to vector<1x1x1xf32>
    %53 = vector.shape_cast %52 : vector<1x1x1xf32> to vector<1xf32>
    %54 = vector.shape_cast %53 : vector<1xf32> to vector<1x1x1x1xf32>
    %55 = vector.broadcast %54 : vector<1x1x1x1xf32> to vector<1x8x8x1xf32>
    %56 = arith.mulf %51, %55 : vector<1x8x8x1xf32>
    %57 = arith.addf %50, %56 : vector<1x8x8x1xf32>
    %c0_32 = arith.constant 0 : index
    %c2_33 = arith.constant 2 : index
    %c2_34 = arith.constant 2 : index
    %c0_35 = arith.constant 0 : index
    %58 = vector.load %arg1[%c0_32, %c2_33, %c2_34, %c0_35] : memref<1x10x10x1xf32, #tpu.memory_space<vmem>>, vector<1x8x8x1xf32>
    %59 = vector.extract_strided_slice %0 {offsets = [2, 2, 0], sizes = [1, 1, 1], strides = [1, 1, 1]} : vector<3x3x1xf32> to vector<1x1x1xf32>
    %60 = vector.shape_cast %59 : vector<1x1x1xf32> to vector<1xf32>
    %61 = vector.shape_cast %60 : vector<1xf32> to vector<1x1x1x1xf32>
    %62 = vector.broadcast %61 : vector<1x1x1x1xf32> to vector<1x8x8x1xf32>
    %63 = arith.mulf %58, %62 : vector<1x8x8x1xf32>
    %64 = arith.addf %57, %63 : vector<1x8x8x1xf32>
    %c0_36 = arith.constant 0 : index
    %c0_37 = arith.constant 0 : index
    %c0_38 = arith.constant 0 : index
    %c0_39 = arith.constant 0 : index
    %65 = vector.load %arg3[%c0_36, %c0_37, %c0_38, %c0_39] : memref<1x1x1x1xf32, #tpu.memory_space<vmem>>, vector<1x1x1x1xf32>
    %66 = vector.broadcast %65 : vector<1x1x1x1xf32> to vector<1x8x8x1xf32>
    %67 = arith.addf %64, %66 : vector<1x8x8x1xf32>
    %c0_40 = arith.constant 0 : index
    %c0_41 = arith.constant 0 : index
    %c0_42 = arith.constant 0 : index
    %c0_43 = arith.constant 0 : index
    %68 = vector.load %arg4[%c0_40, %c0_41, %c0_42, %c0_43] : memref<1x8x8x1xf32, #tpu.memory_space<vmem>>, vector<1x8x8x1xf32>
    tpu.vector_store %arg4[%c0_40, %c0_41, %c0_42, %c0_43], %67 {strides = array<i32>} : memref<1x8x8x1xf32, #tpu.memory_space<vmem>>, vector<1x8x8x1xf32>,
    return
  }
  func.func @transform_0(%arg0: i32) -> (i32, i32, i32, i32) {
    %c0_i32 = arith.constant 0 : i32
    %c0_i32_0 = arith.constant 0 : i32
    %c0_i32_1 = arith.constant 0 : i32
    %c0_i32_2 = arith.constant 0 : i32
    return %arg0, %c0_i32, %c0_i32_0, %c0_i32_1 : i32, i32, i32, i32
  }
  func.func @transform_1(%arg0: i32) -> (i32, i32, i32) {
    %c0_i32 = arith.constant 0 : i32
    %c0_i32_0 = arith.constant 0 : i32
    %c0_i32_1 = arith.constant 0 : i32
    %c0_i32_2 = arith.constant 0 : i32
    return %c0_i32, %c0_i32_0, %c0_i32_1 : i32, i32, i32
  }
  func.func @transform_2(%arg0: i32) -> (i32, i32, i32, i32) {
    %c0_i32 = arith.constant 0 : i32
    %c0_i32_0 = arith.constant 0 : i32
    %c0_i32_1 = arith.constant 0 : i32
    %c0_i32_2 = arith.constant 0 : i32
    %c0_i32_3 = arith.constant 0 : i32
    return %c0_i32, %c0_i32_0, %c0_i32_1, %c0_i32_2 : i32, i32, i32, i32
  }
  func.func @transform_3(%arg0: i32) -> (i32, i32, i32, i32) {
    %c0_i32 = arith.constant 0 : i32
    %c0_i32_0 = arith.constant 0 : i32
    %c0_i32_1 = arith.constant 0 : i32
    %c0_i32_2 = arith.constant 0 : i32
    return %arg0, %c0_i32, %c0_i32_0, %c0_i32_1 : i32, i32, i32, i32
  }
}

module attributes {stable_mosaic.version = 11 : i64} {
  func.func @_dwconv_kernel(%arg0: i32, %arg1: memref<1x6x6x1xf32, #tpu.memory_space<vmem>>, %arg2: memref<3x3x1xf32, #tpu.memory_space<vmem>>, %arg3: memref<1x1x1x1xf32, #tpu.memory_space<vmem>>, %arg4: memref<1x4x4x1xf32, #tpu.memory_space<vmem>>) attributes {dimension_semantics = [#tpu.dimension_semantics<parallel>], iteration_bounds = array<i64: 2>, scalar_prefetch = 0 : i64, scratch_operands = 0 : i64, tpu.core_type = #tpu.core_type<tc>, window_params = [{transform_indices = @transform_0, window_bounds = array<i64: 1, 6, 6, 1>}, {pipeline_mode = #tpu.pipeline_mode<synchronous>, transform_indices = @transform_1, window_bounds = array<i64: 3, 3, 1>}, {pipeline_mode = #tpu.pipeline_mode<synchronous>, transform_indices = @transform_2, window_bounds = array<i64: 1, 1, 1, 1>}, {transform_indices = @transform_3, window_bounds = array<i64: 1, 4, 4, 1>}]} {
    %c0 = arith.constant 0 : index
    %c0_0 = arith.constant 0 : index
    %c0_1 = arith.constant 0 : index
    %0 = vector.load %arg2[%c0, %c0_0, %c0_1] : memref<3x3x1xf32, #tpu.memory_space<vmem>>, vector<3x3x1xf32>
    %cst = arith.constant 0.000000e+00 : f32
    %1 = vector.broadcast %cst : f32 to vector<1x4x4x1xf32>
    %c0_2 = arith.constant 0 : index
    %c0_3 = arith.constant 0 : index
    %c0_4 = arith.constant 0 : index
    %c0_5 = arith.constant 0 : index
    %2 = vector.load %arg1[%c0_2, %c0_3, %c0_4, %c0_5] : memref<1x6x6x1xf32, #tpu.memory_space<vmem>>, vector<1x4x4x1xf32>
    %3 = vector.extract_strided_slice %0 {offsets = [0, 0, 0], sizes = [1, 1, 1], strides = [1, 1, 1]} : vector<3x3x1xf32> to vector<1x1x1xf32>
    %4 = vector.shape_cast %3 : vector<1x1x1xf32> to vector<1xf32>
    %5 = vector.shape_cast %4 : vector<1xf32> to vector<1x1x1x1xf32>
    %6 = vector.broadcast %5 : vector<1x1x1x1xf32> to vector<1x4x4x1xf32>
    %7 = arith.mulf %2, %6 : vector<1x4x4x1xf32>
    %8 = arith.addf %1, %7 : vector<1x4x4x1xf32>
    %c0_6 = arith.constant 0 : index
    %c0_7 = arith.constant 0 : index
    %c1 = arith.constant 1 : index
    %c0_8 = arith.constant 0 : index
    %9 = vector.load %arg1[%c0_6, %c0_7, %c1, %c0_8] : memref<1x6x6x1xf32, #tpu.memory_space<vmem>>, vector<1x4x4x1xf32>
    %10 = vector.extract_strided_slice %0 {offsets = [0, 1, 0], sizes = [1, 1, 1], strides = [1, 1, 1]} : vector<3x3x1xf32> to vector<1x1x1xf32>
    %11 = vector.shape_cast %10 : vector<1x1x1xf32> to vector<1xf32>
    %12 = vector.shape_cast %11 : vector<1xf32> to vector<1x1x1x1xf32>
    %13 = vector.broadcast %12 : vector<1x1x1x1xf32> to vector<1x4x4x1xf32>
    %14 = arith.mulf %9, %13 : vector<1x4x4x1xf32>
    %15 = arith.addf %8, %14 : vector<1x4x4x1xf32>
    %c0_9 = arith.constant 0 : index
    %c0_10 = arith.constant 0 : index
    %c2 = arith.constant 2 : index
    %c0_11 = arith.constant 0 : index
    %16 = vector.load %arg1[%c0_9, %c0_10, %c2, %c0_11] : memref<1x6x6x1xf32, #tpu.memory_space<vmem>>, vector<1x4x4x1xf32>
    %17 = vector.extract_strided_slice %0 {offsets = [0, 2, 0], sizes = [1, 1, 1], strides = [1, 1, 1]} : vector<3x3x1xf32> to vector<1x1x1xf32>
    %18 = vector.shape_cast %17 : vector<1x1x1xf32> to vector<1xf32>
    %19 = vector.shape_cast %18 : vector<1xf32> to vector<1x1x1x1xf32>
    %20 = vector.broadcast %19 : vector<1x1x1x1xf32> to vector<1x4x4x1xf32>
    %21 = arith.mulf %16, %20 : vector<1x4x4x1xf32>
    %22 = arith.addf %15, %21 : vector<1x4x4x1xf32>
    %c0_12 = arith.constant 0 : index
    %c1_13 = arith.constant 1 : index
    %c0_14 = arith.constant 0 : index
    %c0_15 = arith.constant 0 : index
    %23 = vector.load %arg1[%c0_12, %c1_13, %c0_14, %c0_15] : memref<1x6x6x1xf32, #tpu.memory_space<vmem>>, vector<1x4x4x1xf32>
    %24 = vector.extract_strided_slice %0 {offsets = [1, 0, 0], sizes = [1, 1, 1], strides = [1, 1, 1]} : vector<3x3x1xf32> to vector<1x1x1xf32>
    %25 = vector.shape_cast %24 : vector<1x1x1xf32> to vector<1xf32>
    %26 = vector.shape_cast %25 : vector<1xf32> to vector<1x1x1x1xf32>
    %27 = vector.broadcast %26 : vector<1x1x1x1xf32> to vector<1x4x4x1xf32>
    %28 = arith.mulf %23, %27 : vector<1x4x4x1xf32>
    %29 = arith.addf %22, %28 : vector<1x4x4x1xf32>
    %c0_16 = arith.constant 0 : index
    %c1_17 = arith.constant 1 : index
    %c1_18 = arith.constant 1 : index
    %c0_19 = arith.constant 0 : index
    %30 = vector.load %arg1[%c0_16, %c1_17, %c1_18, %c0_19] : memref<1x6x6x1xf32, #tpu.memory_space<vmem>>, vector<1x4x4x1xf32>
    %31 = vector.extract_strided_slice %0 {offsets = [1, 1, 0], sizes = [1, 1, 1], strides = [1, 1, 1]} : vector<3x3x1xf32> to vector<1x1x1xf32>
    %32 = vector.shape_cast %31 : vector<1x1x1xf32> to vector<1xf32>
    %33 = vector.shape_cast %32 : vector<1xf32> to vector<1x1x1x1xf32>
    %34 = vector.broadcast %33 : vector<1x1x1x1xf32> to vector<1x4x4x1xf32>
    %35 = arith.mulf %30, %34 : vector<1x4x4x1xf32>
    %36 = arith.addf %29, %35 : vector<1x4x4x1xf32>
    %c0_20 = arith.constant 0 : index
    %c1_21 = arith.constant 1 : index
    %c2_22 = arith.constant 2 : index
    %c0_23 = arith.constant 0 : index
    %37 = vector.load %arg1[%c0_20, %c1_21, %c2_22, %c0_23] : memref<1x6x6x1xf32, #tpu.memory_space<vmem>>, vector<1x4x4x1xf32>
    %38 = vector.extract_strided_slice %0 {offsets = [1, 2, 0], sizes = [1, 1, 1], strides = [1, 1, 1]} : vector<3x3x1xf32> to vector<1x1x1xf32>
    %39 = vector.shape_cast %38 : vector<1x1x1xf32> to vector<1xf32>
    %40 = vector.shape_cast %39 : vector<1xf32> to vector<1x1x1x1xf32>
    %41 = vector.broadcast %40 : vector<1x1x1x1xf32> to vector<1x4x4x1xf32>
    %42 = arith.mulf %37, %41 : vector<1x4x4x1xf32>
    %43 = arith.addf %36, %42 : vector<1x4x4x1xf32>
    %c0_24 = arith.constant 0 : index
    %c2_25 = arith.constant 2 : index
    %c0_26 = arith.constant 0 : index
    %c0_27 = arith.constant 0 : index
    %44 = vector.load %arg1[%c0_24, %c2_25, %c0_26, %c0_27] : memref<1x6x6x1xf32, #tpu.memory_space<vmem>>, vector<1x4x4x1xf32>
    %45 = vector.extract_strided_slice %0 {offsets = [2, 0, 0], sizes = [1, 1, 1], strides = [1, 1, 1]} : vector<3x3x1xf32> to vector<1x1x1xf32>
    %46 = vector.shape_cast %45 : vector<1x1x1xf32> to vector<1xf32>
    %47 = vector.shape_cast %46 : vector<1xf32> to vector<1x1x1x1xf32>
    %48 = vector.broadcast %47 : vector<1x1x1x1xf32> to vector<1x4x4x1xf32>
    %49 = arith.mulf %44, %48 : vector<1x4x4x1xf32>
    %50 = arith.addf %43, %49 : vector<1x4x4x1xf32>
    %c0_28 = arith.constant 0 : index
    %c2_29 = arith.constant 2 : index
    %c1_30 = arith.constant 1 : index
    %c0_31 = arith.constant 0 : index
    %51 = vector.load %arg1[%c0_28, %c2_29, %c1_30, %c0_31] : memref<1x6x6x1xf32, #tpu.memory_space<vmem>>, vector<1x4x4x1xf32>
    %52 = vector.extract_strided_slice %0 {offsets = [2, 1, 0], sizes = [1, 1, 1], strides = [1, 1, 1]} : vector<3x3x1xf32> to vector<1x1x1xf32>
    %53 = vector.shape_cast %52 : vector<1x1x1xf32> to vector<1xf32>
    %54 = vector.shape_cast %53 : vector<1xf32> to vector<1x1x1x1xf32>
    %55 = vector.broadcast %54 : vector<1x1x1x1xf32> to vector<1x4x4x1xf32>
    %56 = arith.mulf %51, %55 : vector<1x4x4x1xf32>
    %57 = arith.addf %50, %56 : vector<1x4x4x1xf32>
    %c0_32 = arith.constant 0 : index
    %c2_33 = arith.constant 2 : index
    %c2_34 = arith.constant 2 : index
    %c0_35 = arith.constant 0 : index
    %58 = vector.load %arg1[%c0_32, %c2_33, %c2_34, %c0_35] : memref<1x6x6x1xf32, #tpu.memory_space<vmem>>, vector<1x4x4x1xf32>
    %59 = vector.extract_strided_slice %0 {offsets = [2, 2, 0], sizes = [1, 1, 1], strides = [1, 1, 1]} : vector<3x3x1xf32> to vector<1x1x1xf32>
    %60 = vector.shape_cast %59 : vector<1x1x1xf32> to vector<1xf32>
    %61 = vector.shape_cast %60 : vector<1xf32> to vector<1x1x1x1xf32>
    %62 = vector.broadcast %61 : vector<1x1x1x1xf32> to vector<1x4x4x1xf32>
    %63 = arith.mulf %58, %62 : vector<1x4x4x1xf32>
    %64 = arith.addf %57, %63 : vector<1x4x4x1xf32>
    %c0_36 = arith.constant 0 : index
    %c0_37 = arith.constant 0 : index
    %c0_38 = arith.constant 0 : index
    %c0_39 = arith.constant 0 : index
    %65 = vector.load %arg3[%c0_36, %c0_37, %c0_38, %c0_39] : memref<1x1x1x1xf32, #tpu.memory_space<vmem>>, vector<1x1x1x1xf32>
    %66 = vector.broadcast %65 : vector<1x1x1x1xf32> to vector<1x4x4x1xf32>
    %67 = arith.addf %64, %66 : vector<1x4x4x1xf32>
    %c0_40 = arith.constant 0 : index
    %c0_41 = arith.constant 0 : index
    %c0_42 = arith.constant 0 : index
    %c0_43 = arith.constant 0 : index
    %68 = vector.load %arg4[%c0_40, %c0_41, %c0_42, %c0_43] : memref<1x4x4x1xf32, #tpu.memory_space<vmem>>, vector<1x4x4x1xf32>
    tpu.vector_store %arg4[%c0_40, %c0_41, %c0_42, %c0_43], %67 {strides = array<i32>} : memref<1x4x4x1xf32, #tpu.memory_space<vmem>>, vector<1x4x4x1xf32>,
    return
  }
  func.func @transform_0(%arg0: i32) -> (i32, i32, i32, i32) {
    %c0_i32 = arith.constant 0 : i32
    %c0_i32_0 = arith.constant 0 : i32
    %c0_i32_1 = arith.constant 0 : i32
    %c0_i32_2 = arith.constant 0 : i32
    return %arg0, %c0_i32, %c0_i32_0, %c0_i32_1 : i32, i32, i32, i32
  }
  func.func @transform_1(%arg0: i32) -> (i32, i32, i32) {
    %c0_i32 = arith.constant 0 : i32
    %c0_i32_0 = arith.constant 0 : i32
    %c0_i32_1 = arith.constant 0 : i32
    %c0_i32_2 = arith.constant 0 : i32
    return %c0_i32, %c0_i32_0, %c0_i32_1 : i32, i32, i32
  }
  func.func @transform_2(%arg0: i32) -> (i32, i32, i32, i32) {
    %c0_i32 = arith.constant 0 : i32
    %c0_i32_0 = arith.constant 0 : i32
    %c0_i32_1 = arith.constant 0 : i32
    %c0_i32_2 = arith.constant 0 : i32
    %c0_i32_3 = arith.constant 0 : i32
    return %c0_i32, %c0_i32_0, %c0_i32_1, %c0_i32_2 : i32, i32, i32, i32
  }
  func.func @transform_3(%arg0: i32) -> (i32, i32, i32, i32) {
    %c0_i32 = arith.constant 0 : i32
    %c0_i32_0 = arith.constant 0 : i32
    %c0_i32_1 = arith.constant 0 : i32
    %c0_i32_2 = arith.constant 0 : i32
    return %arg0, %c0_i32, %c0_i32_0, %c0_i32_1 : i32, i32, i32, i32
  }
}

module attributes {stable_mosaic.version = 11 : i64} {
  func.func @_dwconv_kernel(%arg0: i32, %arg1: memref<1x4x4x1xf32, #tpu.memory_space<vmem>>, %arg2: memref<3x3x1xf32, #tpu.memory_space<vmem>>, %arg3: memref<1x1x1x1xf32, #tpu.memory_space<vmem>>, %arg4: memref<1x2x2x1xf32, #tpu.memory_space<vmem>>) attributes {dimension_semantics = [#tpu.dimension_semantics<parallel>], iteration_bounds = array<i64: 2>, scalar_prefetch = 0 : i64, scratch_operands = 0 : i64, tpu.core_type = #tpu.core_type<tc>, window_params = [{transform_indices = @transform_0, window_bounds = array<i64: 1, 4, 4, 1>}, {pipeline_mode = #tpu.pipeline_mode<synchronous>, transform_indices = @transform_1, window_bounds = array<i64: 3, 3, 1>}, {pipeline_mode = #tpu.pipeline_mode<synchronous>, transform_indices = @transform_2, window_bounds = array<i64: 1, 1, 1, 1>}, {transform_indices = @transform_3, window_bounds = array<i64: 1, 2, 2, 1>}]} {
    %c0 = arith.constant 0 : index
    %c0_0 = arith.constant 0 : index
    %c0_1 = arith.constant 0 : index
    %0 = vector.load %arg2[%c0, %c0_0, %c0_1] : memref<3x3x1xf32, #tpu.memory_space<vmem>>, vector<3x3x1xf32>
    %cst = arith.constant 0.000000e+00 : f32
    %1 = vector.broadcast %cst : f32 to vector<1x2x2x1xf32>
    %c0_2 = arith.constant 0 : index
    %c0_3 = arith.constant 0 : index
    %c0_4 = arith.constant 0 : index
    %c0_5 = arith.constant 0 : index
    %2 = vector.load %arg1[%c0_2, %c0_3, %c0_4, %c0_5] : memref<1x4x4x1xf32, #tpu.memory_space<vmem>>, vector<1x2x2x1xf32>
    %3 = vector.extract_strided_slice %0 {offsets = [0, 0, 0], sizes = [1, 1, 1], strides = [1, 1, 1]} : vector<3x3x1xf32> to vector<1x1x1xf32>
    %4 = vector.shape_cast %3 : vector<1x1x1xf32> to vector<1xf32>
    %5 = vector.shape_cast %4 : vector<1xf32> to vector<1x1x1x1xf32>
    %6 = vector.broadcast %5 : vector<1x1x1x1xf32> to vector<1x2x2x1xf32>
    %7 = arith.mulf %2, %6 : vector<1x2x2x1xf32>
    %8 = arith.addf %1, %7 : vector<1x2x2x1xf32>
    %c0_6 = arith.constant 0 : index
    %c0_7 = arith.constant 0 : index
    %c1 = arith.constant 1 : index
    %c0_8 = arith.constant 0 : index
    %9 = vector.load %arg1[%c0_6, %c0_7, %c1, %c0_8] : memref<1x4x4x1xf32, #tpu.memory_space<vmem>>, vector<1x2x2x1xf32>
    %10 = vector.extract_strided_slice %0 {offsets = [0, 1, 0], sizes = [1, 1, 1], strides = [1, 1, 1]} : vector<3x3x1xf32> to vector<1x1x1xf32>
    %11 = vector.shape_cast %10 : vector<1x1x1xf32> to vector<1xf32>
    %12 = vector.shape_cast %11 : vector<1xf32> to vector<1x1x1x1xf32>
    %13 = vector.broadcast %12 : vector<1x1x1x1xf32> to vector<1x2x2x1xf32>
    %14 = arith.mulf %9, %13 : vector<1x2x2x1xf32>
    %15 = arith.addf %8, %14 : vector<1x2x2x1xf32>
    %c0_9 = arith.constant 0 : index
    %c0_10 = arith.constant 0 : index
    %c2 = arith.constant 2 : index
    %c0_11 = arith.constant 0 : index
    %16 = vector.load %arg1[%c0_9, %c0_10, %c2, %c0_11] : memref<1x4x4x1xf32, #tpu.memory_space<vmem>>, vector<1x2x2x1xf32>
    %17 = vector.extract_strided_slice %0 {offsets = [0, 2, 0], sizes = [1, 1, 1], strides = [1, 1, 1]} : vector<3x3x1xf32> to vector<1x1x1xf32>
    %18 = vector.shape_cast %17 : vector<1x1x1xf32> to vector<1xf32>
    %19 = vector.shape_cast %18 : vector<1xf32> to vector<1x1x1x1xf32>
    %20 = vector.broadcast %19 : vector<1x1x1x1xf32> to vector<1x2x2x1xf32>
    %21 = arith.mulf %16, %20 : vector<1x2x2x1xf32>
    %22 = arith.addf %15, %21 : vector<1x2x2x1xf32>
    %c0_12 = arith.constant 0 : index
    %c1_13 = arith.constant 1 : index
    %c0_14 = arith.constant 0 : index
    %c0_15 = arith.constant 0 : index
    %23 = vector.load %arg1[%c0_12, %c1_13, %c0_14, %c0_15] : memref<1x4x4x1xf32, #tpu.memory_space<vmem>>, vector<1x2x2x1xf32>
    %24 = vector.extract_strided_slice %0 {offsets = [1, 0, 0], sizes = [1, 1, 1], strides = [1, 1, 1]} : vector<3x3x1xf32> to vector<1x1x1xf32>
    %25 = vector.shape_cast %24 : vector<1x1x1xf32> to vector<1xf32>
    %26 = vector.shape_cast %25 : vector<1xf32> to vector<1x1x1x1xf32>
    %27 = vector.broadcast %26 : vector<1x1x1x1xf32> to vector<1x2x2x1xf32>
    %28 = arith.mulf %23, %27 : vector<1x2x2x1xf32>
    %29 = arith.addf %22, %28 : vector<1x2x2x1xf32>
    %c0_16 = arith.constant 0 : index
    %c1_17 = arith.constant 1 : index
    %c1_18 = arith.constant 1 : index
    %c0_19 = arith.constant 0 : index
    %30 = vector.load %arg1[%c0_16, %c1_17, %c1_18, %c0_19] : memref<1x4x4x1xf32, #tpu.memory_space<vmem>>, vector<1x2x2x1xf32>
    %31 = vector.extract_strided_slice %0 {offsets = [1, 1, 0], sizes = [1, 1, 1], strides = [1, 1, 1]} : vector<3x3x1xf32> to vector<1x1x1xf32>
    %32 = vector.shape_cast %31 : vector<1x1x1xf32> to vector<1xf32>
    %33 = vector.shape_cast %32 : vector<1xf32> to vector<1x1x1x1xf32>
    %34 = vector.broadcast %33 : vector<1x1x1x1xf32> to vector<1x2x2x1xf32>
    %35 = arith.mulf %30, %34 : vector<1x2x2x1xf32>
    %36 = arith.addf %29, %35 : vector<1x2x2x1xf32>
    %c0_20 = arith.constant 0 : index
    %c1_21 = arith.constant 1 : index
    %c2_22 = arith.constant 2 : index
    %c0_23 = arith.constant 0 : index
    %37 = vector.load %arg1[%c0_20, %c1_21, %c2_22, %c0_23] : memref<1x4x4x1xf32, #tpu.memory_space<vmem>>, vector<1x2x2x1xf32>
    %38 = vector.extract_strided_slice %0 {offsets = [1, 2, 0], sizes = [1, 1, 1], strides = [1, 1, 1]} : vector<3x3x1xf32> to vector<1x1x1xf32>
    %39 = vector.shape_cast %38 : vector<1x1x1xf32> to vector<1xf32>
    %40 = vector.shape_cast %39 : vector<1xf32> to vector<1x1x1x1xf32>
    %41 = vector.broadcast %40 : vector<1x1x1x1xf32> to vector<1x2x2x1xf32>
    %42 = arith.mulf %37, %41 : vector<1x2x2x1xf32>
    %43 = arith.addf %36, %42 : vector<1x2x2x1xf32>
    %c0_24 = arith.constant 0 : index
    %c2_25 = arith.constant 2 : index
    %c0_26 = arith.constant 0 : index
    %c0_27 = arith.constant 0 : index
    %44 = vector.load %arg1[%c0_24, %c2_25, %c0_26, %c0_27] : memref<1x4x4x1xf32, #tpu.memory_space<vmem>>, vector<1x2x2x1xf32>
    %45 = vector.extract_strided_slice %0 {offsets = [2, 0, 0], sizes = [1, 1, 1], strides = [1, 1, 1]} : vector<3x3x1xf32> to vector<1x1x1xf32>
    %46 = vector.shape_cast %45 : vector<1x1x1xf32> to vector<1xf32>
    %47 = vector.shape_cast %46 : vector<1xf32> to vector<1x1x1x1xf32>
    %48 = vector.broadcast %47 : vector<1x1x1x1xf32> to vector<1x2x2x1xf32>
    %49 = arith.mulf %44, %48 : vector<1x2x2x1xf32>
    %50 = arith.addf %43, %49 : vector<1x2x2x1xf32>
    %c0_28 = arith.constant 0 : index
    %c2_29 = arith.constant 2 : index
    %c1_30 = arith.constant 1 : index
    %c0_31 = arith.constant 0 : index
    %51 = vector.load %arg1[%c0_28, %c2_29, %c1_30, %c0_31] : memref<1x4x4x1xf32, #tpu.memory_space<vmem>>, vector<1x2x2x1xf32>
    %52 = vector.extract_strided_slice %0 {offsets = [2, 1, 0], sizes = [1, 1, 1], strides = [1, 1, 1]} : vector<3x3x1xf32> to vector<1x1x1xf32>
    %53 = vector.shape_cast %52 : vector<1x1x1xf32> to vector<1xf32>
    %54 = vector.shape_cast %53 : vector<1xf32> to vector<1x1x1x1xf32>
    %55 = vector.broadcast %54 : vector<1x1x1x1xf32> to vector<1x2x2x1xf32>
    %56 = arith.mulf %51, %55 : vector<1x2x2x1xf32>
    %57 = arith.addf %50, %56 : vector<1x2x2x1xf32>
    %c0_32 = arith.constant 0 : index
    %c2_33 = arith.constant 2 : index
    %c2_34 = arith.constant 2 : index
    %c0_35 = arith.constant 0 : index
    %58 = vector.load %arg1[%c0_32, %c2_33, %c2_34, %c0_35] : memref<1x4x4x1xf32, #tpu.memory_space<vmem>>, vector<1x2x2x1xf32>
    %59 = vector.extract_strided_slice %0 {offsets = [2, 2, 0], sizes = [1, 1, 1], strides = [1, 1, 1]} : vector<3x3x1xf32> to vector<1x1x1xf32>
    %60 = vector.shape_cast %59 : vector<1x1x1xf32> to vector<1xf32>
    %61 = vector.shape_cast %60 : vector<1xf32> to vector<1x1x1x1xf32>
    %62 = vector.broadcast %61 : vector<1x1x1x1xf32> to vector<1x2x2x1xf32>
    %63 = arith.mulf %58, %62 : vector<1x2x2x1xf32>
    %64 = arith.addf %57, %63 : vector<1x2x2x1xf32>
    %c0_36 = arith.constant 0 : index
    %c0_37 = arith.constant 0 : index
    %c0_38 = arith.constant 0 : index
    %c0_39 = arith.constant 0 : index
    %65 = vector.load %arg3[%c0_36, %c0_37, %c0_38, %c0_39] : memref<1x1x1x1xf32, #tpu.memory_space<vmem>>, vector<1x1x1x1xf32>
    %66 = vector.broadcast %65 : vector<1x1x1x1xf32> to vector<1x2x2x1xf32>
    %67 = arith.addf %64, %66 : vector<1x2x2x1xf32>
    %c0_40 = arith.constant 0 : index
    %c0_41 = arith.constant 0 : index
    %c0_42 = arith.constant 0 : index
    %c0_43 = arith.constant 0 : index
    %68 = vector.load %arg4[%c0_40, %c0_41, %c0_42, %c0_43] : memref<1x2x2x1xf32, #tpu.memory_space<vmem>>, vector<1x2x2x1xf32>
    tpu.vector_store %arg4[%c0_40, %c0_41, %c0_42, %c0_43], %67 {strides = array<i32>} : memref<1x2x2x1xf32, #tpu.memory_space<vmem>>, vector<1x2x2x1xf32>,
    return
  }
  func.func @transform_0(%arg0: i32) -> (i32, i32, i32, i32) {
    %c0_i32 = arith.constant 0 : i32
    %c0_i32_0 = arith.constant 0 : i32
    %c0_i32_1 = arith.constant 0 : i32
    %c0_i32_2 = arith.constant 0 : i32
    return %arg0, %c0_i32, %c0_i32_0, %c0_i32_1 : i32, i32, i32, i32
  }
  func.func @transform_1(%arg0: i32) -> (i32, i32, i32) {
    %c0_i32 = arith.constant 0 : i32
    %c0_i32_0 = arith.constant 0 : i32
    %c0_i32_1 = arith.constant 0 : i32
    %c0_i32_2 = arith.constant 0 : i32
    return %c0_i32, %c0_i32_0, %c0_i32_1 : i32, i32, i32
  }
  func.func @transform_2(%arg0: i32) -> (i32, i32, i32, i32) {
    %c0_i32 = arith.constant 0 : i32
    %c0_i32_0 = arith.constant 0 : i32
    %c0_i32_1 = arith.constant 0 : i32
    %c0_i32_2 = arith.constant 0 : i32
    %c0_i32_3 = arith.constant 0 : i32
    return %c0_i32, %c0_i32_0, %c0_i32_1, %c0_i32_2 : i32, i32, i32, i32
  }
  func.func @transform_3(%arg0: i32) -> (i32, i32, i32, i32) {
    %c0_i32 = arith.constant 0 : i32
    %c0_i32_0 = arith.constant 0 : i32
    %c0_i32_1 = arith.constant 0 : i32
    %c0_i32_2 = arith.constant 0 : i32
    return %arg0, %c0_i32, %c0_i32_0, %c0_i32_1 : i32, i32, i32, i32
  }
}

module attributes {stable_mosaic.version = 11 : i64} {
  func.func @_dwconv_kernel(%arg0: i32, %arg1: memref<1x3x3x1xf32, #tpu.memory_space<vmem>>, %arg2: memref<3x3x1xf32, #tpu.memory_space<vmem>>, %arg3: memref<1x1x1x1xf32, #tpu.memory_space<vmem>>, %arg4: memref<1x1x1x1xf32, #tpu.memory_space<vmem>>) attributes {dimension_semantics = [#tpu.dimension_semantics<parallel>], iteration_bounds = array<i64: 2>, scalar_prefetch = 0 : i64, scratch_operands = 0 : i64, tpu.core_type = #tpu.core_type<tc>, window_params = [{transform_indices = @transform_0, window_bounds = array<i64: 1, 3, 3, 1>}, {pipeline_mode = #tpu.pipeline_mode<synchronous>, transform_indices = @transform_1, window_bounds = array<i64: 3, 3, 1>}, {pipeline_mode = #tpu.pipeline_mode<synchronous>, transform_indices = @transform_2, window_bounds = array<i64: 1, 1, 1, 1>}, {transform_indices = @transform_3, window_bounds = array<i64: 1, 1, 1, 1>}]} {
    %c0 = arith.constant 0 : index
    %c0_0 = arith.constant 0 : index
    %c0_1 = arith.constant 0 : index
    %0 = vector.load %arg2[%c0, %c0_0, %c0_1] : memref<3x3x1xf32, #tpu.memory_space<vmem>>, vector<3x3x1xf32>
    %cst = arith.constant 0.000000e+00 : f32
    %1 = vector.broadcast %cst : f32 to vector<1x1x1x1xf32>
    %c0_2 = arith.constant 0 : index
    %c0_3 = arith.constant 0 : index
    %c0_4 = arith.constant 0 : index
    %c0_5 = arith.constant 0 : index
    %2 = vector.load %arg1[%c0_2, %c0_3, %c0_4, %c0_5] : memref<1x3x3x1xf32, #tpu.memory_space<vmem>>, vector<1x1x1x1xf32>
    %3 = vector.extract_strided_slice %0 {offsets = [0, 0, 0], sizes = [1, 1, 1], strides = [1, 1, 1]} : vector<3x3x1xf32> to vector<1x1x1xf32>
    %4 = vector.shape_cast %3 : vector<1x1x1xf32> to vector<1xf32>
    %5 = vector.shape_cast %4 : vector<1xf32> to vector<1x1x1x1xf32>
    %6 = arith.mulf %2, %5 : vector<1x1x1x1xf32>
    %7 = arith.addf %1, %6 : vector<1x1x1x1xf32>
    %c0_6 = arith.constant 0 : index
    %c0_7 = arith.constant 0 : index
    %c1 = arith.constant 1 : index
    %c0_8 = arith.constant 0 : index
    %8 = vector.load %arg1[%c0_6, %c0_7, %c1, %c0_8] : memref<1x3x3x1xf32, #tpu.memory_space<vmem>>, vector<1x1x1x1xf32>
    %9 = vector.extract_strided_slice %0 {offsets = [0, 1, 0], sizes = [1, 1, 1], strides = [1, 1, 1]} : vector<3x3x1xf32> to vector<1x1x1xf32>
    %10 = vector.shape_cast %9 : vector<1x1x1xf32> to vector<1xf32>
    %11 = vector.shape_cast %10 : vector<1xf32> to vector<1x1x1x1xf32>
    %12 = arith.mulf %8, %11 : vector<1x1x1x1xf32>
    %13 = arith.addf %7, %12 : vector<1x1x1x1xf32>
    %c0_9 = arith.constant 0 : index
    %c0_10 = arith.constant 0 : index
    %c2 = arith.constant 2 : index
    %c0_11 = arith.constant 0 : index
    %14 = vector.load %arg1[%c0_9, %c0_10, %c2, %c0_11] : memref<1x3x3x1xf32, #tpu.memory_space<vmem>>, vector<1x1x1x1xf32>
    %15 = vector.extract_strided_slice %0 {offsets = [0, 2, 0], sizes = [1, 1, 1], strides = [1, 1, 1]} : vector<3x3x1xf32> to vector<1x1x1xf32>
    %16 = vector.shape_cast %15 : vector<1x1x1xf32> to vector<1xf32>
    %17 = vector.shape_cast %16 : vector<1xf32> to vector<1x1x1x1xf32>
    %18 = arith.mulf %14, %17 : vector<1x1x1x1xf32>
    %19 = arith.addf %13, %18 : vector<1x1x1x1xf32>
    %c0_12 = arith.constant 0 : index
    %c1_13 = arith.constant 1 : index
    %c0_14 = arith.constant 0 : index
    %c0_15 = arith.constant 0 : index
    %20 = vector.load %arg1[%c0_12, %c1_13, %c0_14, %c0_15] : memref<1x3x3x1xf32, #tpu.memory_space<vmem>>, vector<1x1x1x1xf32>
    %21 = vector.extract_strided_slice %0 {offsets = [1, 0, 0], sizes = [1, 1, 1], strides = [1, 1, 1]} : vector<3x3x1xf32> to vector<1x1x1xf32>
    %22 = vector.shape_cast %21 : vector<1x1x1xf32> to vector<1xf32>
    %23 = vector.shape_cast %22 : vector<1xf32> to vector<1x1x1x1xf32>
    %24 = arith.mulf %20, %23 : vector<1x1x1x1xf32>
    %25 = arith.addf %19, %24 : vector<1x1x1x1xf32>
    %c0_16 = arith.constant 0 : index
    %c1_17 = arith.constant 1 : index
    %c1_18 = arith.constant 1 : index
    %c0_19 = arith.constant 0 : index
    %26 = vector.load %arg1[%c0_16, %c1_17, %c1_18, %c0_19] : memref<1x3x3x1xf32, #tpu.memory_space<vmem>>, vector<1x1x1x1xf32>
    %27 = vector.extract_strided_slice %0 {offsets = [1, 1, 0], sizes = [1, 1, 1], strides = [1, 1, 1]} : vector<3x3x1xf32> to vector<1x1x1xf32>
    %28 = vector.shape_cast %27 : vector<1x1x1xf32> to vector<1xf32>
    %29 = vector.shape_cast %28 : vector<1xf32> to vector<1x1x1x1xf32>
    %30 = arith.mulf %26, %29 : vector<1x1x1x1xf32>
    %31 = arith.addf %25, %30 : vector<1x1x1x1xf32>
    %c0_20 = arith.constant 0 : index
    %c1_21 = arith.constant 1 : index
    %c2_22 = arith.constant 2 : index
    %c0_23 = arith.constant 0 : index
    %32 = vector.load %arg1[%c0_20, %c1_21, %c2_22, %c0_23] : memref<1x3x3x1xf32, #tpu.memory_space<vmem>>, vector<1x1x1x1xf32>
    %33 = vector.extract_strided_slice %0 {offsets = [1, 2, 0], sizes = [1, 1, 1], strides = [1, 1, 1]} : vector<3x3x1xf32> to vector<1x1x1xf32>
    %34 = vector.shape_cast %33 : vector<1x1x1xf32> to vector<1xf32>
    %35 = vector.shape_cast %34 : vector<1xf32> to vector<1x1x1x1xf32>
    %36 = arith.mulf %32, %35 : vector<1x1x1x1xf32>
    %37 = arith.addf %31, %36 : vector<1x1x1x1xf32>
    %c0_24 = arith.constant 0 : index
    %c2_25 = arith.constant 2 : index
    %c0_26 = arith.constant 0 : index
    %c0_27 = arith.constant 0 : index
    %38 = vector.load %arg1[%c0_24, %c2_25, %c0_26, %c0_27] : memref<1x3x3x1xf32, #tpu.memory_space<vmem>>, vector<1x1x1x1xf32>
    %39 = vector.extract_strided_slice %0 {offsets = [2, 0, 0], sizes = [1, 1, 1], strides = [1, 1, 1]} : vector<3x3x1xf32> to vector<1x1x1xf32>
    %40 = vector.shape_cast %39 : vector<1x1x1xf32> to vector<1xf32>
    %41 = vector.shape_cast %40 : vector<1xf32> to vector<1x1x1x1xf32>
    %42 = arith.mulf %38, %41 : vector<1x1x1x1xf32>
    %43 = arith.addf %37, %42 : vector<1x1x1x1xf32>
    %c0_28 = arith.constant 0 : index
    %c2_29 = arith.constant 2 : index
    %c1_30 = arith.constant 1 : index
    %c0_31 = arith.constant 0 : index
    %44 = vector.load %arg1[%c0_28, %c2_29, %c1_30, %c0_31] : memref<1x3x3x1xf32, #tpu.memory_space<vmem>>, vector<1x1x1x1xf32>
    %45 = vector.extract_strided_slice %0 {offsets = [2, 1, 0], sizes = [1, 1, 1], strides = [1, 1, 1]} : vector<3x3x1xf32> to vector<1x1x1xf32>
    %46 = vector.shape_cast %45 : vector<1x1x1xf32> to vector<1xf32>
    %47 = vector.shape_cast %46 : vector<1xf32> to vector<1x1x1x1xf32>
    %48 = arith.mulf %44, %47 : vector<1x1x1x1xf32>
    %49 = arith.addf %43, %48 : vector<1x1x1x1xf32>
    %c0_32 = arith.constant 0 : index
    %c2_33 = arith.constant 2 : index
    %c2_34 = arith.constant 2 : index
    %c0_35 = arith.constant 0 : index
    %50 = vector.load %arg1[%c0_32, %c2_33, %c2_34, %c0_35] : memref<1x3x3x1xf32, #tpu.memory_space<vmem>>, vector<1x1x1x1xf32>
    %51 = vector.extract_strided_slice %0 {offsets = [2, 2, 0], sizes = [1, 1, 1], strides = [1, 1, 1]} : vector<3x3x1xf32> to vector<1x1x1xf32>
    %52 = vector.shape_cast %51 : vector<1x1x1xf32> to vector<1xf32>
    %53 = vector.shape_cast %52 : vector<1xf32> to vector<1x1x1x1xf32>
    %54 = arith.mulf %50, %53 : vector<1x1x1x1xf32>
    %55 = arith.addf %49, %54 : vector<1x1x1x1xf32>
    %c0_36 = arith.constant 0 : index
    %c0_37 = arith.constant 0 : index
    %c0_38 = arith.constant 0 : index
    %c0_39 = arith.constant 0 : index
    %56 = vector.load %arg3[%c0_36, %c0_37, %c0_38, %c0_39] : memref<1x1x1x1xf32, #tpu.memory_space<vmem>>, vector<1x1x1x1xf32>
    %57 = arith.addf %55, %56 : vector<1x1x1x1xf32>
    %c0_40 = arith.constant 0 : index
    %c0_41 = arith.constant 0 : index
    %c0_42 = arith.constant 0 : index
    %c0_43 = arith.constant 0 : index
    %58 = vector.load %arg4[%c0_40, %c0_41, %c0_42, %c0_43] : memref<1x1x1x1xf32, #tpu.memory_space<vmem>>, vector<1x1x1x1xf32>
    tpu.vector_store %arg4[%c0_40, %c0_41, %c0_42, %c0_43], %57 {strides = array<i32>} : memref<1x1x1x1xf32, #tpu.memory_space<vmem>>, vector<1x1x1x1xf32>,
    return
  }
  func.func @transform_0(%arg0: i32) -> (i32, i32, i32, i32) {
    %c0_i32 = arith.constant 0 : i32
    %c0_i32_0 = arith.constant 0 : i32
    %c0_i32_1 = arith.constant 0 : i32
    %c0_i32_2 = arith.constant 0 : i32
    return %arg0, %c0_i32, %c0_i32_0, %c0_i32_1 : i32, i32, i32, i32
  }
  func.func @transform_1(%arg0: i32) -> (i32, i32, i32) {
    %c0_i32 = arith.constant 0 : i32
    %c0_i32_0 = arith.constant 0 : i32
    %c0_i32_1 = arith.constant 0 : i32
    %c0_i32_2 = arith.constant 0 : i32
    return %c0_i32, %c0_i32_0, %c0_i32_1 : i32, i32, i32
  }
  func.func @transform_2(%arg0: i32) -> (i32, i32, i32, i32) {
    %c0_i32 = arith.constant 0 : i32
    %c0_i32_0 = arith.constant 0 : i32
    %c0_i32_1 = arith.constant 0 : i32
    %c0_i32_2 = arith.constant 0 : i32
    %c0_i32_3 = arith.constant 0 : i32
    return %c0_i32, %c0_i32_0, %c0_i32_1, %c0_i32_2 : i32, i32, i32, i32
  }
  func.func @transform_3(%arg0: i32) -> (i32, i32, i32, i32) {
    %c0_i32 = arith.constant 0 : i32
    %c0_i32_0 = arith.constant 0 : i32
    %c0_i32_1 = arith.constant 0 : i32
    %c0_i32_2 = arith.constant 0 : i32
    return %arg0, %c0_i32, %c0_i32_0, %c0_i32_1 : i32, i32, i32, i32
  }
}

module attributes {stable_mosaic.version = 11 : i64} {
  func.func @_mm_bias_kernel(%arg0: i32, %arg1: i32, %arg2: i32, %arg3: memref<1x128x4xbf16, #tpu.memory_space<vmem>>, %arg4: memref<1x4x4xbf16, #tpu.memory_space<vmem>>, %arg5: memref<1x1x4xf32, #tpu.memory_space<vmem>>, %arg6: memref<1x128x4xf32, #tpu.memory_space<vmem>>) attributes {dimension_semantics = [#tpu.dimension_semantics<parallel>, #tpu.dimension_semantics<parallel>, #tpu.dimension_semantics<parallel>], iteration_bounds = array<i64: 1, 1, 1>, scalar_prefetch = 0 : i64, scratch_operands = 0 : i64, tpu.core_type = #tpu.core_type<tc>, window_params = [{transform_indices = @transform_0, window_bounds = array<i64: 1, 128, 4>}, {transform_indices = @transform_1, window_bounds = array<i64: 1, 4, 4>}, {transform_indices = @transform_2, window_bounds = array<i64: 1, 1, 4>}, {transform_indices = @transform_3, window_bounds = array<i64: 1, 128, 4>}]} {
    %c0 = arith.constant 0 : index
    %c0_0 = arith.constant 0 : index
    %c0_1 = arith.constant 0 : index
    %0 = vector.load %arg3[%c0, %c0_0, %c0_1] : memref<1x128x4xbf16, #tpu.memory_space<vmem>>, vector<1x128x4xbf16>
    %1 = vector.shape_cast %0 : vector<1x128x4xbf16> to vector<128x4xbf16>
    %c0_2 = arith.constant 0 : index
    %c0_3 = arith.constant 0 : index
    %c0_4 = arith.constant 0 : index
    %2 = vector.load %arg4[%c0_2, %c0_3, %c0_4] : memref<1x4x4xbf16, #tpu.memory_space<vmem>>, vector<1x4x4xbf16>
    %3 = vector.shape_cast %2 : vector<1x4x4xbf16> to vector<4x4xbf16>
    %cst = arith.constant dense<0.000000e+00> : vector<128x4xf32>
    %4 = tpu.matmul %1, %3, %cst {dimension_numbers = #tpu.dot_dimension_numbers<[1], [0], [0], [1], [0, 0, 1, 1], [], []>} : vector<128x4xbf16>, vector<4x4xbf16>, vector<128x4xf32> -> vector<128x4xf32>
    %c0_5 = arith.constant 0 : index
    %c0_6 = arith.constant 0 : index
    %c0_7 = arith.constant 0 : index
    %5 = vector.load %arg5[%c0_5, %c0_6, %c0_7] : memref<1x1x4xf32, #tpu.memory_space<vmem>>, vector<1x1x4xf32>
    %6 = vector.shape_cast %5 : vector<1x1x4xf32> to vector<1x4xf32>
    %7 = vector.broadcast %6 : vector<1x4xf32> to vector<128x4xf32>
    %8 = arith.addf %4, %7 : vector<128x4xf32>
    %c0_8 = arith.constant 0 : index
    %c0_9 = arith.constant 0 : index
    %c0_10 = arith.constant 0 : index
    %9 = vector.load %arg6[%c0_8, %c0_9, %c0_10] : memref<1x128x4xf32, #tpu.memory_space<vmem>>, vector<1x128x4xf32>
    %10 = vector.shape_cast %9 : vector<1x128x4xf32> to vector<128x4xf32>
    %11 = vector.shape_cast %8 : vector<128x4xf32> to vector<1x128x4xf32>
    tpu.vector_store %arg6[%c0_8, %c0_9, %c0_10], %11 {strides = array<i32>} : memref<1x128x4xf32, #tpu.memory_space<vmem>>, vector<1x128x4xf32>,
    return
  }
  func.func @transform_0(%arg0: i32, %arg1: i32, %arg2: i32) -> (i32, i32, i32) {
    %c0_i32 = arith.constant 0 : i32
    %c0_i32_0 = arith.constant 0 : i32
    return %arg0, %arg1, %c0_i32 : i32, i32, i32
  }
  func.func @transform_1(%arg0: i32, %arg1: i32, %arg2: i32) -> (i32, i32, i32) {
    %c0_i32 = arith.constant 0 : i32
    %c0_i32_0 = arith.constant 0 : i32
    return %arg0, %c0_i32, %arg2 : i32, i32, i32
  }
  func.func @transform_2(%arg0: i32, %arg1: i32, %arg2: i32) -> (i32, i32, i32) {
    %c0_i32 = arith.constant 0 : i32
    %c0_i32_0 = arith.constant 0 : i32
    return %arg0, %c0_i32, %arg2 : i32, i32, i32
  }
  func.func @transform_3(%arg0: i32, %arg1: i32, %arg2: i32) -> (i32, i32, i32) {
    %c0_i32 = arith.constant 0 : i32
    return %arg0, %arg1, %arg2 : i32, i32, i32
  }
}

module attributes {stable_mosaic.version = 11 : i64} {
  func.func @_residual_gate_kernel(%arg0: i32, %arg1: memref<128x4xf32, #tpu.memory_space<vmem>>, %arg2: memref<128x4xf32, #tpu.memory_space<vmem>>, %arg3: memref<128x4xf32, #tpu.memory_space<vmem>>) attributes {dimension_semantics = [#tpu.dimension_semantics<parallel>], iteration_bounds = array<i64: 1>, scalar_prefetch = 0 : i64, scratch_operands = 0 : i64, tpu.core_type = #tpu.core_type<tc>, window_params = [{transform_indices = @transform_0, window_bounds = array<i64: 128, 4>}, {transform_indices = @transform_1, window_bounds = array<i64: 128, 4>}, {transform_indices = @transform_2, window_bounds = array<i64: 128, 4>}]} {
    %c0 = arith.constant 0 : index
    %c0_0 = arith.constant 0 : index
    %0 = vector.load %arg1[%c0, %c0_0] : memref<128x4xf32, #tpu.memory_space<vmem>>, vector<128x4xf32>
    %cst = arith.constant 5.000000e-01 : f32
    %1 = vector.broadcast %cst : f32 to vector<128x4xf32>
    %2 = arith.mulf %1, %0 : vector<128x4xf32>
    %cst_1 = arith.constant 4.471500e-02 : f32
    %3 = vector.broadcast %cst_1 : f32 to vector<128x4xf32>
    %4 = arith.mulf %3, %0 : vector<128x4xf32>
    %5 = arith.mulf %4, %0 : vector<128x4xf32>
    %6 = arith.mulf %5, %0 : vector<128x4xf32>
    %7 = arith.addf %0, %6 : vector<128x4xf32>
    %cst_2 = arith.constant 0.797884583 : f32
    %8 = vector.broadcast %cst_2 : f32 to vector<128x4xf32>
    %9 = arith.mulf %8, %7 : vector<128x4xf32>
    %10 = math.tanh %9 : vector<128x4xf32>
    %cst_3 = arith.constant 1.000000e+00 : f32
    %11 = vector.broadcast %cst_3 : f32 to vector<128x4xf32>
    %12 = arith.addf %11, %10 : vector<128x4xf32>
    %13 = arith.mulf %2, %12 : vector<128x4xf32>
    %c0_4 = arith.constant 0 : index
    %c0_5 = arith.constant 0 : index
    %14 = vector.load %arg2[%c0_4, %c0_5] : memref<128x4xf32, #tpu.memory_space<vmem>>, vector<128x4xf32>
    %cst_6 = arith.constant 1.000000e+00 : f32
    %15 = vector.broadcast %cst_6 : f32 to vector<128x4xf32>
    %16 = arith.addf %15, %13 : vector<128x4xf32>
    %17 = arith.mulf %14, %16 : vector<128x4xf32>
    %c0_7 = arith.constant 0 : index
    %c0_8 = arith.constant 0 : index
    %18 = vector.load %arg3[%c0_7, %c0_8] : memref<128x4xf32, #tpu.memory_space<vmem>>, vector<128x4xf32>
    tpu.vector_store %arg3[%c0_7, %c0_8], %17 {strides = array<i32>} : memref<128x4xf32, #tpu.memory_space<vmem>>, vector<128x4xf32>,
    return
  }
  func.func @transform_0(%arg0: i32) -> (i32, i32) {
    %c0_i32 = arith.constant 0 : i32
    %c0_i32_0 = arith.constant 0 : i32
    return %arg0, %c0_i32 : i32, i32
  }
  func.func @transform_1(%arg0: i32) -> (i32, i32) {
    %c0_i32 = arith.constant 0 : i32
    %c0_i32_0 = arith.constant 0 : i32
    return %arg0, %c0_i32 : i32, i32
  }
  func.func @transform_2(%arg0: i32) -> (i32, i32) {
    %c0_i32 = arith.constant 0 : i32
    %c0_i32_0 = arith.constant 0 : i32
    return %arg0, %c0_i32 : i32, i32
  }
}

</mosaic_0001>

<bundles_post_ra>
// kernel: afd_forward.17
= control target key start
LH: loop header
LB: loop body
LE: loop exit
PB: predicated region body
PF: predicated region fallthrough
CT: control target
= control target key end

     0   :  { %vm68_vm0 = vcmask 523264   ;;  %vm124_vm1 = vcmask 130048   ;;  %s219_s1 = inlined_call_operand.vmem [shape: bf16[1,64,16], index: 1, kind: input, shape index: {}]   ;;  %s220_s0 = inlined_call_operand.vmem [shape: bf16[1,32,64], index: 0, kind: input, shape index: {}]   ;;  %s221_s2 = inlined_call_operand.vmem [shape: f32[1,1,16], index: 2, kind: input, shape index: {}]   ;;  %s222_s3 = inlined_call_operand.vmem [shape: f32[1,32,16], index: 3, kind: output, shape index: {}]  }
   0x1   :  { %v160_v0 = vld [vmem:[%s219_s1 + $0x18] sm:$0xff]   ;;  %v161_v1 = vld [vmem:[%s219_s1 + $0x10] sm:$0xff]   ;;  %v162_v2 = vld [vmem:[%s219_s1 + $0x8] sm:$0xff]  }
   0x2   :  { %148 = vmatprep.subr.bf16.mxu0 %v160_v0  ;;  %v164_v3 = vld [vmem:[%s220_s0] sm:$0xff]   ;;  %v165_v5 = vld [vmem:[%s220_s0 + $0x8] sm:$0xff]  }
   0x3   :  { %149 = vmatpush3.bf16.msra.mxu0 %v160_v0  ;;  %156 = vmatprep.mubr.msk.bf16.mxu0 %vm68_vm0, %v164_v3  ;;  %v163_v4 = vld [vmem:[%s219_s1] sm:$0xff]  }
   0x4   :  { %150 = vmatprep.subr.bf16.mxu0 %v161_v1  ;;  %v133_v6 = vld [vmem:[%s221_s2] ss:$0 sm:$0xff] }
   0x7   :  { %151 = vmatpush3.bf16.msra.mxu0 %v161_v1 }
   0x8   :  { %152 = vmatprep.subr.bf16.mxu0 %v162_v2 }
   0xb   :  { %153 = vmatpush3.bf16.msra.mxu0 %v162_v2 }
   0xc   :  { %154 = vmatprep.subr.bf16.mxu0 %v163_v4 }
   0xf   :  { %155 = vmatpush3.bf16.msra.mxu0 %v163_v4 }
  0x12   :  { %157 = vmatmul.mubr.msk.bf16.vlgmr.msra.gmra.mxu0 %vm68_vm0, %v165_v5 }
  0xd2   :  { %v158_v7 = vpop.f32.mrf.mxu0 }
  0xd3   :  { %v118_v8 = vadd.f32 %v158_v7, %v133_v6 }
  0xd4   :  { %v109_v9 = vpop.f32.mrf.mxu0 }
  0xd5   :  { %127 = vst.msk [vmem:[%s222_s3 + $0x10] sm:$0xff] %vm124_vm1, %v118_v8  ;;  %v110_v10 = vadd.f32 %v133_v6, %v109_v9 }
  0xd6   :  { %v159_v11 = vpop.f32.mrf.mxu0 }
  0xd7   :  { %125 = vst.msk [vmem:[%s222_s3] sm:$0xff] %vm124_vm1, %v110_v10  ;;  %v121_v12 = vadd.f32 %v159_v11, %v133_v6 }
  0xd8   :  { %v112_v13 = vpop.f32.mrf.mxu0 }
  0xd9   :  { %128 = vst.msk [vmem:[%s222_s3 + $0x18] sm:$0xff] %vm124_vm1, %v121_v12  ;;  %v113_v14 = vadd.f32 %v133_v6, %v112_v13 }
  0xdb   :  { %126 = vst.msk [vmem:[%s222_s3 + $0x8] sm:$0xff] %vm124_vm1, %v113_v14 }

// kernel: afd_forward.19
= control target key start
LH: loop header
LB: loop body
LE: loop exit
PB: predicated region body
PF: predicated region fallthrough
CT: control target
= control target key end

     0   :  { %vm34_vm0 = vcmask 130048   ;;  %vm90_vm1 = vcmask 523264   ;;  %s152_s1 = inlined_call_operand.vmem [shape: bf16[1,16,64], index: 1, kind: input, shape index: {}]   ;;  %s153_s0 = inlined_call_operand.vmem [shape: bf16[1,32,16], index: 0, kind: input, shape index: {}]   ;;  %s154_s2 = inlined_call_operand.vmem [shape: f32[1,32,64], index: 2, kind: output, shape index: {}]  }
   0x1   :  { %v113_v0 = vld [vmem:[%s152_s1] sm:$0xff]   ;;  %v115_v2 = vld [vmem:[%s153_s0 + $0x8] sm:$0xff]  }
   0x2   :  { %v114_v1 = vld [vmem:[%s153_s0] sm:$0xff]   ;;  %107 = vmatprep.subr.bf16.mxu0 %v113_v0 }
   0x3   :  { %108 = vmatpush3.bf16.msra.mxu0 %v113_v0  ;;  %109 = vmatprep.mubr.msk.bf16.mxu0 %vm34_vm0, %v114_v1 }
   0x6   :  { %110 = vmatmul.mubr.msk.bf16.vlgmr.msra.gmra.mxu0 %vm34_vm0, %v115_v2 }
  0xc6   :  { %v111_v3 = vpop.f32.mrf.mxu0 }
  0xc7   :  { %93 = vst.msk [vmem:[%s154_s2 + $0x10] sm:$0xff] %vm90_vm1, %v111_v3 }
  0xc8   :  { %v75_v4 = vpop.f32.mrf.mxu0 }
  0xc9   :  { %91 = vst.msk [vmem:[%s154_s2] sm:$0xff] %vm90_vm1, %v75_v4 }
  0xca   :  { %v112_v5 = vpop.f32.mrf.mxu0 }
  0xcb   :  { %94 = vst.msk [vmem:[%s154_s2 + $0x18] sm:$0xff] %vm90_vm1, %v112_v5 }
  0xcc   :  { %v78_v6 = vpop.f32.mrf.mxu0 }
  0xcd   :  { %92 = vst.msk [vmem:[%s154_s2 + $0x8] sm:$0xff] %vm90_vm1, %v78_v6 }

// kernel: afd_forward.18
= control target key start
LH: loop header
LB: loop body
LE: loop exit
PB: predicated region body
PF: predicated region fallthrough
CT: control target
= control target key end

     0   :  { %vm18_vm0 = vcmask 130048   ;;  %s174_s0 = inlined_call_operand.vmem [shape: f32[32,16], index: 0, kind: input, shape index: {}]   ;;  %s175_s1 = inlined_call_operand.vmem [shape: f32[1,16], index: 1, kind: input, shape index: {}]   ;;  %s176_s2 = inlined_call_operand.vmem [shape: f32[1,16], index: 2, kind: input, shape index: {}]   ;;  %s177_s3 = inlined_call_operand.vmem [shape: f32[32,16], index: 3, kind: output, shape index: {}]  }
   0x1   :  { %v14_v0 = vld [vmem:[%s174_s0] sm:$0xff]  ;;  %v16_v1 = vld [vmem:[%s174_s0 + $0x10] sm:$0xff]  ;;  %v15_v2 = vld [vmem:[%s174_s0 + $0x8] sm:$0xff] }
   0x2   :  { %v19_v3 = vsel %vm18_vm0, %v14_v0, 0.0  ;;  %v25_v4 = vsel %vm18_vm0, %v16_v1, 0.0  ;;  %v17_v5 = vld [vmem:[%s174_s0 + $0x18] sm:$0xff]  ;;  %v22_v6 = vsel %vm18_vm0, %v15_v2, 0.0  ;;  %v102_v41 = vld [vmem:[%s175_s1] ss:$0 sm:$0xff] }
   0x3   :  { %20 = vadd.xlane.f32.xlu0 %v19_v3  ;;  %26 = vadd.xlane.f32.xlu1 %v25_v4  ;;  %v28_v7 = vsel %vm18_vm0, %v17_v5, 0.0  ;;  %v103_v43 = vld [vmem:[%s176_s2] ss:$0 sm:$0xff] }
   0x7   :  { %23 = vadd.xlane.f32.xlu0 %v22_v6  ;;  %29 = vadd.xlane.f32.xlu1 %v28_v7 }
  0x8c   :  { %v21_v8 = vpop.xlane.xlu0 %20  ;;  %v27_v9 = vpop.xlane.xlu1 %26 }
  0x8d   :  { %v32_v10 = vmul.f32 0.0625, %v21_v8  ;;  %v34_v11 = vmul.f32 0.0625, %v27_v9 }
  0x8f   :  { %v36_v12 = vsub.f32 %v14_v0, %v32_v10  ;;  %v38_v13 = vsub.f32 %v16_v1, %v34_v11 }
  0x90   :  { %v24_v14 = vpop.xlane.xlu0 %23  ;;  %v30_v15 = vpop.xlane.xlu1 %29 }
  0x91   :  { %v33_v16 = vmul.f32 0.0625, %v24_v14  ;;  %v35_v17 = vmul.f32 0.0625, %v30_v15  ;;  %v40_v18 = vmul.f32 %v36_v12, %v36_v12  ;;  %v42_v19 = vmul.f32 %v38_v13, %v38_v13 }
  0x93   :  { %v37_v20 = vsub.f32 %v15_v2, %v33_v16  ;;  %v39_v21 = vsub.f32 %v17_v5, %v35_v17  ;;  %v44_v22 = vsel %vm18_vm0, %v40_v18, 0.0  ;;  %v50_v23 = vsel %vm18_vm0, %v42_v19, 0.0 }
  0x94   :  { %45 = vadd.xlane.f32.xlu0 %v44_v22 }
  0x95   :  { %v41_v24 = vmul.f32 %v37_v20, %v37_v20  ;;  %v43_v25 = vmul.f32 %v39_v21, %v39_v21 }
  0x97   :  { %v47_v26 = vsel %vm18_vm0, %v41_v24, 0.0  ;;  %v53_v27 = vsel %vm18_vm0, %v43_v25, 0.0 }
  0x98   :  { %51 = vadd.xlane.f32.xlu0 %v50_v23  ;;  %48 = vadd.xlane.f32.xlu1 %v47_v26 }
  0x9c   :  { %54 = vadd.xlane.f32.xlu1 %v53_v27 }
 0x11d   :  { %v46_v28 = vpop.xlane.xlu0 %45 }
 0x11e   :  { %v56_v29 = vmul.f32 0.0625, %v46_v28 }
 0x120   :  { %v60_v30 = vadd.f32 1e-05, %v56_v29 }
 0x121   :  { %v49_v31 = vpop.xlane.xlu1 %48  ;;  %v52_v32 = vpop.xlane.xlu0 %51 }
 0x122   :  { %104 = vrsqrt.f32 %v60_v30  ;;  %v57_v33 = vmul.f32 0.0625, %v49_v31  ;;  %v58_v34 = vmul.f32 0.0625, %v52_v32 }
 0x124   :  { %v61_v35 = vadd.f32 1e-05, %v57_v33  ;;  %v62_v36 = vadd.f32 1e-05, %v58_v34 }
 0x125   :  { %v55_v37 = vpop.xlane.xlu1 %54 }
 0x126   :  { %106 = vrsqrt.f32 %v61_v35  ;;  %v59_v38 = vmul.f32 0.0625, %v55_v37 }
 0x127   :  { %108 = vrsqrt.f32 %v62_v36 }
 0x128   :  { %v63_v39 = vadd.f32 1e-05, %v59_v38 }
 0x12a   :  { %110 = vrsqrt.f32 %v63_v39 }
 0x12f   :  { %v105_v40 = vpop.eup %104 }
 0x130   :  { %v68_v42 = vmul.f32 %v105_v40, %v36_v12 }
 0x132   :  { %v79_v44 = vmul.f32 %v102_v41, %v68_v42 }
 0x133   :  { %v107_v45 = vpop.eup %106 }
 0x134   :  { %v109_v46 = vpop.eup %108  ;;  %v90_v47 = vadd.f32 %v103_v43, %v79_v44  ;;  %v69_v48 = vmul.f32 %v107_v45, %v37_v20 }
 0x135   :  { %v70_v49 = vmul.f32 %v109_v46, %v38_v13 }
 0x136   :  { %94 = vst.msk [vmem:[%s177_s3] sm:$0xff] %vm18_vm0, %v90_v47  ;;  %v80_v50 = vmul.f32 %v102_v41, %v69_v48 }
 0x137   :  { %v111_v51 = vpop.eup %110  ;;  %v81_v52 = vmul.f32 %v102_v41, %v70_v49 }
 0x138   :  { %v91_v53 = vadd.f32 %v103_v43, %v80_v50  ;;  %v71_v54 = vmul.f32 %v111_v51, %v39_v21 }
 0x139   :  { %v92_v55 = vadd.f32 %v103_v43, %v81_v52 }
 0x13a   :  { %95 = vst.msk [vmem:[%s177_s3 + $0x8] sm:$0xff] %vm18_vm0, %v91_v53  ;;  %v82_v56 = vmul.f32 %v102_v41, %v71_v54 }
 0x13b   :  { %96 = vst.msk [vmem:[%s177_s3 + $0x10] sm:$0xff] %vm18_vm0, %v92_v55 }
 0x13c   :  { %v93_v57 = vadd.f32 %v103_v43, %v82_v56 }
 0x13e   :  { %97 = vst.msk [vmem:[%s177_s3 + $0x18] sm:$0xff] %vm18_vm0, %v93_v57 }

// kernel: afd_forward.20
= control target key start
LH: loop header
LB: loop body
LE: loop exit
PB: predicated region body
PF: predicated region fallthrough
CT: control target
= control target key end

     0   :  { %s508_s12 = smov 0   ;;  %s621_s0 = inlined_call_operand.vmem [shape: f32[2,6,6,32], index: 0, kind: input, shape index: {}]   ;;  %s622_s1 = inlined_call_operand.vmem [shape: f32[3,3,32], index: 1, kind: input, shape index: {}]   ;;  %s623_s2 = inlined_call_operand.vmem [shape: f32[1,1,1,32], index: 2, kind: input, shape index: {}]   ;;  %s624_s3 = inlined_call_operand.vmem [shape: f32[2,4,4,32], index: 3, kind: output, shape index: {}]  }
   0x1 LB: > { %s419_s13 = sadd.s32 4294967295, %s486_s12   ;;  %p423_p0 = scmp.ge.s32.totalorder %s486_s12, 1  ;;  %s486_s12 = sphi %s508_s12, %s13_s12  }
   0x2   : > { %p137_p1 = scmp.lt.s32.totalorder %s486_s12, 3 }
   0x4   : > { %p138_p2 = pnand %p423_p0, %p137_p1 }
   0x5   : > { %p161_p3 = scmp.lt.s32.totalorder (!%p138_p2), %s419_s13, 1 }
   0x6   : > { %141 = sbr.rel (%p138_p2) target bundleno = 82 (0x52), region = 32 }
   0xb   : > { %v178_v0 = vlaneseq  ;;  %s626_s13 = smov (!%p161_p3, %s419_s13), 1  ;;  %v171_v2 = vld [vmem:[%s622_s1] sm:$0x7]  ;;  %v172_v3 = vld [vmem:[%s622_s1 + $0x4] sm:$0x7]  ;;  %vm359_vm0 = vcmask 257024  }
   0xc   : > { %s455_s18 = smul.u32 48, %s626_s13  ;;  %v173_v14 = vld [vmem:[%s622_s1 + $0x8] sm:$0x7]  ;;  %s454_s26 = sshll.u32 %s626_s13, 4 }
   0xd   : > { %v179_v1 = vshrl.u32 %v178_v0, 7  ;;  %s170_s29 = scalar_lea.vmem %s624_s3, %s454_s26 }
   0xe   : > { %s528_s21 = scalar_lea.vmem %s621_s0, %s455_s18 }
   0xf   : > { %v180_v4 = vsub.s32 0, %v179_v1  ;;  %v196_v5 = vsub.s32 1, %v179_v1  ;;  %v212_v6 = vsub.s32 2, %v179_v1  ;;  %v174_v11 = vld [vmem:[%s528_s21] sm:$0xf] }
  0x10   : > { %v190_v12 = vld [vmem:[%s528_s21 + $0x1] sm:$0xf]  ;;  %v427_v18 = vld [vmem:[%s528_s21 + $0x8] sm:$0xf]  ;;  %v428_v32 = vld [vmem:[%s528_s21 + $0x10] sm:$0xf] }
  0x11   : > { %v181_v7 = vrot.slane %v171_v2, %v180_v4  ;;  %v197_v8 = vrot.slane %v171_v2, %v196_v5  ;;  %v530_v9 = vrot.slane %v171_v2, %v212_v6  ;;  %v532_v10 = vrot.slane %v172_v3, %v180_v4  ;;  %v206_v13 = vld [vmem:[%s528_s21 + $0x2] sm:$0xf]  ;;  %v431_v20 = vld [vmem:[%s528_s21 + $0x9] sm:$0xf]  ;;  %v439_v35 = vld [vmem:[%s528_s21 + $0x10] sm:$0xf] }
  0x12   : > { %v542_v19 = vrot.slane %v172_v3, %v196_v5  ;;  %v435_v21 = vld [vmem:[%s528_s21 + $0xa] sm:$0xf]  ;;  %v546_v22 = vrot.slane %v172_v3, %v212_v6  ;;  %v552_v28 = vrot.slane %v173_v14, %v180_v4  ;;  %v443_v36 = vld [vmem:[%s528_s21 + $0x11] sm:$0xf]  ;;  %v559_v37 = vrot.slane %v173_v14, %v196_v5  ;;  %v429_v50 = vld [vmem:[%s528_s21 + $0x18] sm:$0xf] }
  0x13   : > { %v182_v15 = vmul.f32 %v181_v7, %v174_v11  ;;  %v198_v16 = vmul.f32 %v197_v8, %v190_v12  ;;  %v214_v17 = vmul.f32 %v530_v9, %v206_v13  ;;  %v231_v24 = vmul.f32 %v427_v18, %v532_v10  ;;  %v175_v25 = vld [vmem:[%s528_s21 + $0x8] sm:$0xf]  ;;  %v432_v38 = vld [vmem:[%s528_s21 + $0x11] sm:$0xf]  ;;  %v440_v55 = vld [vmem:[%s528_s21 + $0x18] sm:$0xf] }
  0x14   : > { %v191_v26 = vld [vmem:[%s528_s21 + $0x9] sm:$0xf]  ;;  %v183_v29 = vmul.f32 %v181_v7, %v175_v25  ;;  %v247_v34 = vmul.f32 %v431_v20, %v542_v19  ;;  %v263_v39 = vmul.f32 %v435_v21, %v546_v22  ;;  %v232_v41 = vmul.f32 %v428_v32, %v532_v10  ;;  %v176_v42 = vld [vmem:[%s528_s21 + $0x10] sm:$0xf]  ;;  %v433_v56 = vld [vmem:[%s528_s21 + $0x19] sm:$0xf] }
  0x15   : > { %v202_v23 = vadd.f32 %v198_v16, %v182_v15  ;;  %v207_v27 = vld [vmem:[%s528_s21 + $0xa] sm:$0xf]  ;;  %v199_v30 = vmul.f32 %v197_v8, %v191_v26  ;;  %v192_v43 = vld [vmem:[%s528_s21 + $0x11] sm:$0xf]  ;;  %v184_v47 = vmul.f32 %v181_v7, %v176_v42  ;;  %v280_v51 = vmul.f32 %v439_v35, %v552_v28  ;;  %v177_v61 = vld [vmem:[%s528_s21 + $0x18] sm:$0xf] }
  0x16   : > { %v215_v31 = vmul.f32 %v530_v9, %v207_v27  ;;  %v208_v44 = vld [vmem:[%s528_s21 + $0x12] sm:$0xf]  ;;  %v200_v48 = vmul.f32 %v197_v8, %v192_v43  ;;  %v571_v52 = vrot.slane %v173_v14, %v212_v6  ;;  %v248_v54 = vmul.f32 %v432_v38, %v542_v19  ;;  %v193_v62 = vld [vmem:[%s528_s21 + $0x19] sm:$0xf]  ;;  %v430_v6 = vld [vmem:[%s528_s21 + $0x20] sm:$0xf] }
  0x17   : > { %v218_v33 = vadd.f32 %v214_v17, %v202_v23  ;;  %v203_v40 = vadd.f32 %v199_v30, %v183_v29  ;;  %v436_v46 = vld [vmem:[%s528_s21 + $0x12] sm:$0xf]  ;;  %v216_v49 = vmul.f32 %v530_v9, %v208_v44  ;;  %v296_v58 = vmul.f32 %v443_v36, %v559_v37  ;;  %v209_v63 = vld [vmem:[%s528_s21 + $0x1a] sm:$0xf]  ;;  %v434_v16 = vld [vmem:[%s528_s21 + $0x21] sm:$0xf] }
  0x18   : > { %v204_v59 = vadd.f32 %v200_v48, %v184_v47  ;;  %v233_v60 = vmul.f32 %v429_v50, %v532_v10  ;;  %v447_v0 = vld [vmem:[%s528_s21 + $0x12] sm:$0xf]  ;;  %v264_v2 = vmul.f32 %v436_v46, %v546_v22  ;;  %v437_v3 = vld [vmem:[%s528_s21 + $0x1a] sm:$0xf]  ;;  %v185_v4 = vmul.f32 %v181_v7, %v177_v61  ;;  %v441_v20 = vld [vmem:[%s528_s21 + $0x20] sm:$0xf] }
  0x19   : > { %v235_v45 = vadd.f32 %v231_v24, %v218_v33  ;;  %v219_v53 = vadd.f32 %v215_v31, %v203_v40  ;;  %v201_v5 = vmul.f32 %v197_v8, %v193_v62  ;;  %v444_v12 = vld [vmem:[%s528_s21 + $0x19] sm:$0xf]  ;;  %v249_v14 = vmul.f32 %v433_v56, %v542_v19  ;;  %v438_v27 = vld [vmem:[%s528_s21 + $0x22] sm:$0xf]  ;;  %v442_v35 = vld [vmem:[%s528_s21 + $0x28] sm:$0xf] }
  0x1a   : > { %v220_v13 = vadd.f32 %v216_v49, %v204_v59  ;;  %v217_v15 = vmul.f32 %v530_v9, %v209_v63  ;;  %v281_v18 = vmul.f32 %v440_v55, %v552_v28  ;;  %v234_v7 = vmul.f32 %v430_v6, %v532_v10  ;;  %v448_v24 = vld [vmem:[%s528_s21 + $0x1a] sm:$0xf]  ;;  %v445_v30 = vld [vmem:[%s528_s21 + $0x21] sm:$0xf]  ;;  %v451_v36 = vld [vmem:[%s623_s2] ss:$0 sm:$0xff] }
  0x1b   : > { %v251_v57 = vadd.f32 %v247_v34, %v235_v45  ;;  %v236_v1 = vadd.f32 %v232_v41, %v219_v53  ;;  %v205_v21 = vadd.f32 %v201_v5, %v185_v4  ;;  %v312_v23 = vmul.f32 %v447_v0, %v571_v52  ;;  %v449_v40 = vld [vmem:[%s528_s21 + $0x22] sm:$0xf]  ;;  %v446_v45 = vld [vmem:[%s528_s21 + $0x29] sm:$0xf] }
  0x1c   : > { %v237_v25 = vadd.f32 %v233_v60, %v220_v13  ;;  %v265_v26 = vmul.f32 %v437_v3, %v546_v22  ;;  %v297_v9 = vmul.f32 %v444_v12, %v559_v37  ;;  %v250_v32 = vmul.f32 %v434_v16, %v542_v19  ;;  %v450_v53 = vld [vmem:[%s528_s21 + $0x2a] sm:$0xf] }
  0x1d   : > { %v267_v11 = vadd.f32 %v263_v39, %v251_v57  ;;  %v252_v17 = vadd.f32 %v248_v54, %v236_v1  ;;  %v221_v31 = vadd.f32 %v217_v15, %v205_v21  ;;  %v282_v10 = vmul.f32 %v441_v20, %v552_v28 }
  0x1e   : > { %v253_v34 = vadd.f32 %v249_v14, %v237_v25  ;;  %v313_v39 = vmul.f32 %v448_v24, %v571_v52  ;;  %v266_v42 = vmul.f32 %v438_v27, %v546_v22  ;;  %v298_v19 = vmul.f32 %v445_v30, %v559_v37 }
  0x1f   : > { %v284_v8 = vadd.f32 %v280_v51, %v267_v11  ;;  %v268_v29 = vadd.f32 %v264_v2, %v252_v17  ;;  %v238_v41 = vadd.f32 %v234_v7, %v221_v31  ;;  %v283_v48 = vmul.f32 %v442_v35, %v552_v28 }
  0x20   : > { %v269_v44 = vadd.f32 %v265_v26, %v253_v34  ;;  %v314_v51 = vmul.f32 %v449_v40, %v571_v52  ;;  %v299_v56 = vmul.f32 %v446_v45, %v559_v37  ;;  %v315_v60 = vmul.f32 %v450_v53, %v571_v52 }
  0x21   : > { %v300_v33 = vadd.f32 %v296_v58, %v284_v8  ;;  %v285_v38 = vadd.f32 %v281_v18, %v268_v29  ;;  %v254_v47 = vadd.f32 %v250_v32, %v238_v41 }
  0x22   : > { %v286_v50 = vadd.f32 %v282_v10, %v269_v44 }
  0x23   : > { %v316_v43 = vadd.f32 %v312_v23, %v300_v33  ;;  %v301_v46 = vadd.f32 %v297_v9, %v285_v38  ;;  %v270_v55 = vadd.f32 %v266_v42, %v254_v47 }
  0x24   : > { %v302_v22 = vadd.f32 %v298_v19, %v286_v50 }
  0x25   : > { %v327_v49 = vadd.f32 %v451_v36, %v316_v43  ;;  %v317_v54 = vadd.f32 %v313_v39, %v301_v46  ;;  %v287_v59 = vadd.f32 %v283_v48, %v270_v55 }
  0x26   : > { %v318_v62 = vadd.f32 %v314_v51, %v302_v22 }
  0x27   : > { %v331_v57 = vsub.f32 0.0, %v327_v49  ;;  %v328_v58 = vadd.f32 %v451_v36, %v317_v54  ;;  %v303_v0 = vadd.f32 %v299_v56, %v287_v59 }
  0x28   : > { %v329_v28 = vadd.f32 %v451_v36, %v318_v62 }
  0x29   : > { %v335_v61 = vmul.f32 1.442695, %v331_v57  ;;  %v332_v63 = vsub.f32 0.0, %v328_v58  ;;  %v319_v2 = vadd.f32 %v315_v60, %v303_v0 }
  0x2a   : > { %v333_v3 = vsub.f32 0.0, %v329_v28 }
  0x2b   : > { %464 = vpow2.f32 %v335_v61  ;;  %v337_v1 = vmul.f32 1.442695, %v332_v63  ;;  %v330_v4 = vadd.f32 %v451_v36, %v319_v2 }
  0x2c   : > { %v339_v5 = vmul.f32 1.442695, %v333_v3 }
  0x2d   : > { %466 = vpow2.f32 %v337_v1  ;;  %v334_v6 = vsub.f32 0.0, %v330_v4 }
  0x2e   : > { %468 = vpow2.f32 %v339_v5 }
  0x2f   : > { %v341_v37 = vmul.f32 1.442695, %v334_v6 }
  0x31   : > { %470 = vpow2.f32 %v341_v37 }
  0x38   : > { %v465_v11 = vpop.eup %464 }
  0x39   : > { %v343_v12 = vadd.f32 1.0, %v465_v11 }
  0x3a   : > { %v467_v52 = vpop.eup %466 }
  0x3b   : > { %472 = vrcp.f32 %v343_v12  ;;  %v344_v13 = vadd.f32 1.0, %v467_v52  ;;  %v469_v14 = vpop.eup %468 }
  0x3c   : > { %v345_v15 = vadd.f32 1.0, %v469_v14 }
  0x3d   : > { %474 = vrcp.f32 %v344_v13 }
  0x3e   : > { %v471_v16 = vpop.eup %470  ;;  %476 = vrcp.f32 %v345_v15 }
  0x3f   : > { %v346_v17 = vadd.f32 1.0, %v471_v16 }
  0x41   : > { %478 = vrcp.f32 %v346_v17 }
  0x48   : > { %v473_v18 = vpop.eup %472 }
  0x49   : > { %v355_v20 = vmul.f32 %v473_v18, %v327_v49 }
  0x4a   : > { %v475_v21 = vpop.eup %474 }
  0x4b   : > { %360 = vst.msk [vmem:[%s170_s29] sm:$0xf] %vm359_vm0, %v355_v20  ;;  %v356_v7 = vmul.f32 %v475_v21, %v328_v58  ;;  %v477_v8 = vpop.eup %476 }
  0x4c   : > { %v357_v23 = vmul.f32 %v477_v8, %v329_v28 }
  0x4d   : > { %361 = vst.msk [vmem:[%s170_s29 + $0x4] sm:$0xf] %vm359_vm0, %v356_v7 }
  0x4e   : > { %v479_v24 = vpop.eup %478  ;;  %362 = vst.msk [vmem:[%s170_s29 + $0x8] sm:$0xf] %vm359_vm0, %v357_v23 }
  0x4f   : > { %v358_v25 = vmul.f32 %v479_v24, %v330_v4 }
  0x51   : > { %363 = vst.msk [vmem:[%s170_s29 + $0xc] sm:$0xf] %vm359_vm0, %v358_v25 }
  0x52 PF: > { %s13_s12 = sadd.s32 1, %s486_s12  }
  0x53   : > { %p10_p4 = scmp.ge.s32.totalorder %s13_s12, 4  }
  0x55   :  { %12 = sbr.rel (!%p10_p4) target bundleno = 1 (0x1), region = 64 }

// kernel: afd_forward.21
= control target key start
LH: loop header
LB: loop body
LE: loop exit
PB: predicated region body
PF: predicated region fallthrough
CT: control target
= control target key end

     0   :  { %s540_s9 = smov 0   ;;  %s542_s10 = smov 0   ;;  %s576_s0 = inlined_call_operand.vmem [shape: bf16[4,32,32], index: 0, kind: input, shape index: {}]   ;;  %s577_s1 = inlined_call_operand.vmem [shape: bf16[4,32,33], index: 1, kind: input, shape index: {}]   ;;  %s578_s2 = inlined_call_operand.vmem [shape: f32[4,32,33], index: 2, kind: output, shape index: {}]  }
   0x1   :  { %s544_s11 = smov 0  }
   0x2 LB: > { %s31_s12 = sadd.s32 1, %s519_s10  ;;  %p443_p0 = scmp.ge.s32.totalorder %s523_s11, 1  ;;  %s523_s11 = sphi %s544_s11, %s12_s11   ;;  %s519_s10 = sphi %s542_s10, %s580_s10   ;;  %s515_s9 = sphi %s540_s9, %s579_s9  }
   0x3   : > { %p33_p1 = scmp.ge.s32.totalorder %s31_s12, 4  ;;  %p157_p2 = scmp.lt.s32.totalorder %s523_s11, 5 }
   0x5   : > { %s582_s12 = smov (%p33_p1, %s31_s12), 0  ;;  %p158_p3 = pnand %p443_p0, %p157_p2 }
   0x6   : > { %p199_p4 = scmp.lt.s32.totalorder (!%p158_p3), %s515_s9, 3 }
   0x7   : > { %161 = sbr.rel (%p158_p3) target bundleno = 224 (0xe0), region = 28 }
   0xc   : > { %s584_s9 = smov (!%p199_p4, %s515_s9), 3  ;;  %vm260_vm0 = vcmask 261120   ;;  %vm316_vm1 = vcmask 269312  }
   0xd   : > { %s458_s13 = sshll.u32 %s584_s9, 4  ;;  %s460_s20 = sshll.u32 %s584_s9, 5 }
   0xe   : > { %s215_s16 = scalar_lea.vmem %s577_s1, %s458_s13  ;;  %s206_s19 = scalar_lea.vmem %s576_s0, %s458_s13 }
   0xf   : > { %v497_v0 = vld [vmem:[%s215_s16 + $0x8] sm:$0xff]   ;;  %v498_v1 = vld [vmem:[%s215_s16] sm:$0xff]   ;;  %s227_s23 = scalar_lea.vmem %s578_s2, %s460_s20 }
  0x10   : > { %465 = vmatprep.subr.bf16.mxu0 %v497_v0  ;;  %v499_v2 = vld [vmem:[%s206_s19] sm:$0xff]   ;;  %v500_v3 = vld [vmem:[%s206_s19 + $0x8] sm:$0xff]  }
  0x11   : > { %466 = vmatpush3.bf16.msra.mxu0 %v497_v0  ;;  %469 = vmatprep.mubr.msk.bf16.mxu0 %vm260_vm0, %v499_v2 }
  0x12   : > { %467 = vmatprep.subr.bf16.mxu0 %v498_v1 }
  0x15   : > { %468 = vmatpush3.bf16.msra.mxu0 %v498_v1 }
  0x18   : > { %470 = vmatmul.mubr.msk.bf16.vlgmr.msra.gmra.mxu0 %vm260_vm0, %v500_v3 }
  0xd8   : > { %v471_v4 = vpop.f32.mrf.mxu0 }
  0xd9   : > { %319 = vst.msk [vmem:[%s227_s23 + $0x10] sm:$0xff] %vm316_vm1, %v471_v4 }
  0xda   : > { %v301_v5 = vpop.f32.mrf.mxu0 }
  0xdb   : > { %317 = vst.msk [vmem:[%s227_s23] sm:$0xff] %vm316_vm1, %v301_v5 }
  0xdc   : > { %v472_v6 = vpop.f32.mrf.mxu0 }
  0xdd   : > { %320 = vst.msk [vmem:[%s227_s23 + $0x18] sm:$0xff] %vm316_vm1, %v472_v6 }
  0xde   : > { %v304_v7 = vpop.f32.mrf.mxu0 }
  0xdf   : > { %318 = vst.msk [vmem:[%s227_s23 + $0x8] sm:$0xff] %vm316_vm1, %v304_v7 }
  0xe0 PF: > { %s12_s11 = sadd.s32 1, %s523_s11   ;;  %s579_s9 = smov %s519_s10 }
  0xe1   : > { %p9_p5 = scmp.ge.s32.totalorder %s12_s11, 6   ;;  %s580_s10 = smov %s582_s12 }
  0xe3   :  { %11 = sbr.rel (!%p9_p5) target bundleno = 2 (0x2), region = 61 }

// kernel: afd_forward.22
= control target key start
LH: loop header
LB: loop body
LE: loop exit
PB: predicated region body
PF: predicated region fallthrough
CT: control target
= control target key end

     0   :  { %s511_s9 = smov 0   ;;  %s513_s10 = smov 0   ;;  %s547_s0 = inlined_call_operand.vmem [shape: bf16[4,32,1], index: 0, kind: input, shape index: {}]   ;;  %s548_s1 = inlined_call_operand.vmem [shape: bf16[4,1,32], index: 1, kind: input, shape index: {}]   ;;  %s549_s2 = inlined_call_operand.vmem [shape: f32[4,32,32], index: 2, kind: output, shape index: {}]  }
   0x1   :  { %s515_s11 = smov 0  }
   0x2 LB: > { %s31_s12 = sadd.s32 1, %s489_s10  ;;  %p422_p0 = scmp.ge.s32.totalorder %s493_s11, 1  ;;  %s493_s11 = sphi %s515_s11, %s12_s11   ;;  %s489_s10 = sphi %s513_s10, %s551_s10   ;;  %s485_s9 = sphi %s511_s9, %s550_s9  }
   0x3   : > { %p33_p1 = scmp.ge.s32.totalorder %s31_s12, 4  ;;  %p155_p2 = scmp.lt.s32.totalorder %s493_s11, 5 }
   0x5   : > { %s553_s12 = smov (%p33_p1, %s31_s12), 0  ;;  %p156_p3 = pnand %p422_p0, %p155_p2 }
   0x6   : > { %p195_p4 = scmp.lt.s32.totalorder (!%p156_p3), %s485_s9, 3 }
   0x7   : > { %159 = sbr.rel (%p156_p3) target bundleno = 221 (0xdd), region = 28 }
   0xc   : > { %vm246_vm0 = vcmask 1040384   ;;  %s555_s9 = smov (!%p195_p4, %s485_s9), 3  ;;  %v495_v0 = vmov 0   ;;  %vm239_vm1 = vcmask 7168   ;;  %vm301_vm2 = vcmask 261120  }
   0xd   : > { %v248_v1 = vsel %vm246_vm0, 65535, %v495_v0  ;;  %s209_s15 = scalar_lea.vmem %s548_s1, %s555_s9  ;;  %s433_s16 = sshll.u32 %s555_s9, 4 }
   0xe   : > { %v228_v2 = vld [vmem:[%s209_s15] sm:$0x1]  ;;  %s202_s19 = scalar_lea.vmem %s547_s0, %s433_s16  ;;  %s434_s20 = sshll.u32 %s555_s9, 5 }
   0xf   : > { %v250_v3 = vand.u32 %v248_v1, %v228_v2  ;;  %v469_v4 = vld [vmem:[%s202_s19] sm:$0xff]   ;;  %v470_v5 = vld [vmem:[%s202_s19 + $0x8] sm:$0xff]   ;;  %s221_s23 = scalar_lea.vmem %s549_s2, %s434_s20 }
  0x10   : > { %440 = vmatprep.mubr.msk.bf16.mxu0 %vm239_vm1, %v469_v4 }
  0x11   : > { %438 = vmatprep.subr.bf16.mxu0 %v250_v3 }
  0x12   : > { %439 = vmatpush3.bf16.msra.mxu0 %v250_v3 }
  0x15   : > { %441 = vmatmul.mubr.msk.bf16.vlgmr.msra.gmra.mxu0 %vm239_vm1, %v470_v5 }
  0xd5   : > { %v442_v6 = vpop.f32.mrf.mxu0 }
  0xd6   : > { %304 = vst.msk [vmem:[%s221_s23 + $0x10] sm:$0xff] %vm301_vm2, %v442_v6 }
  0xd7   : > { %v286_v7 = vpop.f32.mrf.mxu0 }
  0xd8   : > { %302 = vst.msk [vmem:[%s221_s23] sm:$0xff] %vm301_vm2, %v286_v7 }
  0xd9   : > { %v443_v8 = vpop.f32.mrf.mxu0 }
  0xda   : > { %305 = vst.msk [vmem:[%s221_s23 + $0x18] sm:$0xff] %vm301_vm2, %v443_v8 }
  0xdb   : > { %v289_v9 = vpop.f32.mrf.mxu0 }
  0xdc   : > { %303 = vst.msk [vmem:[%s221_s23 + $0x8] sm:$0xff] %vm301_vm2, %v289_v9 }
  0xdd PF: > { %s12_s11 = sadd.s32 1, %s493_s11   ;;  %s550_s9 = smov %s489_s10 }
  0xde   : > { %p9_p5 = scmp.ge.s32.totalorder %s12_s11, 6   ;;  %s551_s10 = smov %s553_s12 }
  0xe0   :  { %11 = sbr.rel (!%p9_p5) target bundleno = 2 (0x2), region = 61 }

// kernel: afd_forward.24
= control target key start
LH: loop header
LB: loop body
LE: loop exit
PB: predicated region body
PF: predicated region fallthrough
CT: control target
= control target key end

     0   :  { %vm21_vm0 = vcmask 261120   ;;  %s274_s0 = inlined_call_operand.vmem [shape: f32[32,32], index: 0, kind: input, shape index: {}]   ;;  %s275_s1 = inlined_call_operand.vmem [shape: f32[32,32], index: 1, kind: input, shape index: {}]   ;;  %s276_s2 = inlined_call_operand.vmem [shape: f32[1,32], index: 2, kind: input, shape index: {}]   ;;  %s277_s3 = inlined_call_operand.vmem [shape: f32[1,32], index: 3, kind: input, shape index: {}]   ;;  %s278_s4 = inlined_call_operand.vmem [shape: f32[32,32], index: 4, kind: output, shape index: {}]  }
   0x1   :  { %v17_v0 = vld [vmem:[%s274_s0] sm:$0xff]  ;;  %v19_v1 = vld [vmem:[%s274_s0 + $0x10] sm:$0xff]  ;;  %v18_v2 = vld [vmem:[%s274_s0 + $0x8] sm:$0xff] }
   0x2   :  { %v22_v3 = vsel %vm21_vm0, %v17_v0, 0.0  ;;  %v28_v4 = vsel %vm21_vm0, %v19_v1, 0.0  ;;  %v20_v5 = vld [vmem:[%s274_s0 + $0x18] sm:$0xff]  ;;  %v25_v6 = vsel %vm21_vm0, %v18_v2, 0.0  ;;  %v97_v28 = vld [vmem:[%s275_s1] sm:$0xff]  ;;  %v98_v30 = vld [vmem:[%s275_s1 + $0x8] sm:$0xff] }
   0x3   :  { %23 = vadd.xlane.f32.xlu0 %v22_v3  ;;  %29 = vadd.xlane.f32.xlu1 %v28_v4  ;;  %v31_v7 = vsel %vm21_vm0, %v20_v5, 0.0  ;;  %v101_v29 = vsub.f32 0.0, %v97_v28  ;;  %v237_v31 = vld [vmem:[%s275_s1 + $0x10] sm:$0xff]  ;;  %v102_v32 = vsub.f32 0.0, %v98_v30  ;;  %v243_v35 = vld [vmem:[%s275_s1 + $0x18] sm:$0xff] }
   0x4   :  { %v103_v34 = vsub.f32 0.0, %v237_v31  ;;  %v104_v38 = vsub.f32 0.0, %v243_v35  ;;  %v141_v62 = vld [vmem:[%s276_s2] ss:$0 sm:$0xff] }
   0x5   :  { %v105_v33 = vmul.f32 1.442695, %v101_v29  ;;  %v107_v36 = vmul.f32 1.442695, %v102_v32 }
   0x6   :  { %v109_v37 = vmul.f32 1.442695, %v103_v34  ;;  %v111_v39 = vmul.f32 1.442695, %v104_v38 }
   0x7   :  { %26 = vadd.xlane.f32.xlu0 %v25_v6  ;;  %32 = vadd.xlane.f32.xlu1 %v31_v7  ;;  %143 = vpow2.f32 %v105_v33 }
   0x8   :  { %145 = vpow2.f32 %v107_v36 }
   0x9   :  { %147 = vpow2.f32 %v109_v37 }
   0xa   :  { %149 = vpow2.f32 %v111_v39 }
  0x14   :  { %v144_v40 = vpop.eup %143 }
  0x15   :  { %v146_v41 = vpop.eup %145  ;;  %v113_v42 = vadd.f32 1.0, %v144_v40 }
  0x16   :  { %v148_v44 = vpop.eup %147  ;;  %v114_v47 = vadd.f32 1.0, %v146_v41 }
  0x17   :  { %151 = vrcp.f32 %v113_v42  ;;  %v115_v49 = vadd.f32 1.0, %v148_v44  ;;  %v150_v51 = vpop.eup %149 }
  0x18   :  { %v116_v56 = vadd.f32 1.0, %v150_v51 }
  0x24   :  { %v152_v60 = vpop.eup %151 }
  0x25   :  { %v125_v3 = vmul.f32 %v152_v60, %v97_v28 }
  0x8c   :  { %v24_v8 = vpop.xlane.xlu0 %23  ;;  %v30_v9 = vpop.xlane.xlu1 %29 }
  0x8d   :  { %v35_v10 = vmul.f32 0.03125, %v24_v8  ;;  %v37_v11 = vmul.f32 0.03125, %v30_v9 }
  0x8f   :  { %v208_v12 = vsub.f32 %v17_v0, %v35_v10  ;;  %v210_v13 = vsub.f32 %v19_v1, %v37_v11  ;;  %v142_v1 = vld [vmem:[%s277_s3] ss:$0 sm:$0xff] }
  0x90   :  { %v27_v14 = vpop.xlane.xlu0 %26  ;;  %v33_v15 = vpop.xlane.xlu1 %32 }
  0x91   :  { %v36_v16 = vmul.f32 0.03125, %v27_v14  ;;  %v38_v17 = vmul.f32 0.03125, %v33_v15  ;;  %v43_v18 = vmul.f32 %v208_v12, %v208_v12  ;;  %v45_v19 = vmul.f32 %v210_v13, %v210_v13 }
  0x93   :  { %v216_v20 = vsub.f32 %v18_v2, %v36_v16  ;;  %v218_v21 = vsub.f32 %v20_v5, %v38_v17  ;;  %v47_v22 = vsel %vm21_vm0, %v43_v18, 0.0  ;;  %v53_v23 = vsel %vm21_vm0, %v45_v19, 0.0 }
  0x94   :  { %48 = vadd.xlane.f32.xlu0 %v47_v22 }
  0x95   :  { %v44_v24 = vmul.f32 %v216_v20, %v216_v20  ;;  %v46_v25 = vmul.f32 %v218_v21, %v218_v21 }
  0x97   :  { %v50_v26 = vsel %vm21_vm0, %v44_v24, 0.0  ;;  %v56_v27 = vsel %vm21_vm0, %v46_v25, 0.0 }
  0x98   :  { %54 = vadd.xlane.f32.xlu0 %v53_v23  ;;  %51 = vadd.xlane.f32.xlu1 %v50_v26 }
  0x9c   :  { %57 = vadd.xlane.f32.xlu1 %v56_v27 }
 0x11d   :  { %v49_v43 = vpop.xlane.xlu0 %48 }
 0x11e   :  { %v59_v45 = vmul.f32 0.03125, %v49_v43 }
 0x120   :  { %v63_v46 = vadd.f32 1e-05, %v59_v45 }
 0x121   :  { %v52_v48 = vpop.xlane.xlu1 %51  ;;  %v55_v50 = vpop.xlane.xlu0 %54 }
 0x122   :  { %153 = vrsqrt.f32 %v63_v46  ;;  %v60_v52 = vmul.f32 0.03125, %v52_v48  ;;  %v61_v53 = vmul.f32 0.03125, %v55_v50 }
 0x123   :  { %155 = vrcp.f32 %v114_v47 }
 0x124   :  { %v64_v54 = vadd.f32 1e-05, %v60_v52  ;;  %v65_v55 = vadd.f32 1e-05, %v61_v53  ;;  %157 = vrcp.f32 %v115_v49 }
 0x125   :  { %v58_v57 = vpop.xlane.xlu1 %57 }
 0x126   :  { %159 = vrsqrt.f32 %v64_v54  ;;  %v62_v58 = vmul.f32 0.03125, %v58_v57 }
 0x127   :  { %161 = vrsqrt.f32 %v65_v55 }
 0x128   :  { %v66_v59 = vadd.f32 1e-05, %v62_v58  ;;  %163 = vrcp.f32 %v116_v56 }
 0x12a   :  { %165 = vrsqrt.f32 %v66_v59 }
 0x12f   :  { %v154_v61 = vpop.eup %153 }
 0x130   :  { %v71_v63 = vmul.f32 %v154_v61, %v208_v12  ;;  %v156_v0 = vpop.eup %155 }
 0x131   :  { %v158_v2 = vpop.eup %157  ;;  %v126_v14 = vmul.f32 %v156_v0, %v98_v30 }
 0x132   :  { %v82_v4 = vmul.f32 %v141_v62, %v71_v63  ;;  %v127_v16 = vmul.f32 %v158_v2, %v237_v31 }
 0x133   :  { %v160_v5 = vpop.eup %159 }
 0x134   :  { %v162_v6 = vpop.eup %161  ;;  %v93_v7 = vadd.f32 %v142_v1, %v82_v4  ;;  %v72_v8 = vmul.f32 %v160_v5, %v216_v20 }
 0x135   :  { %v73_v9 = vmul.f32 %v162_v6, %v210_v13  ;;  %v164_v10 = vpop.eup %163 }
 0x136   :  { %v129_v11 = vmul.f32 %v125_v3, %v93_v7  ;;  %v83_v15 = vmul.f32 %v141_v62, %v72_v8  ;;  %v128_v13 = vmul.f32 %v164_v10, %v243_v35 }
 0x137   :  { %v166_v12 = vpop.eup %165  ;;  %v84_v17 = vmul.f32 %v141_v62, %v73_v9 }
 0x138   :  { %133 = vst.msk [vmem:[%s278_s4] sm:$0xff] %vm21_vm0, %v129_v11  ;;  %v94_v18 = vadd.f32 %v142_v1, %v83_v15  ;;  %v74_v19 = vmul.f32 %v166_v12, %v218_v21 }
 0x139   :  { %v95_v22 = vadd.f32 %v142_v1, %v84_v17 }
 0x13a   :  { %v130_v20 = vmul.f32 %v126_v14, %v94_v18  ;;  %v85_v23 = vmul.f32 %v141_v62, %v74_v19 }
 0x13b   :  { %v131_v24 = vmul.f32 %v127_v16, %v95_v22 }
 0x13c   :  { %134 = vst.msk [vmem:[%s278_s4 + $0x8] sm:$0xff] %vm21_vm0, %v130_v20  ;;  %v96_v25 = vadd.f32 %v142_v1, %v85_v23 }
 0x13d   :  { %135 = vst.msk [vmem:[%s278_s4 + $0x10] sm:$0xff] %vm21_vm0, %v131_v24 }
 0x13e   :  { %v132_v26 = vmul.f32 %v128_v13, %v96_v25 }
 0x140   :  { %136 = vst.msk [vmem:[%s278_s4 + $0x18] sm:$0xff] %vm21_vm0, %v132_v26 }

// kernel: squeeze.26
= control target key start
LH: loop header
LB: loop body
LE: loop exit
PB: predicated region body
PF: predicated region fallthrough
CT: control target
= control target key end

     0   :  { %vm3_vm0 = vcmask 31744   ;;  %s495_s10 = smov 124   ;;  %s496_s11 = smov 116   ;;  %s677_s0 = inlined_call_operand.vmem [shape: f32[1,32,16], index: 0, kind: input, shape index: {}]   ;;  %s678_s1 = inlined_call_operand.vmem [shape: f32[2,4,4,2,2,4], index: 1, kind: output, shape index: {}]  }
   0x1   :  { %v44_v0 = vld [vmem:[%s677_s0] sm:$0xff]   ;;  %v450_v1 = vld [vmem:[%s677_s0 + $0x8] sm:$0xff]   ;;  %s494_s0 = smov 120   ;;  %s497_s12 = smov 112  }
   0x2   :  { %45 = vrot.lane.b32.xlu1 %v44_v0, %s494_s0  ;;  %20 = vrot.lane.b32.xlu0 %v44_v0, %s495_s10  ;;  %4 = vst.msk [vmem:[#allocation0] ss:$16 sm:$0x3] %vm3_vm0, %v44_v0   ;;  %5 = vst.msk [vmem:[#allocation0] ss:$16 sm:$0xc] %vm3_vm0, %v44_v0  }
   0x3   :  { %6 = vst.msk [vmem:[#allocation0] ss:$16 sm:$0x30] %vm3_vm0, %v44_v0   ;;  %7 = vst.msk [vmem:[#allocation0] ss:$16 sm:$0xc0] %vm3_vm0, %v44_v0  }
   0x4   :  { %12 = vst.msk [vmem:[#allocation0 + $0x80] ss:$16 sm:$0x3] %vm3_vm0, %v450_v1   ;;  %14 = vst.msk [vmem:[#allocation0 + $0x80] ss:$16 sm:$0xc] %vm3_vm0, %v450_v1  }
   0x5   :  { %16 = vst.msk [vmem:[#allocation0 + $0x80] ss:$16 sm:$0x30] %vm3_vm0, %v450_v1   ;;  %18 = vst.msk [vmem:[#allocation0 + $0x80] ss:$16 sm:$0xc0] %vm3_vm0, %v450_v1  }
   0x6   :  { %58 = vrot.lane.b32.xlu1 %v450_v1, %s494_s0  ;;  %33 = vrot.lane.b32.xlu0 %v450_v1, %s495_s10  ;;  %s498_s13 = smov 108   ;;  %s499_s14 = smov 104  }
   0x7   :  { %s500_s15 = smov 100  }
   0xa   :  { %83 = vrot.lane.b32.xlu1 %v450_v1, %s496_s11  ;;  %70 = vrot.lane.b32.xlu0 %v44_v0, %s496_s11 }
   0xe   :  { %108 = vrot.lane.b32.xlu1 %v450_v1, %s497_s12  ;;  %95 = vrot.lane.b32.xlu0 %v44_v0, %s497_s12 }
  0x12   :  { %133 = vrot.lane.b32.xlu1 %v450_v1, %s498_s13  ;;  %120 = vrot.lane.b32.xlu0 %v44_v0, %s498_s13 }
  0x16   :  { %158 = vrot.lane.b32.xlu1 %v450_v1, %s499_s14  ;;  %145 = vrot.lane.b32.xlu0 %v44_v0, %s499_s14 }
  0x1a   :  { %183 = vrot.lane.b32.xlu1 %v450_v1, %s500_s15  ;;  %170 = vrot.lane.b32.xlu0 %v44_v0, %s500_s15 }
  0x74   :  { %v46_v2 = vpop.permute.xlu1 %45   ;;  %v21_v3 = vpop.permute.xlu0 %20  }
  0x75   :  { %49 = vst.msk [vmem:[#allocation0 + $0x2] ss:$16 sm:$0x3] %vm3_vm0, %v46_v2   ;;  %51 = vst.msk [vmem:[#allocation0 + $0x2] ss:$16 sm:$0xc] %vm3_vm0, %v46_v2  }
  0x76   :  { %53 = vst.msk [vmem:[#allocation0 + $0x2] ss:$16 sm:$0x30] %vm3_vm0, %v46_v2   ;;  %55 = vst.msk [vmem:[#allocation0 + $0x2] ss:$16 sm:$0xc0] %vm3_vm0, %v46_v2  }
  0x77   :  { %24 = vst.msk [vmem:[#allocation0 + $0x1] ss:$16 sm:$0x3] %vm3_vm0, %v21_v3   ;;  %26 = vst.msk [vmem:[#allocation0 + $0x1] ss:$16 sm:$0xc] %vm3_vm0, %v21_v3  }
  0x78   :  { %28 = vst.msk [vmem:[#allocation0 + $0x1] ss:$16 sm:$0x30] %vm3_vm0, %v21_v3   ;;  %30 = vst.msk [vmem:[#allocation0 + $0x1] ss:$16 sm:$0xc0] %vm3_vm0, %v21_v3   ;;  %v59_v4 = vpop.permute.xlu1 %58   ;;  %v34_v5 = vpop.permute.xlu0 %33  }
  0x79   :  { %62 = vst.msk [vmem:[#allocation0 + $0x82] ss:$16 sm:$0x3] %vm3_vm0, %v59_v4   ;;  %64 = vst.msk [vmem:[#allocation0 + $0x82] ss:$16 sm:$0xc] %vm3_vm0, %v59_v4  }
  0x7a   :  { %66 = vst.msk [vmem:[#allocation0 + $0x82] ss:$16 sm:$0x30] %vm3_vm0, %v59_v4   ;;  %68 = vst.msk [vmem:[#allocation0 + $0x82] ss:$16 sm:$0xc0] %vm3_vm0, %v59_v4  }
  0x7b   :  { %37 = vst.msk [vmem:[#allocation0 + $0x81] ss:$16 sm:$0x3] %vm3_vm0, %v34_v5   ;;  %39 = vst.msk [vmem:[#allocation0 + $0x81] ss:$16 sm:$0xc] %vm3_vm0, %v34_v5  }
  0x7c   :  { %41 = vst.msk [vmem:[#allocation0 + $0x81] ss:$16 sm:$0x30] %vm3_vm0, %v34_v5   ;;  %43 = vst.msk [vmem:[#allocation0 + $0x81] ss:$16 sm:$0xc0] %vm3_vm0, %v34_v5   ;;  %v84_v6 = vpop.permute.xlu1 %83   ;;  %v71_v7 = vpop.permute.xlu0 %70  }
  0x7d   :  { %87 = vst.msk [vmem:[#allocation0 + $0x83] ss:$16 sm:$0x3] %vm3_vm0, %v84_v6   ;;  %89 = vst.msk [vmem:[#allocation0 + $0x83] ss:$16 sm:$0xc] %vm3_vm0, %v84_v6  }
  0x7e   :  { %91 = vst.msk [vmem:[#allocation0 + $0x83] ss:$16 sm:$0x30] %vm3_vm0, %v84_v6   ;;  %93 = vst.msk [vmem:[#allocation0 + $0x83] ss:$16 sm:$0xc0] %vm3_vm0, %v84_v6  }
  0x7f   :  { %74 = vst.msk [vmem:[#allocation0 + $0x3] ss:$16 sm:$0x3] %vm3_vm0, %v71_v7   ;;  %76 = vst.msk [vmem:[#allocation0 + $0x3] ss:$16 sm:$0xc] %vm3_vm0, %v71_v7  }
  0x80   :  { %78 = vst.msk [vmem:[#allocation0 + $0x3] ss:$16 sm:$0x30] %vm3_vm0, %v71_v7   ;;  %80 = vst.msk [vmem:[#allocation0 + $0x3] ss:$16 sm:$0xc0] %vm3_vm0, %v71_v7   ;;  %v109_v8 = vpop.permute.xlu1 %108   ;;  %v96_v9 = vpop.permute.xlu0 %95  }
  0x81   :  { %112 = vst.msk [vmem:[#allocation0 + $0x88] ss:$16 sm:$0x3] %vm3_vm0, %v109_v8   ;;  %114 = vst.msk [vmem:[#allocation0 + $0x88] ss:$16 sm:$0xc] %vm3_vm0, %v109_v8  }
  0x82   :  { %116 = vst.msk [vmem:[#allocation0 + $0x88] ss:$16 sm:$0x30] %vm3_vm0, %v109_v8   ;;  %118 = vst.msk [vmem:[#allocation0 + $0x88] ss:$16 sm:$0xc0] %vm3_vm0, %v109_v8  }
  0x83   :  { %99 = vst.msk [vmem:[#allocation0 + $0x8] ss:$16 sm:$0x3] %vm3_vm0, %v96_v9   ;;  %101 = vst.msk [vmem:[#allocation0 + $0x8] ss:$16 sm:$0xc] %vm3_vm0, %v96_v9  }
  0x84   :  { %103 = vst.msk [vmem:[#allocation0 + $0x8] ss:$16 sm:$0x30] %vm3_vm0, %v96_v9   ;;  %105 = vst.msk [vmem:[#allocation0 + $0x8] ss:$16 sm:$0xc0] %vm3_vm0, %v96_v9   ;;  %v134_v13 = vpop.permute.xlu1 %133   ;;  %v121_v14 = vpop.permute.xlu0 %120  }
  0x85   :  { %v307_v10 = vld [vmem:[#allocation0 + $0x80] sm:$0xf]  ;;  %v321_v11 = vld [vmem:[#allocation0 + $0x90] sm:$0xf] }
  0x86   :  { %v335_v12 = vld [vmem:[#allocation0 + $0xa0] sm:$0xf]  ;;  %v349_v15 = vld [vmem:[#allocation0 + $0xb0] sm:$0xf]  ;;  %471 = vst [vmem:[%s678_s1 + $0x40] sm:$0xf] %v307_v10 }
  0x87   :  { %v363_v16 = vld [vmem:[#allocation0 + $0xc0] sm:$0xf]  ;;  %v377_v17 = vld [vmem:[#allocation0 + $0xd0] sm:$0xf]  ;;  %473 = vst [vmem:[%s678_s1 + $0x48] sm:$0xf] %v321_v11 }
  0x88   :  { %475 = vst [vmem:[%s678_s1 + $0x50] sm:$0xf] %v335_v12  ;;  %137 = vst.msk [vmem:[#allocation0 + $0x89] ss:$16 sm:$0x3] %vm3_vm0, %v134_v13   ;;  %v159_v27 = vpop.permute.xlu1 %158   ;;  %v146_v28 = vpop.permute.xlu0 %145  }
  0x89   :  { %139 = vst.msk [vmem:[#allocation0 + $0x89] ss:$16 sm:$0xc] %vm3_vm0, %v134_v13   ;;  %141 = vst.msk [vmem:[#allocation0 + $0x89] ss:$16 sm:$0x30] %vm3_vm0, %v134_v13  }
  0x8a   :  { %143 = vst.msk [vmem:[#allocation0 + $0x89] ss:$16 sm:$0xc0] %vm3_vm0, %v134_v13   ;;  %124 = vst.msk [vmem:[#allocation0 + $0x9] ss:$16 sm:$0x3] %vm3_vm0, %v121_v14  }
  0x8b   :  { %126 = vst.msk [vmem:[#allocation0 + $0x9] ss:$16 sm:$0xc] %vm3_vm0, %v121_v14   ;;  %128 = vst.msk [vmem:[#allocation0 + $0x9] ss:$16 sm:$0x30] %vm3_vm0, %v121_v14  }
  0x8c   :  { %130 = vst.msk [vmem:[#allocation0 + $0x9] ss:$16 sm:$0xc0] %vm3_vm0, %v121_v14   ;;  %v391_v18 = vld [vmem:[#allocation0 + $0xe0] sm:$0xf]  ;;  %v184_v30 = vpop.permute.xlu1 %183   ;;  %v171_v31 = vpop.permute.xlu0 %170  }
  0x8d   :  { %v405_v19 = vld [vmem:[#allocation0 + $0xf0] sm:$0xf]  ;;  %v198_v20 = vld [vmem:[#allocation0] sm:$0xf]  ;;  %477 = vst [vmem:[%s678_s1 + $0x58] sm:$0xf] %v349_v15 }
  0x8e   :  { %479 = vst [vmem:[%s678_s1 + $0x60] sm:$0xf] %v363_v16  ;;  %481 = vst [vmem:[%s678_s1 + $0x68] sm:$0xf] %v377_v17  ;;  %v209_v21 = vld [vmem:[#allocation0 + $0x10] sm:$0xf] }
  0x8f   :  { %v223_v22 = vld [vmem:[#allocation0 + $0x20] sm:$0xf]  ;;  %v237_v23 = vld [vmem:[#allocation0 + $0x30] sm:$0xf]  ;;  %483 = vst [vmem:[%s678_s1 + $0x70] sm:$0xf] %v391_v18 }
  0x90   :  { %485 = vst [vmem:[%s678_s1 + $0x78] sm:$0xf] %v405_v19  ;;  %201 = vst [vmem:[%s678_s1] sm:$0xf] %v198_v20  ;;  %v251_v24 = vld [vmem:[#allocation0 + $0x40] sm:$0xf] }
  0x91   :  { %v265_v25 = vld [vmem:[#allocation0 + $0x50] sm:$0xf]  ;;  %v279_v26 = vld [vmem:[#allocation0 + $0x60] sm:$0xf]  ;;  %457 = vst [vmem:[%s678_s1 + $0x8] sm:$0xf] %v209_v21 }
  0x92   :  { %459 = vst [vmem:[%s678_s1 + $0x10] sm:$0xf] %v223_v22  ;;  %461 = vst [vmem:[%s678_s1 + $0x18] sm:$0xf] %v237_v23  ;;  %v293_v29 = vld [vmem:[#allocation0 + $0x70] sm:$0xf] }
  0x93   :  { %463 = vst [vmem:[%s678_s1 + $0x20] sm:$0xf] %v251_v24  ;;  %465 = vst [vmem:[%s678_s1 + $0x28] sm:$0xf] %v265_v25 }
  0x94   :  { %467 = vst [vmem:[%s678_s1 + $0x30] sm:$0xf] %v279_v26  ;;  %162 = vst.msk [vmem:[#allocation0 + $0x8a] ss:$16 sm:$0x3] %vm3_vm0, %v159_v27  }
  0x95   :  { %164 = vst.msk [vmem:[#allocation0 + $0x8a] ss:$16 sm:$0xc] %vm3_vm0, %v159_v27   ;;  %166 = vst.msk [vmem:[#allocation0 + $0x8a] ss:$16 sm:$0x30] %vm3_vm0, %v159_v27  }
  0x96   :  { %168 = vst.msk [vmem:[#allocation0 + $0x8a] ss:$16 sm:$0xc0] %vm3_vm0, %v159_v27   ;;  %149 = vst.msk [vmem:[#allocation0 + $0xa] ss:$16 sm:$0x3] %vm3_vm0, %v146_v28  }
  0x97   :  { %151 = vst.msk [vmem:[#allocation0 + $0xa] ss:$16 sm:$0xc] %vm3_vm0, %v146_v28   ;;  %153 = vst.msk [vmem:[#allocation0 + $0xa] ss:$16 sm:$0x30] %vm3_vm0, %v146_v28  }
  0x98   :  { %155 = vst.msk [vmem:[#allocation0 + $0xa] ss:$16 sm:$0xc0] %vm3_vm0, %v146_v28   ;;  %469 = vst [vmem:[%s678_s1 + $0x38] sm:$0xf] %v293_v29 }
  0x99   :  { %187 = vst.msk [vmem:[#allocation0 + $0x8b] ss:$16 sm:$0x3] %vm3_vm0, %v184_v30   ;;  %189 = vst.msk [vmem:[#allocation0 + $0x8b] ss:$16 sm:$0xc] %vm3_vm0, %v184_v30  }
  0x9a   :  { %191 = vst.msk [vmem:[#allocation0 + $0x8b] ss:$16 sm:$0x30] %vm3_vm0, %v184_v30   ;;  %193 = vst.msk [vmem:[#allocation0 + $0x8b] ss:$16 sm:$0xc0] %vm3_vm0, %v184_v30  }
  0x9b   :  { %174 = vst.msk [vmem:[#allocation0 + $0xb] ss:$16 sm:$0x3] %vm3_vm0, %v171_v31   ;;  %176 = vst.msk [vmem:[#allocation0 + $0xb] ss:$16 sm:$0xc] %vm3_vm0, %v171_v31  }
  0x9c   :  { %178 = vst.msk [vmem:[#allocation0 + $0xb] ss:$16 sm:$0x30] %vm3_vm0, %v171_v31   ;;  %180 = vst.msk [vmem:[#allocation0 + $0xb] ss:$16 sm:$0xc0] %vm3_vm0, %v171_v31  }
  0xa0   :  { %v314_v32 = vld [vmem:[#allocation0 + $0x88] sm:$0xf]  ;;  %v328_v33 = vld [vmem:[#allocation0 + $0x98] sm:$0xf] }
  0xa1   :  { %v342_v34 = vld [vmem:[#allocation0 + $0xa8] sm:$0xf]  ;;  %472 = vst [vmem:[%s678_s1 + $0x44] sm:$0xf] %v314_v32  ;;  %474 = vst [vmem:[%s678_s1 + $0x4c] sm:$0xf] %v328_v33 }
  0xa2   :  { %476 = vst [vmem:[%s678_s1 + $0x54] sm:$0xf] %v342_v34  ;;  %v356_v35 = vld [vmem:[#allocation0 + $0xb8] sm:$0xf]  ;;  %v370_v36 = vld [vmem:[#allocation0 + $0xc8] sm:$0xf] }
  0xa3   :  { %v384_v37 = vld [vmem:[#allocation0 + $0xd8] sm:$0xf]  ;;  %478 = vst [vmem:[%s678_s1 + $0x5c] sm:$0xf] %v356_v35  ;;  %480 = vst [vmem:[%s678_s1 + $0x64] sm:$0xf] %v370_v36 }
  0xa4   :  { %482 = vst [vmem:[%s678_s1 + $0x6c] sm:$0xf] %v384_v37  ;;  %v398_v38 = vld [vmem:[#allocation0 + $0xe8] sm:$0xf]  ;;  %v412_v39 = vld [vmem:[#allocation0 + $0xf8] sm:$0xf] }
  0xa5   :  { %v203_v40 = vld [vmem:[#allocation0 + $0x8] sm:$0xf]  ;;  %484 = vst [vmem:[%s678_s1 + $0x74] sm:$0xf] %v398_v38  ;;  %486 = vst [vmem:[%s678_s1 + $0x7c] sm:$0xf] %v412_v39 }
  0xa6   :  { %456 = vst [vmem:[%s678_s1 + $0x4] sm:$0xf] %v203_v40  ;;  %v216_v41 = vld [vmem:[#allocation0 + $0x18] sm:$0xf]  ;;  %v230_v42 = vld [vmem:[#allocation0 + $0x28] sm:$0xf] }
  0xa7   :  { %v244_v43 = vld [vmem:[#allocation0 + $0x38] sm:$0xf]  ;;  %458 = vst [vmem:[%s678_s1 + $0xc] sm:$0xf] %v216_v41  ;;  %460 = vst [vmem:[%s678_s1 + $0x14] sm:$0xf] %v230_v42 }
  0xa8   :  { %462 = vst [vmem:[%s678_s1 + $0x1c] sm:$0xf] %v244_v43  ;;  %v258_v44 = vld [vmem:[#allocation0 + $0x48] sm:$0xf]  ;;  %v272_v45 = vld [vmem:[#allocation0 + $0x58] sm:$0xf] }
  0xa9   :  { %v286_v46 = vld [vmem:[#allocation0 + $0x68] sm:$0xf]  ;;  %464 = vst [vmem:[%s678_s1 + $0x24] sm:$0xf] %v258_v44  ;;  %466 = vst [vmem:[%s678_s1 + $0x2c] sm:$0xf] %v272_v45 }
  0xaa   :  { %468 = vst [vmem:[%s678_s1 + $0x34] sm:$0xf] %v286_v46  ;;  %v300_v47 = vld [vmem:[#allocation0 + $0x78] sm:$0xf] }
  0xab   :  { %470 = vst [vmem:[%s678_s1 + $0x3c] sm:$0xf] %v300_v47 }

// kernel: afd_forward.25
= control target key start
LH: loop header
LB: loop body
LE: loop exit
PB: predicated region body
PF: predicated region fallthrough
CT: control target
= control target key end

     0   :  { %vm42_vm0 = vcmask 261120   ;;  %vm98_vm1 = vcmask 130048   ;;  %s168_s1 = inlined_call_operand.vmem [shape: bf16[1,32,16], index: 1, kind: input, shape index: {}]   ;;  %s169_s0 = inlined_call_operand.vmem [shape: bf16[1,32,32], index: 0, kind: input, shape index: {}]   ;;  %s170_s2 = inlined_call_operand.vmem [shape: f32[1,32,16], index: 2, kind: output, shape index: {}]  }
   0x1   :  { %v125_v0 = vld [vmem:[%s168_s1 + $0x8] sm:$0xff]   ;;  %v126_v1 = vld [vmem:[%s168_s1] sm:$0xff]  }
   0x2   :  { %117 = vmatprep.subr.bf16.mxu0 %v125_v0  ;;  %v127_v2 = vld [vmem:[%s169_s0] sm:$0xff]   ;;  %v128_v3 = vld [vmem:[%s169_s0 + $0x8] sm:$0xff]  }
   0x3   :  { %118 = vmatpush3.bf16.msra.mxu0 %v125_v0  ;;  %121 = vmatprep.mubr.msk.bf16.mxu0 %vm42_vm0, %v127_v2 }
   0x4   :  { %119 = vmatprep.subr.bf16.mxu0 %v126_v1 }
   0x7   :  { %120 = vmatpush3.bf16.msra.mxu0 %v126_v1 }
   0xa   :  { %122 = vmatmul.mubr.msk.bf16.vlgmr.msra.gmra.mxu0 %vm42_vm0, %v128_v3 }
  0xca   :  { %v123_v4 = vpop.f32.mrf.mxu0 }
  0xcb   :  { %101 = vst.msk [vmem:[%s170_s2 + $0x10] sm:$0xff] %vm98_vm1, %v123_v4 }
  0xcc   :  { %v83_v5 = vpop.f32.mrf.mxu0 }
  0xcd   :  { %99 = vst.msk [vmem:[%s170_s2] sm:$0xff] %vm98_vm1, %v83_v5 }
  0xce   :  { %v124_v6 = vpop.f32.mrf.mxu0 }
  0xcf   :  { %102 = vst.msk [vmem:[%s170_s2 + $0x18] sm:$0xff] %vm98_vm1, %v124_v6 }
  0xd0   :  { %v86_v7 = vpop.f32.mrf.mxu0 }
  0xd1   :  { %100 = vst.msk [vmem:[%s170_s2 + $0x8] sm:$0xff] %vm98_vm1, %v86_v7 }

// kernel: afd_forward.23
= control target key start
LH: loop header
LB: loop body
LE: loop exit
PB: predicated region body
PF: predicated region fallthrough
CT: control target
= control target key end

     0   :  { %s2347_s24 = smov 0   ;;  %s2349_s25 = smov 0   ;;  %s2885_s0 = inlined_call_operand.vmem [shape: f32[2,4,16,32], index: 0, kind: input, shape index: {}]   ;;  %s2886_s1 = inlined_call_operand.vmem [shape: f32[2,4,16,32], index: 1, kind: input, shape index: {}]   ;;  %s2887_s2 = inlined_call_operand.vmem [shape: f32[2,4,16,16], index: 2, kind: input, shape index: {}]   ;;  %s2888_s3 = inlined_call_operand.vmem [shape: f32[2,4,16,16], index: 3, kind: input, shape index: {}]   ;;  %s2889_s4 = inlined_call_operand.vmem [shape: f32[4,16,32], index: 4, kind: input, shape index: {}]   ;;  %s2890_s5 = inlined_call_operand.vmem [shape: f32[4,1,32], index: 5, kind: input, shape index: {}]   ;;  %s2891_s6 = inlined_call_operand.vmem [shape: f32[4,1,32], index: 6, kind: input, shape index: {}]   ;;  %s2892_s7 = inlined_call_operand.vmem [shape: f32[2,4,16,32], index: 7, kind: output, shape index: {}]  }
   0x1   :  { %s2351_s26 = smov 0   ;;  %s2353_s27 = smov 0  }
   0x2   :  { %s2355_s28 = smov 0  }
   0x3 LB: > { %s32_s29 = sadd.s32 1, %s2283_s26  ;;  %s36_s30 = sadd.s32 1, %s2287_s27  ;;  %s2291_s28 = sphi %s2355_s28, %s17_s28   ;;  %s2287_s27 = sphi %s2353_s27, %s2896_s27   ;;  %s2283_s26 = sphi %s2351_s26, %s2895_s26   ;;  %s2279_s25 = sphi %s2349_s25, %s2894_s25   ;;  %s2275_s24 = sphi %s2347_s24, %s2893_s24  }
   0x4   : > { %p34_p0 = scmp.ge.s32.totalorder %s32_s29, 4  ;;  %p2079_p1 = scmp.ge.s32.totalorder %s2291_s28, 1 }
   0x5   : > { %p368_p2 = scmp.lt.s32.totalorder %s2291_s28, 9 }
   0x6   : > { %s2898_s29 = smov (%p34_p0, %s32_s29), 0  ;;  %s2900_s30 = smov (!%p34_p0, %s36_s30), %s2287_s27 }
   0x7   : > { %p369_p3 = pnand %p2079_p1, %p368_p2  ;;  %p38_p4 = scmp.ge.s32.totalorder %s2900_s30, 2 }
   0x8   : > { %p467_p5 = scmp.lt.s32.totalorder (!%p369_p3), %s2279_s25, 1  ;;  %p469_p6 = scmp.lt.s32.totalorder (!%p369_p3), %s2275_s24, 3 }
   0x9   : > { %s2902_s30 = smov (%p38_p4, %s2900_s30), 0  ;;  %372 = sbr.rel (%p369_p3) target bundleno = 403 (0x193), region = 48 }
   0xa   : > { %s2301_s19 = smov (!%p369_p3), 0  }
   0xe   : > { %v598_v0 = vlaneseq  ;;  %s2904_s25 = smov (!%p467_p5, %s2279_s25), 1  ;;  %s2906_s24 = smov (!%p469_p6, %s2275_s24), 3  ;;  %v2305_v40 = vmov 1966171168   ;;  %vm551_vm0 = vcmask 261120   ;;  %v2306_v55 = vmov 0.0  }
   0xf   : > { %s2081_s8 = sshll.u32 %s2904_s25, 3  ;;  %s2080_s9 = sshll.u32 %s2906_s24, 1  ;;  %v596_v41 = vunpack.c.l.s4 %v2305_v40  ;;  %552 = vst.msk [vmem:[#allocation2] sm:$0xff] %vm551_vm0, %v2306_v55  ;;  %553 = vst.msk [vmem:[#allocation2 + $0x8] sm:$0xff] %vm551_vm0, %v2306_v55 }
  0x10   : > { %v2377_v1 = vshrl.u32 %v598_v0, 7  ;;  %s476_s10 = sadd.s32 %s2081_s8, %s2080_s9  ;;  %s529_s14 = scalar_lea.vmem %s2890_s5, %s2906_s24 }
  0x11   : > { %s2388_s11 = sshll.u32 %s476_s10, 3  ;;  %v2400_v4 = vld [vmem:[%s529_s14] ss:$0 sm:$0xff]  ;;  %s532_s20 = scalar_lea.vmem %s2891_s6, %s2906_s24  ;;  %v597_v43 = vunpack.c.0.s8 %v596_v41 }
  0x12   : > { %v2383_v2 = vsub.s32 0, %v2377_v1  ;;  %v2386_v3 = vsub.s32 1, %v2377_v1  ;;  %s2398_s17 = scalar_lea.vmem %s2887_s2, %s2388_s11  ;;  %s492_s23 = scalar_lea.vmem %s2886_s1, %s2388_s11  ;;  %v2097_v8 = vld [vmem:[%s532_s20] ss:$0 sm:$0xff]  ;;  %v2414_v11 = vsub.s32 2, %v2377_v1  ;;  %v2422_v15 = vsub.s32 3, %v2377_v1 }
  0x13   : > { %v560_v5 = vld [vmem:[%s2398_s17] sm:$0xff]  ;;  %v565_v10 = vld [vmem:[%s492_s23 + $0x8] sm:$0xff]  ;;  %v2428_v21 = vsub.s32 4, %v2377_v1  ;;  %v2432_v25 = vsub.s32 5, %v2377_v1  ;;  %v2436_v27 = vsub.s32 6, %v2377_v1  ;;  %s520_s9 = scalar_lea.vmem %s2888_s3, %s2388_s11  ;;  %s2446_s13 = scalar_lea.vmem %s2892_s7, %s2388_s11  ;;  %v2454_v31 = vsub.s32 7, %v2377_v1 }
  0x14   : > { %v1017_v6 = vrot.slane %v560_v5, %v2386_v3  ;;  %v1006_v7 = vrot.slane %v560_v5, %v2383_v2  ;;  %v564_v9 = vld [vmem:[%s492_s23] sm:$0xff]  ;;  %v2418_v13 = vadd.f32 %v2097_v8, %v565_v10  ;;  %v1028_v14 = vrot.slane %v560_v5, %v2414_v11  ;;  %v2450_v29 = vld [vmem:[%s520_s9 + $0x8] sm:$0xff]  ;;  %s478_s16 = scalar_lea.vmem %s2885_s0, %s2388_s11  ;;  %s2102_s11 = sshll.u32 %s2906_s24, 4 }
  0x15   : > { %v2416_v12 = vadd.f32 %v2097_v8, %v564_v9  ;;  %v1039_v20 = vrot.slane %v560_v5, %v2422_v15  ;;  %v1050_v24 = vrot.slane %v560_v5, %v2428_v21  ;;  %v1061_v26 = vrot.slane %v560_v5, %v2432_v25  ;;  %v2448_v28 = vld [vmem:[%s520_s9] sm:$0xff]  ;;  %v2458_v36 = vld [vmem:[%s2398_s17 + $0x8] sm:$0xff]  ;;  %s526_s24 = scalar_lea.vmem %s2889_s4, %s2102_s11 }
  0x16   : > { %1019 = vbcast.lane.b32.xlu1 %v1017_v6, 256  ;;  %1008 = vbcast.lane.b32.xlu0 %v1006_v7, 256  ;;  %v577_v17 = vand.u32 2147483647, %v2418_v13  ;;  %v1072_v30 = vrot.slane %v560_v5, %v2436_v27  ;;  %v1083_v34 = vrot.slane %v560_v5, %v2454_v31  ;;  %v1094_v38 = vrot.slane %v2458_v36, %v2383_v2  ;;  %v2474_v50 = vld [vmem:[%s478_s16] sm:$0xff]  ;;  %v2479_v54 = vld [vmem:[%s478_s16 + $0x8] sm:$0xff] }
  0x17   : > { %v576_v16 = vand.u32 2147483647, %v2416_v12  ;;  %v1105_v39 = vrot.slane %v2458_v36, %v2386_v3  ;;  %v1116_v42 = vrot.slane %v2458_v36, %v2414_v11  ;;  %v574_v44 = vmax.f32 %v2416_v12, 0.0  ;;  %v2506_v8 = vld [vmem:[%s526_s24] sm:$0xff] }
  0x18   : > { %v579_v19 = vsub.f32 0.0, %v577_v17  ;;  %v575_v46 = vmax.f32 %v2418_v13, 0.0  ;;  %v1127_v48 = vrot.slane %v2458_v36, %v2422_v15  ;;  %v2477_v52 = vsub.s32 %v597_v43, %v2377_v1  ;;  %v2512_v13 = vld [vmem:[#allocation2] sm:$0xff]  }
  0x19   : > { %v578_v18 = vsub.f32 0.0, %v576_v16  ;;  %v1138_v56 = vrot.slane %v2458_v36, %v2428_v21  ;;  %v1149_v5 = vrot.slane %v2458_v36, %v2432_v25  ;;  %v2516_v16 = vld [vmem:[%s526_s24 + $0x8] sm:$0xff] }
  0x1a   : > { %1023 = vbcast.lane.b32.xlu1 %v1017_v6, 264  ;;  %1012 = vbcast.lane.b32.xlu0 %v1006_v7, 264  ;;  %v582_v23 = vmul.f32 1.442695, %v579_v19 }
  0x1b   : > { %v580_v22 = vmul.f32 1.442695, %v578_v18 }
  0x1d   : > { %2169 = vpow2.f32 %v580_v22 }
  0x1e   : > { %1034 = vbcast.lane.b32.xlu1 %v1028_v14, 264  ;;  %1030 = vbcast.lane.b32.xlu0 %v1028_v14, 256  ;;  %2171 = vpow2.f32 %v582_v23  ;;  %v2514_v14 = vld [vmem:[#allocation2 + $0x8] sm:$0xff]  }
  0x22   : > { %1045 = vbcast.lane.b32.xlu1 %v1039_v20, 264  ;;  %1041 = vbcast.lane.b32.xlu0 %v1039_v20, 256 }
  0x26   : > { %1056 = vbcast.lane.b32.xlu1 %v1050_v24, 264  ;;  %1052 = vbcast.lane.b32.xlu0 %v1050_v24, 256  ;;  %v1160_v24 = vrot.slane %v2458_v36, %v2436_v27 }
  0x2a   : > { %1067 = vbcast.lane.b32.xlu1 %v1061_v26, 264  ;;  %1063 = vbcast.lane.b32.xlu0 %v1061_v26, 256  ;;  %v2170_v32 = vpop.eup %2169 }
  0x2b   : > { %v2172_v33 = vpop.eup %2171  ;;  %v584_v35 = vadd.f32 1.0, %v2170_v32  ;;  %v1171_v32 = vrot.slane %v2458_v36, %v2454_v31 }
  0x2c   : > { %v585_v37 = vadd.f32 1.0, %v2172_v33 }
  0x2d   : > { %2173 = vlog2.f32 %v584_v35 }
  0x2e   : > { %1078 = vbcast.lane.b32.xlu1 %v1072_v30, 264  ;;  %1074 = vbcast.lane.b32.xlu0 %v1072_v30, 256  ;;  %2175 = vlog2.f32 %v585_v37 }
  0x32   : > { %1089 = vbcast.lane.b32.xlu1 %v1083_v34, 264  ;;  %1085 = vbcast.lane.b32.xlu0 %v1083_v34, 256 }
  0x36   : > { %1100 = vbcast.lane.b32.xlu1 %v1094_v38, 264  ;;  %1096 = vbcast.lane.b32.xlu0 %v1094_v38, 256 }
  0x3a   : > { %1111 = vbcast.lane.b32.xlu1 %v1105_v39, 264  ;;  %1107 = vbcast.lane.b32.xlu0 %v1105_v39, 256  ;;  %v2174_v45 = vpop.eup %2173 }
  0x3b   : > { %v2176_v47 = vpop.eup %2175  ;;  %v587_v49 = vmul.f32 0.6931472, %v2174_v45 }
  0x3c   : > { %v589_v51 = vmul.f32 0.6931472, %v2176_v47 }
  0x3d   : > { %v590_v53 = vadd.f32 %v587_v49, %v574_v44 }
  0x3e   : > { %1122 = vbcast.lane.b32.xlu1 %v1116_v42, 264  ;;  %1118 = vbcast.lane.b32.xlu0 %v1116_v42, 256  ;;  %v2486_v57 = vadd.f32 %v589_v51, %v575_v46 }
  0x3f   : > { %v594_v58 = vcombine.high %v590_v53, %v590_v53  ;;  %v601_v59 = vrot.slane %v590_v53, %v2477_v52  ;;  %v2490_v60 = vmul.f32 %v590_v53, %v2474_v50 }
  0x40   : > { %v2494_v61 = vmul.f32 %v2486_v57, %v2479_v54  ;;  %v650_v23 = vrot.slane %v2486_v57, %v2477_v52  ;;  %v643_v40 = vcombine.high %v2486_v57, %v2486_v57 }
  0x41   : > { %v608_v62 = vrot.slane %v594_v58, %v2477_v52  ;;  %v609_v63 = vcombine.high %v601_v59, %v601_v59  ;;  %v617_v0 = vrot.slane %v601_v59, %v2477_v52  ;;  %v912_v1 = vrot.slane %v2490_v60, %v2477_v52 }
  0x42   : > { %1133 = vbcast.lane.b32.xlu1 %v1127_v48, 264  ;;  %1129 = vbcast.lane.b32.xlu0 %v1127_v48, 256  ;;  %v905_v36 = vcombine.high %v2490_v60, %v2490_v60  ;;  %v658_v43 = vcombine.high %v650_v23, %v650_v23 }
  0x43   : > { %v610_v6 = vcombine.high %v608_v62, %v608_v62  ;;  %v631_v7 = vrot.slane %v609_v63, %v2477_v52  ;;  %v639_v9 = vcombine.high %v617_v0, %v617_v0  ;;  %v695_v10 = vrot.slane %v617_v0, %v2383_v2 }
  0x44   : > { %v2510_v12 = vrot.slane %v912_v1, %v2477_v52  ;;  %v624_v17 = vrot.slane %v608_v62, %v2477_v52  ;;  %v920_v47 = vcombine.high %v912_v1, %v912_v1 }
  0x45   : > { %v641_v18 = vcombine.high %v631_v7, %v631_v7  ;;  %v699_v19 = vrot.slane %v631_v7, %v2383_v2  ;;  %v638_v20 = vrot.slane %v610_v6, %v2477_v52  ;;  %v703_v22 = vrot.slane %v639_v9, %v2383_v2 }
  0x46   : > { %1144 = vbcast.lane.b32.xlu1 %v1138_v56, 264  ;;  %1140 = vbcast.lane.b32.xlu0 %v1138_v56, 256  ;;  %v772_v30 = vmul.f32 %v695_v10, %v2506_v8  ;;  %v773_v33 = vmul.f32 %v695_v10, %v2516_v16  ;;  %v640_v37 = vcombine.high %v624_v17, %v624_v17 }
  0x47   : > { %v707_v26 = vrot.slane %v641_v18, %v2383_v2  ;;  %v774_v34 = vmul.f32 %v699_v19, %v2506_v8  ;;  %v775_v35 = vmul.f32 %v699_v19, %v2516_v16  ;;  %v711_v38 = vrot.slane %v624_v17, %v2383_v2 }
  0x48   : > { %v776_v39 = vmul.f32 %v703_v22, %v2506_v8  ;;  %v642_v41 = vcombine.high %v638_v20, %v638_v20  ;;  %v777_v42 = vmul.f32 %v703_v22, %v2516_v16  ;;  %v715_v44 = vrot.slane %v638_v20, %v2383_v2 }
  0x49   : > { %v778_v45 = vmul.f32 %v707_v26, %v2506_v8  ;;  %v804_v46 = vmul.f32 1.442695, %v772_v30  ;;  %v779_v48 = vmul.f32 %v707_v26, %v2516_v16  ;;  %v806_v49 = vmul.f32 1.442695, %v773_v33 }
  0x4a   : > { %1155 = vbcast.lane.b32.xlu1 %v1149_v5, 264  ;;  %1151 = vbcast.lane.b32.xlu0 %v1149_v5, 256  ;;  %v808_v51 = vmul.f32 1.442695, %v774_v34  ;;  %v810_v53 = vmul.f32 1.442695, %v775_v35  ;;  %v719_v55 = vrot.slane %v640_v37, %v2383_v2  ;;  %v780_v56 = vmul.f32 %v711_v38, %v2506_v8 }
  0x4b   : > { %2177 = vpow2.f32 %v804_v46  ;;  %v812_v57 = vmul.f32 1.442695, %v776_v39  ;;  %v723_v58 = vrot.slane %v642_v41, %v2383_v2  ;;  %v781_v59 = vmul.f32 %v711_v38, %v2516_v16 }
  0x4c   : > { %2179 = vpow2.f32 %v806_v49  ;;  %v814_v60 = vmul.f32 1.442695, %v777_v42  ;;  %v782_v62 = vmul.f32 %v715_v44, %v2506_v8  ;;  %v816_v63 = vmul.f32 1.442695, %v778_v45 }
  0x4d   : > { %2181 = vpow2.f32 %v808_v51  ;;  %v2549_v0 = vrot.slane %v920_v47, %v2477_v52  ;;  %v783_v1 = vmul.f32 %v715_v44, %v2516_v16  ;;  %v818_v5 = vmul.f32 1.442695, %v779_v48 }
  0x4e   : > { %1166 = vbcast.lane.b32.xlu1 %v1160_v24, 264  ;;  %1162 = vbcast.lane.b32.xlu0 %v1160_v24, 256  ;;  %2183 = vpow2.f32 %v810_v53  ;;  %v666_v6 = vrot.slane %v650_v23, %v2477_v52  ;;  %v784_v7 = vmul.f32 %v719_v55, %v2506_v8  ;;  %v785_v9 = vmul.f32 %v719_v55, %v2516_v16 }
  0x4f   : > { %2185 = vpow2.f32 %v812_v57  ;;  %v820_v10 = vmul.f32 1.442695, %v780_v56  ;;  %v786_v17 = vmul.f32 %v723_v58, %v2506_v8  ;;  %v822_v18 = vmul.f32 1.442695, %v781_v59 }
  0x50   : > { %2187 = vpow2.f32 %v814_v60  ;;  %v919_v19 = vrot.slane %v905_v36, %v2477_v52  ;;  %v824_v20 = vmul.f32 1.442695, %v782_v62  ;;  %v657_v22 = vrot.slane %v643_v40, %v2477_v52 }
  0x51   : > { %2189 = vpow2.f32 %v816_v63  ;;  %v680_v24 = vrot.slane %v658_v43, %v2477_v52  ;;  %v787_v23 = vmul.f32 %v723_v58, %v2516_v16  ;;  %v826_v26 = vmul.f32 1.442695, %v783_v1 }
  0x52   : > { %1177 = vbcast.lane.b32.xlu1 %v1171_v32, 264  ;;  %1173 = vbcast.lane.b32.xlu0 %v1171_v32, 256  ;;  %2191 = vpow2.f32 %v818_v5  ;;  %v2561_v30 = vrot.slane %v919_v19, %v2477_v52  ;;  %v828_v32 = vmul.f32 1.442695, %v784_v7  ;;  %v921_v33 = vcombine.high %v919_v19, %v919_v19 }
  0x53   : > { %2193 = vpow2.f32 %v820_v10  ;;  %v830_v34 = vmul.f32 1.442695, %v785_v9  ;;  %v832_v35 = vmul.f32 1.442695, %v786_v17  ;;  %v688_v37 = vcombine.high %v666_v6, %v666_v6 }
  0x54   : > { %2195 = vpow2.f32 %v822_v18  ;;  %v2564_v38 = vrot.slane %v921_v33, %v2477_v52  ;;  %v659_v39 = vcombine.high %v657_v22, %v657_v22  ;;  %v690_v40 = vcombine.high %v680_v24, %v680_v24 }
  0x55   : > { %2197 = vpow2.f32 %v824_v20  ;;  %v834_v41 = vmul.f32 1.442695, %v787_v23  ;;  %v727_v42 = vrot.slane %v666_v6, %v2383_v2  ;;  %v731_v36 = vrot.slane %v680_v24, %v2383_v2 }
  0x56   : > { %2199 = vpow2.f32 %v826_v26  ;;  %v673_v44 = vrot.slane %v657_v22, %v2477_v52  ;;  %v735_v45 = vrot.slane %v688_v37, %v2383_v2  ;;  %v687_v47 = vrot.slane %v659_v39, %v2477_v52 }
  0x57   : > { %2201 = vpow2.f32 %v828_v32  ;;  %v739_v48 = vrot.slane %v690_v40, %v2383_v2  ;;  %v788_v51 = vmul.f32 %v727_v42, %v2506_v8  ;;  %v789_v53 = vmul.f32 %v727_v42, %v2516_v16 }
  0x58   : > { %v2178_v43 = vpop.eup %2177  ;;  %2203 = vpow2.f32 %v830_v34  ;;  %v790_v55 = vmul.f32 %v731_v36, %v2506_v8  ;;  %v791_v57 = vmul.f32 %v731_v36, %v2516_v16  ;;  %v689_v59 = vcombine.high %v673_v44, %v673_v44 }
  0x59   : > { %v2180_v46 = vpop.eup %2179  ;;  %2205 = vpow2.f32 %v832_v35  ;;  %869 = vst.msk [vmem:[#allocation3] sm:$0xff] %vm551_vm0, %v2178_v43  ;;  %v743_v60 = vrot.slane %v673_v44, %v2383_v2  ;;  %v792_v62 = vmul.f32 %v735_v45, %v2506_v8  ;;  %v691_v1 = vcombine.high %v687_v47, %v687_v47 }
  0x5a   : > { %v2182_v49 = vpop.eup %2181  ;;  %2207 = vpow2.f32 %v834_v41  ;;  %870 = vst.msk [vmem:[#allocation3 + $0x8] sm:$0xff] %vm551_vm0, %v2180_v46  ;;  %v747_v5 = vrot.slane %v687_v47, %v2383_v2  ;;  %v793_v6 = vmul.f32 %v735_v45, %v2516_v16  ;;  %v794_v9 = vmul.f32 %v739_v48, %v2506_v8 }
  0x5b   : > { %v2184_v56 = vpop.eup %2183  ;;  %871 = vst.msk [vmem:[#allocation3 + $0x10] sm:$0xff] %vm551_vm0, %v2182_v49  ;;  %v836_v10 = vmul.f32 1.442695, %v788_v51  ;;  %v838_v17 = vmul.f32 1.442695, %v789_v53  ;;  %v795_v20 = vmul.f32 %v739_v48, %v2516_v16  ;;  %v961_v24 = vrot.slane %v2494_v61, %v2477_v52 }
  0x5c   : > { %v2186_v58 = vpop.eup %2185  ;;  %872 = vst.msk [vmem:[#allocation3 + $0x18] sm:$0xff] %vm551_vm0, %v2184_v56  ;;  %v840_v18 = vmul.f32 1.442695, %v790_v55  ;;  %v842_v22 = vmul.f32 1.442695, %v791_v57  ;;  %v751_v26 = vrot.slane %v689_v59, %v2383_v2  ;;  %v796_v32 = vmul.f32 %v743_v60, %v2506_v8 }
  0x5d   : > { %v2188_v63 = vpop.eup %2187  ;;  %873 = vst.msk [vmem:[#allocation3 + $0x20] sm:$0xff] %vm551_vm0, %v2186_v58  ;;  %2209 = vpow2.f32 %v836_v10  ;;  %v844_v33 = vmul.f32 1.442695, %v792_v62  ;;  %v755_v35 = vrot.slane %v691_v1, %v2383_v2  ;;  %v797_v37 = vmul.f32 %v743_v60, %v2516_v16 }
  0x5e   : > { %v2190_v7 = vpop.eup %2189  ;;  %874 = vst.msk [vmem:[#allocation3 + $0x28] sm:$0xff] %vm551_vm0, %v2188_v63  ;;  %2211 = vpow2.f32 %v838_v17  ;;  %v846_v39 = vmul.f32 1.442695, %v793_v6  ;;  %v798_v41 = vmul.f32 %v747_v5, %v2506_v8  ;;  %v799_v42 = vmul.f32 %v747_v5, %v2516_v16 }
  0x5f   : > { %v2192_v19 = vpop.eup %2191  ;;  %875 = vst.msk [vmem:[#allocation3 + $0x30] sm:$0xff] %vm551_vm0, %v2190_v7  ;;  %2213 = vpow2.f32 %v840_v18  ;;  %v848_v36 = vmul.f32 1.442695, %v794_v9  ;;  %v850_v44 = vmul.f32 1.442695, %v795_v20  ;;  %v2602_v45 = vrot.slane %v961_v24, %v2477_v52 }
  0x60   : > { %v2194_v23 = vpop.eup %2193  ;;  %876 = vst.msk [vmem:[#allocation3 + $0x38] sm:$0xff] %vm551_vm0, %v2192_v19  ;;  %2215 = vpow2.f32 %v842_v22  ;;  %v969_v46 = vcombine.high %v961_v24, %v961_v24  ;;  %v800_v48 = vmul.f32 %v751_v26, %v2506_v8  ;;  %v852_v49 = vmul.f32 1.442695, %v796_v32 }
  0x61   : > { %v2196_v34 = vpop.eup %2195  ;;  %877 = vst.msk [vmem:[#allocation3 + $0x40] sm:$0xff] %vm551_vm0, %v2194_v23  ;;  %2217 = vpow2.f32 %v844_v33  ;;  %v954_v51 = vcombine.high %v2494_v61, %v2494_v61  ;;  %v801_v55 = vmul.f32 %v751_v26, %v2516_v16  ;;  %v854_v56 = vmul.f32 1.442695, %v797_v37 }
  0x62   : > { %v2198_v40 = vpop.eup %2197  ;;  %878 = vst.msk [vmem:[#allocation3 + $0x48] sm:$0xff] %vm551_vm0, %v2196_v34  ;;  %2219 = vpow2.f32 %v846_v39  ;;  %v2611_v57 = vrot.slane %v969_v46, %v2477_v52  ;;  %v802_v59 = vmul.f32 %v755_v35, %v2506_v8  ;;  %v856_v60 = vmul.f32 1.442695, %v798_v41 }
  0x63   : > { %v2200_v43 = vpop.eup %2199  ;;  %879 = vst.msk [vmem:[#allocation3 + $0x50] sm:$0xff] %vm551_vm0, %v2198_v40  ;;  %2221 = vpow2.f32 %v848_v36  ;;  %v968_v62 = vrot.slane %v954_v51, %v2477_v52  ;;  %v803_v63 = vmul.f32 %v755_v35, %v2516_v16  ;;  %v858_v1 = vmul.f32 1.442695, %v799_v42 }
  0x64   : > { %v2202_v47 = vpop.eup %2201  ;;  %880 = vst.msk [vmem:[#allocation3 + $0x58] sm:$0xff] %vm551_vm0, %v2200_v43  ;;  %2223 = vpow2.f32 %v850_v44  ;;  %v860_v5 = vmul.f32 1.442695, %v800_v48  ;;  %v862_v8 = vmul.f32 1.442695, %v801_v55  ;;  %v1186_v41 = vrot.slane %v2549_v0, %v2383_v2 }
  0x65   : > { %v2204_v53 = vpop.eup %2203  ;;  %881 = vst.msk [vmem:[#allocation3 + $0x60] sm:$0xff] %vm551_vm0, %v2202_v47  ;;  %2225 = vpow2.f32 %v852_v49  ;;  %v2620_v6 = vrot.slane %v968_v62, %v2477_v52  ;;  %v970_v7 = vcombine.high %v968_v62, %v968_v62  ;;  %v864_v9 = vmul.f32 1.442695, %v802_v59 }
  0x66   : > { %v2206_v58 = vpop.eup %2205  ;;  %882 = vst.msk [vmem:[#allocation3 + $0x68] sm:$0xff] %vm551_vm0, %v2204_v53  ;;  %2227 = vpow2.f32 %v854_v56  ;;  %v866_v17 = vmul.f32 1.442695, %v803_v63  ;;  %v1182_v42 = vrot.slane %v2510_v12, %v2383_v2  ;;  %v950_v47 = vcombine.high %v2510_v12, %v2510_v12 }
  0x67   : > { %v2208_v61 = vpop.eup %2207  ;;  %883 = vst.msk [vmem:[#allocation3 + $0x70] sm:$0xff] %vm551_vm0, %v2206_v58  ;;  %2229 = vpow2.f32 %v856_v60  ;;  %v2623_v10 = vrot.slane %v970_v7, %v2477_v52  ;;  %v952_v56 = vcombine.high %v2549_v0, %v2549_v0  ;;  %v1198_v0 = vrot.slane %v2561_v30, %v2383_v2 }
  0x68   : > { %884 = vst.msk [vmem:[#allocation3 + $0x78] sm:$0xff] %vm551_vm0, %v2208_v61  ;;  %2231 = vpow2.f32 %v858_v1  ;;  %v1190_v55 = vrot.slane %v950_v47, %v2383_v2 }
  0x69   : > { %2233 = vpow2.f32 %v860_v5  ;;  %v1194_v62 = vrot.slane %v952_v56, %v2383_v2 }
  0x6a   : > { %v2210_v16 = vpop.eup %2209  ;;  %2235 = vpow2.f32 %v862_v8 }
  0x6b   : > { %v2212_v18 = vpop.eup %2211  ;;  %2237 = vpow2.f32 %v864_v9  ;;  %885 = vst.msk [vmem:[#allocation3 + $0x80] sm:$0xff] %vm551_vm0, %v2210_v16  ;;  %v1202_v16 = vrot.slane %v2564_v38, %v2383_v2 }
  0x6c   : > { %v2214_v19 = vpop.eup %2213  ;;  %2239 = vpow2.f32 %v866_v17  ;;  %886 = vst.msk [vmem:[#allocation3 + $0x88] sm:$0xff] %vm551_vm0, %v2212_v18  ;;  %v951_v18 = vcombine.high %v2561_v30, %v2561_v30 }
  0x6d   : > { %v2216_v20 = vpop.eup %2215  ;;  %887 = vst.msk [vmem:[#allocation3 + $0x90] sm:$0xff] %vm551_vm0, %v2214_v19 }
  0x6e   : > { %v2218_v22 = vpop.eup %2217  ;;  %888 = vst.msk [vmem:[#allocation3 + $0x98] sm:$0xff] %vm551_vm0, %v2216_v20 }
  0x6f   : > { %v2220_v52 = vpop.eup %2219  ;;  %889 = vst.msk [vmem:[#allocation3 + $0xa0] sm:$0xff] %vm551_vm0, %v2218_v22 }
  0x70   : > { %v2222_v24 = vpop.eup %2221  ;;  %890 = vst.msk [vmem:[#allocation3 + $0xa8] sm:$0xff] %vm551_vm0, %v2220_v52 }
  0x71   : > { %v2224_v23 = vpop.eup %2223  ;;  %891 = vst.msk [vmem:[#allocation3 + $0xb0] sm:$0xff] %vm551_vm0, %v2222_v24  ;;  %v1206_v24 = vrot.slane %v951_v18, %v2383_v2 }
  0x72   : > { %v2226_v26 = vpop.eup %2225  ;;  %892 = vst.msk [vmem:[#allocation3 + $0xb8] sm:$0xff] %vm551_vm0, %v2224_v23  ;;  %v953_v23 = vcombine.high %v2564_v38, %v2564_v38  ;;  %v1214_v38 = vrot.slane %v2602_v45, %v2383_v2 }
  0x73   : > { %v2228_v32 = vpop.eup %2227  ;;  %893 = vst.msk [vmem:[#allocation3 + $0xc0] sm:$0xff] %vm551_vm0, %v2226_v26 }
  0x74   : > { %v2230_v33 = vpop.eup %2229  ;;  %894 = vst.msk [vmem:[#allocation3 + $0xc8] sm:$0xff] %vm551_vm0, %v2228_v32 }
  0x75   : > { %v2232_v34 = vpop.eup %2231  ;;  %895 = vst.msk [vmem:[#allocation3 + $0xd0] sm:$0xff] %vm551_vm0, %v2230_v33 }
  0x76   : > { %v2234_v35 = vpop.eup %2233  ;;  %896 = vst.msk [vmem:[#allocation3 + $0xd8] sm:$0xff] %vm551_vm0, %v2232_v34  ;;  %v1210_v34 = vrot.slane %v953_v23, %v2383_v2 }
  0x77   : > { %v2236_v37 = vpop.eup %2235  ;;  %897 = vst.msk [vmem:[#allocation3 + $0xe0] sm:$0xff] %vm551_vm0, %v2234_v35 }
  0x78   : > { %v2238_v39 = vpop.eup %2237  ;;  %898 = vst.msk [vmem:[#allocation3 + $0xe8] sm:$0xff] %vm551_vm0, %v2236_v37 }
  0x79   : > { %v2240_v40 = vpop.eup %2239  ;;  %899 = vst.msk [vmem:[#allocation3 + $0xf0] sm:$0xff] %vm551_vm0, %v2238_v39 }
  0x7a   : > { %900 = vst.msk [vmem:[#allocation3 + $0xf8] sm:$0xff] %vm551_vm0, %v2240_v40 }
  0x88   : > { %v1020_v36 = vpop.permute.xlu1 %1019  ;;  %v1009_v43 = vpop.permute.xlu0 %1008 }
  0x89   : > { %v1261_v44 = vmul.f32 %v1186_v41, %v1020_v36  ;;  %v1259_v46 = vmul.f32 %v1182_v42, %v1009_v43 }
  0x8b   : > { %1293 = vst.msk [vmem:[#allocation4 + $0x10] sm:$0xff] %vm551_vm0, %v1261_v44  ;;  %1291 = vst.msk [vmem:[#allocation4] sm:$0xff] %vm551_vm0, %v1259_v46  ;;  %v1218_v44 = vrot.slane %v2611_v57, %v2383_v2  ;;  %v999_v46 = vcombine.high %v2602_v45, %v2602_v45 }
  0x8c   : > { %v1024_v48 = vpop.permute.xlu1 %1023  ;;  %v1013_v49 = vpop.permute.xlu0 %1012 }
  0x8d   : > { %v1262_v51 = vmul.f32 %v1186_v41, %v1024_v48  ;;  %v1260_v53 = vmul.f32 %v1182_v42, %v1013_v49 }
  0x8f   : > { %1294 = vst.msk [vmem:[#allocation4 + $0x18] sm:$0xff] %vm551_vm0, %v1262_v51  ;;  %1292 = vst.msk [vmem:[#allocation4 + $0x8] sm:$0xff] %vm551_vm0, %v1260_v53  ;;  %v1222_v53 = vrot.slane %v999_v46, %v2383_v2 }
  0x90   : > { %v1035_v58 = vpop.permute.xlu1 %1034  ;;  %v1031_v59 = vpop.permute.xlu0 %1030 }
  0x91   : > { %v1264_v12 = vmul.f32 %v1190_v55, %v1035_v58  ;;  %v1263_v60 = vmul.f32 %v1190_v55, %v1031_v59  ;;  %v1001_v55 = vcombine.high %v2611_v57, %v2611_v57  ;;  %v1230_v57 = vrot.slane %v2620_v6, %v2383_v2 }
  0x93   : > { %1296 = vst.msk [vmem:[#allocation4 + $0x28] sm:$0xff] %vm551_vm0, %v1264_v12  ;;  %1295 = vst.msk [vmem:[#allocation4 + $0x20] sm:$0xff] %vm551_vm0, %v1263_v60  ;;  %v1226_v12 = vrot.slane %v1001_v55, %v2383_v2 }
  0x94   : > { %v1046_v61 = vpop.permute.xlu1 %1045  ;;  %v1042_v63 = vpop.permute.xlu0 %1041 }
  0x95   : > { %v1266_v1 = vmul.f32 %v1194_v62, %v1046_v61  ;;  %v1265_v5 = vmul.f32 %v1194_v62, %v1042_v63 }
  0x97   : > { %1298 = vst.msk [vmem:[#allocation4 + $0x38] sm:$0xff] %vm551_vm0, %v1266_v1  ;;  %1297 = vst.msk [vmem:[#allocation4 + $0x30] sm:$0xff] %vm551_vm0, %v1265_v5 }
  0x98   : > { %v1057_v7 = vpop.permute.xlu1 %1056  ;;  %v1053_v8 = vpop.permute.xlu0 %1052 }
  0x99   : > { %v1268_v9 = vmul.f32 %v1198_v0, %v1057_v7  ;;  %v1267_v17 = vmul.f32 %v1198_v0, %v1053_v8  ;;  %v1234_v8 = vrot.slane %v2623_v10, %v2383_v2 }
  0x9b   : > { %1300 = vst.msk [vmem:[#allocation4 + $0x48] sm:$0xff] %vm551_vm0, %v1268_v9  ;;  %1299 = vst.msk [vmem:[#allocation4 + $0x40] sm:$0xff] %vm551_vm0, %v1267_v17  ;;  %v1000_v9 = vcombine.high %v2620_v6, %v2620_v6 }
  0x9c   : > { %v1068_v19 = vpop.permute.xlu1 %1067  ;;  %v1064_v20 = vpop.permute.xlu0 %1063 }
  0x9d   : > { %v1270_v22 = vmul.f32 %v1202_v16, %v1068_v19  ;;  %v1269_v52 = vmul.f32 %v1202_v16, %v1064_v20  ;;  %v1238_v20 = vrot.slane %v1000_v9, %v2383_v2 }
  0x9f   : > { %1302 = vst.msk [vmem:[#allocation4 + $0x58] sm:$0xff] %vm551_vm0, %v1270_v22  ;;  %1301 = vst.msk [vmem:[#allocation4 + $0x50] sm:$0xff] %vm551_vm0, %v1269_v52  ;;  %v1002_v22 = vcombine.high %v2623_v10, %v2623_v10  ;;  %v2293_v10 = vmov %v2514_v14  }
  0xa0   : > { %v1079_v26 = vpop.permute.xlu1 %1078  ;;  %v1075_v32 = vpop.permute.xlu0 %1074 }
  0xa1   : > { %v1272_v30 = vmul.f32 %v1206_v24, %v1079_v26  ;;  %v1271_v33 = vmul.f32 %v1206_v24, %v1075_v32  ;;  %v1242_v26 = vrot.slane %v1002_v22, %v2383_v2 }
  0xa3   : > { %1304 = vst.msk [vmem:[#allocation4 + $0x68] sm:$0xff] %vm551_vm0, %v1272_v30  ;;  %1303 = vst.msk [vmem:[#allocation4 + $0x60] sm:$0xff] %vm551_vm0, %v1271_v33 }
  0xa4   : > { %v1090_v35 = vpop.permute.xlu1 %1089  ;;  %v1086_v37 = vpop.permute.xlu0 %1085 }
  0xa5   : > { %v1274_v39 = vmul.f32 %v1210_v34, %v1090_v35  ;;  %v1273_v40 = vmul.f32 %v1210_v34, %v1086_v37  ;;  %v2297_v35 = vmov %v2512_v13  }
  0xa7   : > { %1306 = vst.msk [vmem:[#allocation4 + $0x78] sm:$0xff] %vm551_vm0, %v1274_v39  ;;  %1305 = vst.msk [vmem:[#allocation4 + $0x70] sm:$0xff] %vm551_vm0, %v1273_v40 }
  0xa8   : > { %v1101_v41 = vpop.permute.xlu1 %1100  ;;  %v1097_v42 = vpop.permute.xlu0 %1096 }
  0xa9   : > { %v1276_v36 = vmul.f32 %v1214_v38, %v1101_v41  ;;  %v1275_v43 = vmul.f32 %v1214_v38, %v1097_v42 }
  0xab   : > { %1308 = vst.msk [vmem:[#allocation4 + $0x88] sm:$0xff] %vm551_vm0, %v1276_v36  ;;  %1307 = vst.msk [vmem:[#allocation4 + $0x80] sm:$0xff] %vm551_vm0, %v1275_v43 }
  0xac   : > { %v1112_v47 = vpop.permute.xlu1 %1111  ;;  %v1108_v48 = vpop.permute.xlu0 %1107 }
  0xad   : > { %v1278_v49 = vmul.f32 %v1218_v44, %v1112_v47  ;;  %v1277_v51 = vmul.f32 %v1218_v44, %v1108_v48 }
  0xaf   : > { %1310 = vst.msk [vmem:[#allocation4 + $0x98] sm:$0xff] %vm551_vm0, %v1278_v49  ;;  %1309 = vst.msk [vmem:[#allocation4 + $0x90] sm:$0xff] %vm551_vm0, %v1277_v51 }
  0xb0   : > { %v1123_v56 = vpop.permute.xlu1 %1122  ;;  %v1119_v58 = vpop.permute.xlu0 %1118 }
  0xb1   : > { %v1280_v45 = vmul.f32 %v1222_v53, %v1123_v56  ;;  %v1279_v59 = vmul.f32 %v1222_v53, %v1119_v58 }
  0xb3   : > { %1312 = vst.msk [vmem:[#allocation4 + $0xa8] sm:$0xff] %vm551_vm0, %v1280_v45  ;;  %1311 = vst.msk [vmem:[#allocation4 + $0xa0] sm:$0xff] %vm551_vm0, %v1279_v59 }
  0xb4   : > { %v1134_v60 = vpop.permute.xlu1 %1133  ;;  %v1130_v62 = vpop.permute.xlu0 %1129 }
  0xb5   : > { %v1282_v61 = vmul.f32 %v1226_v12, %v1134_v60  ;;  %v1281_v63 = vmul.f32 %v1226_v12, %v1130_v62 }
  0xb7   : > { %1314 = vst.msk [vmem:[#allocation4 + $0xb8] sm:$0xff] %vm551_vm0, %v1282_v61  ;;  %1313 = vst.msk [vmem:[#allocation4 + $0xb0] sm:$0xff] %vm551_vm0, %v1281_v63 }
  0xb8   : > { %v1145_v1 = vpop.permute.xlu1 %1144  ;;  %v1141_v5 = vpop.permute.xlu0 %1140 }
  0xb9   : > { %v1284_v0 = vmul.f32 %v1230_v57, %v1145_v1  ;;  %v1283_v7 = vmul.f32 %v1230_v57, %v1141_v5 }
  0xbb   : > { %1316 = vst.msk [vmem:[#allocation4 + $0xc8] sm:$0xff] %vm551_vm0, %v1284_v0  ;;  %1315 = vst.msk [vmem:[#allocation4 + $0xc0] sm:$0xff] %vm551_vm0, %v1283_v7 }
  0xbc   : > { %v1156_v17 = vpop.permute.xlu1 %1155  ;;  %v1152_v16 = vpop.permute.xlu0 %1151 }
  0xbd   : > { %v1286_v18 = vmul.f32 %v1234_v8, %v1156_v17  ;;  %v1285_v19 = vmul.f32 %v1234_v8, %v1152_v16 }
  0xbf   : > { %1318 = vst.msk [vmem:[#allocation4 + $0xd8] sm:$0xff] %vm551_vm0, %v1286_v18  ;;  %1317 = vst.msk [vmem:[#allocation4 + $0xd0] sm:$0xff] %vm551_vm0, %v1285_v19 }
  0xc0   : > { %v1167_v52 = vpop.permute.xlu1 %1166  ;;  %v1163_v24 = vpop.permute.xlu0 %1162 }
  0xc1   : > { %v1288_v6 = vmul.f32 %v1238_v20, %v1167_v52  ;;  %v1287_v23 = vmul.f32 %v1238_v20, %v1163_v24 }
  0xc3   : > { %1320 = vst.msk [vmem:[#allocation4 + $0xe8] sm:$0xff] %vm551_vm0, %v1288_v6  ;;  %1319 = vst.msk [vmem:[#allocation4 + $0xe0] sm:$0xff] %vm551_vm0, %v1287_v23 }
  0xc4   : > { %v1178_v32 = vpop.permute.xlu1 %1177  ;;  %v1174_v30 = vpop.permute.xlu0 %1173 }
  0xc5   : > { %v1290_v33 = vmul.f32 %v1242_v26, %v1178_v32  ;;  %v1289_v34 = vmul.f32 %v1242_v26, %v1174_v30 }
  0xc7   : > { %1322 = vst.msk [vmem:[#allocation4 + $0xf8] sm:$0xff] %vm551_vm0, %v1290_v33  ;;  %1321 = vst.msk [vmem:[#allocation4 + $0xf0] sm:$0xff] %vm551_vm0, %v1289_v34 }
  0xc8 LB: >> { %s2098_s20 = sshll.u32 %s2303_s19, 4  ;;  %s1330_s19 = sadd.s32 1, %s2303_s19   ;;  %s2303_s19 = sphi %s2301_s19, %s1330_s19   ;;  %v2299_v35 = vphi %v2297_v35, %v2298_v35   ;;  %v2295_v10 = vphi %v2293_v10, %v2294_v10  }
  0xc9   : >> { %s1334_s21 = scalar_lea.vmem [#allocation3], %s2098_s20  ;;  %s1339_s22 = scalar_lea.vmem [#allocation4], %s2098_s20 }
  0xca   : >> { %v1335_v37 = vld [vmem:[%s1334_s21] sm:$0xff]  ;;  %v1336_v40 = vld [vmem:[%s1334_s21 + $0x8] sm:$0xff]  ;;  %p1327_p7 = scmp.ge.s32.totalorder %s1330_s19, 16  }
  0xcb   : >> { %v1337_v38 = vmul.f32 %v2299_v35, %v1335_v37  ;;  %v1338_v41 = vmul.f32 %v2295_v10, %v1336_v40  ;;  %v1450_v13 = vrot.slane (%p1327_p7), %v2450_v29, %v2386_v3  ;;  %v1362_v14 = vrot.slane (%p1327_p7), %v2448_v28, %v2386_v3 }
  0xcc   : > { %v1373_v44 = vrot.slane (%p1327_p7), %v2448_v28, %v2414_v11  ;;  %v1461_v46 = vrot.slane (%p1327_p7), %v2450_v29, %v2414_v11  ;;  %v1351_v3 = vrot.slane (%p1327_p7), %v2448_v28, %v2383_v2  ;;  %v1384_v47 = vrot.slane (%p1327_p7), %v2448_v28, %v2422_v15 }
  0xcd   : > { %1329 = sbr.rel (!%p1327_p7) target bundleno = 200 (0xc8), region = 109  ;;  %1452 = vbcast.lane.b32.xlu1 (%p1327_p7), %v1450_v13, 256  ;;  %1364 = vbcast.lane.b32.xlu0 (%p1327_p7), %v1362_v14, 256  ;;  %v1439_v48 = vrot.slane (%p1327_p7), %v2450_v29, %v2383_v2  ;;  %v1472_v11 = vrot.slane (%p1327_p7), %v2450_v29, %v2422_v15  ;;  %v1395_v49 = vrot.slane (%p1327_p7), %v2448_v28, %v2428_v21  ;;  %vm1805_vm1 = vcmask (%p1327_p7), 1041409  }
  0xce   : >> { %v1340_v39 = vld [vmem:[%s1339_s22] sm:$0xff]  ;;  %v1341_v42 = vld [vmem:[%s1339_s22 + $0x8] sm:$0xff]  ;;  %v1483_v51 = vrot.slane (%p1327_p7), %v2450_v29, %v2428_v21  ;;  %v1406_v2 = vrot.slane (%p1327_p7), %v2448_v28, %v2432_v25  ;;  %v1494_v15 = vrot.slane (%p1327_p7), %v2450_v29, %v2432_v25  ;;  %v1417_v53 = vrot.slane (%p1327_p7), %v2448_v28, %v2436_v27 }
  0xcf   : >> { %v1342_v36 = vadd.f32 %v1340_v39, %v1337_v38   ;;  %v1343_v43 = vadd.f32 %v1341_v42, %v1338_v41   ;;  %v1505_v21 = vrot.slane (%p1327_p7), %v2450_v29, %v2436_v27  ;;  %v1428_v55 = vrot.slane (%p1327_p7), %v2448_v28, %v2454_v31 }
  0xd0   : > { %v1516_v25 = vrot.slane (%p1327_p7), %v2450_v29, %v2454_v31  ;;  %v2759_v38 = vmul.f32 (%p1327_p7), %v2400_v4, %v2479_v54  ;;  %vm1808_vm2 = vcmask (%p1327_p7), 1042434   ;;  %vm1811_vm3 = vcmask (%p1327_p7), 1043459  }
  0xd1   : >> { %1344 = vst.msk [vmem:[%s1339_s22] sm:$0xff] %vm551_vm0, %v1342_v36  ;;  %1345 = vst.msk [vmem:[%s1339_s22 + $0x8] sm:$0xff] %vm551_vm0, %v1343_v43  ;;  %v2294_v10 = vmov %v1343_v43   ;;  %v2298_v35 = vmov %v1342_v36   ;;  %1456 = vbcast.lane.b32.xlu1 (%p1327_p7), %v1450_v13, 264  ;;  %1368 = vbcast.lane.b32.xlu0 (%p1327_p7), %v1362_v14, 264  ;;  %vm1814_vm4 = vcmask (%p1327_p7), 1044484   ;;  %vm1817_vm5 = vcmask (%p1327_p7), 1045509  }
  0xd2   : > { %1346 = vst.msk [vmem:[#allocation2] sm:$0xff] %vm551_vm0, %v1342_v36  ;;  %1347 = vst.msk [vmem:[#allocation2 + $0x8] sm:$0xff] %vm551_vm0, %v1343_v43  ;;  %vm1820_vm6 = vcmask 1046534   ;;  %vm1823_vm7 = vcmask 1047559  }
  0xd5   : > { %1379 = vbcast.lane.b32.xlu1 %v1373_v44, 264  ;;  %1375 = vbcast.lane.b32.xlu0 %v1373_v44, 256 }
  0xd8   : > { %v1543_v45 = vld [vmem:[#allocation4 + $0x98] sm:$0xff]  ;;  %v1542_v62 = vld [vmem:[#allocation4 + $0x90] sm:$0xff]  ;;  %v1529_v18 = vld [vmem:[#allocation4 + $0x28] sm:$0xff] }
  0xd9   : > { %1467 = vbcast.lane.b32.xlu1 %v1461_v46, 264  ;;  %1463 = vbcast.lane.b32.xlu0 %v1461_v46, 256  ;;  %v1527_v59 = vld [vmem:[#allocation4 + $0x18] sm:$0xff]  ;;  %v1526_v27 = vld [vmem:[#allocation4 + $0x10] sm:$0xff]  ;;  %v1528_v19 = vld [vmem:[#allocation4 + $0x20] sm:$0xff] }
  0xda   : > { %v1545_v35 = vld [vmem:[#allocation4 + $0xa8] sm:$0xff]  ;;  %v1544_v37 = vld [vmem:[#allocation4 + $0xa0] sm:$0xff] }
  0xdb   : > { %v1525_v39 = vld [vmem:[#allocation4 + $0x8] sm:$0xff]  ;;  %v1524_v40 = vld [vmem:[#allocation4] sm:$0xff] }
  0xdd   : > { %1357 = vbcast.lane.b32.xlu1 %v1351_v3, 264  ;;  %1353 = vbcast.lane.b32.xlu0 %v1351_v3, 256 }
  0xe1   : > { %1390 = vbcast.lane.b32.xlu1 %v1384_v47, 264  ;;  %1386 = vbcast.lane.b32.xlu0 %v1384_v47, 256  ;;  %v2763_v47 = vmul.f32 %v2400_v4, %v2474_v50 }
  0xe3   : > { %v1742_v4 = vrot.slane %v2763_v47, 1  ;;  %v1743_v50 = vrot.slane %v2763_v47, 2 }
  0xe5   : > { %1445 = vbcast.lane.b32.xlu1 %v1439_v48, 264  ;;  %1441 = vbcast.lane.b32.xlu0 %v1439_v48, 256  ;;  %v1531_v48 = vld [vmem:[#allocation4 + $0x38] sm:$0xff] }
  0xe9   : > { %1478 = vbcast.lane.b32.xlu1 %v1472_v11, 264  ;;  %1474 = vbcast.lane.b32.xlu0 %v1472_v11, 256  ;;  %v1530_v11 = vld [vmem:[#allocation4 + $0x30] sm:$0xff] }
  0xed   : > { %1401 = vbcast.lane.b32.xlu1 %v1395_v49, 264  ;;  %1397 = vbcast.lane.b32.xlu0 %v1395_v49, 256  ;;  %v1749_v49 = vrot.slane %v2759_v38, 1 }
  0xf1   : > { %1489 = vbcast.lane.b32.xlu1 %v1483_v51, 264  ;;  %1485 = vbcast.lane.b32.xlu0 %v1483_v51, 256 }
  0xf5   : > { %1412 = vbcast.lane.b32.xlu1 %v1406_v2, 264  ;;  %1408 = vbcast.lane.b32.xlu0 %v1406_v2, 256 }
  0xf9   : > { %1500 = vbcast.lane.b32.xlu1 %v1494_v15, 264  ;;  %1496 = vbcast.lane.b32.xlu0 %v1494_v15, 256 }
  0xfd   : > { %1423 = vbcast.lane.b32.xlu1 %v1417_v53, 264  ;;  %1419 = vbcast.lane.b32.xlu0 %v1417_v53, 256 }
 0x101   : > { %1511 = vbcast.lane.b32.xlu1 %v1505_v21, 264  ;;  %1507 = vbcast.lane.b32.xlu0 %v1505_v21, 256 }
 0x105   : > { %1434 = vbcast.lane.b32.xlu1 %v1428_v55, 264  ;;  %1430 = vbcast.lane.b32.xlu0 %v1428_v55, 256 }
 0x109   : > { %1522 = vbcast.lane.b32.xlu1 %v1516_v25, 264  ;;  %1518 = vbcast.lane.b32.xlu0 %v1516_v25, 256 }
 0x13f   : > { %v1453_v56 = vpop.permute.xlu1 %1452  ;;  %v1365_v58 = vpop.permute.xlu0 %1364 }
 0x140   : > { %v1574_v57 = vmul.f32 %v1542_v62, %v1453_v56  ;;  %v1558_v1 = vmul.f32 %v1526_v27, %v1365_v58  ;;  %v1744_v62 = vrot.slane %v2763_v47, 3  ;;  %v1541_v27 = vld [vmem:[#allocation4 + $0x88] sm:$0xff] }
 0x142   : > { %v1669_v31 = vsel %vm551_vm0, %v1574_v57, 0.0  ;;  %v1597_v7 = vsel %vm551_vm0, %v1558_v1, 0.0  ;;  %v1745_v57 = vrot.slane %v2763_v47, 4 }
 0x143   : > { %v1457_v12 = vpop.permute.xlu1 %1456  ;;  %v1369_v60 = vpop.permute.xlu0 %1368 }
 0x144   : > { %v1575_v61 = vmul.f32 %v1543_v45, %v1457_v12  ;;  %v1559_v63 = vmul.f32 %v1527_v59, %v1369_v60  ;;  %v1533_v59 = vld [vmem:[#allocation4 + $0x48] sm:$0xff]  ;;  %v1532_v12 = vld [vmem:[#allocation4 + $0x40] sm:$0xff]  ;;  %v1750_v60 = vrot.slane %v2759_v38, 2 }
 0x146   : > { %v1670_v0 = vsel %vm551_vm0, %v1575_v61, 0.0  ;;  %v1598_v29 = vsel %vm551_vm0, %v1559_v63, 0.0  ;;  %v1540_v61 = vld [vmem:[#allocation4 + $0x80] sm:$0xff]  ;;  %v1751_v63 = vrot.slane %v2759_v38, 3 }
 0x147   : > { %v1380_v28 = vpop.permute.xlu1 %1379  ;;  %v1376_v5 = vpop.permute.xlu0 %1375  ;;  %v1671_v17 = vadd.f32 %v1670_v0, %v1669_v31  ;;  %v1599_v16 = vadd.f32 %v1598_v29, %v1597_v7  ;;  %v1547_v0 = vld [vmem:[#allocation4 + $0xb8] sm:$0xff]  ;;  %v1546_v29 = vld [vmem:[#allocation4 + $0xb0] sm:$0xff] }
 0x148   : > { %v1561_v6 = vmul.f32 %v1529_v18, %v1380_v28  ;;  %v1560_v23 = vmul.f32 %v1528_v19, %v1376_v5 }
 0x149   : > { %v1672_v52 = vrot.slane %v1671_v17, 4  ;;  %v1600_v24 = vrot.slane %v1599_v16, 4 }
 0x14a   : > { %v1607_v34 = vsel %vm551_vm0, %v1561_v6, 0.0  ;;  %v1606_v10 = vsel %vm551_vm0, %v1560_v23, 0.0  ;;  %v1548_v6 = vld [vmem:[#allocation4 + $0xc0] sm:$0xff] }
 0x14b   : > { %v1468_v8 = vpop.permute.xlu1 %1467  ;;  %v1464_v9 = vpop.permute.xlu0 %1463  ;;  %v1673_v30 = vadd.f32 %v1672_v52, %v1671_v17  ;;  %v1601_v33 = vadd.f32 %v1600_v24, %v1599_v16  ;;  %v1608_v41 = vadd.f32 %v1607_v34, %v1606_v10  ;;  %v1549_v24 = vld [vmem:[#allocation4 + $0xc8] sm:$0xff] }
 0x14c   : > { %v1577_v42 = vmul.f32 %v1545_v35, %v1468_v8  ;;  %v1576_v36 = vmul.f32 %v1544_v37, %v1464_v9  ;;  %v1752_v8 = vrot.slane %v2759_v38, 4  ;;  %v1746_v37 = vrot.slane %v2763_v47, 5 }
 0x14d   : > { %v1674_v14 = vrot.slane %v1673_v30, 2  ;;  %v1602_v44 = vrot.slane %v1601_v33, 2  ;;  %v1609_v51 = vrot.slane %v1608_v41, 4 }
 0x14e   : > { %v1679_v54 = vsel %vm551_vm0, %v1577_v42, 0.0  ;;  %v1678_v2 = vsel %vm551_vm0, %v1576_v36, 0.0  ;;  %v1747_v36 = vrot.slane %v2763_v47, 6 }
 0x14f   : > { %v1358_v20 = vpop.permute.xlu1 %1357  ;;  %v1354_v22 = vpop.permute.xlu0 %1353  ;;  %v1675_v21 = vadd.f32 %v1674_v14, %v1673_v30  ;;  %v1603_v55 = vadd.f32 %v1602_v44, %v1601_v33  ;;  %v1610_v1 = vadd.f32 %v1609_v51, %v1608_v41  ;;  %v1680_v28 = vadd.f32 %v1679_v54, %v1678_v2 }
 0x150   : > { %v1557_v46 = vmul.f32 %v1525_v39, %v1358_v20  ;;  %v1556_v3 = vmul.f32 %v1524_v40, %v1354_v22  ;;  %v1753_v39 = vrot.slane %v2759_v38, 5 }
 0x151   : > { %v1676_v9 = vrot.slane %v1675_v21, 1  ;;  %v1604_v17 = vrot.slane %v1603_v55, 1  ;;  %v1611_v33 = vrot.slane %v1610_v1, 2  ;;  %v1681_v14 = vrot.slane %v1680_v28, 4 }
 0x152   : > { %v1589_v25 = vsel %vm551_vm0, %v1557_v46, 0.0  ;;  %v1588_v56 = vsel %vm551_vm0, %v1556_v3, 0.0  ;;  %v1535_v46 = vld [vmem:[#allocation4 + $0x58] sm:$0xff]  ;;  %v1534_v3 = vld [vmem:[#allocation4 + $0x50] sm:$0xff] }
 0x153   : > { %v1391_v26 = vpop.permute.xlu1 %1390  ;;  %v1387_v32 = vpop.permute.xlu0 %1386  ;;  %v1590_v5 = vadd.f32 %v1589_v25, %v1588_v56  ;;  %v1612_v2 = vadd.f32 %v1611_v33, %v1610_v1  ;;  %v1537_v33 = vld [vmem:[#allocation4 + $0x68] sm:$0xff] }
 0x154   : > { %v1563_v58 = vmul.f32 %v1531_v48, %v1391_v26  ;;  %v1562_v45 = vmul.f32 %v1530_v11, %v1387_v32 }
 0x155   : > { %v1591_v34 = vrot.slane %v1590_v5, 4 }
 0x156   : > { %v1616_v19 = vsel %vm551_vm0, %v1563_v58, 0.0  ;;  %v1615_v20 = vsel %vm551_vm0, %v1562_v45, 0.0 }
 0x157   : > { %v1446_v43 = vpop.permute.xlu1 %1445  ;;  %v1442_v13 = vpop.permute.xlu0 %1441  ;;  %v1617_v40 = vadd.f32 %v1616_v19, %v1615_v20 }
 0x158   : > { %v1573_v22 = vmul.f32 %v1541_v27, %v1446_v43  ;;  %v1572_v52 = vmul.f32 %v1540_v61, %v1442_v13  ;;  %v1677_v43 = vadd.f32 %v1676_v9, %v1675_v21  ;;  %v1605_v13 = vadd.f32 %v1604_v17, %v1603_v55 }
 0x159   : > { %v1618_v56 = vrot.slane %v1617_v40, 4  ;;  %v1748_v9 = vrot.slane %v2763_v47, 7 }
 0x15a   : > { %v1661_v48 = vsel %vm551_vm0, %v1573_v22, 0.0  ;;  %v1660_v11 = vsel %vm551_vm0, %v1572_v52, 0.0  ;;  %v2796_v17 = vadd.f32 %v1749_v49, %v1677_v43 }
 0x15b   : > { %v1479_v15 = vpop.permute.xlu1 %1478  ;;  %v1475_v53 = vpop.permute.xlu0 %1474  ;;  %v1662_v27 = vadd.f32 %v1661_v48, %v1660_v11  ;;  %v1619_v22 = vadd.f32 %v1618_v56, %v1617_v40 }
 0x15c   : > { %v1579_v23 = vmul.f32 %v1547_v0, %v1479_v15  ;;  %v1578_v26 = vmul.f32 %v1546_v29, %v1475_v53  ;;  %v1592_v15 = vadd.f32 %v1591_v34, %v1590_v5  ;;  %v1551_v29 = vld [vmem:[#allocation4 + $0xd8] sm:$0xff]  ;;  %v1536_v34 = vld [vmem:[#allocation4 + $0x60] sm:$0xff] }
 0x15e   : > { %v1688_v51 = vsel %vm551_vm0, %v1579_v23, 0.0  ;;  %v1687_v54 = vsel %vm551_vm0, %v1578_v26, 0.0  ;;  %v1663_v26 = vrot.slane %v1662_v27, 4 }
 0x15f   : > { %v1402_v31 = vpop.permute.xlu1 %1401  ;;  %v1398_v7 = vpop.permute.xlu0 %1397  ;;  %v1689_v61 = vadd.f32 %v1688_v51, %v1687_v54 }
 0x160   : > { %v1565_v16 = vmul.f32 %v1533_v59, %v1402_v31  ;;  %v1564_v18 = vmul.f32 %v1532_v12, %v1398_v7  ;;  %v1754_v59 = vrot.slane %v2759_v38, 6  ;;  %v1682_v12 = vadd.f32 %v1681_v14, %v1680_v28  ;;  %v1550_v31 = vld [vmem:[#allocation4 + $0xd0] sm:$0xff] }
 0x161   : > { %v1613_v28 = vrot.slane %v1612_v2, 1  ;;  %v1664_v51 = vadd.f32 %v1663_v26, %v1662_v27 }
 0x162   : > { %v1625_v32 = vsel %vm551_vm0, %v1565_v16, 0.0  ;;  %v1624_v30 = vsel %vm551_vm0, %v1564_v18, 0.0  ;;  %v2800_v16 = vadd.f32 %v1742_v4, %v1605_v13  ;;  %v1593_v18 = vrot.slane %v1592_v15, 2 }
 0x163   : > { %v1490_v10 = vpop.permute.xlu1 %1489  ;;  %v1486_v35 = vpop.permute.xlu0 %1485  ;;  %v1626_v44 = vadd.f32 %v1625_v32, %v1624_v30  ;;  %v1683_v23 = vrot.slane %v1682_v12, 2  ;;  %v1690_v32 = vrot.slane %v1689_v61, 4 }
 0x164   : > { %v1581_v41 = vmul.f32 %v1549_v24, %v1490_v10  ;;  %v1580_v42 = vmul.f32 %v1548_v6, %v1486_v35  ;;  %v1594_v40 = vadd.f32 %v1593_v18, %v1592_v15 }
 0x165   : > { %v1627_v0 = vrot.slane %v1626_v44, 4  ;;  %v2806_v11 = vadd.f32 %v1683_v23, %v1682_v12  ;;  %v1691_v54 = vadd.f32 %v1690_v32, %v1689_v61 }
 0x166   : > { %v1697_v53 = vsel %vm551_vm0, %v1581_v41, 0.0  ;;  %v1696_v25 = vsel %vm551_vm0, %v1580_v42, 0.0  ;;  %v1825_v41 = vrot.slane %v2796_v17, 7  ;;  %v1804_v42 = vrot.slane %v2800_v16, 7 }
 0x167   : > { %v1413_v21 = vpop.permute.xlu1 %1412  ;;  %v1409_v55 = vpop.permute.xlu0 %1408  ;;  %v1698_v7 = vadd.f32 %v1697_v53, %v1696_v25  ;;  %v1628_v30 = vadd.f32 %v1627_v0, %v1626_v44  ;;  %v1553_v25 = vld [vmem:[#allocation4 + $0xe8] sm:$0xff]  ;;  %v1595_v0 = vrot.slane %v1594_v40, 1 }
 0x168   : > { %v1567_v58 = vmul.f32 %v1535_v46, %v1413_v21  ;;  %v1566_v45 = vmul.f32 %v1534_v3, %v1409_v55  ;;  %v1620_v46 = vrot.slane %v1619_v22, 2  ;;  %v1552_v21 = vld [vmem:[#allocation4 + $0xe0] sm:$0xff] }
 0x169   : > { %v1699_v49 = vrot.slane %v1698_v7, 4  ;;  %v1629_v55 = vrot.slane %v1628_v30, 2  ;;  %v1596_v32 = vadd.f32 %v1595_v0, %v1594_v40 }
 0x16a   : > { %v1634_v1 = vsel %vm551_vm0, %v1567_v58, 0.0  ;;  %v1633_v5 = vsel %vm551_vm0, %v1566_v45, 0.0  ;;  %v2810_v45 = vadd.f32 %v1613_v28, %v1612_v2  ;;  %v1621_v12 = vadd.f32 %v1620_v46, %v1619_v22 }
 0x16b   : > { %v1501_v19 = vpop.permute.xlu1 %1500  ;;  %v1497_v20 = vpop.permute.xlu0 %1496  ;;  %v1635_v52 = vadd.f32 %v1634_v1, %v1633_v5  ;;  %v1700_v56 = vadd.f32 %v1699_v49, %v1698_v7  ;;  %v1630_v23 = vadd.f32 %v1629_v55, %v1628_v30  ;;  %v1555_v30 = vld [vmem:[#allocation4 + $0xf8] sm:$0xff] }
 0x16c   : > { %v1583_v24 = vmul.f32 %v1551_v29, %v1501_v19  ;;  %v1582_v6 = vmul.f32 %v1550_v31, %v1497_v20  ;;  %v1685_v19 = vrot.slane %v2806_v11, 1  ;;  %v1665_v20 = vrot.slane %v1664_v51, 2 }
 0x16d   : > { %v1636_v10 = vrot.slane %v1635_v52, 4  ;;  %v1701_v26 = vrot.slane %v1700_v56, 2 }
 0x16e   : > { %v1706_v35 = vsel %vm551_vm0, %v1583_v24, 0.0  ;;  %v1705_v4 = vsel %vm551_vm0, %v1582_v6, 0.0  ;;  %v1539_v24 = vld [vmem:[#allocation4 + $0x78] sm:$0xff]  ;;  %v1538_v6 = vld [vmem:[#allocation4 + $0x70] sm:$0xff] }
 0x16f   : > { %v1707_v43 = vadd.f32 %v1706_v35, %v1705_v4  ;;  %v1424_v13 = vpop.permute.xlu1 %1423  ;;  %v1420_v14 = vpop.permute.xlu0 %1419  ;;  %v1637_v3 = vadd.f32 %v1636_v10, %v1635_v52  ;;  %v1692_v52 = vrot.slane %v1691_v54, 2  ;;  %v1622_v35 = vrot.slane %v1621_v12, 1 }
 0x170   : > { %v1569_v48 = vmul.f32 %v1537_v33, %v1424_v13  ;;  %v1568_v44 = vmul.f32 %v1536_v34, %v1420_v14  ;;  %v1666_v14 = vadd.f32 %v1665_v20, %v1664_v51 }
 0x171   : > { %v1708_v53 = vrot.slane %v1707_v43, 4  ;;  %v1638_v29 = vrot.slane %v1637_v3, 2  ;;  %v1693_v46 = vadd.f32 %v1692_v52, %v1691_v54 }
 0x172   : > { %v1643_v58 = vsel %vm551_vm0, %v1569_v48, 0.0  ;;  %v1642_v15 = vsel %vm551_vm0, %v1568_v44, 0.0 }
 0x173   : > { %v1644_v31 = vadd.f32 %v1643_v58, %v1642_v15  ;;  %v1512_v1 = vpop.permute.xlu1 %1511  ;;  %v1508_v5 = vpop.permute.xlu0 %1507  ;;  %v1709_v18 = vadd.f32 %v1708_v53, %v1707_v43  ;;  %v1639_v33 = vadd.f32 %v1638_v29, %v1637_v3  ;;  %v1554_v53 = vld [vmem:[#allocation4 + $0xf0] sm:$0xff] }
 0x174   : > { %v1585_v27 = vmul.f32 %v1553_v25, %v1512_v1  ;;  %v1584_v61 = vmul.f32 %v1552_v21, %v1508_v5  ;;  %v1631_v25 = vrot.slane %v1630_v23, 1  ;;  %v1702_v21 = vadd.f32 %v1701_v26, %v1700_v56 }
 0x175   : > { %v1645_v7 = vrot.slane %v1644_v31, 4  ;;  %v1710_v4 = vrot.slane %v1709_v18, 2  ;;  %v1640_v55 = vrot.slane %v1639_v33, 1  ;;  %v1623_v1 = vadd.f32 %v1622_v35, %v1621_v12 }
 0x176   : > { %v1715_v2 = vsel %vm551_vm0, %v1585_v27, 0.0  ;;  %v1714_v28 = vsel %vm551_vm0, %v1584_v61, 0.0  ;;  %v1667_v27 = vrot.slane %v1666_v14, 1  ;;  %v1694_v56 = vrot.slane %v1693_v46, 1 }
 0x177   : > { %v1646_v34 = vadd.f32 %v1645_v7, %v1644_v31  ;;  %v1716_v22 = vadd.f32 %v1715_v2, %v1714_v28  ;;  %v1435_v49 = vpop.permute.xlu1 %1434  ;;  %v1431_v10 = vpop.permute.xlu0 %1430  ;;  %v1711_v51 = vadd.f32 %v1710_v4, %v1709_v18  ;;  %v1632_v7 = vadd.f32 %v1631_v25, %v1630_v23 }
 0x178   : > { %v1571_v43 = vmul.f32 %v1539_v24, %v1435_v49  ;;  %v1570_v13 = vmul.f32 %v1538_v6, %v1431_v10  ;;  %v1703_v26 = vrot.slane %v1702_v21, 1  ;;  %v1641_v2 = vadd.f32 %v1640_v55, %v1639_v33 }
 0x179   : > { %v1647_v48 = vrot.slane %v1646_v34, 2  ;;  %v1717_v44 = vrot.slane %v1716_v22, 4  ;;  %v1774_v18 = vadd.f32 %v1743_v50, %v2810_v45  ;;  %v1772_v10 = vadd.f32 %v2763_v47, %v1596_v32 }
 0x17a   : > { %v1652_v40 = vsel %vm551_vm0, %v1571_v43, 0.0  ;;  %v1651_v3 = vsel %vm551_vm0, %v1570_v13, 0.0  ;;  %v1775_v23 = vadd.f32 %v1744_v62, %v1623_v1  ;;  %v1668_v43 = vadd.f32 %v1667_v27, %v1666_v14 }
 0x17b   : > { %v1648_v58 = vadd.f32 %v1647_v48, %v1646_v34  ;;  %v1718_v15 = vadd.f32 %v1717_v44, %v1716_v22  ;;  %v1653_v0 = vadd.f32 %v1652_v40, %v1651_v3  ;;  %v1523_v29 = vpop.permute.xlu1 %1522  ;;  %v1519_v31 = vpop.permute.xlu0 %1518  ;;  %v1712_v34 = vrot.slane %v1711_v51, 1 }
 0x17c   : > { %v1587_v54 = vmul.f32 %v1555_v30, %v1523_v29  ;;  %v1586_v5 = vmul.f32 %v1554_v53, %v1519_v31  ;;  %v1695_v33 = vadd.f32 %v1694_v56, %v1693_v46  ;;  %v1776_v13 = vadd.f32 %v1745_v57, %v1632_v7 }
 0x17d   : > { %v1649_v61 = vrot.slane %v1648_v58, 1  ;;  %v1719_v20 = vrot.slane %v1718_v15, 2  ;;  %v1654_v52 = vrot.slane %v1653_v0, 4  ;;  %v1686_v50 = vadd.f32 %v1685_v19, %v2806_v11 }
 0x17e   : > { %v1724_v24 = vsel %vm551_vm0, %v1587_v54, 0.0  ;;  %v1723_v6 = vsel %vm551_vm0, %v1586_v5, 0.0  ;;  %v1704_v45 = vadd.f32 %v1703_v26, %v1702_v21  ;;  %v1777_v32 = vadd.f32 %v1746_v37, %v1641_v2 }
 0x17f   : > { %v1720_v28 = vadd.f32 %v1719_v20, %v1718_v15  ;;  %v1655_v12 = vadd.f32 %v1654_v52, %v1653_v0  ;;  %v1650_v22 = vadd.f32 %v1649_v61, %v1648_v58  ;;  %v1725_v49 = vadd.f32 %v1724_v24, %v1723_v6 }
 0x180   : > { %v1807_v62 = vrot.slane %v1774_v18, 6  ;;  %v1713_v30 = vadd.f32 %v1712_v34, %v1711_v51  ;;  %v1806_v57 = vsel %vm1805_vm1, %v1804_v42, %v1772_v10  ;;  %v1810_v53 = vrot.slane %v1775_v23, 5 }
 0x181   : > { %v1721_v35 = vrot.slane %v1720_v28, 1  ;;  %v1656_v4 = vrot.slane %v1655_v12, 2  ;;  %v1726_v48 = vrot.slane %v1725_v49, 4  ;;  %v1778_v14 = vadd.f32 %v1747_v36, %v1650_v22 }
 0x182   : > { %v1780_v11 = vadd.f32 %v2759_v38, %v1668_v43  ;;  %v1783_v19 = vadd.f32 %v1751_v63, %v1695_v33  ;;  %v1813_v37 = vrot.slane %v1776_v13, 4  ;;  %v1782_v3 = vadd.f32 %v1750_v60, %v1686_v50 }
 0x183   : > { %v1657_v44 = vadd.f32 %v1656_v4, %v1655_v12  ;;  %v1727_v46 = vadd.f32 %v1726_v48, %v1725_v49  ;;  %v1722_v25 = vadd.f32 %v1721_v35, %v1720_v28  ;;  %v1784_v36 = vadd.f32 %v1752_v8, %v1704_v45 }
 0x184   : > { %v1816_v55 = vrot.slane %v1777_v32, 3  ;;  %v1809_v42 = vsel %vm1808_vm2, %v1807_v62, %v1806_v57  ;;  %v1785_v58 = vadd.f32 %v1753_v39, %v1713_v30  ;;  %v1819_v15 = vrot.slane %v1778_v14, 2 }
 0x185   : > { %v1658_v40 = vrot.slane %v1657_v44, 1  ;;  %v1728_v21 = vrot.slane %v1727_v46, 2  ;;  %v1812_v29 = vsel %vm1811_vm3, %v1810_v53, %v1809_v42  ;;  %v1786_v63 = vadd.f32 %v1754_v59, %v1722_v25 }
 0x186   : > { %v1755_v31 = vrot.slane %v2759_v38, 7  ;;  %v1826_v8 = vsel %vm1805_vm1, %v1825_v41, %v1780_v11  ;;  %v1829_v1 = vrot.slane %v1783_v19, 5  ;;  %v1815_v39 = vsel %vm1814_vm4, %v1813_v37, %v1812_v29 }
 0x187   : > { %v1659_v16 = vadd.f32 %v1658_v40, %v1657_v44  ;;  %v1729_v0 = vadd.f32 %v1728_v21, %v1727_v46  ;;  %v1827_v54 = vrot.slane %v1782_v3, 6  ;;  %v1831_v5 = vrot.slane %v1784_v36, 4 }
 0x188   : > { %v1818_v27 = vsel %vm1817_vm5, %v1816_v55, %v1815_v39  ;;  %v1833_v61 = vrot.slane %v1785_v58, 3  ;;  %v1835_v17 = vrot.slane %v1786_v63, 2 }
 0x189   : > { %v1779_v60 = vadd.f32 %v1748_v9, %v1659_v16  ;;  %v1730_v51 = vrot.slane %v1729_v0, 1  ;;  %v1821_v47 = vsel %vm1820_vm6, %v1819_v15, %v1818_v27  ;;  %v1828_v38 = vsel %vm1808_vm2, %v1827_v54, %v1826_v8 }
 0x18a   : > { %v1830_v41 = vsel %vm1811_vm3, %v1829_v1, %v1828_v38 }
 0x18b   : > { %v1822_v59 = vrot.slane %v1779_v60, 1  ;;  %v1731_v9 = vadd.f32 %v1730_v51, %v1729_v0  ;;  %v1832_v56 = vsel %vm1814_vm4, %v1831_v5, %v1830_v41 }
 0x18c   : > { %v1834_v7 = vsel %vm1817_vm5, %v1833_v61, %v1832_v56 }
 0x18d   : > { %v1824_v20 = vsel %vm1823_vm7, %v1822_v59, %v1821_v47  ;;  %v1787_v52 = vadd.f32 %v1755_v31, %v1731_v9  ;;  %v1836_v6 = vsel %vm1820_vm6, %v1835_v17, %v1834_v7 }
 0x18e   : > { %1841 = vst.msk [vmem:[%s2446_s13] sm:$0xff] %vm551_vm0, %v1824_v20 }
 0x18f   : > { %v1837_v24 = vrot.slane %v1787_v52, 1 }
 0x191   : > { %v1838_v26 = vsel %vm1823_vm7, %v1837_v24, %v1836_v6 }
 0x192   : > { %1842 = vst.msk [vmem:[%s2446_s13 + $0x8] sm:$0xff] %vm551_vm0, %v1838_v26 }
 0x193 PF: > { %s17_s28 = sadd.s32 1, %s2291_s28   ;;  %s2893_s24 = smov %s2283_s26 }
 0x194   : > { %p14_p8 = scmp.ge.s32.totalorder %s17_s28, 10   ;;  %s2894_s25 = smov %s2287_s27 }
 0x195   : > { %s2895_s26 = smov %s2898_s29  ;;  %s2896_s27 = smov %s2902_s30 }
 0x196   :  { %16 = sbr.rel (!%p14_p8) target bundleno = 3 (0x3), region = 120 }

// kernel: afd_forward.26
= control target key start
LH: loop header
LB: loop body
LE: loop exit
PB: predicated region body
PF: predicated region fallthrough
CT: control target
= control target key end

     0   :  { %vm34_vm0 = vcmask 130048   ;;  %s151_s1 = inlined_call_operand.vmem [shape: bf16[1,16,16], index: 1, kind: input, shape index: {}]   ;;  %s152_s0 = inlined_call_operand.vmem [shape: bf16[1,32,16], index: 0, kind: input, shape index: {}]   ;;  %s153_s2 = inlined_call_operand.vmem [shape: f32[1,32,16], index: 2, kind: output, shape index: {}]  }
   0x1   :  { %v112_v0 = vld [vmem:[%s151_s1] sm:$0xff]   ;;  %v114_v2 = vld [vmem:[%s152_s0 + $0x8] sm:$0xff]  }
   0x2   :  { %v113_v1 = vld [vmem:[%s152_s0] sm:$0xff]   ;;  %106 = vmatprep.subr.bf16.mxu0 %v112_v0 }
   0x3   :  { %107 = vmatpush3.bf16.msra.mxu0 %v112_v0  ;;  %108 = vmatprep.mubr.msk.bf16.mxu0 %vm34_vm0, %v113_v1 }
   0x6   :  { %109 = vmatmul.mubr.msk.bf16.vlgmr.msra.gmra.mxu0 %vm34_vm0, %v114_v2 }
  0xc6   :  { %v110_v3 = vpop.f32.mrf.mxu0 }
  0xc7   :  { %92 = vst.msk [vmem:[%s153_s2 + $0x10] sm:$0xff] %vm34_vm0, %v110_v3 }
  0xc8   :  { %v75_v4 = vpop.f32.mrf.mxu0 }
  0xc9   :  { %90 = vst.msk [vmem:[%s153_s2] sm:$0xff] %vm34_vm0, %v75_v4 }
  0xca   :  { %v111_v5 = vpop.f32.mrf.mxu0 }
  0xcb   :  { %93 = vst.msk [vmem:[%s153_s2 + $0x18] sm:$0xff] %vm34_vm0, %v111_v5 }
  0xcc   :  { %v78_v6 = vpop.f32.mrf.mxu0 }
  0xcd   :  { %91 = vst.msk [vmem:[%s153_s2 + $0x8] sm:$0xff] %vm34_vm0, %v78_v6 }

// kernel: afd_forward.27
= control target key start
LH: loop header
LB: loop body
LE: loop exit
PB: predicated region body
PF: predicated region fallthrough
CT: control target
= control target key end

     0   :  { %vm30_vm0 = vcmask 31744   ;;  %s666_s0 = inlined_call_operand.vmem [shape: f32[128,4], index: 0, kind: input, shape index: {}]   ;;  %s667_s1 = inlined_call_operand.vmem [shape: f32[1,4], index: 1, kind: input, shape index: {}]   ;;  %s668_s2 = inlined_call_operand.vmem [shape: f32[1,4], index: 2, kind: input, shape index: {}]   ;;  %s669_s3 = inlined_call_operand.vmem [shape: f32[128,4], index: 3, kind: output, shape index: {}]  }
   0x1   :  { %v14_v0 = vld [vmem:[%s666_s0] sm:$0xff]  ;;  %v16_v1 = vld [vmem:[%s666_s0 + $0x10] sm:$0xff]  ;;  %v15_v2 = vld [vmem:[%s666_s0 + $0x8] sm:$0xff] }
   0x2   :  { %v31_v3 = vsel %vm30_vm0, %v14_v0, 0.0  ;;  %v37_v4 = vsel %vm30_vm0, %v16_v1, 0.0  ;;  %v17_v5 = vld [vmem:[%s666_s0 + $0x18] sm:$0xff]  ;;  %v34_v6 = vsel %vm30_vm0, %v15_v2, 0.0  ;;  %v18_v8 = vld [vmem:[%s666_s0 + $0x20] sm:$0xff]  ;;  %v19_v9 = vld [vmem:[%s666_s0 + $0x28] sm:$0xff] }
   0x3   :  { %32 = vadd.xlane.f32.xlu0 %v31_v3  ;;  %38 = vadd.xlane.f32.xlu1 %v37_v4  ;;  %v40_v7 = vsel %vm30_vm0, %v17_v5, 0.0  ;;  %v43_v10 = vsel %vm30_vm0, %v18_v8, 0.0  ;;  %v46_v11 = vsel %vm30_vm0, %v19_v9, 0.0  ;;  %v387_v12 = vld [vmem:[%s666_s0 + $0x30] sm:$0xff]  ;;  %v392_v13 = vld [vmem:[%s666_s0 + $0x38] sm:$0xff]  ;;  %v401_v16 = vld [vmem:[%s666_s0 + $0x40] sm:$0xff] }
   0x4   :  { %v49_v14 = vsel %vm30_vm0, %v387_v12, 0.0  ;;  %v52_v15 = vsel %vm30_vm0, %v392_v13, 0.0  ;;  %v406_v17 = vld [vmem:[%s666_s0 + $0x48] sm:$0xff]  ;;  %v55_v18 = vsel %vm30_vm0, %v401_v16, 0.0  ;;  %v415_v20 = vld [vmem:[%s666_s0 + $0x50] sm:$0xff]  ;;  %v420_v21 = vld [vmem:[%s666_s0 + $0x58] sm:$0xff] }
   0x5   :  { %v58_v19 = vsel %vm30_vm0, %v406_v17, 0.0  ;;  %v61_v22 = vsel %vm30_vm0, %v415_v20, 0.0  ;;  %v64_v23 = vsel %vm30_vm0, %v420_v21, 0.0  ;;  %v429_v24 = vld [vmem:[%s666_s0 + $0x60] sm:$0xff]  ;;  %v434_v25 = vld [vmem:[%s666_s0 + $0x68] sm:$0xff]  ;;  %v443_v28 = vld [vmem:[%s666_s0 + $0x70] sm:$0xff] }
   0x6   :  { %v67_v26 = vsel %vm30_vm0, %v429_v24, 0.0  ;;  %v70_v27 = vsel %vm30_vm0, %v434_v25, 0.0  ;;  %v448_v29 = vld [vmem:[%s666_s0 + $0x78] sm:$0xff]  ;;  %v73_v30 = vsel %vm30_vm0, %v443_v28, 0.0 }
   0x7   :  { %35 = vadd.xlane.f32.xlu0 %v34_v6  ;;  %41 = vadd.xlane.f32.xlu1 %v40_v7  ;;  %v76_v31 = vsel %vm30_vm0, %v448_v29, 0.0 }
   0xb   :  { %44 = vadd.xlane.f32.xlu0 %v43_v10  ;;  %47 = vadd.xlane.f32.xlu1 %v46_v11 }
   0xf   :  { %50 = vadd.xlane.f32.xlu0 %v49_v14  ;;  %53 = vadd.xlane.f32.xlu1 %v52_v15 }
  0x13   :  { %56 = vadd.xlane.f32.xlu0 %v55_v18  ;;  %59 = vadd.xlane.f32.xlu1 %v58_v19 }
  0x17   :  { %62 = vadd.xlane.f32.xlu0 %v61_v22  ;;  %65 = vadd.xlane.f32.xlu1 %v64_v23 }
  0x1b   :  { %68 = vadd.xlane.f32.xlu0 %v67_v26  ;;  %71 = vadd.xlane.f32.xlu1 %v70_v27 }
  0x1f   :  { %74 = vadd.xlane.f32.xlu0 %v73_v30  ;;  %77 = vadd.xlane.f32.xlu1 %v76_v31 }
  0x8c   :  { %v33_v32 = vpop.xlane.xlu0 %32  ;;  %v39_v33 = vpop.xlane.xlu1 %38 }
  0x8d   :  { %v80_v34 = vmul.f32 0.25, %v33_v32  ;;  %v82_v35 = vmul.f32 0.25, %v39_v33 }
  0x8f   :  { %v454_v36 = vsub.f32 %v14_v0, %v80_v34  ;;  %v456_v37 = vsub.f32 %v16_v1, %v82_v35 }
  0x90   :  { %v36_v38 = vpop.xlane.xlu0 %35  ;;  %v42_v39 = vpop.xlane.xlu1 %41 }
  0x91   :  { %v81_v40 = vmul.f32 0.25, %v36_v38  ;;  %v83_v41 = vmul.f32 0.25, %v42_v39  ;;  %v112_v42 = vmul.f32 %v454_v36, %v454_v36  ;;  %v114_v43 = vmul.f32 %v456_v37, %v456_v37 }
  0x93   :  { %v462_v44 = vsub.f32 %v15_v2, %v81_v40  ;;  %v464_v45 = vsub.f32 %v17_v5, %v83_v41  ;;  %v128_v46 = vsel %vm30_vm0, %v112_v42, 0.0  ;;  %v134_v49 = vsel %vm30_vm0, %v114_v43, 0.0 }
  0x94   :  { %129 = vadd.xlane.f32.xlu0 %v128_v46  ;;  %v45_v47 = vpop.xlane.xlu0 %44  ;;  %v48_v48 = vpop.xlane.xlu1 %47 }
  0x95   :  { %v84_v50 = vmul.f32 0.25, %v45_v47  ;;  %v85_v51 = vmul.f32 0.25, %v48_v48  ;;  %v113_v52 = vmul.f32 %v462_v44, %v462_v44  ;;  %v115_v53 = vmul.f32 %v464_v45, %v464_v45 }
  0x97   :  { %v472_v54 = vsub.f32 %v18_v8, %v84_v50  ;;  %v474_v55 = vsub.f32 %v19_v9, %v85_v51  ;;  %v131_v56 = vsel %vm30_vm0, %v113_v52, 0.0  ;;  %v137_v59 = vsel %vm30_vm0, %v115_v53, 0.0 }
  0x98   :  { %135 = vadd.xlane.f32.xlu0 %v134_v49  ;;  %132 = vadd.xlane.f32.xlu1 %v131_v56  ;;  %v51_v57 = vpop.xlane.xlu0 %50  ;;  %v54_v58 = vpop.xlane.xlu1 %53 }
  0x99   :  { %v86_v60 = vmul.f32 0.25, %v51_v57  ;;  %v87_v61 = vmul.f32 0.25, %v54_v58  ;;  %v116_v62 = vmul.f32 %v472_v54, %v472_v54  ;;  %v117_v63 = vmul.f32 %v474_v55, %v474_v55 }
  0x9b   :  { %v483_v0 = vsub.f32 %v387_v12, %v86_v60  ;;  %v486_v1 = vsub.f32 %v392_v13, %v87_v61  ;;  %v140_v2 = vsel %vm30_vm0, %v116_v62, 0.0  ;;  %v143_v5 = vsel %vm30_vm0, %v117_v63, 0.0 }
  0x9c   :  { %138 = vadd.xlane.f32.xlu1 %v137_v59  ;;  %141 = vadd.xlane.f32.xlu0 %v140_v2  ;;  %v57_v3 = vpop.xlane.xlu0 %56  ;;  %v60_v4 = vpop.xlane.xlu1 %59 }
  0x9d   :  { %v88_v6 = vmul.f32 0.25, %v57_v3  ;;  %v89_v7 = vmul.f32 0.25, %v60_v4  ;;  %v118_v8 = vmul.f32 %v483_v0, %v483_v0  ;;  %v119_v9 = vmul.f32 %v486_v1, %v486_v1 }
  0x9f   :  { %v495_v10 = vsub.f32 %v401_v16, %v88_v6  ;;  %v498_v11 = vsub.f32 %v406_v17, %v89_v7  ;;  %v146_v12 = vsel %vm30_vm0, %v118_v8, 0.0  ;;  %v149_v15 = vsel %vm30_vm0, %v119_v9, 0.0 }
  0xa0   :  { %144 = vadd.xlane.f32.xlu1 %v143_v5  ;;  %147 = vadd.xlane.f32.xlu0 %v146_v12  ;;  %v63_v13 = vpop.xlane.xlu0 %62  ;;  %v66_v14 = vpop.xlane.xlu1 %65 }
  0xa1   :  { %v90_v18 = vmul.f32 0.25, %v63_v13  ;;  %v91_v19 = vmul.f32 0.25, %v66_v14  ;;  %v120_v22 = vmul.f32 %v495_v10, %v495_v10  ;;  %v121_v16 = vmul.f32 %v498_v11, %v498_v11 }
  0xa3   :  { %v507_v23 = vsub.f32 %v415_v20, %v90_v18  ;;  %v510_v17 = vsub.f32 %v420_v21, %v91_v19  ;;  %v152_v26 = vsel %vm30_vm0, %v120_v22, 0.0  ;;  %v155_v31 = vsel %vm30_vm0, %v121_v16, 0.0 }
  0xa4   :  { %150 = vadd.xlane.f32.xlu1 %v149_v15  ;;  %153 = vadd.xlane.f32.xlu0 %v152_v26  ;;  %v69_v27 = vpop.xlane.xlu0 %68  ;;  %v72_v30 = vpop.xlane.xlu1 %71  ;;  %v547_v26 = vld [vmem:[%s667_s1] ss:$0 sm:$0xff] }
  0xa5   :  { %v92_v32 = vmul.f32 0.25, %v69_v27  ;;  %v93_v33 = vmul.f32 0.25, %v72_v30  ;;  %v122_v34 = vmul.f32 %v507_v23, %v507_v23  ;;  %v123_v20 = vmul.f32 %v510_v17, %v510_v17 }
  0xa7   :  { %v519_v35 = vsub.f32 %v429_v24, %v92_v32  ;;  %v522_v21 = vsub.f32 %v434_v25, %v93_v33  ;;  %v158_v38 = vsel %vm30_vm0, %v122_v34, 0.0  ;;  %v161_v41 = vsel %vm30_vm0, %v123_v20, 0.0  ;;  %v553_v32 = vld [vmem:[%s668_s2] ss:$0 sm:$0xff] }
  0xa8   :  { %156 = vadd.xlane.f32.xlu1 %v155_v31  ;;  %159 = vadd.xlane.f32.xlu0 %v158_v38  ;;  %v75_v39 = vpop.xlane.xlu0 %74  ;;  %v78_v40 = vpop.xlane.xlu1 %77 }
  0xa9   :  { %v94_v42 = vmul.f32 0.25, %v75_v39  ;;  %v95_v43 = vmul.f32 0.25, %v78_v40  ;;  %v124_v46 = vmul.f32 %v519_v35, %v519_v35  ;;  %v125_v24 = vmul.f32 %v522_v21, %v522_v21 }
  0xab   :  { %v531_v47 = vsub.f32 %v443_v28, %v94_v42  ;;  %v534_v25 = vsub.f32 %v448_v29, %v95_v43  ;;  %v164_v48 = vsel %vm30_vm0, %v124_v46, 0.0  ;;  %v167_v49 = vsel %vm30_vm0, %v125_v24, 0.0 }
  0xac   :  { %162 = vadd.xlane.f32.xlu1 %v161_v41  ;;  %165 = vadd.xlane.f32.xlu0 %v164_v48 }
  0xad   :  { %v126_v50 = vmul.f32 %v531_v47, %v531_v47  ;;  %v127_v51 = vmul.f32 %v534_v25, %v534_v25 }
  0xaf   :  { %v170_v52 = vsel %vm30_vm0, %v126_v50, 0.0  ;;  %v173_v28 = vsel %vm30_vm0, %v127_v51, 0.0 }
  0xb0   :  { %168 = vadd.xlane.f32.xlu1 %v167_v49  ;;  %171 = vadd.xlane.f32.xlu0 %v170_v52 }
  0xb4   :  { %174 = vadd.xlane.f32.xlu1 %v173_v28 }
 0x11d   :  { %v130_v29 = vpop.xlane.xlu0 %129 }
 0x11e   :  { %v176_v53 = vmul.f32 0.25, %v130_v29 }
 0x120   :  { %v192_v56 = vadd.f32 1e-05, %v176_v53 }
 0x121   :  { %v133_v57 = vpop.xlane.xlu1 %132  ;;  %v136_v58 = vpop.xlane.xlu0 %135 }
 0x122   :  { %308 = vrsqrt.f32 %v192_v56  ;;  %v177_v59 = vmul.f32 0.25, %v133_v57  ;;  %v178_v60 = vmul.f32 0.25, %v136_v58 }
 0x124   :  { %v193_v61 = vadd.f32 1e-05, %v177_v59  ;;  %v194_v62 = vadd.f32 1e-05, %v178_v60 }
 0x125   :  { %v139_v63 = vpop.xlane.xlu1 %138  ;;  %v142_v2 = vpop.xlane.xlu0 %141 }
 0x126   :  { %310 = vrsqrt.f32 %v193_v61  ;;  %v179_v3 = vmul.f32 0.25, %v139_v63  ;;  %v180_v4 = vmul.f32 0.25, %v142_v2 }
 0x127   :  { %312 = vrsqrt.f32 %v194_v62 }
 0x128   :  { %v195_v5 = vadd.f32 1e-05, %v179_v3  ;;  %v196_v6 = vadd.f32 1e-05, %v180_v4 }
 0x129   :  { %v145_v7 = vpop.xlane.xlu1 %144  ;;  %v148_v8 = vpop.xlane.xlu0 %147 }
 0x12a   :  { %314 = vrsqrt.f32 %v195_v5  ;;  %v181_v9 = vmul.f32 0.25, %v145_v7  ;;  %v182_v12 = vmul.f32 0.25, %v148_v8 }
 0x12b   :  { %316 = vrsqrt.f32 %v196_v6 }
 0x12c   :  { %v197_v13 = vadd.f32 1e-05, %v181_v9  ;;  %v198_v14 = vadd.f32 1e-05, %v182_v12 }
 0x12d   :  { %v151_v15 = vpop.xlane.xlu1 %150  ;;  %v154_v18 = vpop.xlane.xlu0 %153 }
 0x12e   :  { %318 = vrsqrt.f32 %v197_v13  ;;  %v183_v19 = vmul.f32 0.25, %v151_v15  ;;  %v184_v22 = vmul.f32 0.25, %v154_v18 }
 0x12f   :  { %v309_v16 = vpop.eup %308  ;;  %320 = vrsqrt.f32 %v198_v14 }
 0x130   :  { %v224_v27 = vmul.f32 %v309_v16, %v454_v36  ;;  %v199_v30 = vadd.f32 1e-05, %v183_v19  ;;  %v200_v31 = vadd.f32 1e-05, %v184_v22 }
 0x131   :  { %v157_v33 = vpop.xlane.xlu1 %156  ;;  %v160_v34 = vpop.xlane.xlu0 %159 }
 0x132   :  { %v247_v20 = vmul.f32 %v547_v26, %v224_v27  ;;  %322 = vrsqrt.f32 %v199_v30  ;;  %v185_v38 = vmul.f32 0.25, %v157_v33  ;;  %v186_v39 = vmul.f32 0.25, %v160_v34 }
 0x133   :  { %v311_v40 = vpop.eup %310  ;;  %324 = vrsqrt.f32 %v200_v31 }
 0x134   :  { %v313_v41 = vpop.eup %312  ;;  %v270_v42 = vadd.f32 %v553_v32, %v247_v20  ;;  %v225_v36 = vmul.f32 %v311_v40, %v462_v44  ;;  %v201_v43 = vadd.f32 1e-05, %v185_v38  ;;  %v202_v46 = vadd.f32 1e-05, %v186_v39 }
 0x135   :  { %v226_v24 = vmul.f32 %v313_v41, %v456_v37  ;;  %v163_v48 = vpop.xlane.xlu1 %162  ;;  %v166_v49 = vpop.xlane.xlu0 %165 }
 0x136   :  { %286 = vst.msk [vmem:[%s669_s3] sm:$0xff] %vm30_vm0, %v270_v42  ;;  %v248_v50 = vmul.f32 %v547_v26, %v225_v36  ;;  %326 = vrsqrt.f32 %v201_v43  ;;  %v187_v51 = vmul.f32 0.25, %v163_v48  ;;  %v188_v52 = vmul.f32 0.25, %v166_v49 }
 0x137   :  { %v315_v28 = vpop.eup %314  ;;  %v249_v29 = vmul.f32 %v547_v26, %v226_v24  ;;  %328 = vrsqrt.f32 %v202_v46 }
 0x138   :  { %v317_v44 = vpop.eup %316  ;;  %v271_v53 = vadd.f32 %v553_v32, %v248_v50  ;;  %v227_v37 = vmul.f32 %v315_v28, %v464_v45  ;;  %v203_v56 = vadd.f32 1e-05, %v187_v51  ;;  %v204_v57 = vadd.f32 1e-05, %v188_v52 }
 0x139   :  { %v272_v58 = vadd.f32 %v553_v32, %v249_v29  ;;  %v228_v59 = vmul.f32 %v317_v44, %v472_v54  ;;  %v169_v60 = vpop.xlane.xlu1 %168  ;;  %v172_v61 = vpop.xlane.xlu0 %171 }
 0x13a   :  { %287 = vst.msk [vmem:[%s669_s3 + $0x8] sm:$0xff] %vm30_vm0, %v271_v53  ;;  %v250_v62 = vmul.f32 %v547_v26, %v227_v37  ;;  %330 = vrsqrt.f32 %v203_v56  ;;  %v189_v63 = vmul.f32 0.25, %v169_v60  ;;  %v190_v2 = vmul.f32 0.25, %v172_v61 }
 0x13b   :  { %v319_v3 = vpop.eup %318  ;;  %288 = vst.msk [vmem:[%s669_s3 + $0x10] sm:$0xff] %vm30_vm0, %v272_v58  ;;  %v251_v45 = vmul.f32 %v547_v26, %v228_v59  ;;  %332 = vrsqrt.f32 %v204_v57 }
 0x13c   :  { %v321_v54 = vpop.eup %320  ;;  %v273_v4 = vadd.f32 %v553_v32, %v250_v62  ;;  %v229_v5 = vmul.f32 %v319_v3, %v474_v55  ;;  %v205_v6 = vadd.f32 1e-05, %v189_v63  ;;  %v206_v7 = vadd.f32 1e-05, %v190_v2 }
 0x13d   :  { %v274_v8 = vadd.f32 %v553_v32, %v251_v45  ;;  %v230_v9 = vmul.f32 %v321_v54, %v483_v0  ;;  %v175_v12 = vpop.xlane.xlu1 %174 }
 0x13e   :  { %289 = vst.msk [vmem:[%s669_s3 + $0x18] sm:$0xff] %vm30_vm0, %v273_v4  ;;  %v252_v13 = vmul.f32 %v547_v26, %v229_v5  ;;  %334 = vrsqrt.f32 %v205_v6  ;;  %v191_v14 = vmul.f32 0.25, %v175_v12 }
 0x13f   :  { %v323_v15 = vpop.eup %322  ;;  %290 = vst.msk [vmem:[%s669_s3 + $0x20] sm:$0xff] %vm30_vm0, %v274_v8  ;;  %v253_v55 = vmul.f32 %v547_v26, %v230_v9  ;;  %336 = vrsqrt.f32 %v206_v7 }
 0x140   :  { %v325_v0 = vpop.eup %324  ;;  %v275_v18 = vadd.f32 %v553_v32, %v252_v13  ;;  %v231_v19 = vmul.f32 %v323_v15, %v486_v1  ;;  %v207_v22 = vadd.f32 1e-05, %v191_v14 }
 0x141   :  { %v276_v16 = vadd.f32 %v553_v32, %v253_v55  ;;  %v232_v27 = vmul.f32 %v325_v0, %v495_v10 }
 0x142   :  { %291 = vst.msk [vmem:[%s669_s3 + $0x28] sm:$0xff] %vm30_vm0, %v275_v18  ;;  %v254_v30 = vmul.f32 %v547_v26, %v231_v19  ;;  %338 = vrsqrt.f32 %v207_v22 }
 0x143   :  { %v327_v31 = vpop.eup %326  ;;  %292 = vst.msk [vmem:[%s669_s3 + $0x30] sm:$0xff] %vm30_vm0, %v276_v16  ;;  %v255_v1 = vmul.f32 %v547_v26, %v232_v27 }
 0x144   :  { %v329_v33 = vpop.eup %328  ;;  %v277_v34 = vadd.f32 %v553_v32, %v254_v30  ;;  %v233_v10 = vmul.f32 %v327_v31, %v498_v11 }
 0x145   :  { %v278_v20 = vadd.f32 %v553_v32, %v255_v1  ;;  %v234_v38 = vmul.f32 %v329_v33, %v507_v23 }
 0x146   :  { %293 = vst.msk [vmem:[%s669_s3 + $0x38] sm:$0xff] %vm30_vm0, %v277_v34  ;;  %v256_v39 = vmul.f32 %v547_v26, %v233_v10 }
 0x147   :  { %v331_v40 = vpop.eup %330  ;;  %294 = vst.msk [vmem:[%s669_s3 + $0x40] sm:$0xff] %vm30_vm0, %v278_v20  ;;  %v257_v41 = vmul.f32 %v547_v26, %v234_v38 }
 0x148   :  { %v333_v11 = vpop.eup %332  ;;  %v279_v42 = vadd.f32 %v553_v32, %v256_v39  ;;  %v235_v23 = vmul.f32 %v331_v40, %v510_v17 }
 0x149   :  { %v280_v36 = vadd.f32 %v553_v32, %v257_v41  ;;  %v236_v43 = vmul.f32 %v333_v11, %v519_v35 }
 0x14a   :  { %295 = vst.msk [vmem:[%s669_s3 + $0x48] sm:$0xff] %vm30_vm0, %v279_v42  ;;  %v258_v46 = vmul.f32 %v547_v26, %v235_v23 }
 0x14b   :  { %v335_v24 = vpop.eup %334  ;;  %296 = vst.msk [vmem:[%s669_s3 + $0x50] sm:$0xff] %vm30_vm0, %v280_v36  ;;  %v259_v48 = vmul.f32 %v547_v26, %v236_v43 }
 0x14c   :  { %v337_v17 = vpop.eup %336  ;;  %v281_v49 = vadd.f32 %v553_v32, %v258_v46  ;;  %v237_v35 = vmul.f32 %v335_v24, %v522_v21 }
 0x14d   :  { %v282_v50 = vadd.f32 %v553_v32, %v259_v48  ;;  %v238_v51 = vmul.f32 %v337_v17, %v531_v47 }
 0x14e   :  { %297 = vst.msk [vmem:[%s669_s3 + $0x58] sm:$0xff] %vm30_vm0, %v281_v49  ;;  %v260_v52 = vmul.f32 %v547_v26, %v237_v35 }
 0x14f   :  { %v339_v28 = vpop.eup %338  ;;  %298 = vst.msk [vmem:[%s669_s3 + $0x60] sm:$0xff] %vm30_vm0, %v282_v50  ;;  %v261_v29 = vmul.f32 %v547_v26, %v238_v51 }
 0x150   :  { %v283_v21 = vadd.f32 %v553_v32, %v260_v52  ;;  %v239_v44 = vmul.f32 %v339_v28, %v534_v25 }
 0x151   :  { %v284_v47 = vadd.f32 %v553_v32, %v261_v29 }
 0x152   :  { %299 = vst.msk [vmem:[%s669_s3 + $0x68] sm:$0xff] %vm30_vm0, %v283_v21  ;;  %v262_v53 = vmul.f32 %v547_v26, %v239_v44 }
 0x153   :  { %300 = vst.msk [vmem:[%s669_s3 + $0x70] sm:$0xff] %vm30_vm0, %v284_v47 }
 0x154   :  { %v285_v37 = vadd.f32 %v553_v32, %v262_v53 }
 0x156   :  { %301 = vst.msk [vmem:[%s669_s3 + $0x78] sm:$0xff] %vm30_vm0, %v285_v37 }

// kernel: afd_forward.29
= control target key start
LH: loop header
LB: loop body
LE: loop exit
PB: predicated region body
PF: predicated region fallthrough
CT: control target
= control target key end

     0   :  { %s469_s14 = smov 0   ;;  %s583_s0 = inlined_call_operand.vmem [shape: f32[2,6,6,1], index: 0, kind: input, shape index: {}]   ;;  %s584_s1 = inlined_call_operand.vmem [shape: f32[3,3,1], index: 1, kind: input, shape index: {}]   ;;  %s585_s2 = inlined_call_operand.<no memory space> [shape: f32[1,1,1,1], index: 2, kind: input, shape index: {}]   ;;  %s586_s3 = inlined_call_operand.vmem [shape: f32[2,4,4,1], index: 3, kind: output, shape index: {}]  }
   0x1   :  { %v8_v0 = vstv %s585_s2 }
   0x2   :  { %9 = vst [vmem:[#allocation2] sm:$0x1] %v8_v0 }
   0x3 LB: > { %s393_s15 = sadd.s32 4294967295, %s444_s14   ;;  %p397_p0 = scmp.ge.s32.totalorder %s444_s14, 1  ;;  %s444_s14 = sphi %s469_s14, %s15_s14  }
   0x4   : > { %p139_p1 = scmp.lt.s32.totalorder %s444_s14, 3 }
   0x6   : > { %p140_p2 = pnand %p397_p0, %p139_p1 }
   0x7   : > { %p163_p3 = scmp.lt.s32.totalorder (!%p140_p2), %s393_s15, 1 }
   0x8   : > { %143 = sbr.rel (%p140_p2) target bundleno = 48 (0x30), region = 32 }
   0xd   : > { %v180_v1 = vlaneseq  ;;  %s588_s15 = smov (!%p163_p3, %s393_s15), 1  ;;  %v173_v3 = vld [vmem:[%s584_s1] sm:$0x7]  ;;  %v174_v4 = vld [vmem:[%s584_s1 + $0x4] sm:$0x7]  ;;  %vm333_vm0 = vcmask 3072  }
   0xe   : > { %s429_s19 = smul.u32 48, %s588_s15  ;;  %v175_v15 = vld [vmem:[%s584_s1 + $0x8] sm:$0x7]  ;;  %s428_s25 = sshll.u32 %s588_s15, 4 }
   0xf   : > { %v181_v2 = vshrl.u32 %v180_v1, 7  ;;  %s172_s28 = scalar_lea.vmem %s586_s3, %s428_s25 }
  0x10   : > { %s489_s22 = scalar_lea.vmem %s583_s0, %s429_s19 }
  0x11   : > { %v182_v5 = vsub.s32 0, %v181_v2  ;;  %v198_v6 = vsub.s32 1, %v181_v2  ;;  %v214_v7 = vsub.s32 2, %v181_v2  ;;  %v176_v12 = vld [vmem:[%s489_s22] sm:$0xf] }
  0x12   : > { %v192_v13 = vld [vmem:[%s489_s22 + $0x1] sm:$0xf]  ;;  %v401_v19 = vld [vmem:[%s489_s22 + $0x8] sm:$0xf]  ;;  %v402_v33 = vld [vmem:[%s489_s22 + $0x10] sm:$0xf] }
  0x13   : > { %v183_v8 = vrot.slane %v173_v3, %v182_v5  ;;  %v199_v9 = vrot.slane %v173_v3, %v198_v6  ;;  %v491_v10 = vrot.slane %v173_v3, %v214_v7  ;;  %v493_v11 = vrot.slane %v174_v4, %v182_v5  ;;  %v208_v14 = vld [vmem:[%s489_s22 + $0x2] sm:$0xf]  ;;  %v405_v21 = vld [vmem:[%s489_s22 + $0x9] sm:$0xf]  ;;  %v413_v36 = vld [vmem:[%s489_s22 + $0x10] sm:$0xf] }
  0x14   : > { %v503_v20 = vrot.slane %v174_v4, %v198_v6  ;;  %v409_v22 = vld [vmem:[%s489_s22 + $0xa] sm:$0xf]  ;;  %v507_v23 = vrot.slane %v174_v4, %v214_v7  ;;  %v513_v29 = vrot.slane %v175_v15, %v182_v5  ;;  %v417_v37 = vld [vmem:[%s489_s22 + $0x11] sm:$0xf]  ;;  %v520_v38 = vrot.slane %v175_v15, %v198_v6  ;;  %v403_v51 = vld [vmem:[%s489_s22 + $0x18] sm:$0xf] }
  0x15   : > { %v184_v16 = vmul.f32 %v183_v8, %v176_v12  ;;  %v200_v17 = vmul.f32 %v199_v9, %v192_v13  ;;  %v216_v18 = vmul.f32 %v491_v10, %v208_v14  ;;  %v233_v25 = vmul.f32 %v401_v19, %v493_v11  ;;  %v177_v26 = vld [vmem:[%s489_s22 + $0x8] sm:$0xf]  ;;  %v406_v39 = vld [vmem:[%s489_s22 + $0x11] sm:$0xf]  ;;  %v414_v56 = vld [vmem:[%s489_s22 + $0x18] sm:$0xf] }
  0x16   : > { %v193_v27 = vld [vmem:[%s489_s22 + $0x9] sm:$0xf]  ;;  %v185_v30 = vmul.f32 %v183_v8, %v177_v26  ;;  %v249_v35 = vmul.f32 %v405_v21, %v503_v20  ;;  %v265_v40 = vmul.f32 %v409_v22, %v507_v23  ;;  %v234_v42 = vmul.f32 %v402_v33, %v493_v11  ;;  %v178_v43 = vld [vmem:[%s489_s22 + $0x10] sm:$0xf]  ;;  %v407_v57 = vld [vmem:[%s489_s22 + $0x19] sm:$0xf] }
  0x17   : > { %v204_v24 = vadd.f32 %v200_v17, %v184_v16  ;;  %v209_v28 = vld [vmem:[%s489_s22 + $0xa] sm:$0xf]  ;;  %v201_v31 = vmul.f32 %v199_v9, %v193_v27  ;;  %v194_v44 = vld [vmem:[%s489_s22 + $0x11] sm:$0xf]  ;;  %v186_v48 = vmul.f32 %v183_v8, %v178_v43  ;;  %v282_v52 = vmul.f32 %v413_v36, %v513_v29  ;;  %v179_v62 = vld [vmem:[%s489_s22 + $0x18] sm:$0xf] }
  0x18   : > { %v217_v32 = vmul.f32 %v491_v10, %v209_v28  ;;  %v210_v45 = vld [vmem:[%s489_s22 + $0x12] sm:$0xf]  ;;  %v202_v49 = vmul.f32 %v199_v9, %v194_v44  ;;  %v532_v53 = vrot.slane %v175_v15, %v214_v7  ;;  %v250_v55 = vmul.f32 %v406_v39, %v503_v20  ;;  %v195_v63 = vld [vmem:[%s489_s22 + $0x19] sm:$0xf]  ;;  %v404_v7 = vld [vmem:[%s489_s22 + $0x20] sm:$0xf] }
  0x19   : > { %v220_v34 = vadd.f32 %v216_v18, %v204_v24  ;;  %v205_v41 = vadd.f32 %v201_v31, %v185_v30  ;;  %v410_v47 = vld [vmem:[%s489_s22 + $0x12] sm:$0xf]  ;;  %v218_v50 = vmul.f32 %v491_v10, %v210_v45  ;;  %v298_v59 = vmul.f32 %v417_v37, %v520_v38  ;;  %v211_v0 = vld [vmem:[%s489_s22 + $0x1a] sm:$0xf]  ;;  %v408_v17 = vld [vmem:[%s489_s22 + $0x21] sm:$0xf] }
  0x1a   : > { %v206_v60 = vadd.f32 %v202_v49, %v186_v48  ;;  %v235_v61 = vmul.f32 %v403_v51, %v493_v11  ;;  %v421_v1 = vld [vmem:[%s489_s22 + $0x12] sm:$0xf]  ;;  %v266_v3 = vmul.f32 %v410_v47, %v507_v23  ;;  %v411_v4 = vld [vmem:[%s489_s22 + $0x1a] sm:$0xf]  ;;  %v187_v5 = vmul.f32 %v183_v8, %v179_v62  ;;  %v415_v21 = vld [vmem:[%s489_s22 + $0x20] sm:$0xf] }
  0x1b   : > { %v237_v46 = vadd.f32 %v233_v25, %v220_v34  ;;  %v221_v54 = vadd.f32 %v217_v32, %v205_v41  ;;  %v203_v6 = vmul.f32 %v199_v9, %v195_v63  ;;  %v418_v13 = vld [vmem:[%s489_s22 + $0x19] sm:$0xf]  ;;  %v251_v15 = vmul.f32 %v407_v57, %v503_v20  ;;  %v412_v28 = vld [vmem:[%s489_s22 + $0x22] sm:$0xf]  ;;  %v416_v36 = vld [vmem:[%s489_s22 + $0x28] sm:$0xf] }
  0x1c   : > { %v222_v14 = vadd.f32 %v218_v50, %v206_v60  ;;  %v219_v16 = vmul.f32 %v491_v10, %v211_v0  ;;  %v283_v19 = vmul.f32 %v414_v56, %v513_v29  ;;  %v236_v8 = vmul.f32 %v404_v7, %v493_v11  ;;  %v422_v25 = vld [vmem:[%s489_s22 + $0x1a] sm:$0xf]  ;;  %v419_v31 = vld [vmem:[%s489_s22 + $0x21] sm:$0xf]  ;;  %v425_v37 = vld [vmem:[#allocation2] ss:$0 sm:$0xff] }
  0x1d   : > { %v253_v58 = vadd.f32 %v249_v35, %v237_v46  ;;  %v238_v2 = vadd.f32 %v234_v42, %v221_v54  ;;  %v207_v22 = vadd.f32 %v203_v6, %v187_v5  ;;  %v314_v24 = vmul.f32 %v421_v1, %v532_v53  ;;  %v423_v41 = vld [vmem:[%s489_s22 + $0x22] sm:$0xf]  ;;  %v424_v54 = vld [vmem:[%s489_s22 + $0x2a] sm:$0xf] }
  0x1e   : > { %v239_v26 = vadd.f32 %v235_v61, %v222_v14  ;;  %v267_v27 = vmul.f32 %v411_v4, %v507_v23  ;;  %v299_v30 = vmul.f32 %v418_v13, %v520_v38  ;;  %v252_v33 = vmul.f32 %v408_v17, %v503_v20  ;;  %v420_v20 = vld [vmem:[%s489_s22 + $0x29] sm:$0xf] }
  0x1f   : > { %v269_v12 = vadd.f32 %v265_v40, %v253_v58  ;;  %v254_v18 = vadd.f32 %v250_v55, %v238_v2  ;;  %v223_v32 = vadd.f32 %v219_v16, %v207_v22  ;;  %v284_v35 = vmul.f32 %v415_v21, %v513_v29 }
  0x20   : > { %v255_v34 = vadd.f32 %v251_v15, %v239_v26  ;;  %v315_v40 = vmul.f32 %v422_v25, %v532_v53  ;;  %v268_v43 = vmul.f32 %v412_v28, %v507_v23  ;;  %v300_v46 = vmul.f32 %v419_v31, %v520_v38 }
  0x21   : > { %v286_v9 = vadd.f32 %v282_v52, %v269_v12  ;;  %v270_v10 = vadd.f32 %v266_v3, %v254_v18  ;;  %v240_v42 = vadd.f32 %v236_v8, %v223_v32  ;;  %v285_v49 = vmul.f32 %v416_v36, %v513_v29 }
  0x22   : > { %v271_v45 = vadd.f32 %v267_v27, %v255_v34  ;;  %v316_v52 = vmul.f32 %v423_v41, %v532_v53  ;;  %v301_v56 = vmul.f32 %v420_v20, %v520_v38  ;;  %v317_v60 = vmul.f32 %v424_v54, %v532_v53 }
  0x23   : > { %v302_v11 = vadd.f32 %v298_v59, %v286_v9  ;;  %v287_v39 = vadd.f32 %v283_v19, %v270_v10  ;;  %v256_v48 = vadd.f32 %v252_v33, %v240_v42 }
  0x24   : > { %v288_v51 = vadd.f32 %v284_v35, %v271_v45 }
  0x25   : > { %v318_v44 = vadd.f32 %v314_v24, %v302_v11  ;;  %v303_v47 = vadd.f32 %v299_v30, %v287_v39  ;;  %v272_v55 = vadd.f32 %v268_v43, %v256_v48 }
  0x26   : > { %v304_v57 = vadd.f32 %v300_v46, %v288_v51 }
  0x27   : > { %v329_v50 = vadd.f32 %v425_v37, %v318_v44  ;;  %v319_v23 = vadd.f32 %v315_v40, %v303_v47  ;;  %v289_v59 = vadd.f32 %v285_v49, %v272_v55 }
  0x28   : > { %v320_v61 = vadd.f32 %v316_v52, %v304_v57 }
  0x29   : > { %334 = vst.msk [vmem:[%s172_s28] sm:$0xf] %vm333_vm0, %v329_v50  ;;  %v330_v58 = vadd.f32 %v425_v37, %v319_v23  ;;  %v305_v29 = vadd.f32 %v301_v56, %v289_v59 }
  0x2a   : > { %v331_v62 = vadd.f32 %v425_v37, %v320_v61 }
  0x2b   : > { %335 = vst.msk [vmem:[%s172_s28 + $0x4] sm:$0xf] %vm333_vm0, %v330_v58  ;;  %v321_v63 = vadd.f32 %v317_v60, %v305_v29 }
  0x2c   : > { %336 = vst.msk [vmem:[%s172_s28 + $0x8] sm:$0xf] %vm333_vm0, %v331_v62 }
  0x2d   : > { %v332_v0 = vadd.f32 %v425_v37, %v321_v63 }
  0x2f   : > { %337 = vst.msk [vmem:[%s172_s28 + $0xc] sm:$0xf] %vm333_vm0, %v332_v0 }
  0x30 PF: > { %s15_s14 = sadd.s32 1, %s444_s14  }
  0x31   : > { %p12_p4 = scmp.ge.s32.totalorder %s15_s14, 4  }
  0x33   :  { %14 = sbr.rel (!%p12_p4) target bundleno = 3 (0x3), region = 64 }

// kernel: afd_forward.28
= control target key start
LH: loop header
LB: loop body
LE: loop exit
PB: predicated region body
PF: predicated region fallthrough
CT: control target
= control target key end

     0   :  { %s609_s14 = smov 0   ;;  %s789_s0 = inlined_call_operand.vmem [shape: f32[2,10,10,1], index: 0, kind: input, shape index: {}]   ;;  %s790_s1 = inlined_call_operand.vmem [shape: f32[3,3,1], index: 1, kind: input, shape index: {}]   ;;  %s791_s2 = inlined_call_operand.<no memory space> [shape: f32[1,1,1,1], index: 2, kind: input, shape index: {}]   ;;  %s792_s3 = inlined_call_operand.vmem [shape: f32[2,8,8,1], index: 3, kind: output, shape index: {}]  }
   0x1   :  { %v8_v0 = vstv %s791_s2 }
   0x2   :  { %9 = vst [vmem:[#allocation2] sm:$0x1] %v8_v0 }
   0x3 LB: > { %s509_s15 = sadd.s32 4294967295, %s584_s14   ;;  %p513_p0 = scmp.ge.s32.totalorder %s584_s14, 1  ;;  %s584_s14 = sphi %s609_s14, %s15_s14  }
   0x4   : > { %p139_p1 = scmp.lt.s32.totalorder %s584_s14, 3 }
   0x6   : > { %p140_p2 = pnand %p513_p0, %p139_p1 }
   0x7   : > { %p163_p3 = scmp.lt.s32.totalorder (!%p140_p2), %s509_s15, 1 }
   0x8   : > { %143 = sbr.rel (%p140_p2) target bundleno = 69 (0x45), region = 32 }
   0xd   : > { %v184_v1 = vlaneseq  ;;  %s794_s15 = smov (!%p163_p3, %s509_s15), 1  ;;  %v173_v3 = vld [vmem:[%s790_s1] sm:$0x7]  ;;  %v174_v4 = vld [vmem:[%s790_s1 + $0x4] sm:$0x7]  ;;  %vm445_vm0 = vcmask 7168  }
   0xe   : > { %s569_s19 = smul.u32 160, %s794_s15  ;;  %v175_v5 = vld [vmem:[%s790_s1 + $0x8] sm:$0x7]  ;;  %s568_s25 = sshll.u32 %s794_s15, 6 }
   0xf   : > { %v185_v2 = vshrl.u32 %v184_v1, 7  ;;  %s717_s28 = scalar_lea.vmem %s792_s3, %s568_s25 }
  0x10   : > { %s632_s24 = scalar_lea.vmem %s789_s0, %s569_s19 }
  0x11   : > { %v186_v6 = vsub.s32 0, %v185_v2  ;;  %v214_v7 = vsub.s32 1, %v185_v2  ;;  %v242_v8 = vsub.s32 2, %v185_v2  ;;  %v176_v13 = vld [vmem:[%s632_s24] sm:$0xff]  ;;  %v517_v23 = vld [vmem:[%s632_s24 + $0x10] sm:$0xff] }
  0x12   : > { %v204_v14 = vld [vmem:[%s632_s24 + $0x1] sm:$0xff]  ;;  %v525_v24 = vld [vmem:[%s632_s24 + $0x11] sm:$0xff] }
  0x13   : > { %v634_v9 = vrot.slane %v173_v3, %v186_v6  ;;  %v636_v10 = vrot.slane %v173_v3, %v214_v7  ;;  %v638_v11 = vrot.slane %v173_v3, %v242_v8  ;;  %v640_v12 = vrot.slane %v174_v4, %v186_v6  ;;  %v232_v15 = vld [vmem:[%s632_s24 + $0x2] sm:$0xff]  ;;  %v533_v25 = vld [vmem:[%s632_s24 + $0x12] sm:$0xff] }
  0x14   : > { %v645_v16 = vrot.slane %v174_v4, %v214_v7  ;;  %v647_v17 = vrot.slane %v174_v4, %v242_v8  ;;  %v649_v18 = vrot.slane %v175_v5, %v186_v6  ;;  %v651_v19 = vrot.slane %v175_v5, %v214_v7  ;;  %v541_v32 = vld [vmem:[%s632_s24 + $0x20] sm:$0xff]  ;;  %v542_v45 = vld [vmem:[%s632_s24 + $0x30] sm:$0xff] }
  0x15   : > { %v188_v20 = vmul.f32 %v634_v9, %v176_v13  ;;  %v216_v21 = vmul.f32 %v636_v10, %v204_v14  ;;  %v244_v22 = vmul.f32 %v638_v11, %v232_v15  ;;  %v659_v26 = vrot.slane %v175_v5, %v242_v8  ;;  %v549_v33 = vld [vmem:[%s632_s24 + $0x21] sm:$0xff]  ;;  %v550_v46 = vld [vmem:[%s632_s24 + $0x31] sm:$0xff] }
  0x16   : > { %v189_v27 = vmul.f32 %v517_v23, %v634_v9  ;;  %v273_v29 = vmul.f32 %v517_v23, %v640_v12  ;;  %v301_v30 = vmul.f32 %v525_v24, %v645_v16  ;;  %v329_v31 = vmul.f32 %v533_v25, %v647_v17  ;;  %v557_v36 = vld [vmem:[%s632_s24 + $0x22] sm:$0xff]  ;;  %v558_v52 = vld [vmem:[%s632_s24 + $0x32] sm:$0xff] }
  0x17   : > { %v224_v28 = vadd.f32 %v216_v21, %v188_v20  ;;  %v358_v34 = vmul.f32 %v541_v32, %v649_v18  ;;  %v386_v35 = vmul.f32 %v549_v33, %v651_v19  ;;  %v217_v37 = vmul.f32 %v525_v24, %v636_v10  ;;  %v543_v0 = vld [vmem:[%s632_s24 + $0x40] sm:$0xff] }
  0x18   : > { %v245_v38 = vmul.f32 %v533_v25, %v638_v11  ;;  %v414_v40 = vmul.f32 %v557_v36, %v659_v26  ;;  %v274_v41 = vmul.f32 %v541_v32, %v640_v12  ;;  %v302_v42 = vmul.f32 %v549_v33, %v645_v16  ;;  %v551_v1 = vld [vmem:[%s632_s24 + $0x41] sm:$0xff] }
  0x19   : > { %v252_v39 = vadd.f32 %v244_v22, %v224_v28  ;;  %v225_v43 = vadd.f32 %v217_v37, %v189_v27  ;;  %v330_v44 = vmul.f32 %v557_v36, %v647_v17  ;;  %v190_v47 = vmul.f32 %v541_v32, %v634_v9  ;;  %v559_v2 = vld [vmem:[%s632_s24 + $0x42] sm:$0xff] }
  0x1a   : > { %v218_v48 = vmul.f32 %v549_v33, %v636_v10  ;;  %v359_v50 = vmul.f32 %v542_v45, %v649_v18  ;;  %v387_v51 = vmul.f32 %v550_v46, %v651_v19  ;;  %v246_v53 = vmul.f32 %v557_v36, %v638_v11  ;;  %v707_v36 = vld [vmem:[#allocation2] ss:$0 sm:$0xff] }
  0x1b   : > { %v281_v49 = vadd.f32 %v273_v29, %v252_v39  ;;  %v253_v54 = vadd.f32 %v245_v38, %v225_v43  ;;  %v415_v55 = vmul.f32 %v558_v52, %v659_v26  ;;  %v275_v57 = vmul.f32 %v542_v45, %v640_v12  ;;  %v544_v29 = vld [vmem:[%s632_s24 + $0x50] sm:$0xff] }
  0x1c   : > { %v226_v56 = vadd.f32 %v218_v48, %v190_v47  ;;  %v303_v59 = vmul.f32 %v550_v46, %v645_v16  ;;  %v331_v60 = vmul.f32 %v558_v52, %v647_v17  ;;  %v191_v61 = vmul.f32 %v542_v45, %v634_v9 }
  0x1d   : > { %v309_v58 = vadd.f32 %v301_v30, %v281_v49  ;;  %v282_v62 = vadd.f32 %v274_v41, %v253_v54  ;;  %v219_v3 = vmul.f32 %v550_v46, %v636_v10  ;;  %v247_v4 = vmul.f32 %v558_v52, %v638_v11  ;;  %v552_v41 = vld [vmem:[%s632_s24 + $0x51] sm:$0xff] }
  0x1e   : > { %v254_v63 = vadd.f32 %v246_v53, %v226_v56  ;;  %v360_v6 = vmul.f32 %v543_v0, %v649_v18  ;;  %v388_v7 = vmul.f32 %v551_v1, %v651_v19  ;;  %v416_v8 = vmul.f32 %v559_v2, %v659_v26 }
  0x1f   : > { %v337_v5 = vadd.f32 %v329_v31, %v309_v58  ;;  %v310_v13 = vadd.f32 %v302_v42, %v282_v62  ;;  %v227_v15 = vadd.f32 %v219_v3, %v191_v61  ;;  %v276_v20 = vmul.f32 %v543_v0, %v640_v12  ;;  %v560_v42 = vld [vmem:[%s632_s24 + $0x52] sm:$0xff]  ;;  %v553_v3 = vld [vmem:[%s632_s24 + $0x61] sm:$0xff] }
  0x20   : > { %v283_v14 = vadd.f32 %v275_v57, %v254_v63  ;;  %v304_v22 = vmul.f32 %v551_v1, %v645_v16  ;;  %v332_v23 = vmul.f32 %v559_v2, %v647_v17  ;;  %v192_v24 = vmul.f32 %v543_v0, %v634_v9 }
  0x21   : > { %v366_v21 = vadd.f32 %v358_v34, %v337_v5  ;;  %v338_v25 = vadd.f32 %v330_v44, %v310_v13  ;;  %v255_v28 = vadd.f32 %v247_v4, %v227_v15  ;;  %v220_v30 = vmul.f32 %v551_v1, %v636_v10  ;;  %v561_v4 = vld [vmem:[%s632_s24 + $0x62] sm:$0xff] }
  0x22   : > { %v311_v27 = vadd.f32 %v303_v59, %v283_v14  ;;  %v361_v32 = vmul.f32 %v544_v29, %v649_v18  ;;  %v248_v33 = vmul.f32 %v559_v2, %v638_v11  ;;  %v277_v34 = vmul.f32 %v544_v29, %v640_v12 }
  0x23   : > { %v394_v31 = vadd.f32 %v386_v35, %v366_v21  ;;  %v367_v37 = vadd.f32 %v359_v50, %v338_v25  ;;  %v284_v39 = vadd.f32 %v276_v20, %v255_v28  ;;  %v228_v43 = vadd.f32 %v220_v30, %v192_v24  ;;  %v546_v28 = vld [vmem:[%s632_s24 + $0x70] sm:$0xff] }
  0x24   : > { %v339_v38 = vadd.f32 %v331_v60, %v311_v27  ;;  %v389_v45 = vmul.f32 %v552_v41, %v651_v19  ;;  %v417_v35 = vmul.f32 %v560_v42, %v659_v26  ;;  %v305_v46 = vmul.f32 %v552_v41, %v645_v16  ;;  %v545_v60 = vld [vmem:[%s632_s24 + $0x60] sm:$0xff] }
  0x25   : > { %v422_v44 = vadd.f32 %v414_v40, %v394_v31  ;;  %v395_v47 = vadd.f32 %v387_v51, %v367_v37  ;;  %v312_v49 = vadd.f32 %v304_v22, %v284_v39  ;;  %v256_v50 = vadd.f32 %v248_v33, %v228_v43 }
  0x26   : > { %v368_v48 = vadd.f32 %v360_v6, %v339_v38  ;;  %v333_v40 = vmul.f32 %v560_v42, %v647_v17  ;;  %v193_v53 = vmul.f32 %v544_v29, %v634_v9  ;;  %v221_v54 = vmul.f32 %v552_v41, %v636_v10  ;;  %v554_v29 = vld [vmem:[%s632_s24 + $0x71] sm:$0xff] }
  0x27   : > { %v437_v52 = vadd.f32 %v707_v36, %v422_v44  ;;  %v423_v56 = vadd.f32 %v415_v55, %v395_v47  ;;  %v340_v58 = vadd.f32 %v332_v23, %v312_v49  ;;  %v285_v59 = vadd.f32 %v277_v34, %v256_v50  ;;  %v555_v49 = vld [vmem:[%s632_s24 + $0x81] sm:$0xff] }
  0x28   : > { %v396_v57 = vadd.f32 %v388_v7, %v368_v48  ;;  %v362_v51 = vmul.f32 %v545_v60, %v649_v18  ;;  %v229_v61 = vadd.f32 %v221_v54, %v193_v53  ;;  %v249_v62 = vmul.f32 %v560_v42, %v638_v11  ;;  %v547_v42 = vld [vmem:[%s632_s24 + $0x80] sm:$0xff] }
  0x29   : > { %446 = vst.msk [vmem:[%s717_s28] sm:$0xff] %vm445_vm0, %v437_v52  ;;  %v278_v63 = vmul.f32 %v545_v60, %v640_v12  ;;  %v438_v0 = vadd.f32 %v707_v36, %v423_v56  ;;  %v369_v2 = vadd.f32 %v361_v32, %v340_v58  ;;  %v313_v55 = vadd.f32 %v305_v46, %v285_v59  ;;  %v562_v32 = vld [vmem:[%s632_s24 + $0x72] sm:$0xff]  ;;  %v563_v56 = vld [vmem:[%s632_s24 + $0x82] sm:$0xff] }
  0x2a   : > { %v424_v1 = vadd.f32 %v416_v8, %v396_v57  ;;  %v390_v5 = vmul.f32 %v553_v3, %v651_v19  ;;  %v257_v6 = vadd.f32 %v249_v62, %v229_v61  ;;  %v306_v7 = vmul.f32 %v553_v3, %v645_v16 }
  0x2b   : > { %447 = vst.msk [vmem:[%s717_s28 + $0x8] sm:$0xff] %vm445_vm0, %v438_v0  ;;  %v397_v14 = vadd.f32 %v389_v45, %v369_v2  ;;  %v341_v15 = vadd.f32 %v333_v40, %v313_v55  ;;  %v334_v8 = vmul.f32 %v561_v4, %v647_v17  ;;  %v194_v21 = vmul.f32 %v545_v60, %v634_v9 }
  0x2c   : > { %v439_v13 = vadd.f32 %v707_v36, %v424_v1  ;;  %v286_v20 = vadd.f32 %v278_v63, %v257_v6  ;;  %v222_v22 = vmul.f32 %v553_v3, %v636_v10  ;;  %v250_v23 = vmul.f32 %v561_v4, %v638_v11  ;;  %v556_v1 = vld [vmem:[%s632_s24 + $0x91] sm:$0xff] }
  0x2d   : > { %v425_v24 = vadd.f32 %v417_v35, %v397_v14  ;;  %v370_v25 = vadd.f32 %v362_v51, %v341_v15  ;;  %v418_v27 = vmul.f32 %v561_v4, %v659_v26  ;;  %v363_v31 = vmul.f32 %v546_v28, %v649_v18  ;;  %v548_v51 = vld [vmem:[%s632_s24 + $0x90] sm:$0xff] }
  0x2e   : > { %448 = vst.msk [vmem:[%s717_s28 + $0x10] sm:$0xff] %vm445_vm0, %v439_v13  ;;  %v314_v30 = vadd.f32 %v306_v7, %v286_v20  ;;  %v230_v33 = vadd.f32 %v222_v22, %v194_v21  ;;  %v279_v34 = vmul.f32 %v546_v28, %v640_v12  ;;  %v391_v39 = vmul.f32 %v554_v29, %v651_v19  ;;  %v564_v4 = vld [vmem:[%s632_s24 + $0x92] sm:$0xff] }
  0x2f   : > { %v440_v37 = vadd.f32 %v707_v36, %v425_v24  ;;  %v398_v38 = vadd.f32 %v390_v5, %v370_v25  ;;  %v307_v41 = vmul.f32 %v554_v29, %v645_v16  ;;  %v195_v45 = vmul.f32 %v546_v28, %v634_v9 }
  0x30   : > { %v342_v43 = vadd.f32 %v334_v8, %v314_v30  ;;  %v258_v44 = vadd.f32 %v250_v23, %v230_v33  ;;  %v223_v35 = vmul.f32 %v554_v29, %v636_v10  ;;  %v419_v47 = vmul.f32 %v562_v32, %v659_v26 }
  0x31   : > { %449 = vst.msk [vmem:[%s717_s28 + $0x18] sm:$0xff] %vm445_vm0, %v440_v37  ;;  %v426_v46 = vadd.f32 %v418_v27, %v398_v38  ;;  %v335_v48 = vmul.f32 %v562_v32, %v647_v17  ;;  %v251_v50 = vmul.f32 %v562_v32, %v638_v11  ;;  %v280_v54 = vmul.f32 %v547_v42, %v640_v12 }
  0x32   : > { %v371_v52 = vadd.f32 %v363_v31, %v342_v43  ;;  %v287_v40 = vadd.f32 %v279_v34, %v258_v44  ;;  %v231_v53 = vadd.f32 %v223_v35, %v195_v45  ;;  %v364_v10 = vmul.f32 %v547_v42, %v649_v18 }
  0x33   : > { %v441_v9 = vadd.f32 %v707_v36, %v426_v46  ;;  %v308_v60 = vmul.f32 %v555_v49, %v645_v16  ;;  %v392_v11 = vmul.f32 %v555_v49, %v651_v19  ;;  %v336_v63 = vmul.f32 %v563_v56, %v647_v17 }
  0x34   : > { %v399_v57 = vadd.f32 %v391_v39, %v371_v52  ;;  %v315_v58 = vadd.f32 %v307_v41, %v287_v40  ;;  %v259_v59 = vadd.f32 %v251_v50, %v231_v53  ;;  %v420_v0 = vmul.f32 %v563_v56, %v659_v26 }
  0x35   : > { %450 = vst.msk [vmem:[%s717_s28 + $0x20] sm:$0xff] %vm445_vm0, %v441_v9  ;;  %v365_v16 = vmul.f32 %v548_v51, %v649_v18  ;;  %v393_v7 = vmul.f32 %v556_v1, %v651_v19  ;;  %v421_v14 = vmul.f32 %v564_v4, %v659_v26 }
  0x36   : > { %v427_v61 = vadd.f32 %v419_v47, %v399_v57  ;;  %v343_v12 = vadd.f32 %v335_v48, %v315_v58  ;;  %v288_v62 = vadd.f32 %v280_v54, %v259_v59 }
  0x38   : > { %v442_v2 = vadd.f32 %v707_v36, %v427_v61  ;;  %v372_v55 = vadd.f32 %v364_v10, %v343_v12  ;;  %v316_v3 = vadd.f32 %v308_v60, %v288_v62 }
  0x3a   : > { %451 = vst.msk [vmem:[%s717_s28 + $0x28] sm:$0xff] %vm445_vm0, %v442_v2  ;;  %v400_v5 = vadd.f32 %v392_v11, %v372_v55  ;;  %v344_v6 = vadd.f32 %v336_v63, %v316_v3 }
  0x3c   : > { %v428_v13 = vadd.f32 %v420_v0, %v400_v5  ;;  %v373_v17 = vadd.f32 %v365_v16, %v344_v6 }
  0x3e   : > { %v443_v15 = vadd.f32 %v707_v36, %v428_v13  ;;  %v401_v8 = vadd.f32 %v393_v7, %v373_v17 }
  0x40   : > { %452 = vst.msk [vmem:[%s717_s28 + $0x30] sm:$0xff] %vm445_vm0, %v443_v15  ;;  %v429_v20 = vadd.f32 %v421_v14, %v401_v8 }
  0x42   : > { %v444_v21 = vadd.f32 %v707_v36, %v429_v20 }
  0x44   : > { %453 = vst.msk [vmem:[%s717_s28 + $0x38] sm:$0xff] %vm445_vm0, %v444_v21 }
  0x45 PF: > { %s15_s14 = sadd.s32 1, %s584_s14  }
  0x46   : > { %p12_p4 = scmp.ge.s32.totalorder %s15_s14, 4  }
  0x48   :  { %14 = sbr.rel (!%p12_p4) target bundleno = 3 (0x3), region = 64 }

// kernel: afd_forward.30
= control target key start
LH: loop header
LB: loop body
LE: loop exit
PB: predicated region body
PF: predicated region fallthrough
CT: control target
= control target key end

     0   :  { %s400_s14 = smov 0   ;;  %s450_s0 = inlined_call_operand.vmem [shape: f32[2,4,4,1], index: 0, kind: input, shape index: {}]   ;;  %s451_s1 = inlined_call_operand.vmem [shape: f32[3,3,1], index: 1, kind: input, shape index: {}]   ;;  %s452_s2 = inlined_call_operand.<no memory space> [shape: f32[1,1,1,1], index: 2, kind: input, shape index: {}]   ;;  %s453_s3 = inlined_call_operand.vmem [shape: f32[2,2,2,1], index: 3, kind: output, shape index: {}]  }
   0x1   :  { %v8_v0 = vstv %s452_s2 }
   0x2   :  { %9 = vst [vmem:[#allocation2] sm:$0x1] %v8_v0 }
   0x3 LB: > { %s335_s15 = sadd.s32 4294967295, %s375_s14   ;;  %p339_p0 = scmp.ge.s32.totalorder %s375_s14, 1  ;;  %s375_s14 = sphi %s400_s14, %s15_s14  }
   0x4   : > { %p139_p1 = scmp.lt.s32.totalorder %s375_s14, 3 }
   0x6   : > { %p140_p2 = pnand %p339_p0, %p139_p1 }
   0x7   : > { %p163_p3 = scmp.lt.s32.totalorder (!%p140_p2), %s335_s15, 1 }
   0x8   : > { %143 = sbr.rel (%p140_p2) target bundleno = 43 (0x2b), region = 32 }
   0xd   : > { %v178_v1 = vlaneseq  ;;  %s455_s15 = smov (!%p163_p3, %s335_s15), 1  ;;  %v173_v3 = vld [vmem:[%s451_s1] sm:$0x7]  ;;  %v174_v4 = vld [vmem:[%s451_s1 + $0x4] sm:$0x7]  ;;  %vm277_vm0 = vcmask 1024  }
   0xe   : > { %s359_s19 = sshll.u32 %s455_s15, 4  ;;  %v175_v16 = vld [vmem:[%s451_s1 + $0x8] sm:$0x7]  ;;  %s360_s25 = sshll.u32 %s455_s15, 2 }
   0xf   : > { %v179_v2 = vshrl.u32 %v178_v1, 7  ;;  %s420_s22 = scalar_lea.vmem %s450_s0, %s359_s19  ;;  %s172_s28 = scalar_lea.vmem %s453_s3, %s360_s25 }
  0x10   : > { %v176_v8 = vld [vmem:[%s420_s22] sm:$0x3]  ;;  %v196_v12 = vld [vmem:[%s420_s22 + $0x2] sm:$0x3]  ;;  %v344_v15 = vld [vmem:[%s420_s22 + $0x4] sm:$0x3] }
  0x11   : > { %v180_v5 = vsub.s32 0, %v179_v2  ;;  %v190_v6 = vsub.s32 1, %v179_v2  ;;  %v200_v7 = vsub.s32 2, %v179_v2  ;;  %v186_v10 = vld [vmem:[%s420_s22 + $0x1] sm:$0x3] }
  0x12   : > { %v346_v20 = vld [vmem:[%s420_s22 + $0x5] sm:$0x3]  ;;  %v345_v30 = vld [vmem:[%s420_s22 + $0x8] sm:$0x3]  ;;  %v349_v41 = vld [vmem:[%s420_s22 + $0xa] sm:$0x3] }
  0x13   : > { %v181_v9 = vrot.slane %v173_v3, %v180_v5  ;;  %v191_v11 = vrot.slane %v173_v3, %v190_v6  ;;  %v201_v13 = vrot.slane %v173_v3, %v200_v7  ;;  %v212_v14 = vrot.slane %v174_v4, %v180_v5  ;;  %v177_v23 = vld [vmem:[%s420_s22 + $0x4] sm:$0x3]  ;;  %v197_v25 = vld [vmem:[%s420_s22 + $0x6] sm:$0x3]  ;;  %v347_v34 = vld [vmem:[%s420_s22 + $0x9] sm:$0x3] }
  0x14   : > { %v222_v21 = vrot.slane %v174_v4, %v190_v6  ;;  %v232_v22 = vrot.slane %v174_v4, %v200_v7  ;;  %v187_v24 = vld [vmem:[%s420_s22 + $0x5] sm:$0x3]  ;;  %v243_v32 = vrot.slane %v175_v16, %v180_v5  ;;  %v350_v37 = vld [vmem:[%s420_s22 + $0x8] sm:$0x3]  ;;  %v253_v40 = vrot.slane %v175_v16, %v190_v6  ;;  %v351_v48 = vld [vmem:[%s420_s22 + $0xc] sm:$0x3] }
  0x15   : > { %v182_v17 = vmul.f32 %v181_v9, %v176_v8  ;;  %v192_v18 = vmul.f32 %v191_v11, %v186_v10  ;;  %v202_v19 = vmul.f32 %v201_v13, %v196_v12  ;;  %v213_v27 = vmul.f32 %v344_v15, %v212_v14  ;;  %v348_v31 = vld [vmem:[%s420_s22 + $0x6] sm:$0x3]  ;;  %v352_v47 = vld [vmem:[%s420_s22 + $0x9] sm:$0x3]  ;;  %v353_v54 = vld [vmem:[%s420_s22 + $0xd] sm:$0x3] }
  0x16   : > { %v183_v28 = vmul.f32 %v181_v9, %v177_v23  ;;  %v193_v29 = vmul.f32 %v191_v11, %v187_v24  ;;  %v203_v33 = vmul.f32 %v201_v13, %v197_v25  ;;  %v223_v36 = vmul.f32 %v346_v20, %v222_v21  ;;  %v354_v53 = vld [vmem:[%s420_s22 + $0xa] sm:$0x3]  ;;  %v355_v59 = vld [vmem:[%s420_s22 + $0xe] sm:$0x3]  ;;  %v356_v3 = vld [vmem:[#allocation2] ss:$0 sm:$0xff] }
  0x17   : > { %v194_v26 = vadd.f32 %v192_v18, %v182_v17  ;;  %v214_v39 = vmul.f32 %v345_v30, %v212_v14  ;;  %v233_v43 = vmul.f32 %v348_v31, %v232_v22  ;;  %v224_v45 = vmul.f32 %v347_v34, %v222_v21 }
  0x18   : > { %v195_v38 = vadd.f32 %v193_v29, %v183_v28  ;;  %v244_v46 = vmul.f32 %v350_v37, %v243_v32  ;;  %v263_v50 = vrot.slane %v175_v16, %v200_v7  ;;  %v234_v52 = vmul.f32 %v349_v41, %v232_v22 }
  0x19   : > { %v204_v35 = vadd.f32 %v202_v19, %v194_v26  ;;  %v254_v56 = vmul.f32 %v352_v47, %v253_v40  ;;  %v245_v58 = vmul.f32 %v351_v48, %v243_v32  ;;  %v255_v63 = vmul.f32 %v353_v54, %v253_v40 }
  0x1a   : > { %v205_v44 = vadd.f32 %v203_v33, %v195_v38  ;;  %v264_v61 = vmul.f32 %v354_v53, %v263_v50  ;;  %v265_v2 = vmul.f32 %v355_v59, %v263_v50 }
  0x1b   : > { %v215_v42 = vadd.f32 %v213_v27, %v204_v35 }
  0x1c   : > { %v216_v51 = vadd.f32 %v214_v39, %v205_v44 }
  0x1d   : > { %v225_v49 = vadd.f32 %v223_v36, %v215_v42 }
  0x1e   : > { %v226_v57 = vadd.f32 %v224_v45, %v216_v51 }
  0x1f   : > { %v235_v55 = vadd.f32 %v233_v43, %v225_v49 }
  0x20   : > { %v236_v62 = vadd.f32 %v234_v52, %v226_v57 }
  0x21   : > { %v246_v60 = vadd.f32 %v244_v46, %v235_v55 }
  0x22   : > { %v247_v1 = vadd.f32 %v245_v58, %v236_v62 }
  0x23   : > { %v256_v0 = vadd.f32 %v254_v56, %v246_v60 }
  0x24   : > { %v257_v5 = vadd.f32 %v255_v63, %v247_v1 }
  0x25   : > { %v266_v4 = vadd.f32 %v264_v61, %v256_v0 }
  0x26   : > { %v267_v7 = vadd.f32 %v265_v2, %v257_v5 }
  0x27   : > { %v275_v6 = vadd.f32 %v356_v3, %v266_v4 }
  0x28   : > { %v276_v8 = vadd.f32 %v356_v3, %v267_v7 }
  0x29   : > { %278 = vst.msk [vmem:[%s172_s28] sm:$0x3] %vm277_vm0, %v275_v6 }
  0x2a   : > { %279 = vst.msk [vmem:[%s172_s28 + $0x2] sm:$0x3] %vm277_vm0, %v276_v8 }
  0x2b PF: > { %s15_s14 = sadd.s32 1, %s375_s14  }
  0x2c   : > { %p12_p4 = scmp.ge.s32.totalorder %s15_s14, 4  }
  0x2e   :  { %14 = sbr.rel (!%p12_p4) target bundleno = 3 (0x3), region = 64 }

// kernel: afd_forward.31
= control target key start
LH: loop header
LB: loop body
LE: loop exit
PB: predicated region body
PF: predicated region fallthrough
CT: control target
= control target key end

     0   :  { %s321_s14 = smov 0   ;;  %s351_s0 = inlined_call_operand.vmem [shape: f32[2,3,3,1], index: 0, kind: input, shape index: {}]   ;;  %s352_s1 = inlined_call_operand.vmem [shape: f32[3,3,1], index: 1, kind: input, shape index: {}]   ;;  %s353_s2 = inlined_call_operand.<no memory space> [shape: f32[1,1,1,1], index: 2, kind: input, shape index: {}]   ;;  %s354_s3 = inlined_call_operand.vmem [shape: f32[2,1,1,1], index: 3, kind: output, shape index: {}]  }
   0x1   :  { %v8_v0 = vstv %s353_s2 }
   0x2   :  { %9 = vst [vmem:[#allocation2] sm:$0x1] %v8_v0 }
   0x3 LB: > { %s267_s15 = sadd.s32 4294967295, %s296_s14   ;;  %p271_p0 = scmp.ge.s32.totalorder %s296_s14, 1  ;;  %s296_s14 = sphi %s321_s14, %s15_s14  }
   0x4   : > { %p139_p1 = scmp.lt.s32.totalorder %s296_s14, 3 }
   0x6   : > { %p140_p2 = pnand %p271_p0, %p139_p1 }
   0x7   : > { %p161_p3 = scmp.lt.s32.totalorder (!%p140_p2), %s267_s15, 1 }
   0x8   : > { %143 = sbr.rel (%p140_p2) target bundleno = 39 (0x27), region = 32 }
   0xd   : > { %v169_v1 = vld [vmem:[%s352_s1] sm:$0x7]  ;;  %s356_s15 = smov (!%p161_p3, %s267_s15), 1  ;;  %v170_v4 = vld [vmem:[%s352_s1 + $0x4] sm:$0x7]  ;;  %vm218_vm0 = vcmask 0  }
   0xe   : > { %s281_s2 = smul.u32 12, %s356_s15  ;;  %v177_v2 = vrot.slane %v169_v1, 1  ;;  %v182_v3 = vrot.slane %v169_v1, 2  ;;  %v192_v12 = vrot.slane %v170_v4, 1  ;;  %v197_v16 = vrot.slane %v170_v4, 2  ;;  %s168_s27 = scalar_lea.vmem %s354_s3, %s356_s15 }
   0xf   : > { %v171_v17 = vld [vmem:[%s352_s1 + $0x8] sm:$0x7]  ;;  %v216_v35 = vld [vmem:[#allocation2] sm:$0x1] }
  0x10   : > { %s165_s22 = scalar_lea.vmem %s351_s0, %s281_s2  ;;  %v207_v24 = vrot.slane %v171_v17, 1  ;;  %v212_v28 = vrot.slane %v171_v17, 2 }
  0x11   : > { %v172_v5 = vld [vmem:[%s165_s22] sm:$0x1]  ;;  %v175_v6 = vld [vmem:[%s165_s22 + $0x1] sm:$0x1]  ;;  %v181_v7 = vld [vmem:[%s165_s22 + $0x2] sm:$0x1] }
  0x12   : > { %v173_v8 = vmul.f32 %v172_v5, %v169_v1  ;;  %v179_v9 = vmul.f32 %v177_v2, %v175_v6  ;;  %v184_v10 = vmul.f32 %v182_v3, %v181_v7  ;;  %v273_v11 = vld [vmem:[%s165_s22 + $0x4] sm:$0x1]  ;;  %v274_v13 = vld [vmem:[%s165_s22 + $0x5] sm:$0x1]  ;;  %v275_v18 = vld [vmem:[%s165_s22 + $0x6] sm:$0x1] }
  0x13   : > { %v188_v15 = vmul.f32 %v273_v11, %v170_v4  ;;  %v194_v20 = vmul.f32 %v274_v13, %v192_v12  ;;  %v276_v21 = vld [vmem:[%s165_s22 + $0x8] sm:$0x1]  ;;  %v199_v23 = vmul.f32 %v275_v18, %v197_v16  ;;  %v277_v25 = vld [vmem:[%s165_s22 + $0x9] sm:$0x1]  ;;  %v278_v29 = vld [vmem:[%s165_s22 + $0xa] sm:$0x1] }
  0x14   : > { %v180_v14 = vadd.f32 %v179_v9, %v173_v8  ;;  %v203_v27 = vmul.f32 %v276_v21, %v171_v17  ;;  %v209_v31 = vmul.f32 %v277_v25, %v207_v24  ;;  %v214_v33 = vmul.f32 %v278_v29, %v212_v28 }
  0x16   : > { %v185_v19 = vadd.f32 %v184_v10, %v180_v14 }
  0x18   : > { %v189_v22 = vadd.f32 %v188_v15, %v185_v19 }
  0x1a   : > { %v195_v26 = vadd.f32 %v194_v20, %v189_v22 }
  0x1c   : > { %v200_v30 = vadd.f32 %v199_v23, %v195_v26 }
  0x1e   : > { %v204_v32 = vadd.f32 %v203_v27, %v200_v30 }
  0x20   : > { %v210_v34 = vadd.f32 %v209_v31, %v204_v32 }
  0x22   : > { %v215_v36 = vadd.f32 %v214_v33, %v210_v34 }
  0x24   : > { %v217_v37 = vadd.f32 %v216_v35, %v215_v36 }
  0x26   : > { %219 = vst.msk [vmem:[%s168_s27] sm:$0x1] %vm218_vm0, %v217_v37 }
  0x27 PF: > { %s15_s14 = sadd.s32 1, %s296_s14  }
  0x28   : > { %p12_p4 = scmp.ge.s32.totalorder %s15_s14, 4  }
  0x2a   :  { %14 = sbr.rel (!%p12_p4) target bundleno = 3 (0x3), region = 64 }

// kernel: afd_forward.32
= control target key start
LH: loop header
LB: loop body
LE: loop exit
PB: predicated region body
PF: predicated region fallthrough
CT: control target
= control target key end

     0   :  { %vm104_vm0 = vcmask 1041408   ;;  %vm79_vm1 = vcmask 31744   ;;  %s403_s1 = inlined_call_operand.vmem [shape: bf16[1,4,4], index: 1, kind: input, shape index: {}]   ;;  %s404_s0 = inlined_call_operand.vmem [shape: bf16[1,128,4], index: 0, kind: input, shape index: {}]   ;;  %s405_s2 = inlined_call_operand.vmem [shape: f32[1,1,4], index: 2, kind: input, shape index: {}]   ;;  %s406_s3 = inlined_call_operand.vmem [shape: f32[1,128,4], index: 3, kind: output, shape index: {}]  }
   0x1   :  { %v31_v0 = vld [vmem:[%s403_s1] sm:$0x3]  ;;  %v275_v4 = vld [vmem:[%s404_s0 + $0x8] sm:$0xff]   ;;  %v277_v6 = vld [vmem:[%s404_s0 + $0x10] sm:$0xff]  }
   0x2   :  { %271 = vmatprep.subr.msk.bf16.mxu0 %vm104_vm0, %v31_v0  ;;  %272 = vmatprep.subr.msk.bf16.mxu1 %vm104_vm0, %v31_v0  ;;  %v106_v1 = vsel %vm104_vm0, %v31_v0, 0  ;;  %v273_v2 = vld [vmem:[%s404_s0] sm:$0xff]   ;;  %v276_v5 = vld [vmem:[%s404_s0 + $0x28] sm:$0xff]   ;;  %v278_v7 = vld [vmem:[%s404_s0 + $0x30] sm:$0xff]  }
   0x3   :  { %252 = vmatpush3.bf16.msra.mxu0 %v106_v1  ;;  %270 = vmatpush3.bf16.msra.mxu1 %v106_v1  ;;  %v274_v3 = vld [vmem:[%s404_s0 + $0x20] sm:$0xff]   ;;  %v279_v8 = vld [vmem:[%s404_s0 + $0x18] sm:$0xff]  }
   0x4   :  { %253 = vmatprep.mubr.msk.bf16.mxu0 %vm79_vm1, %v273_v2  ;;  %261 = vmatprep.mubr.msk.bf16.mxu1 %vm79_vm1, %v274_v3  ;;  %v280_v9 = vld [vmem:[%s404_s0 + $0x38] sm:$0xff]   ;;  %v225_v10 = vld [vmem:[%s405_s2] ss:$0 sm:$0xff] }
   0x6   :  { %254 = vmatmul.mubr.msk.bf16.vlgmr.msra.gmra.mxu0 %vm79_vm1, %v275_v4  ;;  %262 = vmatmul.mubr.msk.bf16.vlgmr.msra.gmra.mxu1 %vm79_vm1, %v276_v5 }
   0x7   :  { %257 = vmatprep.mubr.msk.bf16.mxu0 %vm79_vm1, %v277_v6  ;;  %265 = vmatprep.mubr.msk.bf16.mxu1 %vm79_vm1, %v278_v7 }
   0xe   :  { %258 = vmatmul.mubr.msk.bf16.gmra.mxu0 %vm79_vm1, %v279_v8  ;;  %266 = vmatmul.mubr.msk.bf16.gmra.mxu1 %vm79_vm1, %v280_v9 }
  0xc6   :  { %v255_v11 = vpop.f32.mrf.mxu0  ;;  %v263_v13 = vpop.f32.mrf.mxu1 }
  0xc7   :  { %v151_v12 = vadd.f32 %v255_v11, %v225_v10  ;;  %v183_v14 = vadd.f32 %v263_v13, %v225_v10 }
  0xc8   :  { %v142_v15 = vpop.f32.mrf.mxu0  ;;  %v174_v17 = vpop.f32.mrf.mxu1 }
  0xc9   :  { %207 = vst.msk [vmem:[%s406_s3 + $0x10] sm:$0xff] %vm79_vm1, %v151_v12  ;;  %v143_v16 = vadd.f32 %v225_v10, %v142_v15  ;;  %215 = vst.msk [vmem:[%s406_s3 + $0x50] sm:$0xff] %vm79_vm1, %v183_v14  ;;  %v175_v18 = vadd.f32 %v225_v10, %v174_v17 }
  0xca   :  { %v256_v19 = vpop.f32.mrf.mxu0  ;;  %v264_v21 = vpop.f32.mrf.mxu1 }
  0xcb   :  { %205 = vst.msk [vmem:[%s406_s3] sm:$0xff] %vm79_vm1, %v143_v16  ;;  %v154_v20 = vadd.f32 %v256_v19, %v225_v10  ;;  %213 = vst.msk [vmem:[%s406_s3 + $0x40] sm:$0xff] %vm79_vm1, %v175_v18  ;;  %v186_v22 = vadd.f32 %v264_v21, %v225_v10 }
  0xcc   :  { %v145_v23 = vpop.f32.mrf.mxu0  ;;  %v177_v25 = vpop.f32.mrf.mxu1 }
  0xcd   :  { %208 = vst.msk [vmem:[%s406_s3 + $0x18] sm:$0xff] %vm79_vm1, %v154_v20  ;;  %v146_v24 = vadd.f32 %v225_v10, %v145_v23  ;;  %216 = vst.msk [vmem:[%s406_s3 + $0x58] sm:$0xff] %vm79_vm1, %v186_v22  ;;  %v178_v26 = vadd.f32 %v225_v10, %v177_v25 }
  0xce   :  { %v259_v27 = vpop.f32.mrf.mxu0  ;;  %v267_v29 = vpop.f32.mrf.mxu1 }
  0xcf   :  { %206 = vst.msk [vmem:[%s406_s3 + $0x8] sm:$0xff] %vm79_vm1, %v146_v24  ;;  %v167_v28 = vadd.f32 %v259_v27, %v225_v10  ;;  %214 = vst.msk [vmem:[%s406_s3 + $0x48] sm:$0xff] %vm79_vm1, %v178_v26  ;;  %v199_v30 = vadd.f32 %v267_v29, %v225_v10 }
  0xd0   :  { %v158_v31 = vpop.f32.mrf.mxu0  ;;  %v190_v33 = vpop.f32.mrf.mxu1 }
  0xd1   :  { %211 = vst.msk [vmem:[%s406_s3 + $0x30] sm:$0xff] %vm79_vm1, %v167_v28  ;;  %v159_v32 = vadd.f32 %v225_v10, %v158_v31  ;;  %219 = vst.msk [vmem:[%s406_s3 + $0x70] sm:$0xff] %vm79_vm1, %v199_v30  ;;  %v191_v34 = vadd.f32 %v225_v10, %v190_v33 }
  0xd2   :  { %v260_v35 = vpop.f32.mrf.mxu0  ;;  %v268_v37 = vpop.f32.mrf.mxu1 }
  0xd3   :  { %209 = vst.msk [vmem:[%s406_s3 + $0x20] sm:$0xff] %vm79_vm1, %v159_v32  ;;  %v170_v36 = vadd.f32 %v260_v35, %v225_v10  ;;  %217 = vst.msk [vmem:[%s406_s3 + $0x60] sm:$0xff] %vm79_vm1, %v191_v34  ;;  %v202_v38 = vadd.f32 %v268_v37, %v225_v10 }
  0xd4   :  { %v161_v39 = vpop.f32.mrf.mxu0  ;;  %v193_v41 = vpop.f32.mrf.mxu1 }
  0xd5   :  { %212 = vst.msk [vmem:[%s406_s3 + $0x38] sm:$0xff] %vm79_vm1, %v170_v36  ;;  %v162_v40 = vadd.f32 %v225_v10, %v161_v39  ;;  %220 = vst.msk [vmem:[%s406_s3 + $0x78] sm:$0xff] %vm79_vm1, %v202_v38  ;;  %v194_v42 = vadd.f32 %v225_v10, %v193_v41 }
  0xd7   :  { %210 = vst.msk [vmem:[%s406_s3 + $0x28] sm:$0xff] %vm79_vm1, %v162_v40  ;;  %218 = vst.msk [vmem:[%s406_s3 + $0x68] sm:$0xff] %vm79_vm1, %v194_v42 }

// kernel: afd_forward.33
= control target key start
LH: loop header
LB: loop body
LE: loop exit
PB: predicated region body
PF: predicated region fallthrough
CT: control target
= control target key end

     0   :  { %vm219_vm0 = vcmask 31744   ;;  %s541_s0 = inlined_call_operand.vmem [shape: f32[128,4], index: 0, kind: input, shape index: {}]   ;;  %s542_s1 = inlined_call_operand.vmem [shape: f32[128,4], index: 1, kind: input, shape index: {}]   ;;  %s543_s2 = inlined_call_operand.vmem [shape: f32[128,4], index: 2, kind: output, shape index: {}]  }
   0x1   :  { %v11_v0 = vld [vmem:[%s541_s0] sm:$0xff]  ;;  %v12_v1 = vld [vmem:[%s541_s0 + $0x8] sm:$0xff]  ;;  %v13_v4 = vld [vmem:[%s541_s0 + $0x10] sm:$0xff] }
   0x2   :  { %v43_v2 = vmul.f32 0.044715, %v11_v0  ;;  %v44_v3 = vmul.f32 0.044715, %v12_v1  ;;  %v45_v7 = vmul.f32 0.044715, %v13_v4 }
   0x3   :  { %v14_v8 = vld [vmem:[%s541_s0 + $0x18] sm:$0xff]  ;;  %v15_v9 = vld [vmem:[%s541_s0 + $0x20] sm:$0xff]  ;;  %v16_v15 = vld [vmem:[%s541_s0 + $0x28] sm:$0xff]  ;;  %v322_v36 = vmul.f32 0.5, %v11_v0  ;;  %v338_v47 = vmul.f32 0.5, %v12_v1  ;;  %v349_v54 = vmul.f32 0.5, %v13_v4 }
   0x4   :  { %v59_v5 = vmul.f32 %v43_v2, %v11_v0  ;;  %v60_v6 = vmul.f32 %v44_v3, %v12_v1  ;;  %v46_v10 = vmul.f32 0.044715, %v14_v8  ;;  %v47_v11 = vmul.f32 0.044715, %v15_v9  ;;  %v308_v19 = vld [vmem:[%s541_s0 + $0x30] sm:$0xff]  ;;  %v314_v27 = vld [vmem:[%s541_s0 + $0x38] sm:$0xff] }
   0x5   :  { %v61_v14 = vmul.f32 %v45_v7, %v13_v4  ;;  %v48_v18 = vmul.f32 0.044715, %v16_v15  ;;  %v49_v26 = vmul.f32 0.044715, %v308_v19  ;;  %v320_v35 = vld [vmem:[%s541_s0 + $0x40] sm:$0xff]  ;;  %v328_v39 = vld [vmem:[%s541_s0 + $0x48] sm:$0xff] }
   0x6   :  { %v75_v12 = vmul.f32 %v59_v5, %v11_v0  ;;  %v76_v13 = vmul.f32 %v60_v6, %v12_v1  ;;  %v62_v16 = vmul.f32 %v46_v10, %v14_v8  ;;  %v63_v17 = vmul.f32 %v47_v11, %v15_v9  ;;  %v336_v46 = vld [vmem:[%s541_s0 + $0x50] sm:$0xff]  ;;  %v347_v53 = vld [vmem:[%s541_s0 + $0x58] sm:$0xff]  ;;  %v356_v57 = vld [vmem:[%s541_s0 + $0x60] sm:$0xff] }
   0x7   :  { %v77_v22 = vmul.f32 %v61_v14, %v13_v4  ;;  %v64_v25 = vmul.f32 %v48_v18, %v16_v15  ;;  %v65_v34 = vmul.f32 %v49_v26, %v308_v19  ;;  %v50_v38 = vmul.f32 0.044715, %v314_v27  ;;  %v370_v2 = vld [vmem:[%s541_s0 + $0x68] sm:$0xff]  ;;  %v382_v10 = vld [vmem:[%s541_s0 + $0x70] sm:$0xff] }
   0x8   :  { %v91_v20 = vadd.f32 %v75_v12, %v11_v0  ;;  %v92_v21 = vadd.f32 %v76_v13, %v12_v1  ;;  %v78_v23 = vmul.f32 %v62_v16, %v14_v8  ;;  %v79_v24 = vmul.f32 %v63_v17, %v15_v9 }
   0x9   :  { %v93_v30 = vadd.f32 %v77_v22, %v13_v4  ;;  %v80_v33 = vmul.f32 %v64_v25, %v16_v15  ;;  %v81_v43 = vmul.f32 %v65_v34, %v308_v19  ;;  %v66_v44 = vmul.f32 %v50_v38, %v314_v27  ;;  %v397_v22 = vld [vmem:[%s541_s0 + $0x78] sm:$0xff] }
   0xa   :  { %v107_v28 = vmul.f32 0.7978846, %v91_v20  ;;  %v108_v29 = vmul.f32 0.7978846, %v92_v21  ;;  %v94_v31 = vadd.f32 %v78_v23, %v14_v8  ;;  %v95_v32 = vadd.f32 %v79_v24, %v15_v9 }
   0xb   :  { %v109_v37 = vmul.f32 0.7978846, %v93_v30  ;;  %v96_v42 = vadd.f32 %v80_v33, %v16_v15  ;;  %v51_v45 = vmul.f32 0.044715, %v320_v35  ;;  %v52_v49 = vmul.f32 0.044715, %v328_v39 }
   0xc   :  { %240 = vtanh.f32 %v107_v28  ;;  %v110_v40 = vmul.f32 0.7978846, %v94_v31  ;;  %v111_v41 = vmul.f32 0.7978846, %v95_v32  ;;  %v97_v50 = vadd.f32 %v81_v43, %v308_v19 }
   0xd   :  { %242 = vtanh.f32 %v108_v29  ;;  %v112_v48 = vmul.f32 0.7978846, %v96_v42  ;;  %v82_v51 = vmul.f32 %v66_v44, %v314_v27  ;;  %v67_v52 = vmul.f32 %v51_v45, %v320_v35  ;;  %v171_v44 = vld [vmem:[%s542_s1] sm:$0xff] }
   0xe   :  { %244 = vtanh.f32 %v109_v37  ;;  %v68_v55 = vmul.f32 %v52_v49, %v328_v39  ;;  %v53_v56 = vmul.f32 0.044715, %v336_v46  ;;  %v358_v58 = vmul.f32 0.5, %v14_v8 }
   0xf   :  { %246 = vtanh.f32 %v110_v40  ;;  %v113_v59 = vmul.f32 0.7978846, %v97_v50  ;;  %v98_v60 = vadd.f32 %v82_v51, %v314_v27  ;;  %v83_v61 = vmul.f32 %v67_v52, %v320_v35 }
  0x10   :  { %248 = vtanh.f32 %v111_v41  ;;  %v362_v62 = vmul.f32 0.5, %v15_v9  ;;  %v84_v63 = vmul.f32 %v68_v55, %v328_v39  ;;  %v69_v0 = vmul.f32 %v53_v56, %v336_v46 }
  0x11   :  { %250 = vtanh.f32 %v112_v48  ;;  %v54_v1 = vmul.f32 0.044715, %v347_v53  ;;  %v114_v3 = vmul.f32 0.7978846, %v98_v60  ;;  %v99_v4 = vadd.f32 %v83_v61, %v320_v35 }
  0x12   :  { %252 = vtanh.f32 %v113_v59  ;;  %v55_v5 = vmul.f32 0.044715, %v356_v57  ;;  %v374_v6 = vmul.f32 0.5, %v16_v15  ;;  %v100_v7 = vadd.f32 %v84_v63, %v328_v39  ;;  %v173_v59 = vld [vmem:[%s542_s1 + $0x10] sm:$0xff] }
  0x13   :  { %v85_v8 = vmul.f32 %v69_v0, %v336_v46  ;;  %v70_v9 = vmul.f32 %v54_v1, %v347_v53  ;;  %254 = vtanh.f32 %v114_v3  ;;  %v115_v11 = vmul.f32 0.7978846, %v99_v4  ;;  %v174_v1 = vld [vmem:[%s542_s1 + $0x18] sm:$0xff] }
  0x14   :  { %v71_v12 = vmul.f32 %v55_v5, %v356_v57  ;;  %v56_v13 = vmul.f32 0.044715, %v370_v2  ;;  %v387_v14 = vmul.f32 0.5, %v308_v19  ;;  %v116_v15 = vmul.f32 0.7978846, %v100_v7 }
  0x15   :  { %v101_v16 = vadd.f32 %v85_v8, %v336_v46  ;;  %v86_v17 = vmul.f32 %v70_v9, %v347_v53  ;;  %256 = vtanh.f32 %v115_v11  ;;  %v57_v21 = vmul.f32 0.044715, %v382_v10  ;;  %v175_v8 = vld [vmem:[%s542_s1 + $0x20] sm:$0xff] }
  0x16   :  { %v87_v18 = vmul.f32 %v71_v12, %v356_v57  ;;  %v72_v20 = vmul.f32 %v56_v13, %v370_v2  ;;  %v400_v19 = vmul.f32 0.5, %v314_v27  ;;  %258 = vtanh.f32 %v116_v15 }
  0x17   :  { %v117_v24 = vmul.f32 0.7978846, %v101_v16  ;;  %v102_v25 = vadd.f32 %v86_v17, %v347_v53  ;;  %v73_v31 = vmul.f32 %v57_v21, %v382_v10  ;;  %v58_v37 = vmul.f32 0.044715, %v397_v22 }
  0x18   :  { %v103_v29 = vadd.f32 %v87_v18, %v356_v57  ;;  %v88_v30 = vmul.f32 %v72_v20, %v370_v2  ;;  %v35_v17 = vmul.f32 0.5, %v320_v35  ;;  %v177_v35 = vld [vmem:[%s542_s1 + $0x30] sm:$0xff] }
  0x19   :  { %v241_v23 = vpop.eup %240  ;;  %260 = vtanh.f32 %v117_v24  ;;  %v118_v34 = vmul.f32 0.7978846, %v102_v25  ;;  %v89_v49 = vmul.f32 %v73_v31, %v382_v10  ;;  %v74_v18 = vmul.f32 %v58_v37, %v397_v22 }
  0x1a   :  { %v243_v26 = vpop.eup %242  ;;  %v139_v28 = vadd.f32 1.0, %v241_v23  ;;  %v119_v41 = vmul.f32 0.7978846, %v103_v29  ;;  %v104_v42 = vadd.f32 %v88_v30, %v370_v2 }
  0x1b   :  { %v245_v32 = vpop.eup %244  ;;  %v140_v33 = vadd.f32 1.0, %v243_v26  ;;  %262 = vtanh.f32 %v118_v34  ;;  %v36_v26 = vmul.f32 0.5, %v328_v39  ;;  %v178_v39 = vld [vmem:[%s542_s1 + $0x38] sm:$0xff] }
  0x1c   :  { %v247_v27 = vpop.eup %246  ;;  %v155_v38 = vmul.f32 %v139_v28, %v322_v36  ;;  %v141_v40 = vadd.f32 1.0, %v245_v32  ;;  %v172_v36 = vld [vmem:[%s542_s1 + $0x8] sm:$0xff]  ;;  %264 = vtanh.f32 %v119_v41  ;;  %v120_v61 = vmul.f32 0.7978846, %v104_v42 }
  0x1d   :  { %v249_v43 = vpop.eup %248  ;;  %v156_v45 = vmul.f32 %v140_v33, %v338_v47  ;;  %v142_v48 = vadd.f32 1.0, %v247_v27  ;;  %v90_v28 = vmul.f32 %v74_v18, %v397_v22  ;;  %v37_v33 = vmul.f32 0.5, %v336_v46 }
  0x1e   :  { %v251_v50 = vpop.eup %250  ;;  %v187_v51 = vadd.f32 1.0, %v155_v38  ;;  %v157_v52 = vmul.f32 %v141_v40, %v349_v54  ;;  %v143_v55 = vadd.f32 1.0, %v249_v43  ;;  %v105_v54 = vadd.f32 %v89_v49, %v382_v10  ;;  %v180_v49 = vld [vmem:[%s542_s1 + $0x48] sm:$0xff] }
  0x1f   :  { %v188_v56 = vadd.f32 1.0, %v156_v45  ;;  %v158_v47 = vmul.f32 %v142_v48, %v358_v58  ;;  %v144_v60 = vadd.f32 1.0, %v251_v50  ;;  %v253_v4 = vpop.eup %252  ;;  %266 = vtanh.f32 %v120_v61 }
  0x20   :  { %v203_v63 = vmul.f32 %v187_v51, %v171_v44  ;;  %v189_v0 = vadd.f32 1.0, %v157_v52  ;;  %v159_v3 = vmul.f32 %v143_v55, %v362_v62  ;;  %v176_v62 = vld [vmem:[%s542_s1 + $0x28] sm:$0xff]  ;;  %v145_v12 = vadd.f32 1.0, %v253_v4  ;;  %v255_v15 = vpop.eup %254 }
  0x21   :  { %v204_v5 = vmul.f32 %v188_v56, %v172_v36  ;;  %v190_v7 = vadd.f32 1.0, %v158_v47  ;;  %v160_v58 = vmul.f32 %v144_v60, %v374_v6  ;;  %v121_v13 = vmul.f32 0.7978846, %v105_v54  ;;  %v181_v56 = vld [vmem:[%s542_s1 + $0x50] sm:$0xff] }
  0x22   :  { %220 = vst.msk [vmem:[%s543_s2] sm:$0xff] %vm219_vm0, %v203_v63  ;;  %v205_v9 = vmul.f32 %v189_v0, %v173_v59  ;;  %v191_v11 = vadd.f32 1.0, %v159_v3  ;;  %v161_v21 = vmul.f32 %v145_v12, %v387_v14  ;;  %v146_v23 = vadd.f32 1.0, %v255_v15  ;;  %v257_v24 = vpop.eup %256  ;;  %v182_v0 = vld [vmem:[%s542_s1 + $0x58] sm:$0xff] }
  0x23   :  { %221 = vst.msk [vmem:[%s543_s2 + $0x8] sm:$0xff] %vm219_vm0, %v204_v5  ;;  %v206_v6 = vmul.f32 %v190_v7, %v174_v1  ;;  %v192_v16 = vadd.f32 1.0, %v160_v58  ;;  %268 = vtanh.f32 %v121_v13  ;;  %v259_v29 = vpop.eup %258  ;;  %v147_v31 = vadd.f32 1.0, %v257_v24  ;;  %v186_v24 = vld [vmem:[%s542_s1 + $0x78] sm:$0xff] }
  0x24   :  { %222 = vst.msk [vmem:[%s543_s2 + $0x10] sm:$0xff] %vm219_vm0, %v205_v9  ;;  %v207_v20 = vmul.f32 %v191_v11, %v175_v8  ;;  %v193_v14 = vadd.f32 1.0, %v161_v21  ;;  %v162_v30 = vmul.f32 %v146_v23, %v400_v19  ;;  %v148_v32 = vadd.f32 1.0, %v259_v29  ;;  %v179_v19 = vld [vmem:[%s542_s1 + $0x40] sm:$0xff] }
  0x25   :  { %223 = vst.msk [vmem:[%s543_s2 + $0x18] sm:$0xff] %vm219_vm0, %v206_v6  ;;  %v208_v25 = vmul.f32 %v192_v16, %v176_v62  ;;  %v106_v34 = vadd.f32 %v90_v28, %v397_v22  ;;  %v163_v40 = vmul.f32 %v147_v31, %v35_v17  ;;  %v38_v43 = vmul.f32 0.5, %v347_v53  ;;  %v184_v62 = vld [vmem:[%s542_s1 + $0x68] sm:$0xff]  ;;  %v185_v6 = vld [vmem:[%s542_s1 + $0x70] sm:$0xff] }
  0x26   :  { %224 = vst.msk [vmem:[%s543_s2 + $0x20] sm:$0xff] %vm219_vm0, %v207_v20  ;;  %v261_v37 = vpop.eup %260  ;;  %v209_v27 = vmul.f32 %v193_v14, %v177_v35  ;;  %v194_v38 = vadd.f32 1.0, %v162_v30  ;;  %v164_v41 = vmul.f32 %v148_v32, %v36_v26  ;;  %v39_v50 = vmul.f32 0.5, %v356_v57 }
  0x27   :  { %225 = vst.msk [vmem:[%s543_s2 + $0x28] sm:$0xff] %vm219_vm0, %v208_v25  ;;  %v149_v42 = vadd.f32 1.0, %v261_v37  ;;  %v122_v44 = vmul.f32 0.7978846, %v106_v34  ;;  %v195_v48 = vadd.f32 1.0, %v163_v40  ;;  %v40_v57 = vmul.f32 0.5, %v370_v2 }
  0x28   :  { %v263_v45 = vpop.eup %262  ;;  %226 = vst.msk [vmem:[%s543_s2 + $0x30] sm:$0xff] %vm219_vm0, %v209_v27  ;;  %v210_v46 = vmul.f32 %v194_v38, %v178_v39  ;;  %v196_v36 = vadd.f32 1.0, %v164_v41  ;;  %v183_v2 = vld [vmem:[%s542_s1 + $0x60] sm:$0xff]  ;;  %v41_v7 = vmul.f32 0.5, %v382_v10  ;;  %v42_v17 = vmul.f32 0.5, %v397_v22 }
  0x29   :  { %v265_v51 = vpop.eup %264  ;;  %v165_v52 = vmul.f32 %v149_v42, %v37_v33  ;;  %v150_v55 = vadd.f32 1.0, %v263_v45  ;;  %270 = vtanh.f32 %v122_v44  ;;  %v211_v53 = vmul.f32 %v195_v48, %v179_v19 }
  0x2a   :  { %227 = vst.msk [vmem:[%s543_s2 + $0x38] sm:$0xff] %vm219_vm0, %v210_v46  ;;  %v151_v59 = vadd.f32 1.0, %v265_v51  ;;  %v212_v47 = vmul.f32 %v196_v36, %v180_v49 }
  0x2b   :  { %v197_v60 = vadd.f32 1.0, %v165_v52  ;;  %v166_v61 = vmul.f32 %v150_v55, %v38_v43  ;;  %228 = vst.msk [vmem:[%s543_s2 + $0x40] sm:$0xff] %vm219_vm0, %v211_v53 }
  0x2c   :  { %v267_v63 = vpop.eup %266  ;;  %v167_v1 = vmul.f32 %v151_v59, %v39_v50  ;;  %229 = vst.msk [vmem:[%s543_s2 + $0x48] sm:$0xff] %vm219_vm0, %v212_v47 }
  0x2d   :  { %v213_v3 = vmul.f32 %v197_v60, %v181_v56  ;;  %v198_v54 = vadd.f32 1.0, %v166_v61  ;;  %v152_v4 = vadd.f32 1.0, %v267_v63 }
  0x2e   :  { %v199_v5 = vadd.f32 1.0, %v167_v1 }
  0x2f   :  { %230 = vst.msk [vmem:[%s543_s2 + $0x50] sm:$0xff] %vm219_vm0, %v213_v3  ;;  %v214_v58 = vmul.f32 %v198_v54, %v182_v0  ;;  %v168_v9 = vmul.f32 %v152_v4, %v40_v57 }
  0x30   :  { %v269_v8 = vpop.eup %268  ;;  %v215_v11 = vmul.f32 %v199_v5, %v183_v2 }
  0x31   :  { %v153_v12 = vadd.f32 1.0, %v269_v8  ;;  %231 = vst.msk [vmem:[%s543_s2 + $0x58] sm:$0xff] %vm219_vm0, %v214_v58  ;;  %v200_v10 = vadd.f32 1.0, %v168_v9 }
  0x32   :  { %232 = vst.msk [vmem:[%s543_s2 + $0x60] sm:$0xff] %vm219_vm0, %v215_v11 }
  0x33   :  { %v169_v13 = vmul.f32 %v153_v12, %v41_v7  ;;  %v216_v15 = vmul.f32 %v200_v10, %v184_v62 }
  0x35   :  { %v201_v16 = vadd.f32 1.0, %v169_v13  ;;  %233 = vst.msk [vmem:[%s543_s2 + $0x68] sm:$0xff] %vm219_vm0, %v216_v15 }
  0x36   :  { %v271_v18 = vpop.eup %270 }
  0x37   :  { %v217_v20 = vmul.f32 %v201_v16, %v185_v6  ;;  %v154_v21 = vadd.f32 1.0, %v271_v18 }
  0x39   :  { %234 = vst.msk [vmem:[%s543_s2 + $0x70] sm:$0xff] %vm219_vm0, %v217_v20  ;;  %v170_v23 = vmul.f32 %v154_v21, %v42_v17 }
  0x3b   :  { %v202_v25 = vadd.f32 1.0, %v170_v23 }
  0x3d   :  { %v218_v35 = vmul.f32 %v202_v25, %v186_v24 }
  0x3f   :  { %235 = vst.msk [vmem:[%s543_s2 + $0x78] sm:$0xff] %vm219_vm0, %v218_v35 }

</bundles_post_ra>
